<compile_context>
chip_gen: v5e
topology: v5e:2x2
jax: 0.10.0
libtpu: 0.0.40
codegen_flags: <defaults>
</compile_context>

<pallas_src>
import functools
from collections import namedtuple

import jax
import jax.numpy as jnp
from jax.experimental import pallas as pl
from jax.experimental.pallas import tpu as pltpu

THRESH = 0.2
DECAY = 0.2

# (in_planes, out_planes, stride, padding, kernel_size, groups)
CFG_CNN = [(6, 12, 2, 0, 3, 1), (12, 252, 2, 0, 4, 2), (252, 256, 1, 0, 1, 2),
           (256, 256, 2, 0, 2, 2), (256, 512, 1, 1, 3, 32), (512, 512, 1, 0, 1, 4),
           (512, 512, 1, 0, 1, 4), (512, 512, 1, 0, 1, 4), (512, 512, 2, 0, 2, 16),
           (512, 1024, 1, 1, 3, 64), (1024, 1024, 1, 0, 1, 8), (1024, 1024, 1, 0, 1, 8),
           (1024, 1024, 2, 0, 2, 32), (1024, 1024, 1, 0, 1, 8), (1024, 968, 1, 0, 1, 8),
           (968, 2640, 1, 0, 1, 8)]
CFG_FC = [128, 11]
CFG_KERNEL = [31, 14, 14, 7, 7, 7, 7, 7, 3, 3, 3, 3, 1, 1, 1, 1]

FC2_PAD = 128                      # fc2 output padded 11 -> 128 (lane-dense stores)
TM_MAX = 512                       # max row tile for the generic chain kernel
LANE_PACK_BUDGET = 128             # group-packing lane budget (128 = safe on v5e)

# Layer chains: inside a chain every follower is a 1x1 conv whose grouping
# matches the head's effective grouping, so the grouped spike output of layer i
# is exactly the matmul input of layer i+1 (no layout round trip, no HBM hop).
GENERIC_CHAINS = ((0,), (1, 2), (3,), (4, 5, 6, 7), (8,), (9, 10, 11))
TAIL_CHAIN = (12, 13, 14, 15)      # + fc1 + fc2, all fused in the tail kernel
ALL_CHAINS = GENERIC_CHAINS + (TAIL_CHAIN,)
CHAIN_HEAD = {i: chain[0] for chain in ALL_CHAINS for i in chain}

LayerMeta = namedtuple(
    "LayerMeta",
    "cin cout stride pad k g pack g_eff cin_g cout_g k_eff c_eff k_pad c_pad hw")


def _round_up(x, m):
    return ((x + m - 1) // m) * m


def _build_layer_meta(lane_budget=LANE_PACK_BUDGET):
    metas = [None] * len(CFG_CNN)
    for chain in ALL_CHAINS:
        prev = None
        for pos, i in enumerate(chain):
            cin, cout, s, p, k, g = CFG_CNN[i]
            cin_g, cout_g = cin // g, cout // g
            pack = 1
            for cand in range(g, 0, -1):          # largest divisor of g that fits
                if g % cand == 0 and cand * cout_g <= lane_budget:
                    pack = cand
                    break
            g_eff = g // pack
            k_eff = pack * cin_g * k * k
            c_eff = pack * cout_g
            c_pad = _round_up(c_eff, 128)         # lane-dense outputs
            if pos == 0:
                k_pad = _round_up(k_eff, 8)
            else:
                # follower must consume the head's grouped output directly
                assert k == 1 and s == 1 and p == 0
                assert g_eff == prev.g_eff and cin == prev.cout
                assert cin_g == prev.c_eff
                k_pad = prev.c_pad
            metas[i] = LayerMeta(cin, cout, s, p, k, g, pack, g_eff, cin_g,
                                 cout_g, k_eff, c_eff, k_pad, c_pad,
                                 CFG_KERNEL[i])
            prev = metas[i]
    return tuple(metas)


LAYER_META = _build_layer_meta()


def _choose_m_tiling(m):
    """Returns (m_pad, tm): rows padded to a multiple of tm, tm a multiple of 8."""
    m8 = _round_up(max(m, 8), 8)
    if m8 <= TM_MAX:
        return m8, m8
    return _round_up(m, TM_MAX), TM_MAX


# ----------------------------------------------------------------------------
# Pallas kernel 1: fused chain of (grouped matmul + bias + LIF) layers.
# refs = [x, (w,b,mem)*n, mem_out*n, spk_out_last]
# ----------------------------------------------------------------------------
def _make_chain_kernel(n_layers):
    def kernel(*refs):
        x = refs[0][0]                                     # (TM, K0) bf16
        for i in range(n_layers):
            w = refs[1 + 3 * i][0]                         # (K, C) bf16
            b = refs[2 + 3 * i][0]                         # (1, C) f32
            prev = refs[3 + 3 * i][0]                      # (TM, C) f32
            y = jnp.dot(x, w, preferred_element_type=jnp.float32) + b
            # previous spike recomputed from previous membrane (spike = mem > thresh)
            mem = jnp.where(prev > THRESH, 0.0, prev * DECAY) + y
            refs[1 + 3 * n_layers + i][0] = mem
            x = (mem > THRESH).astype(jnp.bfloat16)
        refs[1 + 4 * n_layers][0] = x                      # last layer's spikes
    return kernel


def chain_update(x, layer_params, layer_mems, tm):
    """x:(G,Mp,K0) bf16; per layer w:(G,K,C) bf16, b:(G,1,C) f32, mem:(G,Mp,C) f32."""
    G, Mp, K0 = x.shape
    n_layers = len(layer_params)
    grid = (G, Mp // tm)                 # m is the inner axis -> weights fetched once/group

    in_specs = [pl.BlockSpec((1, tm, K0), lambda g, m: (g, m, 0))]
    inputs = [x]
    out_specs, out_shape, aliases = [], [], {}
    for idx, ((w, b), mem) in enumerate(zip(layer_params, layer_mems)):
        Kp, Cp = w.shape[1], w.shape[2]
        in_specs.append(pl.BlockSpec((1, Kp, Cp), lambda g, m: (g, 0, 0)))
        in_specs.append(pl.BlockSpec((1, 1, Cp), lambda g, m: (g, 0, 0)))
        in_specs.append(pl.BlockSpec((1, tm, Cp), lambda g, m: (g, m, 0)))
        inputs += [w, b, mem]
        out_specs.append(pl.BlockSpec((1, tm, Cp), lambda g, m: (g, m, 0)))
        out_shape.append(jax.ShapeDtypeStruct(mem.shape, jnp.float32))
        aliases[3 * idx + 3] = idx       # membrane state updated in place
    c_last = layer_params[-1][0].shape[2]
    out_specs.append(pl.BlockSpec((1, tm, c_last), lambda g, m: (g, m, 0)))
    out_shape.append(jax.ShapeDtypeStruct((G, Mp, c_last), jnp.bfloat16))

    outs = pl.pallas_call(
        _make_chain_kernel(n_layers),
        grid=grid,
        in_specs=in_specs,
        out_specs=out_specs,
        out_shape=out_shape,
        input_output_aliases=aliases,
        compiler_params=pltpu.CompilerParams(
            dimension_semantics=("parallel", "parallel"),
            vmem_limit_bytes=32 * 1024 * 1024),
    )(*inputs)
    return list(outs[:n_layers]), outs[n_layers]


# ----------------------------------------------------------------------------
# Pallas kernel 2: fused tail — layer12 + conv13/14/15 (1x1, 8 groups) + fc1/fc2
# Grid over the 8 groups; fc1 partial sums accumulate in a VMEM scratch.
# ----------------------------------------------------------------------------
def _tail_kernel(x_ref,
                 w12_ref, b12_ref, m12_ref,
                 w13_ref, b13_ref, m13_ref,
                 w14_ref, b14_ref, m14_ref,
                 w15_ref, b15_ref, m15_ref,
                 wf1_ref, bf1_ref, mh1_ref,
                 wf2_ref, bf2_ref, mh2_ref, h2sum_ref,
                 m12_out, m13_out, m14_out, m15_out,
                 mh1_out, mh2_out, h2sum_out,
                 acc_ref):
    g = pl.program_id(0)

    @pl.when(g == 0)
    def _():
        acc_ref[...] = jnp.zeros_like(acc_ref)

    def lif(prev, y):
        mem = jnp.where(prev > THRESH, 0.0, prev * DECAY) + y
        return mem, (mem > THRESH).astype(jnp.bfloat16)

    m, s = lif(m12_ref[0], jnp.dot(x_ref[0], w12_ref[0],
                                   preferred_element_type=jnp.float32) + b12_ref[0])
    m12_out[0] = m
    m, s = lif(m13_ref[0], jnp.dot(s, w13_ref[0],
                                   preferred_element_type=jnp.float32) + b13_ref[0])
    m13_out[0] = m
    m, s = lif(m14_ref[0], jnp.dot(s, w14_ref[0],
                                   preferred_element_type=jnp.float32) + b14_ref[0])
    m14_out[0] = m
    m, s = lif(m15_ref[0], jnp.dot(s, w15_ref[0],
                                   preferred_element_type=jnp.float32) + b15_ref[0])
    m15_out[0] = m
    acc_ref[...] += jnp.dot(s, wf1_ref[0], preferred_element_type=jnp.float32)

    @pl.when(g == pl.num_programs(0) - 1)
    def _():
        mh1, sh1 = lif(mh1_ref[...], acc_ref[...] + bf1_ref[...])
        mh1_out[...] = mh1
        yh2 = jnp.dot(sh1, wf2_ref[...],
                      preferred_element_type=jnp.float32) + bf2_ref[...]
        mh2, sh2 = lif(mh2_ref[...], yh2)
        mh2_out[...] = mh2
        h2sum_out[...] = h2sum_ref[...] + sh2.astype(jnp.float32)


def tail_update(x12, tail_convs, fc_params, tail_mems, mh1, mh2, h2sum):
    (wf1, bf1), (wf2, bf2) = fc_params
    (w12, b12), (w13, b13), (w14, b14), (w15, b15) = tail_convs
    m12, m13, m14, m15 = tail_mems
    G, n, _ = x12.shape

    def gspec(a):
        nd = a.ndim
        return pl.BlockSpec((1,) + a.shape[1:], lambda g, _nd=nd: (g,) + (0,) * (_nd - 1))

    def fspec(a):
        nd = a.ndim
        return pl.BlockSpec(a.shape, lambda g, _nd=nd: (0,) * _nd)

    inputs = [x12, w12, b12, m12, w13, b13, m13, w14, b14, m14,
              w15, b15, m15, wf1, bf1, mh1, wf2, bf2, mh2, h2sum]
    in_specs = [gspec(x12), gspec(w12), gspec(b12), gspec(m12),
                gspec(w13), gspec(b13), gspec(m13),
                gspec(w14), gspec(b14), gspec(m14),
                gspec(w15), gspec(b15), gspec(m15),
                gspec(wf1), fspec(bf1), fspec(mh1),
                fspec(wf2), fspec(bf2), fspec(mh2), fspec(h2sum)]
    out_arrays = (m12, m13, m14, m15, mh1, mh2, h2sum)
    out_specs = [gspec(m12), gspec(m13), gspec(m14), gspec(m15),
                 fspec(mh1), fspec(mh2), fspec(h2sum)]
    out_shape = [jax.ShapeDtypeStruct(a.shape, a.dtype) for a in out_arrays]

    outs = pl.pallas_call(
        _tail_kernel,
        grid=(G,),
        in_specs=in_specs,
        out_specs=out_specs,
        out_shape=out_shape,
        scratch_shapes=[pltpu.VMEM((n, CFG_FC[0]), jnp.float32)],
        input_output_aliases={3: 0, 6: 1, 9: 2, 12: 3, 15: 4, 18: 5, 19: 6},
        compiler_params=pltpu.CompilerParams(
            dimension_semantics=("arbitrary",),
            vmem_limit_bytes=32 * 1024 * 1024),
    )(*inputs)
    return list(outs[:4]), outs[4], outs[5], outs[6]


# ----------------------------------------------------------------------------
# Plain-JAX glue: im2col patch extraction / layout conversion between chains.
# TODO(synk): fold this into the chain kernel via an 'arbitrary' (kh,kw) axis.
# ----------------------------------------------------------------------------
def extract_group_patches(x, meta):
    """x: (N, H, W, Cin) NHWC -> (G_eff, N*OH*OW, K_eff), K ordered (p, ci, kh, kw)."""
    s, p, k, out_hw = meta.stride, meta.pad, meta.k, meta.hw
    N = x.shape[0]
    if p > 0:
        x = jnp.pad(x, ((0, 0), (p, p), (p, p), (0, 0)))
    cols = []
    for kh in range(k):
        for kw in range(k):
            cols.append(x[:, kh:kh + s * (out_hw - 1) + 1:s,
                          kw:kw + s * (out_hw - 1) + 1:s, :])
    pat = jnp.stack(cols, axis=3)                       # (N, OH, OW, k*k, Cin)
    pat = pat.transpose(0, 1, 2, 4, 3)                  # (N, OH, OW, Cin, k*k)
    pat = pat.reshape(N, out_hw, out_hw, meta.g_eff, meta.k_eff)
    pat = pat.transpose(3, 0, 1, 2, 4).reshape(
        meta.g_eff, N * out_hw * out_hw, meta.k_eff)
    return pat


def group_to_nhwc(spk, meta, n):
    """(G_eff, N*hw*hw, C_eff) -> (N, hw, hw, Cout) in PyTorch channel order."""
    hw = meta.hw
    return spk.reshape(meta.g_eff, n, hw, hw, meta.c_eff).transpose(
        1, 2, 3, 0, 4).reshape(n, hw, hw, meta.g_eff * meta.c_eff)


# ----------------------------------------------------------------------------
# Deterministic parameter initialization (synthetic; mimics PyTorch fan-in init)
# ----------------------------------------------------------------------------
def _pack_conv_weight(w, b, meta):
    """w:(Cout,Cin_g,k,k), b:(Cout,) -> block-diagonal packed + lane-padded weights."""
    kk = meta.cin_g * meta.k * meta.k
    wt = w.reshape(meta.g, meta.cout_g, kk).transpose(0, 2, 1)   # (g, kk, Cout_g)
    wt = wt.reshape(meta.g_eff, meta.pack, kk, meta.cout_g)
    w_full = jnp.zeros((meta.g_eff, meta.k_pad, meta.c_pad), jnp.float32)
    for p in range(meta.pack):
        w_full = w_full.at[:, p * kk:(p + 1) * kk,
                           p * meta.cout_g:(p + 1) * meta.cout_g].set(wt[:, p])
    b_full = jnp.zeros((meta.g_eff, 1, meta.c_pad), jnp.float32)
    b_full = b_full.at[:, 0, :meta.c_eff].set(b.reshape(meta.g_eff, meta.c_eff))
    return w_full.astype(jnp.bfloat16), b_full


def init_params(key):
    conv_params = []
    for meta in LAYER_META:
        key, k1, k2 = jax.random.split(key, 3)
        fan_in = meta.cin_g * meta.k * meta.k
        bound = 1.0 / (fan_in ** 0.5)
        w = jax.random.uniform(k1, (meta.cout, meta.cin_g, meta.k, meta.k),
                               jnp.float32, -bound, bound)
        b = jax.random.uniform(k2, (meta.cout,), jnp.float32, -bound, bound)
        conv_params.append(_pack_conv_weight(w, b, meta))

    # fc1: split along input features into the same 8 groups as conv16's output,
    # zero rows for conv16's padded output lanes.
    meta15 = LAYER_META[15]
    in_f = CFG_CNN[15][1]                                  # 2640 = 8 * 330
    key, k1, k2 = jax.random.split(key, 3)
    bound = 1.0 / (in_f ** 0.5)
    w1 = jax.random.uniform(k1, (CFG_FC[0], in_f), jnp.float32, -bound, bound)
    b1 = jax.random.uniform(k2, (CFG_FC[0],), jnp.float32, -bound, bound)
    w1t = w1.T.reshape(meta15.g_eff, meta15.c_eff, CFG_FC[0])
    wf1 = jnp.zeros((meta15.g_eff, meta15.c_pad, CFG_FC[0]), jnp.float32)
    wf1 = wf1.at[:, :meta15.c_eff, :].set(w1t).astype(jnp.bfloat16)
    bf1 = b1.reshape(1, CFG_FC[0])

    # fc2: output padded 11 -> 128 with zero columns / zero bias.
    key, k1, k2 = jax.random.split(key, 3)
    bound = 1.0 / (CFG_FC[0] ** 0.5)
    w2 = jax.random.uniform(k1, (CFG_FC[1], CFG_FC[0]), jnp.float32, -bound, bound)
    b2 = jax.random.uniform(k2, (CFG_FC[1],), jnp.float32, -bound, bound)
    wf2 = jnp.zeros((CFG_FC[0], FC2_PAD), jnp.float32)
    wf2 = wf2.at[:, :CFG_FC[1]].set(w2.T).astype(jnp.bfloat16)
    bf2 = jnp.zeros((1, FC2_PAD), jnp.float32).at[0, :CFG_FC[1]].set(b2)
    return conv_params, ((wf1, bf1), (wf2, bf2))


# ----------------------------------------------------------------------------
# SCNN forward (matches the PyTorch module semantics)
# ----------------------------------------------------------------------------
def scnn_forward(inp, conv_params, fc_params, *, time_window):
    n = inp.shape[0]
    chain_tiling = {c[0]: _choose_m_tiling(n * LAYER_META[c[0]].hw ** 2)
                    for c in GENERIC_CHAINS}

    mems = []
    for i, meta in enumerate(LAYER_META):
        if i in TAIL_CHAIN:
            rows = n                                       # tail works on N rows
        else:
            rows = chain_tiling[CHAIN_HEAD[i]][0]
        mems.append(jnp.zeros((meta.g_eff, rows, meta.c_pad), jnp.float32))
    mh1 = jnp.zeros((n, CFG_FC[0]), jnp.float32)
    mh2 = jnp.zeros((n, FC2_PAD), jnp.float32)
    h2sum = jnp.zeros((n, FC2_PAD), jnp.float32)
    # h1_sumspike of the reference never reaches the output -> dropped (dead state).

    def step_fn(step, carry):
        mems, mh1, mh2, h2sum = carry
        mems = list(mems)
        x = jax.lax.dynamic_index_in_dim(inp, step, axis=1, keepdims=False)
        feed = jnp.transpose(x, (0, 2, 3, 1)).astype(jnp.bfloat16)   # NHWC bf16

        for chain in GENERIC_CHAINS:
            head = LAYER_META[chain[0]]
            m_pad, tm = chain_tiling[chain[0]]
            m_valid = n * head.hw * head.hw
            pat = extract_group_patches(feed, head)
            if m_pad > m_valid or head.k_pad > head.k_eff:
                pat = jnp.pad(pat, ((0, 0), (0, m_pad - m_valid),
                                    (0, head.k_pad - head.k_eff)))
            params = [conv_params[i] for i in chain]
            chain_mems = [mems[i] for i in chain]
            new_mems, spk = chain_update(pat, params, chain_mems, tm)
            for j, i in enumerate(chain):
                mems[i] = new_mems[j]
            last = LAYER_META[chain[-1]]
            spk = spk[:, :m_valid, :last.c_eff]
            feed = group_to_nhwc(spk, last, n)             # NHWC for the next head

        # Tail chain: layer 12 (k=2,s=2) + conv13/14/15 + fc1 + fc2, one kernel.
        meta12 = LAYER_META[12]
        pat12 = extract_group_patches(feed, meta12)        # (8, N, 512)
        tail_convs = [conv_params[i] for i in TAIL_CHAIN]
        tail_mems = [mems[i] for i in TAIL_CHAIN]
        new_tail, mh1, mh2, h2sum = tail_update(
            pat12, tail_convs, fc_params, tail_mems, mh1, mh2, h2sum)
        for j, i in enumerate(TAIL_CHAIN):
            mems[i] = new_tail[j]
        return (tuple(mems), mh1, mh2, h2sum)

    carry = (tuple(mems), mh1, mh2, h2sum)
    # The PyTorch reference runs `for step in range(time_window - 1)` and divides
    # the spike sum by time_window — reproduce exactly that.
    carry = jax.lax.fori_loop(0, time_window - 1, step_fn, carry)
    return carry[3][:, :CFG_FC[1]] / time_window           # (N, 11)


if __name__ == "__main__":
    key = jax.random.PRNGKey(0)
    pkey, xkey = jax.random.split(key)
    conv_params, fc_params = init_params(pkey)

    # The conv config fixes C=6, H=W=64; small batch and time window for the demo.
    N, T = 2, 3
    x = jax.random.normal(xkey, (N, T, 6, 64, 64), dtype=jnp.float32)

    fwd = jax.jit(functools.partial(scnn_forward, time_window=T))
    out = jax.block_until_ready(fwd(x, conv_params, fc_params))
    assert out.shape == (N, CFG_FC[1])
    assert bool(jnp.all(jnp.isfinite(out)))
    print("KERNEL_OK")
</pallas_src>

<mosaic_0001>
module attributes {stable_mosaic.version = 11 : i64} {
  func.func @kernel(%arg0: i32, %arg1: i32, %arg2: memref<1x512x56xbf16, #tpu.memory_space<vmem>>, %arg3: memref<1x56x128xbf16, #tpu.memory_space<vmem>>, %arg4: memref<1x1x128xf32, #tpu.memory_space<vmem>>, %arg5: memref<1x512x128xf32, #tpu.memory_space<vmem>>, %arg6: memref<1x512x128xf32, #tpu.memory_space<vmem>>, %arg7: memref<1x512x128xbf16, #tpu.memory_space<vmem>>) attributes {dimension_semantics = [#tpu.dimension_semantics<parallel>, #tpu.dimension_semantics<parallel>], iteration_bounds = array<i64: 1, 4>, scalar_prefetch = 0 : i64, scratch_operands = 0 : i64, tpu.core_type = #tpu.core_type<tc>, window_params = [{transform_indices = @transform_0, window_bounds = array<i64: 1, 512, 56>}, {transform_indices = @transform_1, window_bounds = array<i64: 1, 56, 128>}, {transform_indices = @transform_2, window_bounds = array<i64: 1, 1, 128>}, {transform_indices = @transform_3, window_bounds = array<i64: 1, 512, 128>}, {transform_indices = @transform_4, window_bounds = array<i64: 1, 512, 128>}, {transform_indices = @transform_5, window_bounds = array<i64: 1, 512, 128>}]} {
    %c0 = arith.constant 0 : index
    %c0_0 = arith.constant 0 : index
    %c0_1 = arith.constant 0 : index
    %0 = vector.load %arg2[%c0, %c0_0, %c0_1] : memref<1x512x56xbf16, #tpu.memory_space<vmem>>, vector<1x512x56xbf16>
    %1 = vector.shape_cast %0 : vector<1x512x56xbf16> to vector<512x56xbf16>
    %c0_2 = arith.constant 0 : index
    %c0_3 = arith.constant 0 : index
    %c0_4 = arith.constant 0 : index
    %2 = vector.load %arg3[%c0_2, %c0_3, %c0_4] : memref<1x56x128xbf16, #tpu.memory_space<vmem>>, vector<1x56x128xbf16>
    %3 = vector.shape_cast %2 : vector<1x56x128xbf16> to vector<56x128xbf16>
    %c0_5 = arith.constant 0 : index
    %c0_6 = arith.constant 0 : index
    %c0_7 = arith.constant 0 : index
    %4 = vector.load %arg4[%c0_5, %c0_6, %c0_7] : memref<1x1x128xf32, #tpu.memory_space<vmem>>, vector<1x1x128xf32>
    %5 = vector.shape_cast %4 : vector<1x1x128xf32> to vector<1x128xf32>
    %c0_8 = arith.constant 0 : index
    %c0_9 = arith.constant 0 : index
    %c0_10 = arith.constant 0 : index
    %6 = vector.load %arg5[%c0_8, %c0_9, %c0_10] : memref<1x512x128xf32, #tpu.memory_space<vmem>>, vector<1x512x128xf32>
    %7 = vector.shape_cast %6 : vector<1x512x128xf32> to vector<512x128xf32>
    %cst = arith.constant dense<0.000000e+00> : vector<512x128xf32>
    %8 = tpu.matmul %1, %3, %cst {dimension_numbers = #tpu.dot_dimension_numbers<[1], [0], [0], [1], [0, 0, 1, 1], [], []>} : vector<512x56xbf16>, vector<56x128xbf16>, vector<512x128xf32> -> vector<512x128xf32>
    %9 = vector.broadcast %5 : vector<1x128xf32> to vector<512x128xf32>
    %10 = arith.addf %8, %9 : vector<512x128xf32>
    %cst_11 = arith.constant 2.000000e-01 : f32
    %11 = vector.broadcast %cst_11 : f32 to vector<512x128xf32>
    %12 = arith.cmpf ogt, %7, %11 : vector<512x128xf32>
    %cst_12 = arith.constant 2.000000e-01 : f32
    %13 = vector.broadcast %cst_12 : f32 to vector<512x128xf32>
    %14 = arith.mulf %7, %13 : vector<512x128xf32>
    %cst_13 = arith.constant 0.000000e+00 : f32
    %15 = vector.broadcast %cst_13 : f32 to vector<512x128xf32>
    %16 = arith.select %12, %15, %14 : vector<512x128xi1>, vector<512x128xf32>
    %17 = arith.addf %16, %10 : vector<512x128xf32>
    %c0_14 = arith.constant 0 : index
    %c0_15 = arith.constant 0 : index
    %c0_16 = arith.constant 0 : index
    %18 = vector.load %arg6[%c0_14, %c0_15, %c0_16] : memref<1x512x128xf32, #tpu.memory_space<vmem>>, vector<1x512x128xf32>
    %19 = vector.shape_cast %18 : vector<1x512x128xf32> to vector<512x128xf32>
    %20 = vector.shape_cast %17 : vector<512x128xf32> to vector<1x512x128xf32>
    tpu.vector_store %arg6[%c0_14, %c0_15, %c0_16], %20 {strides = array<i32>} : memref<1x512x128xf32, #tpu.memory_space<vmem>>, vector<1x512x128xf32>,
    %cst_17 = arith.constant 2.000000e-01 : f32
    %21 = vector.broadcast %cst_17 : f32 to vector<512x128xf32>
    %22 = arith.cmpf ogt, %17, %21 : vector<512x128xf32>
    %23 = arith.extui %22 : vector<512x128xi1> to vector<512x128xi32>
    %24 = arith.sitofp %23 : vector<512x128xi32> to vector<512x128xf32>
    %25 = arith.truncf %24 : vector<512x128xf32> to vector<512x128xbf16>
    %c0_18 = arith.constant 0 : index
    %c0_19 = arith.constant 0 : index
    %c0_20 = arith.constant 0 : index
    %26 = vector.load %arg7[%c0_18, %c0_19, %c0_20] : memref<1x512x128xbf16, #tpu.memory_space<vmem>>, vector<1x512x128xbf16>
    %27 = vector.shape_cast %26 : vector<1x512x128xbf16> to vector<512x128xbf16>
    %28 = vector.shape_cast %25 : vector<512x128xbf16> to vector<1x512x128xbf16>
    tpu.vector_store %arg7[%c0_18, %c0_19, %c0_20], %28 {strides = array<i32>} : memref<1x512x128xbf16, #tpu.memory_space<vmem>>, vector<1x512x128xbf16>,
    return
  }
  func.func @transform_0(%arg0: i32, %arg1: i32) -> (i32, i32, i32) {
    %c0_i32 = arith.constant 0 : i32
    %c0_i32_0 = arith.constant 0 : i32
    return %arg0, %arg1, %c0_i32 : i32, i32, i32
  }
  func.func @transform_1(%arg0: i32, %arg1: i32) -> (i32, i32, i32) {
    %c0_i32 = arith.constant 0 : i32
    %c0_i32_0 = arith.constant 0 : i32
    %c0_i32_1 = arith.constant 0 : i32
    return %arg0, %c0_i32, %c0_i32_0 : i32, i32, i32
  }
  func.func @transform_2(%arg0: i32, %arg1: i32) -> (i32, i32, i32) {
    %c0_i32 = arith.constant 0 : i32
    %c0_i32_0 = arith.constant 0 : i32
    %c0_i32_1 = arith.constant 0 : i32
    return %arg0, %c0_i32, %c0_i32_0 : i32, i32, i32
  }
  func.func @transform_3(%arg0: i32, %arg1: i32) -> (i32, i32, i32) {
    %c0_i32 = arith.constant 0 : i32
    %c0_i32_0 = arith.constant 0 : i32
    return %arg0, %arg1, %c0_i32 : i32, i32, i32
  }
  func.func @transform_4(%arg0: i32, %arg1: i32) -> (i32, i32, i32) {
    %c0_i32 = arith.constant 0 : i32
    %c0_i32_0 = arith.constant 0 : i32
    return %arg0, %arg1, %c0_i32 : i32, i32, i32
  }
  func.func @transform_5(%arg0: i32, %arg1: i32) -> (i32, i32, i32) {
    %c0_i32 = arith.constant 0 : i32
    %c0_i32_0 = arith.constant 0 : i32
    return %arg0, %arg1, %c0_i32 : i32, i32, i32
  }
}

module attributes {stable_mosaic.version = 11 : i64} {
  func.func @kernel(%arg0: i32, %arg1: i32, %arg2: memref<1x392x96xbf16, #tpu.memory_space<vmem>>, %arg3: memref<1x96x128xbf16, #tpu.memory_space<vmem>>, %arg4: memref<1x1x128xf32, #tpu.memory_space<vmem>>, %arg5: memref<1x392x128xf32, #tpu.memory_space<vmem>>, %arg6: memref<1x128x128xbf16, #tpu.memory_space<vmem>>, %arg7: memref<1x1x128xf32, #tpu.memory_space<vmem>>, %arg8: memref<1x392x128xf32, #tpu.memory_space<vmem>>, %arg9: memref<1x392x128xf32, #tpu.memory_space<vmem>>, %arg10: memref<1x392x128xf32, #tpu.memory_space<vmem>>, %arg11: memref<1x392x128xbf16, #tpu.memory_space<vmem>>) attributes {dimension_semantics = [#tpu.dimension_semantics<parallel>, #tpu.dimension_semantics<parallel>], iteration_bounds = array<i64: 2, 1>, scalar_prefetch = 0 : i64, scratch_operands = 0 : i64, tpu.core_type = #tpu.core_type<tc>, window_params = [{transform_indices = @transform_0, window_bounds = array<i64: 1, 392, 96>}, {transform_indices = @transform_1, window_bounds = array<i64: 1, 96, 128>}, {transform_indices = @transform_2, window_bounds = array<i64: 1, 1, 128>}, {transform_indices = @transform_3, window_bounds = array<i64: 1, 392, 128>}, {transform_indices = @transform_4, window_bounds = array<i64: 1, 128, 128>}, {transform_indices = @transform_5, window_bounds = array<i64: 1, 1, 128>}, {transform_indices = @transform_6, window_bounds = array<i64: 1, 392, 128>}, {transform_indices = @transform_7, window_bounds = array<i64: 1, 392, 128>}, {transform_indices = @transform_8, window_bounds = array<i64: 1, 392, 128>}, {transform_indices = @transform_9, window_bounds = array<i64: 1, 392, 128>}]} {
    %c0 = arith.constant 0 : index
    %c0_0 = arith.constant 0 : index
    %c0_1 = arith.constant 0 : index
    %0 = vector.load %arg2[%c0, %c0_0, %c0_1] : memref<1x392x96xbf16, #tpu.memory_space<vmem>>, vector<1x392x96xbf16>
    %1 = vector.shape_cast %0 : vector<1x392x96xbf16> to vector<392x96xbf16>
    %c0_2 = arith.constant 0 : index
    %c0_3 = arith.constant 0 : index
    %c0_4 = arith.constant 0 : index
    %2 = vector.load %arg3[%c0_2, %c0_3, %c0_4] : memref<1x96x128xbf16, #tpu.memory_space<vmem>>, vector<1x96x128xbf16>
    %3 = vector.shape_cast %2 : vector<1x96x128xbf16> to vector<96x128xbf16>
    %c0_5 = arith.constant 0 : index
    %c0_6 = arith.constant 0 : index
    %c0_7 = arith.constant 0 : index
    %4 = vector.load %arg4[%c0_5, %c0_6, %c0_7] : memref<1x1x128xf32, #tpu.memory_space<vmem>>, vector<1x1x128xf32>
    %5 = vector.shape_cast %4 : vector<1x1x128xf32> to vector<1x128xf32>
    %c0_8 = arith.constant 0 : index
    %c0_9 = arith.constant 0 : index
    %c0_10 = arith.constant 0 : index
    %6 = vector.load %arg5[%c0_8, %c0_9, %c0_10] : memref<1x392x128xf32, #tpu.memory_space<vmem>>, vector<1x392x128xf32>
    %7 = vector.shape_cast %6 : vector<1x392x128xf32> to vector<392x128xf32>
    %cst = arith.constant dense<0.000000e+00> : vector<392x128xf32>
    %8 = tpu.matmul %1, %3, %cst {dimension_numbers = #tpu.dot_dimension_numbers<[1], [0], [0], [1], [0, 0, 1, 1], [], []>} : vector<392x96xbf16>, vector<96x128xbf16>, vector<392x128xf32> -> vector<392x128xf32>
    %9 = vector.broadcast %5 : vector<1x128xf32> to vector<392x128xf32>
    %10 = arith.addf %8, %9 : vector<392x128xf32>
    %cst_11 = arith.constant 2.000000e-01 : f32
    %11 = vector.broadcast %cst_11 : f32 to vector<392x128xf32>
    %12 = arith.cmpf ogt, %7, %11 : vector<392x128xf32>
    %cst_12 = arith.constant 2.000000e-01 : f32
    %13 = vector.broadcast %cst_12 : f32 to vector<392x128xf32>
    %14 = arith.mulf %7, %13 : vector<392x128xf32>
    %cst_13 = arith.constant 0.000000e+00 : f32
    %15 = vector.broadcast %cst_13 : f32 to vector<392x128xf32>
    %16 = arith.select %12, %15, %14 : vector<392x128xi1>, vector<392x128xf32>
    %17 = arith.addf %16, %10 : vector<392x128xf32>
    %c0_14 = arith.constant 0 : index
    %c0_15 = arith.constant 0 : index
    %c0_16 = arith.constant 0 : index
    %18 = vector.load %arg9[%c0_14, %c0_15, %c0_16] : memref<1x392x128xf32, #tpu.memory_space<vmem>>, vector<1x392x128xf32>
    %19 = vector.shape_cast %18 : vector<1x392x128xf32> to vector<392x128xf32>
    %20 = vector.shape_cast %17 : vector<392x128xf32> to vector<1x392x128xf32>
    tpu.vector_store %arg9[%c0_14, %c0_15, %c0_16], %20 {strides = array<i32>} : memref<1x392x128xf32, #tpu.memory_space<vmem>>, vector<1x392x128xf32>,
    %cst_17 = arith.constant 2.000000e-01 : f32
    %21 = vector.broadcast %cst_17 : f32 to vector<392x128xf32>
    %22 = arith.cmpf ogt, %17, %21 : vector<392x128xf32>
    %23 = arith.extui %22 : vector<392x128xi1> to vector<392x128xi32>
    %24 = arith.sitofp %23 : vector<392x128xi32> to vector<392x128xf32>
    %25 = arith.truncf %24 : vector<392x128xf32> to vector<392x128xbf16>
    %c0_18 = arith.constant 0 : index
    %c0_19 = arith.constant 0 : index
    %c0_20 = arith.constant 0 : index
    %26 = vector.load %arg6[%c0_18, %c0_19, %c0_20] : memref<1x128x128xbf16, #tpu.memory_space<vmem>>, vector<1x128x128xbf16>
    %27 = vector.shape_cast %26 : vector<1x128x128xbf16> to vector<128x128xbf16>
    %c0_21 = arith.constant 0 : index
    %c0_22 = arith.constant 0 : index
    %c0_23 = arith.constant 0 : index
    %28 = vector.load %arg7[%c0_21, %c0_22, %c0_23] : memref<1x1x128xf32, #tpu.memory_space<vmem>>, vector<1x1x128xf32>
    %29 = vector.shape_cast %28 : vector<1x1x128xf32> to vector<1x128xf32>
    %c0_24 = arith.constant 0 : index
    %c0_25 = arith.constant 0 : index
    %c0_26 = arith.constant 0 : index
    %30 = vector.load %arg8[%c0_24, %c0_25, %c0_26] : memref<1x392x128xf32, #tpu.memory_space<vmem>>, vector<1x392x128xf32>
    %31 = vector.shape_cast %30 : vector<1x392x128xf32> to vector<392x128xf32>
    %cst_27 = arith.constant dense<0.000000e+00> : vector<392x128xf32>
    %32 = tpu.matmul %25, %27, %cst_27 {dimension_numbers = #tpu.dot_dimension_numbers<[1], [0], [0], [1], [0, 0, 1, 1], [], []>} : vector<392x128xbf16>, vector<128x128xbf16>, vector<392x128xf32> -> vector<392x128xf32>
    %33 = vector.broadcast %29 : vector<1x128xf32> to vector<392x128xf32>
    %34 = arith.addf %32, %33 : vector<392x128xf32>
    %cst_28 = arith.constant 2.000000e-01 : f32
    %35 = vector.broadcast %cst_28 : f32 to vector<392x128xf32>
    %36 = arith.cmpf ogt, %31, %35 : vector<392x128xf32>
    %cst_29 = arith.constant 2.000000e-01 : f32
    %37 = vector.broadcast %cst_29 : f32 to vector<392x128xf32>
    %38 = arith.mulf %31, %37 : vector<392x128xf32>
    %cst_30 = arith.constant 0.000000e+00 : f32
    %39 = vector.broadcast %cst_30 : f32 to vector<392x128xf32>
    %40 = arith.select %36, %39, %38 : vector<392x128xi1>, vector<392x128xf32>
    %41 = arith.addf %40, %34 : vector<392x128xf32>
    %c0_31 = arith.constant 0 : index
    %c0_32 = arith.constant 0 : index
    %c0_33 = arith.constant 0 : index
    %42 = vector.load %arg10[%c0_31, %c0_32, %c0_33] : memref<1x392x128xf32, #tpu.memory_space<vmem>>, vector<1x392x128xf32>
    %43 = vector.shape_cast %42 : vector<1x392x128xf32> to vector<392x128xf32>
    %44 = vector.shape_cast %41 : vector<392x128xf32> to vector<1x392x128xf32>
    tpu.vector_store %arg10[%c0_31, %c0_32, %c0_33], %44 {strides = array<i32>} : memref<1x392x128xf32, #tpu.memory_space<vmem>>, vector<1x392x128xf32>,
    %cst_34 = arith.constant 2.000000e-01 : f32
    %45 = vector.broadcast %cst_34 : f32 to vector<392x128xf32>
    %46 = arith.cmpf ogt, %41, %45 : vector<392x128xf32>
    %47 = arith.extui %46 : vector<392x128xi1> to vector<392x128xi32>
    %48 = arith.sitofp %47 : vector<392x128xi32> to vector<392x128xf32>
    %49 = arith.truncf %48 : vector<392x128xf32> to vector<392x128xbf16>
    %c0_35 = arith.constant 0 : index
    %c0_36 = arith.constant 0 : index
    %c0_37 = arith.constant 0 : index
    %50 = vector.load %arg11[%c0_35, %c0_36, %c0_37] : memref<1x392x128xbf16, #tpu.memory_space<vmem>>, vector<1x392x128xbf16>
    %51 = vector.shape_cast %50 : vector<1x392x128xbf16> to vector<392x128xbf16>
    %52 = vector.shape_cast %49 : vector<392x128xbf16> to vector<1x392x128xbf16>
    tpu.vector_store %arg11[%c0_35, %c0_36, %c0_37], %52 {strides = array<i32>} : memref<1x392x128xbf16, #tpu.memory_space<vmem>>, vector<1x392x128xbf16>,
    return
  }
  func.func @transform_0(%arg0: i32, %arg1: i32) -> (i32, i32, i32) {
    %c0_i32 = arith.constant 0 : i32
    %c0_i32_0 = arith.constant 0 : i32
    return %arg0, %arg1, %c0_i32 : i32, i32, i32
  }
  func.func @transform_1(%arg0: i32, %arg1: i32) -> (i32, i32, i32) {
    %c0_i32 = arith.constant 0 : i32
    %c0_i32_0 = arith.constant 0 : i32
    %c0_i32_1 = arith.constant 0 : i32
    return %arg0, %c0_i32, %c0_i32_0 : i32, i32, i32
  }
  func.func @transform_2(%arg0: i32, %arg1: i32) -> (i32, i32, i32) {
    %c0_i32 = arith.constant 0 : i32
    %c0_i32_0 = arith.constant 0 : i32
    %c0_i32_1 = arith.constant 0 : i32
    return %arg0, %c0_i32, %c0_i32_0 : i32, i32, i32
  }
  func.func @transform_3(%arg0: i32, %arg1: i32) -> (i32, i32, i32) {
    %c0_i32 = arith.constant 0 : i32
    %c0_i32_0 = arith.constant 0 : i32
    return %arg0, %arg1, %c0_i32 : i32, i32, i32
  }
  func.func @transform_4(%arg0: i32, %arg1: i32) -> (i32, i32, i32) {
    %c0_i32 = arith.constant 0 : i32
    %c0_i32_0 = arith.constant 0 : i32
    %c0_i32_1 = arith.constant 0 : i32
    return %arg0, %c0_i32, %c0_i32_0 : i32, i32, i32
  }
  func.func @transform_5(%arg0: i32, %arg1: i32) -> (i32, i32, i32) {
    %c0_i32 = arith.constant 0 : i32
    %c0_i32_0 = arith.constant 0 : i32
    %c0_i32_1 = arith.constant 0 : i32
    return %arg0, %c0_i32, %c0_i32_0 : i32, i32, i32
  }
  func.func @transform_6(%arg0: i32, %arg1: i32) -> (i32, i32, i32) {
    %c0_i32 = arith.constant 0 : i32
    %c0_i32_0 = arith.constant 0 : i32
    return %arg0, %arg1, %c0_i32 : i32, i32, i32
  }
  func.func @transform_7(%arg0: i32, %arg1: i32) -> (i32, i32, i32) {
    %c0_i32 = arith.constant 0 : i32
    %c0_i32_0 = arith.constant 0 : i32
    return %arg0, %arg1, %c0_i32 : i32, i32, i32
  }
  func.func @transform_8(%arg0: i32, %arg1: i32) -> (i32, i32, i32) {
    %c0_i32 = arith.constant 0 : i32
    %c0_i32_0 = arith.constant 0 : i32
    return %arg0, %arg1, %c0_i32 : i32, i32, i32
  }
  func.func @transform_9(%arg0: i32, %arg1: i32) -> (i32, i32, i32) {
    %c0_i32 = arith.constant 0 : i32
    %c0_i32_0 = arith.constant 0 : i32
    return %arg0, %arg1, %c0_i32 : i32, i32, i32
  }
}

module attributes {stable_mosaic.version = 11 : i64} {
  func.func @kernel(%arg0: i32, %arg1: i32, %arg2: memref<1x104x512xbf16, #tpu.memory_space<vmem>>, %arg3: memref<1x512x128xbf16, #tpu.memory_space<vmem>>, %arg4: memref<1x1x128xf32, #tpu.memory_space<vmem>>, %arg5: memref<1x104x128xf32, #tpu.memory_space<vmem>>, %arg6: memref<1x104x128xf32, #tpu.memory_space<vmem>>, %arg7: memref<1x104x128xbf16, #tpu.memory_space<vmem>>) attributes {dimension_semantics = [#tpu.dimension_semantics<parallel>, #tpu.dimension_semantics<parallel>], iteration_bounds = array<i64: 2, 1>, scalar_prefetch = 0 : i64, scratch_operands = 0 : i64, tpu.core_type = #tpu.core_type<tc>, window_params = [{transform_indices = @transform_0, window_bounds = array<i64: 1, 104, 512>}, {transform_indices = @transform_1, window_bounds = array<i64: 1, 512, 128>}, {transform_indices = @transform_2, window_bounds = array<i64: 1, 1, 128>}, {transform_indices = @transform_3, window_bounds = array<i64: 1, 104, 128>}, {transform_indices = @transform_4, window_bounds = array<i64: 1, 104, 128>}, {transform_indices = @transform_5, window_bounds = array<i64: 1, 104, 128>}]} {
    %c0 = arith.constant 0 : index
    %c0_0 = arith.constant 0 : index
    %c0_1 = arith.constant 0 : index
    %0 = vector.load %arg2[%c0, %c0_0, %c0_1] : memref<1x104x512xbf16, #tpu.memory_space<vmem>>, vector<1x104x512xbf16>
    %1 = vector.shape_cast %0 : vector<1x104x512xbf16> to vector<104x512xbf16>
    %c0_2 = arith.constant 0 : index
    %c0_3 = arith.constant 0 : index
    %c0_4 = arith.constant 0 : index
    %2 = vector.load %arg3[%c0_2, %c0_3, %c0_4] : memref<1x512x128xbf16, #tpu.memory_space<vmem>>, vector<1x512x128xbf16>
    %3 = vector.shape_cast %2 : vector<1x512x128xbf16> to vector<512x128xbf16>
    %c0_5 = arith.constant 0 : index
    %c0_6 = arith.constant 0 : index
    %c0_7 = arith.constant 0 : index
    %4 = vector.load %arg4[%c0_5, %c0_6, %c0_7] : memref<1x1x128xf32, #tpu.memory_space<vmem>>, vector<1x1x128xf32>
    %5 = vector.shape_cast %4 : vector<1x1x128xf32> to vector<1x128xf32>
    %c0_8 = arith.constant 0 : index
    %c0_9 = arith.constant 0 : index
    %c0_10 = arith.constant 0 : index
    %6 = vector.load %arg5[%c0_8, %c0_9, %c0_10] : memref<1x104x128xf32, #tpu.memory_space<vmem>>, vector<1x104x128xf32>
    %7 = vector.shape_cast %6 : vector<1x104x128xf32> to vector<104x128xf32>
    %cst = arith.constant dense<0.000000e+00> : vector<104x128xf32>
    %8 = tpu.matmul %1, %3, %cst {dimension_numbers = #tpu.dot_dimension_numbers<[1], [0], [0], [1], [0, 0, 1, 1], [], []>} : vector<104x512xbf16>, vector<512x128xbf16>, vector<104x128xf32> -> vector<104x128xf32>
    %9 = vector.broadcast %5 : vector<1x128xf32> to vector<104x128xf32>
    %10 = arith.addf %8, %9 : vector<104x128xf32>
    %cst_11 = arith.constant 2.000000e-01 : f32
    %11 = vector.broadcast %cst_11 : f32 to vector<104x128xf32>
    %12 = arith.cmpf ogt, %7, %11 : vector<104x128xf32>
    %cst_12 = arith.constant 2.000000e-01 : f32
    %13 = vector.broadcast %cst_12 : f32 to vector<104x128xf32>
    %14 = arith.mulf %7, %13 : vector<104x128xf32>
    %cst_13 = arith.constant 0.000000e+00 : f32
    %15 = vector.broadcast %cst_13 : f32 to vector<104x128xf32>
    %16 = arith.select %12, %15, %14 : vector<104x128xi1>, vector<104x128xf32>
    %17 = arith.addf %16, %10 : vector<104x128xf32>
    %c0_14 = arith.constant 0 : index
    %c0_15 = arith.constant 0 : index
    %c0_16 = arith.constant 0 : index
    %18 = vector.load %arg6[%c0_14, %c0_15, %c0_16] : memref<1x104x128xf32, #tpu.memory_space<vmem>>, vector<1x104x128xf32>
    %19 = vector.shape_cast %18 : vector<1x104x128xf32> to vector<104x128xf32>
    %20 = vector.shape_cast %17 : vector<104x128xf32> to vector<1x104x128xf32>
    tpu.vector_store %arg6[%c0_14, %c0_15, %c0_16], %20 {strides = array<i32>} : memref<1x104x128xf32, #tpu.memory_space<vmem>>, vector<1x104x128xf32>,
    %cst_17 = arith.constant 2.000000e-01 : f32
    %21 = vector.broadcast %cst_17 : f32 to vector<104x128xf32>
    %22 = arith.cmpf ogt, %17, %21 : vector<104x128xf32>
    %23 = arith.extui %22 : vector<104x128xi1> to vector<104x128xi32>
    %24 = arith.sitofp %23 : vector<104x128xi32> to vector<104x128xf32>
    %25 = arith.truncf %24 : vector<104x128xf32> to vector<104x128xbf16>
    %c0_18 = arith.constant 0 : index
    %c0_19 = arith.constant 0 : index
    %c0_20 = arith.constant 0 : index
    %26 = vector.load %arg7[%c0_18, %c0_19, %c0_20] : memref<1x104x128xbf16, #tpu.memory_space<vmem>>, vector<1x104x128xbf16>
    %27 = vector.shape_cast %26 : vector<1x104x128xbf16> to vector<104x128xbf16>
    %28 = vector.shape_cast %25 : vector<104x128xbf16> to vector<1x104x128xbf16>
    tpu.vector_store %arg7[%c0_18, %c0_19, %c0_20], %28 {strides = array<i32>} : memref<1x104x128xbf16, #tpu.memory_space<vmem>>, vector<1x104x128xbf16>,
    return
  }
  func.func @transform_0(%arg0: i32, %arg1: i32) -> (i32, i32, i32) {
    %c0_i32 = arith.constant 0 : i32
    %c0_i32_0 = arith.constant 0 : i32
    return %arg0, %arg1, %c0_i32 : i32, i32, i32
  }
  func.func @transform_1(%arg0: i32, %arg1: i32) -> (i32, i32, i32) {
    %c0_i32 = arith.constant 0 : i32
    %c0_i32_0 = arith.constant 0 : i32
    %c0_i32_1 = arith.constant 0 : i32
    return %arg0, %c0_i32, %c0_i32_0 : i32, i32, i32
  }
  func.func @transform_2(%arg0: i32, %arg1: i32) -> (i32, i32, i32) {
    %c0_i32 = arith.constant 0 : i32
    %c0_i32_0 = arith.constant 0 : i32
    %c0_i32_1 = arith.constant 0 : i32
    return %arg0, %c0_i32, %c0_i32_0 : i32, i32, i32
  }
  func.func @transform_3(%arg0: i32, %arg1: i32) -> (i32, i32, i32) {
    %c0_i32 = arith.constant 0 : i32
    %c0_i32_0 = arith.constant 0 : i32
    return %arg0, %arg1, %c0_i32 : i32, i32, i32
  }
  func.func @transform_4(%arg0: i32, %arg1: i32) -> (i32, i32, i32) {
    %c0_i32 = arith.constant 0 : i32
    %c0_i32_0 = arith.constant 0 : i32
    return %arg0, %arg1, %c0_i32 : i32, i32, i32
  }
  func.func @transform_5(%arg0: i32, %arg1: i32) -> (i32, i32, i32) {
    %c0_i32 = arith.constant 0 : i32
    %c0_i32_0 = arith.constant 0 : i32
    return %arg0, %arg1, %c0_i32 : i32, i32, i32
  }
}

module attributes {stable_mosaic.version = 11 : i64} {
  func.func @kernel(%arg0: i32, %arg1: i32, %arg2: memref<1x104x576xbf16, #tpu.memory_space<vmem>>, %arg3: memref<1x576x128xbf16, #tpu.memory_space<vmem>>, %arg4: memref<1x1x128xf32, #tpu.memory_space<vmem>>, %arg5: memref<1x104x128xf32, #tpu.memory_space<vmem>>, %arg6: memref<1x128x128xbf16, #tpu.memory_space<vmem>>, %arg7: memref<1x1x128xf32, #tpu.memory_space<vmem>>, %arg8: memref<1x104x128xf32, #tpu.memory_space<vmem>>, %arg9: memref<1x128x128xbf16, #tpu.memory_space<vmem>>, %arg10: memref<1x1x128xf32, #tpu.memory_space<vmem>>, %arg11: memref<1x104x128xf32, #tpu.memory_space<vmem>>, %arg12: memref<1x128x128xbf16, #tpu.memory_space<vmem>>, %arg13: memref<1x1x128xf32, #tpu.memory_space<vmem>>, %arg14: memref<1x104x128xf32, #tpu.memory_space<vmem>>, %arg15: memref<1x104x128xf32, #tpu.memory_space<vmem>>, %arg16: memref<1x104x128xf32, #tpu.memory_space<vmem>>, %arg17: memref<1x104x128xf32, #tpu.memory_space<vmem>>, %arg18: memref<1x104x128xf32, #tpu.memory_space<vmem>>, %arg19: memref<1x104x128xbf16, #tpu.memory_space<vmem>>) attributes {dimension_semantics = [#tpu.dimension_semantics<parallel>, #tpu.dimension_semantics<parallel>], iteration_bounds = array<i64: 4, 1>, scalar_prefetch = 0 : i64, scratch_operands = 0 : i64, tpu.core_type = #tpu.core_type<tc>, window_params = [{transform_indices = @transform_0, window_bounds = array<i64: 1, 104, 576>}, {transform_indices = @transform_1, window_bounds = array<i64: 1, 576, 128>}, {transform_indices = @transform_2, window_bounds = array<i64: 1, 1, 128>}, {transform_indices = @transform_3, window_bounds = array<i64: 1, 104, 128>}, {transform_indices = @transform_4, window_bounds = array<i64: 1, 128, 128>}, {transform_indices = @transform_5, window_bounds = array<i64: 1, 1, 128>}, {transform_indices = @transform_6, window_bounds = array<i64: 1, 104, 128>}, {transform_indices = @transform_7, window_bounds = array<i64: 1, 128, 128>}, {transform_indices = @transform_8, window_bounds = array<i64: 1, 1, 128>}, {transform_indices = @transform_9, window_bounds = array<i64: 1, 104, 128>}, {transform_indices = @transform_10, window_bounds = array<i64: 1, 128, 128>}, {transform_indices = @transform_11, window_bounds = array<i64: 1, 1, 128>}, {transform_indices = @transform_12, window_bounds = array<i64: 1, 104, 128>}, {transform_indices = @transform_13, window_bounds = array<i64: 1, 104, 128>}, {transform_indices = @transform_14, window_bounds = array<i64: 1, 104, 128>}, {transform_indices = @transform_15, window_bounds = array<i64: 1, 104, 128>}, {transform_indices = @transform_16, window_bounds = array<i64: 1, 104, 128>}, {transform_indices = @transform_17, window_bounds = array<i64: 1, 104, 128>}]} {
    %c0 = arith.constant 0 : index
    %c0_0 = arith.constant 0 : index
    %c0_1 = arith.constant 0 : index
    %0 = vector.load %arg2[%c0, %c0_0, %c0_1] : memref<1x104x576xbf16, #tpu.memory_space<vmem>>, vector<1x104x576xbf16>
    %1 = vector.shape_cast %0 : vector<1x104x576xbf16> to vector<104x576xbf16>
    %c0_2 = arith.constant 0 : index
    %c0_3 = arith.constant 0 : index
    %c0_4 = arith.constant 0 : index
    %2 = vector.load %arg3[%c0_2, %c0_3, %c0_4] : memref<1x576x128xbf16, #tpu.memory_space<vmem>>, vector<1x576x128xbf16>
    %3 = vector.shape_cast %2 : vector<1x576x128xbf16> to vector<576x128xbf16>
    %c0_5 = arith.constant 0 : index
    %c0_6 = arith.constant 0 : index
    %c0_7 = arith.constant 0 : index
    %4 = vector.load %arg4[%c0_5, %c0_6, %c0_7] : memref<1x1x128xf32, #tpu.memory_space<vmem>>, vector<1x1x128xf32>
    %5 = vector.shape_cast %4 : vector<1x1x128xf32> to vector<1x128xf32>
    %c0_8 = arith.constant 0 : index
    %c0_9 = arith.constant 0 : index
    %c0_10 = arith.constant 0 : index
    %6 = vector.load %arg5[%c0_8, %c0_9, %c0_10] : memref<1x104x128xf32, #tpu.memory_space<vmem>>, vector<1x104x128xf32>
    %7 = vector.shape_cast %6 : vector<1x104x128xf32> to vector<104x128xf32>
    %cst = arith.constant dense<0.000000e+00> : vector<104x128xf32>
    %8 = tpu.matmul %1, %3, %cst {dimension_numbers = #tpu.dot_dimension_numbers<[1], [0], [0], [1], [0, 0, 1, 1], [], []>} : vector<104x576xbf16>, vector<576x128xbf16>, vector<104x128xf32> -> vector<104x128xf32>
    %9 = vector.broadcast %5 : vector<1x128xf32> to vector<104x128xf32>
    %10 = arith.addf %8, %9 : vector<104x128xf32>
    %cst_11 = arith.constant 2.000000e-01 : f32
    %11 = vector.broadcast %cst_11 : f32 to vector<104x128xf32>
    %12 = arith.cmpf ogt, %7, %11 : vector<104x128xf32>
    %cst_12 = arith.constant 2.000000e-01 : f32
    %13 = vector.broadcast %cst_12 : f32 to vector<104x128xf32>
    %14 = arith.mulf %7, %13 : vector<104x128xf32>
    %cst_13 = arith.constant 0.000000e+00 : f32
    %15 = vector.broadcast %cst_13 : f32 to vector<104x128xf32>
    %16 = arith.select %12, %15, %14 : vector<104x128xi1>, vector<104x128xf32>
    %17 = arith.addf %16, %10 : vector<104x128xf32>
    %c0_14 = arith.constant 0 : index
    %c0_15 = arith.constant 0 : index
    %c0_16 = arith.constant 0 : index
    %18 = vector.load %arg15[%c0_14, %c0_15, %c0_16] : memref<1x104x128xf32, #tpu.memory_space<vmem>>, vector<1x104x128xf32>
    %19 = vector.shape_cast %18 : vector<1x104x128xf32> to vector<104x128xf32>
    %20 = vector.shape_cast %17 : vector<104x128xf32> to vector<1x104x128xf32>
    tpu.vector_store %arg15[%c0_14, %c0_15, %c0_16], %20 {strides = array<i32>} : memref<1x104x128xf32, #tpu.memory_space<vmem>>, vector<1x104x128xf32>,
    %cst_17 = arith.constant 2.000000e-01 : f32
    %21 = vector.broadcast %cst_17 : f32 to vector<104x128xf32>
    %22 = arith.cmpf ogt, %17, %21 : vector<104x128xf32>
    %23 = arith.extui %22 : vector<104x128xi1> to vector<104x128xi32>
    %24 = arith.sitofp %23 : vector<104x128xi32> to vector<104x128xf32>
    %25 = arith.truncf %24 : vector<104x128xf32> to vector<104x128xbf16>
    %c0_18 = arith.constant 0 : index
    %c0_19 = arith.constant 0 : index
    %c0_20 = arith.constant 0 : index
    %26 = vector.load %arg6[%c0_18, %c0_19, %c0_20] : memref<1x128x128xbf16, #tpu.memory_space<vmem>>, vector<1x128x128xbf16>
    %27 = vector.shape_cast %26 : vector<1x128x128xbf16> to vector<128x128xbf16>
    %c0_21 = arith.constant 0 : index
    %c0_22 = arith.constant 0 : index
    %c0_23 = arith.constant 0 : index
    %28 = vector.load %arg7[%c0_21, %c0_22, %c0_23] : memref<1x1x128xf32, #tpu.memory_space<vmem>>, vector<1x1x128xf32>
    %29 = vector.shape_cast %28 : vector<1x1x128xf32> to vector<1x128xf32>
    %c0_24 = arith.constant 0 : index
    %c0_25 = arith.constant 0 : index
    %c0_26 = arith.constant 0 : index
    %30 = vector.load %arg8[%c0_24, %c0_25, %c0_26] : memref<1x104x128xf32, #tpu.memory_space<vmem>>, vector<1x104x128xf32>
    %31 = vector.shape_cast %30 : vector<1x104x128xf32> to vector<104x128xf32>
    %cst_27 = arith.constant dense<0.000000e+00> : vector<104x128xf32>
    %32 = tpu.matmul %25, %27, %cst_27 {dimension_numbers = #tpu.dot_dimension_numbers<[1], [0], [0], [1], [0, 0, 1, 1], [], []>} : vector<104x128xbf16>, vector<128x128xbf16>, vector<104x128xf32> -> vector<104x128xf32>
    %33 = vector.broadcast %29 : vector<1x128xf32> to vector<104x128xf32>
    %34 = arith.addf %32, %33 : vector<104x128xf32>
    %cst_28 = arith.constant 2.000000e-01 : f32
    %35 = vector.broadcast %cst_28 : f32 to vector<104x128xf32>
    %36 = arith.cmpf ogt, %31, %35 : vector<104x128xf32>
    %cst_29 = arith.constant 2.000000e-01 : f32
    %37 = vector.broadcast %cst_29 : f32 to vector<104x128xf32>
    %38 = arith.mulf %31, %37 : vector<104x128xf32>
    %cst_30 = arith.constant 0.000000e+00 : f32
    %39 = vector.broadcast %cst_30 : f32 to vector<104x128xf32>
    %40 = arith.select %36, %39, %38 : vector<104x128xi1>, vector<104x128xf32>
    %41 = arith.addf %40, %34 : vector<104x128xf32>
    %c0_31 = arith.constant 0 : index
    %c0_32 = arith.constant 0 : index
    %c0_33 = arith.constant 0 : index
    %42 = vector.load %arg16[%c0_31, %c0_32, %c0_33] : memref<1x104x128xf32, #tpu.memory_space<vmem>>, vector<1x104x128xf32>
    %43 = vector.shape_cast %42 : vector<1x104x128xf32> to vector<104x128xf32>
    %44 = vector.shape_cast %41 : vector<104x128xf32> to vector<1x104x128xf32>
    tpu.vector_store %arg16[%c0_31, %c0_32, %c0_33], %44 {strides = array<i32>} : memref<1x104x128xf32, #tpu.memory_space<vmem>>, vector<1x104x128xf32>,
    %cst_34 = arith.constant 2.000000e-01 : f32
    %45 = vector.broadcast %cst_34 : f32 to vector<104x128xf32>
    %46 = arith.cmpf ogt, %41, %45 : vector<104x128xf32>
    %47 = arith.extui %46 : vector<104x128xi1> to vector<104x128xi32>
    %48 = arith.sitofp %47 : vector<104x128xi32> to vector<104x128xf32>
    %49 = arith.truncf %48 : vector<104x128xf32> to vector<104x128xbf16>
    %c0_35 = arith.constant 0 : index
    %c0_36 = arith.constant 0 : index
    %c0_37 = arith.constant 0 : index
    %50 = vector.load %arg9[%c0_35, %c0_36, %c0_37] : memref<1x128x128xbf16, #tpu.memory_space<vmem>>, vector<1x128x128xbf16>
    %51 = vector.shape_cast %50 : vector<1x128x128xbf16> to vector<128x128xbf16>
    %c0_38 = arith.constant 0 : index
    %c0_39 = arith.constant 0 : index
    %c0_40 = arith.constant 0 : index
    %52 = vector.load %arg10[%c0_38, %c0_39, %c0_40] : memref<1x1x128xf32, #tpu.memory_space<vmem>>, vector<1x1x128xf32>
    %53 = vector.shape_cast %52 : vector<1x1x128xf32> to vector<1x128xf32>
    %c0_41 = arith.constant 0 : index
    %c0_42 = arith.constant 0 : index
    %c0_43 = arith.constant 0 : index
    %54 = vector.load %arg11[%c0_41, %c0_42, %c0_43] : memref<1x104x128xf32, #tpu.memory_space<vmem>>, vector<1x104x128xf32>
    %55 = vector.shape_cast %54 : vector<1x104x128xf32> to vector<104x128xf32>
    %cst_44 = arith.constant dense<0.000000e+00> : vector<104x128xf32>
    %56 = tpu.matmul %49, %51, %cst_44 {dimension_numbers = #tpu.dot_dimension_numbers<[1], [0], [0], [1], [0, 0, 1, 1], [], []>} : vector<104x128xbf16>, vector<128x128xbf16>, vector<104x128xf32> -> vector<104x128xf32>
    %57 = vector.broadcast %53 : vector<1x128xf32> to vector<104x128xf32>
    %58 = arith.addf %56, %57 : vector<104x128xf32>
    %cst_45 = arith.constant 2.000000e-01 : f32
    %59 = vector.broadcast %cst_45 : f32 to vector<104x128xf32>
    %60 = arith.cmpf ogt, %55, %59 : vector<104x128xf32>
    %cst_46 = arith.constant 2.000000e-01 : f32
    %61 = vector.broadcast %cst_46 : f32 to vector<104x128xf32>
    %62 = arith.mulf %55, %61 : vector<104x128xf32>
    %cst_47 = arith.constant 0.000000e+00 : f32
    %63 = vector.broadcast %cst_47 : f32 to vector<104x128xf32>
    %64 = arith.select %60, %63, %62 : vector<104x128xi1>, vector<104x128xf32>
    %65 = arith.addf %64, %58 : vector<104x128xf32>
    %c0_48 = arith.constant 0 : index
    %c0_49 = arith.constant 0 : index
    %c0_50 = arith.constant 0 : index
    %66 = vector.load %arg17[%c0_48, %c0_49, %c0_50] : memref<1x104x128xf32, #tpu.memory_space<vmem>>, vector<1x104x128xf32>
    %67 = vector.shape_cast %66 : vector<1x104x128xf32> to vector<104x128xf32>
    %68 = vector.shape_cast %65 : vector<104x128xf32> to vector<1x104x128xf32>
    tpu.vector_store %arg17[%c0_48, %c0_49, %c0_50], %68 {strides = array<i32>} : memref<1x104x128xf32, #tpu.memory_space<vmem>>, vector<1x104x128xf32>,
    %cst_51 = arith.constant 2.000000e-01 : f32
    %69 = vector.broadcast %cst_51 : f32 to vector<104x128xf32>
    %70 = arith.cmpf ogt, %65, %69 : vector<104x128xf32>
    %71 = arith.extui %70 : vector<104x128xi1> to vector<104x128xi32>
    %72 = arith.sitofp %71 : vector<104x128xi32> to vector<104x128xf32>
    %73 = arith.truncf %72 : vector<104x128xf32> to vector<104x128xbf16>
    %c0_52 = arith.constant 0 : index
    %c0_53 = arith.constant 0 : index
    %c0_54 = arith.constant 0 : index
    %74 = vector.load %arg12[%c0_52, %c0_53, %c0_54] : memref<1x128x128xbf16, #tpu.memory_space<vmem>>, vector<1x128x128xbf16>
    %75 = vector.shape_cast %74 : vector<1x128x128xbf16> to vector<128x128xbf16>
    %c0_55 = arith.constant 0 : index
    %c0_56 = arith.constant 0 : index
    %c0_57 = arith.constant 0 : index
    %76 = vector.load %arg13[%c0_55, %c0_56, %c0_57] : memref<1x1x128xf32, #tpu.memory_space<vmem>>, vector<1x1x128xf32>
    %77 = vector.shape_cast %76 : vector<1x1x128xf32> to vector<1x128xf32>
    %c0_58 = arith.constant 0 : index
    %c0_59 = arith.constant 0 : index
    %c0_60 = arith.constant 0 : index
    %78 = vector.load %arg14[%c0_58, %c0_59, %c0_60] : memref<1x104x128xf32, #tpu.memory_space<vmem>>, vector<1x104x128xf32>
    %79 = vector.shape_cast %78 : vector<1x104x128xf32> to vector<104x128xf32>
    %cst_61 = arith.constant dense<0.000000e+00> : vector<104x128xf32>
    %80 = tpu.matmul %73, %75, %cst_61 {dimension_numbers = #tpu.dot_dimension_numbers<[1], [0], [0], [1], [0, 0, 1, 1], [], []>} : vector<104x128xbf16>, vector<128x128xbf16>, vector<104x128xf32> -> vector<104x128xf32>
    %81 = vector.broadcast %77 : vector<1x128xf32> to vector<104x128xf32>
    %82 = arith.addf %80, %81 : vector<104x128xf32>
    %cst_62 = arith.constant 2.000000e-01 : f32
    %83 = vector.broadcast %cst_62 : f32 to vector<104x128xf32>
    %84 = arith.cmpf ogt, %79, %83 : vector<104x128xf32>
    %cst_63 = arith.constant 2.000000e-01 : f32
    %85 = vector.broadcast %cst_63 : f32 to vector<104x128xf32>
    %86 = arith.mulf %79, %85 : vector<104x128xf32>
    %cst_64 = arith.constant 0.000000e+00 : f32
    %87 = vector.broadcast %cst_64 : f32 to vector<104x128xf32>
    %88 = arith.select %84, %87, %86 : vector<104x128xi1>, vector<104x128xf32>
    %89 = arith.addf %88, %82 : vector<104x128xf32>
    %c0_65 = arith.constant 0 : index
    %c0_66 = arith.constant 0 : index
    %c0_67 = arith.constant 0 : index
    %90 = vector.load %arg18[%c0_65, %c0_66, %c0_67] : memref<1x104x128xf32, #tpu.memory_space<vmem>>, vector<1x104x128xf32>
    %91 = vector.shape_cast %90 : vector<1x104x128xf32> to vector<104x128xf32>
    %92 = vector.shape_cast %89 : vector<104x128xf32> to vector<1x104x128xf32>
    tpu.vector_store %arg18[%c0_65, %c0_66, %c0_67], %92 {strides = array<i32>} : memref<1x104x128xf32, #tpu.memory_space<vmem>>, vector<1x104x128xf32>,
    %cst_68 = arith.constant 2.000000e-01 : f32
    %93 = vector.broadcast %cst_68 : f32 to vector<104x128xf32>
    %94 = arith.cmpf ogt, %89, %93 : vector<104x128xf32>
    %95 = arith.extui %94 : vector<104x128xi1> to vector<104x128xi32>
    %96 = arith.sitofp %95 : vector<104x128xi32> to vector<104x128xf32>
    %97 = arith.truncf %96 : vector<104x128xf32> to vector<104x128xbf16>
    %c0_69 = arith.constant 0 : index
    %c0_70 = arith.constant 0 : index
    %c0_71 = arith.constant 0 : index
    %98 = vector.load %arg19[%c0_69, %c0_70, %c0_71] : memref<1x104x128xbf16, #tpu.memory_space<vmem>>, vector<1x104x128xbf16>
    %99 = vector.shape_cast %98 : vector<1x104x128xbf16> to vector<104x128xbf16>
    %100 = vector.shape_cast %97 : vector<104x128xbf16> to vector<1x104x128xbf16>
    tpu.vector_store %arg19[%c0_69, %c0_70, %c0_71], %100 {strides = array<i32>} : memref<1x104x128xbf16, #tpu.memory_space<vmem>>, vector<1x104x128xbf16>,
    return
  }
  func.func @transform_0(%arg0: i32, %arg1: i32) -> (i32, i32, i32) {
    %c0_i32 = arith.constant 0 : i32
    %c0_i32_0 = arith.constant 0 : i32
    return %arg0, %arg1, %c0_i32 : i32, i32, i32
  }
  func.func @transform_1(%arg0: i32, %arg1: i32) -> (i32, i32, i32) {
    %c0_i32 = arith.constant 0 : i32
    %c0_i32_0 = arith.constant 0 : i32
    %c0_i32_1 = arith.constant 0 : i32
    return %arg0, %c0_i32, %c0_i32_0 : i32, i32, i32
  }
  func.func @transform_2(%arg0: i32, %arg1: i32) -> (i32, i32, i32) {
    %c0_i32 = arith.constant 0 : i32
    %c0_i32_0 = arith.constant 0 : i32
    %c0_i32_1 = arith.constant 0 : i32
    return %arg0, %c0_i32, %c0_i32_0 : i32, i32, i32
  }
  func.func @transform_3(%arg0: i32, %arg1: i32) -> (i32, i32, i32) {
    %c0_i32 = arith.constant 0 : i32
    %c0_i32_0 = arith.constant 0 : i32
    return %arg0, %arg1, %c0_i32 : i32, i32, i32
  }
  func.func @transform_4(%arg0: i32, %arg1: i32) -> (i32, i32, i32) {
    %c0_i32 = arith.constant 0 : i32
    %c0_i32_0 = arith.constant 0 : i32
    %c0_i32_1 = arith.constant 0 : i32
    return %arg0, %c0_i32, %c0_i32_0 : i32, i32, i32
  }
  func.func @transform_5(%arg0: i32, %arg1: i32) -> (i32, i32, i32) {
    %c0_i32 = arith.constant 0 : i32
    %c0_i32_0 = arith.constant 0 : i32
    %c0_i32_1 = arith.constant 0 : i32
    return %arg0, %c0_i32, %c0_i32_0 : i32, i32, i32
  }
  func.func @transform_6(%arg0: i32, %arg1: i32) -> (i32, i32, i32) {
    %c0_i32 = arith.constant 0 : i32
    %c0_i32_0 = arith.constant 0 : i32
    return %arg0, %arg1, %c0_i32 : i32, i32, i32
  }
  func.func @transform_7(%arg0: i32, %arg1: i32) -> (i32, i32, i32) {
    %c0_i32 = arith.constant 0 : i32
    %c0_i32_0 = arith.constant 0 : i32
    %c0_i32_1 = arith.constant 0 : i32
    return %arg0, %c0_i32, %c0_i32_0 : i32, i32, i32
  }
  func.func @transform_8(%arg0: i32, %arg1: i32) -> (i32, i32, i32) {
    %c0_i32 = arith.constant 0 : i32
    %c0_i32_0 = arith.constant 0 : i32
    %c0_i32_1 = arith.constant 0 : i32
    return %arg0, %c0_i32, %c0_i32_0 : i32, i32, i32
  }
  func.func @transform_9(%arg0: i32, %arg1: i32) -> (i32, i32, i32) {
    %c0_i32 = arith.constant 0 : i32
    %c0_i32_0 = arith.constant 0 : i32
    return %arg0, %arg1, %c0_i32 : i32, i32, i32
  }
  func.func @transform_10(%arg0: i32, %arg1: i32) -> (i32, i32, i32) {
    %c0_i32 = arith.constant 0 : i32
    %c0_i32_0 = arith.constant 0 : i32
    %c0_i32_1 = arith.constant 0 : i32
    return %arg0, %c0_i32, %c0_i32_0 : i32, i32, i32
  }
  func.func @transform_11(%arg0: i32, %arg1: i32) -> (i32, i32, i32) {
    %c0_i32 = arith.constant 0 : i32
    %c0_i32_0 = arith.constant 0 : i32
    %c0_i32_1 = arith.constant 0 : i32
    return %arg0, %c0_i32, %c0_i32_0 : i32, i32, i32
  }
  func.func @transform_12(%arg0: i32, %arg1: i32) -> (i32, i32, i32) {
    %c0_i32 = arith.constant 0 : i32
    %c0_i32_0 = arith.constant 0 : i32
    return %arg0, %arg1, %c0_i32 : i32, i32, i32
  }
  func.func @transform_13(%arg0: i32, %arg1: i32) -> (i32, i32, i32) {
    %c0_i32 = arith.constant 0 : i32
    %c0_i32_0 = arith.constant 0 : i32
    return %arg0, %arg1, %c0_i32 : i32, i32, i32
  }
  func.func @transform_14(%arg0: i32, %arg1: i32) -> (i32, i32, i32) {
    %c0_i32 = arith.constant 0 : i32
    %c0_i32_0 = arith.constant 0 : i32
    return %arg0, %arg1, %c0_i32 : i32, i32, i32
  }
  func.func @transform_15(%arg0: i32, %arg1: i32) -> (i32, i32, i32) {
    %c0_i32 = arith.constant 0 : i32
    %c0_i32_0 = arith.constant 0 : i32
    return %arg0, %arg1, %c0_i32 : i32, i32, i32
  }
  func.func @transform_16(%arg0: i32, %arg1: i32) -> (i32, i32, i32) {
    %c0_i32 = arith.constant 0 : i32
    %c0_i32_0 = arith.constant 0 : i32
    return %arg0, %arg1, %c0_i32 : i32, i32, i32
  }
  func.func @transform_17(%arg0: i32, %arg1: i32) -> (i32, i32, i32) {
    %c0_i32 = arith.constant 0 : i32
    %c0_i32_0 = arith.constant 0 : i32
    return %arg0, %arg1, %c0_i32 : i32, i32, i32
  }
}

module attributes {stable_mosaic.version = 11 : i64} {
  func.func @kernel(%arg0: i32, %arg1: i32, %arg2: memref<1x24x512xbf16, #tpu.memory_space<vmem>>, %arg3: memref<1x512x128xbf16, #tpu.memory_space<vmem>>, %arg4: memref<1x1x128xf32, #tpu.memory_space<vmem>>, %arg5: memref<1x24x128xf32, #tpu.memory_space<vmem>>, %arg6: memref<1x24x128xf32, #tpu.memory_space<vmem>>, %arg7: memref<1x24x128xbf16, #tpu.memory_space<vmem>>) attributes {dimension_semantics = [#tpu.dimension_semantics<parallel>, #tpu.dimension_semantics<parallel>], iteration_bounds = array<i64: 4, 1>, scalar_prefetch = 0 : i64, scratch_operands = 0 : i64, tpu.core_type = #tpu.core_type<tc>, window_params = [{transform_indices = @transform_0, window_bounds = array<i64: 1, 24, 512>}, {transform_indices = @transform_1, window_bounds = array<i64: 1, 512, 128>}, {transform_indices = @transform_2, window_bounds = array<i64: 1, 1, 128>}, {transform_indices = @transform_3, window_bounds = array<i64: 1, 24, 128>}, {transform_indices = @transform_4, window_bounds = array<i64: 1, 24, 128>}, {transform_indices = @transform_5, window_bounds = array<i64: 1, 24, 128>}]} {
    %c0 = arith.constant 0 : index
    %c0_0 = arith.constant 0 : index
    %c0_1 = arith.constant 0 : index
    %0 = vector.load %arg2[%c0, %c0_0, %c0_1] : memref<1x24x512xbf16, #tpu.memory_space<vmem>>, vector<1x24x512xbf16>
    %1 = vector.shape_cast %0 : vector<1x24x512xbf16> to vector<24x512xbf16>
    %c0_2 = arith.constant 0 : index
    %c0_3 = arith.constant 0 : index
    %c0_4 = arith.constant 0 : index
    %2 = vector.load %arg3[%c0_2, %c0_3, %c0_4] : memref<1x512x128xbf16, #tpu.memory_space<vmem>>, vector<1x512x128xbf16>
    %3 = vector.shape_cast %2 : vector<1x512x128xbf16> to vector<512x128xbf16>
    %c0_5 = arith.constant 0 : index
    %c0_6 = arith.constant 0 : index
    %c0_7 = arith.constant 0 : index
    %4 = vector.load %arg4[%c0_5, %c0_6, %c0_7] : memref<1x1x128xf32, #tpu.memory_space<vmem>>, vector<1x1x128xf32>
    %5 = vector.shape_cast %4 : vector<1x1x128xf32> to vector<1x128xf32>
    %c0_8 = arith.constant 0 : index
    %c0_9 = arith.constant 0 : index
    %c0_10 = arith.constant 0 : index
    %6 = vector.load %arg5[%c0_8, %c0_9, %c0_10] : memref<1x24x128xf32, #tpu.memory_space<vmem>>, vector<1x24x128xf32>
    %7 = vector.shape_cast %6 : vector<1x24x128xf32> to vector<24x128xf32>
    %cst = arith.constant dense<0.000000e+00> : vector<24x128xf32>
    %8 = tpu.matmul %1, %3, %cst {dimension_numbers = #tpu.dot_dimension_numbers<[1], [0], [0], [1], [0, 0, 1, 1], [], []>} : vector<24x512xbf16>, vector<512x128xbf16>, vector<24x128xf32> -> vector<24x128xf32>
    %9 = vector.broadcast %5 : vector<1x128xf32> to vector<24x128xf32>
    %10 = arith.addf %8, %9 : vector<24x128xf32>
    %cst_11 = arith.constant 2.000000e-01 : f32
    %11 = vector.broadcast %cst_11 : f32 to vector<24x128xf32>
    %12 = arith.cmpf ogt, %7, %11 : vector<24x128xf32>
    %cst_12 = arith.constant 2.000000e-01 : f32
    %13 = vector.broadcast %cst_12 : f32 to vector<24x128xf32>
    %14 = arith.mulf %7, %13 : vector<24x128xf32>
    %cst_13 = arith.constant 0.000000e+00 : f32
    %15 = vector.broadcast %cst_13 : f32 to vector<24x128xf32>
    %16 = arith.select %12, %15, %14 : vector<24x128xi1>, vector<24x128xf32>
    %17 = arith.addf %16, %10 : vector<24x128xf32>
    %c0_14 = arith.constant 0 : index
    %c0_15 = arith.constant 0 : index
    %c0_16 = arith.constant 0 : index
    %18 = vector.load %arg6[%c0_14, %c0_15, %c0_16] : memref<1x24x128xf32, #tpu.memory_space<vmem>>, vector<1x24x128xf32>
    %19 = vector.shape_cast %18 : vector<1x24x128xf32> to vector<24x128xf32>
    %20 = vector.shape_cast %17 : vector<24x128xf32> to vector<1x24x128xf32>
    tpu.vector_store %arg6[%c0_14, %c0_15, %c0_16], %20 {strides = array<i32>} : memref<1x24x128xf32, #tpu.memory_space<vmem>>, vector<1x24x128xf32>,
    %cst_17 = arith.constant 2.000000e-01 : f32
    %21 = vector.broadcast %cst_17 : f32 to vector<24x128xf32>
    %22 = arith.cmpf ogt, %17, %21 : vector<24x128xf32>
    %23 = arith.extui %22 : vector<24x128xi1> to vector<24x128xi32>
    %24 = arith.sitofp %23 : vector<24x128xi32> to vector<24x128xf32>
    %25 = arith.truncf %24 : vector<24x128xf32> to vector<24x128xbf16>
    %c0_18 = arith.constant 0 : index
    %c0_19 = arith.constant 0 : index
    %c0_20 = arith.constant 0 : index
    %26 = vector.load %arg7[%c0_18, %c0_19, %c0_20] : memref<1x24x128xbf16, #tpu.memory_space<vmem>>, vector<1x24x128xbf16>
    %27 = vector.shape_cast %26 : vector<1x24x128xbf16> to vector<24x128xbf16>
    %28 = vector.shape_cast %25 : vector<24x128xbf16> to vector<1x24x128xbf16>
    tpu.vector_store %arg7[%c0_18, %c0_19, %c0_20], %28 {strides = array<i32>} : memref<1x24x128xbf16, #tpu.memory_space<vmem>>, vector<1x24x128xbf16>,
    return
  }
  func.func @transform_0(%arg0: i32, %arg1: i32) -> (i32, i32, i32) {
    %c0_i32 = arith.constant 0 : i32
    %c0_i32_0 = arith.constant 0 : i32
    return %arg0, %arg1, %c0_i32 : i32, i32, i32
  }
  func.func @transform_1(%arg0: i32, %arg1: i32) -> (i32, i32, i32) {
    %c0_i32 = arith.constant 0 : i32
    %c0_i32_0 = arith.constant 0 : i32
    %c0_i32_1 = arith.constant 0 : i32
    return %arg0, %c0_i32, %c0_i32_0 : i32, i32, i32
  }
  func.func @transform_2(%arg0: i32, %arg1: i32) -> (i32, i32, i32) {
    %c0_i32 = arith.constant 0 : i32
    %c0_i32_0 = arith.constant 0 : i32
    %c0_i32_1 = arith.constant 0 : i32
    return %arg0, %c0_i32, %c0_i32_0 : i32, i32, i32
  }
  func.func @transform_3(%arg0: i32, %arg1: i32) -> (i32, i32, i32) {
    %c0_i32 = arith.constant 0 : i32
    %c0_i32_0 = arith.constant 0 : i32
    return %arg0, %arg1, %c0_i32 : i32, i32, i32
  }
  func.func @transform_4(%arg0: i32, %arg1: i32) -> (i32, i32, i32) {
    %c0_i32 = arith.constant 0 : i32
    %c0_i32_0 = arith.constant 0 : i32
    return %arg0, %arg1, %c0_i32 : i32, i32, i32
  }
  func.func @transform_5(%arg0: i32, %arg1: i32) -> (i32, i32, i32) {
    %c0_i32 = arith.constant 0 : i32
    %c0_i32_0 = arith.constant 0 : i32
    return %arg0, %arg1, %c0_i32 : i32, i32, i32
  }
}

module attributes {stable_mosaic.version = 11 : i64} {
  func.func @kernel(%arg0: i32, %arg1: i32, %arg2: memref<1x24x576xbf16, #tpu.memory_space<vmem>>, %arg3: memref<1x576x128xbf16, #tpu.memory_space<vmem>>, %arg4: memref<1x1x128xf32, #tpu.memory_space<vmem>>, %arg5: memref<1x24x128xf32, #tpu.memory_space<vmem>>, %arg6: memref<1x128x128xbf16, #tpu.memory_space<vmem>>, %arg7: memref<1x1x128xf32, #tpu.memory_space<vmem>>, %arg8: memref<1x24x128xf32, #tpu.memory_space<vmem>>, %arg9: memref<1x128x128xbf16, #tpu.memory_space<vmem>>, %arg10: memref<1x1x128xf32, #tpu.memory_space<vmem>>, %arg11: memref<1x24x128xf32, #tpu.memory_space<vmem>>, %arg12: memref<1x24x128xf32, #tpu.memory_space<vmem>>, %arg13: memref<1x24x128xf32, #tpu.memory_space<vmem>>, %arg14: memref<1x24x128xf32, #tpu.memory_space<vmem>>, %arg15: memref<1x24x128xbf16, #tpu.memory_space<vmem>>) attributes {dimension_semantics = [#tpu.dimension_semantics<parallel>, #tpu.dimension_semantics<parallel>], iteration_bounds = array<i64: 8, 1>, scalar_prefetch = 0 : i64, scratch_operands = 0 : i64, tpu.core_type = #tpu.core_type<tc>, window_params = [{transform_indices = @transform_0, window_bounds = array<i64: 1, 24, 576>}, {transform_indices = @transform_1, window_bounds = array<i64: 1, 576, 128>}, {transform_indices = @transform_2, window_bounds = array<i64: 1, 1, 128>}, {transform_indices = @transform_3, window_bounds = array<i64: 1, 24, 128>}, {transform_indices = @transform_4, window_bounds = array<i64: 1, 128, 128>}, {transform_indices = @transform_5, window_bounds = array<i64: 1, 1, 128>}, {transform_indices = @transform_6, window_bounds = array<i64: 1, 24, 128>}, {transform_indices = @transform_7, window_bounds = array<i64: 1, 128, 128>}, {transform_indices = @transform_8, window_bounds = array<i64: 1, 1, 128>}, {transform_indices = @transform_9, window_bounds = array<i64: 1, 24, 128>}, {transform_indices = @transform_10, window_bounds = array<i64: 1, 24, 128>}, {transform_indices = @transform_11, window_bounds = array<i64: 1, 24, 128>}, {transform_indices = @transform_12, window_bounds = array<i64: 1, 24, 128>}, {transform_indices = @transform_13, window_bounds = array<i64: 1, 24, 128>}]} {
    %c0 = arith.constant 0 : index
    %c0_0 = arith.constant 0 : index
    %c0_1 = arith.constant 0 : index
    %0 = vector.load %arg2[%c0, %c0_0, %c0_1] : memref<1x24x576xbf16, #tpu.memory_space<vmem>>, vector<1x24x576xbf16>
    %1 = vector.shape_cast %0 : vector<1x24x576xbf16> to vector<24x576xbf16>
    %c0_2 = arith.constant 0 : index
    %c0_3 = arith.constant 0 : index
    %c0_4 = arith.constant 0 : index
    %2 = vector.load %arg3[%c0_2, %c0_3, %c0_4] : memref<1x576x128xbf16, #tpu.memory_space<vmem>>, vector<1x576x128xbf16>
    %3 = vector.shape_cast %2 : vector<1x576x128xbf16> to vector<576x128xbf16>
    %c0_5 = arith.constant 0 : index
    %c0_6 = arith.constant 0 : index
    %c0_7 = arith.constant 0 : index
    %4 = vector.load %arg4[%c0_5, %c0_6, %c0_7] : memref<1x1x128xf32, #tpu.memory_space<vmem>>, vector<1x1x128xf32>
    %5 = vector.shape_cast %4 : vector<1x1x128xf32> to vector<1x128xf32>
    %c0_8 = arith.constant 0 : index
    %c0_9 = arith.constant 0 : index
    %c0_10 = arith.constant 0 : index
    %6 = vector.load %arg5[%c0_8, %c0_9, %c0_10] : memref<1x24x128xf32, #tpu.memory_space<vmem>>, vector<1x24x128xf32>
    %7 = vector.shape_cast %6 : vector<1x24x128xf32> to vector<24x128xf32>
    %cst = arith.constant dense<0.000000e+00> : vector<24x128xf32>
    %8 = tpu.matmul %1, %3, %cst {dimension_numbers = #tpu.dot_dimension_numbers<[1], [0], [0], [1], [0, 0, 1, 1], [], []>} : vector<24x576xbf16>, vector<576x128xbf16>, vector<24x128xf32> -> vector<24x128xf32>
    %9 = vector.broadcast %5 : vector<1x128xf32> to vector<24x128xf32>
    %10 = arith.addf %8, %9 : vector<24x128xf32>
    %cst_11 = arith.constant 2.000000e-01 : f32
    %11 = vector.broadcast %cst_11 : f32 to vector<24x128xf32>
    %12 = arith.cmpf ogt, %7, %11 : vector<24x128xf32>
    %cst_12 = arith.constant 2.000000e-01 : f32
    %13 = vector.broadcast %cst_12 : f32 to vector<24x128xf32>
    %14 = arith.mulf %7, %13 : vector<24x128xf32>
    %cst_13 = arith.constant 0.000000e+00 : f32
    %15 = vector.broadcast %cst_13 : f32 to vector<24x128xf32>
    %16 = arith.select %12, %15, %14 : vector<24x128xi1>, vector<24x128xf32>
    %17 = arith.addf %16, %10 : vector<24x128xf32>
    %c0_14 = arith.constant 0 : index
    %c0_15 = arith.constant 0 : index
    %c0_16 = arith.constant 0 : index
    %18 = vector.load %arg12[%c0_14, %c0_15, %c0_16] : memref<1x24x128xf32, #tpu.memory_space<vmem>>, vector<1x24x128xf32>
    %19 = vector.shape_cast %18 : vector<1x24x128xf32> to vector<24x128xf32>
    %20 = vector.shape_cast %17 : vector<24x128xf32> to vector<1x24x128xf32>
    tpu.vector_store %arg12[%c0_14, %c0_15, %c0_16], %20 {strides = array<i32>} : memref<1x24x128xf32, #tpu.memory_space<vmem>>, vector<1x24x128xf32>,
    %cst_17 = arith.constant 2.000000e-01 : f32
    %21 = vector.broadcast %cst_17 : f32 to vector<24x128xf32>
    %22 = arith.cmpf ogt, %17, %21 : vector<24x128xf32>
    %23 = arith.extui %22 : vector<24x128xi1> to vector<24x128xi32>
    %24 = arith.sitofp %23 : vector<24x128xi32> to vector<24x128xf32>
    %25 = arith.truncf %24 : vector<24x128xf32> to vector<24x128xbf16>
    %c0_18 = arith.constant 0 : index
    %c0_19 = arith.constant 0 : index
    %c0_20 = arith.constant 0 : index
    %26 = vector.load %arg6[%c0_18, %c0_19, %c0_20] : memref<1x128x128xbf16, #tpu.memory_space<vmem>>, vector<1x128x128xbf16>
    %27 = vector.shape_cast %26 : vector<1x128x128xbf16> to vector<128x128xbf16>
    %c0_21 = arith.constant 0 : index
    %c0_22 = arith.constant 0 : index
    %c0_23 = arith.constant 0 : index
    %28 = vector.load %arg7[%c0_21, %c0_22, %c0_23] : memref<1x1x128xf32, #tpu.memory_space<vmem>>, vector<1x1x128xf32>
    %29 = vector.shape_cast %28 : vector<1x1x128xf32> to vector<1x128xf32>
    %c0_24 = arith.constant 0 : index
    %c0_25 = arith.constant 0 : index
    %c0_26 = arith.constant 0 : index
    %30 = vector.load %arg8[%c0_24, %c0_25, %c0_26] : memref<1x24x128xf32, #tpu.memory_space<vmem>>, vector<1x24x128xf32>
    %31 = vector.shape_cast %30 : vector<1x24x128xf32> to vector<24x128xf32>
    %cst_27 = arith.constant dense<0.000000e+00> : vector<24x128xf32>
    %32 = tpu.matmul %25, %27, %cst_27 {dimension_numbers = #tpu.dot_dimension_numbers<[1], [0], [0], [1], [0, 0, 1, 1], [], []>} : vector<24x128xbf16>, vector<128x128xbf16>, vector<24x128xf32> -> vector<24x128xf32>
    %33 = vector.broadcast %29 : vector<1x128xf32> to vector<24x128xf32>
    %34 = arith.addf %32, %33 : vector<24x128xf32>
    %cst_28 = arith.constant 2.000000e-01 : f32
    %35 = vector.broadcast %cst_28 : f32 to vector<24x128xf32>
    %36 = arith.cmpf ogt, %31, %35 : vector<24x128xf32>
    %cst_29 = arith.constant 2.000000e-01 : f32
    %37 = vector.broadcast %cst_29 : f32 to vector<24x128xf32>
    %38 = arith.mulf %31, %37 : vector<24x128xf32>
    %cst_30 = arith.constant 0.000000e+00 : f32
    %39 = vector.broadcast %cst_30 : f32 to vector<24x128xf32>
    %40 = arith.select %36, %39, %38 : vector<24x128xi1>, vector<24x128xf32>
    %41 = arith.addf %40, %34 : vector<24x128xf32>
    %c0_31 = arith.constant 0 : index
    %c0_32 = arith.constant 0 : index
    %c0_33 = arith.constant 0 : index
    %42 = vector.load %arg13[%c0_31, %c0_32, %c0_33] : memref<1x24x128xf32, #tpu.memory_space<vmem>>, vector<1x24x128xf32>
    %43 = vector.shape_cast %42 : vector<1x24x128xf32> to vector<24x128xf32>
    %44 = vector.shape_cast %41 : vector<24x128xf32> to vector<1x24x128xf32>
    tpu.vector_store %arg13[%c0_31, %c0_32, %c0_33], %44 {strides = array<i32>} : memref<1x24x128xf32, #tpu.memory_space<vmem>>, vector<1x24x128xf32>,
    %cst_34 = arith.constant 2.000000e-01 : f32
    %45 = vector.broadcast %cst_34 : f32 to vector<24x128xf32>
    %46 = arith.cmpf ogt, %41, %45 : vector<24x128xf32>
    %47 = arith.extui %46 : vector<24x128xi1> to vector<24x128xi32>
    %48 = arith.sitofp %47 : vector<24x128xi32> to vector<24x128xf32>
    %49 = arith.truncf %48 : vector<24x128xf32> to vector<24x128xbf16>
    %c0_35 = arith.constant 0 : index
    %c0_36 = arith.constant 0 : index
    %c0_37 = arith.constant 0 : index
    %50 = vector.load %arg9[%c0_35, %c0_36, %c0_37] : memref<1x128x128xbf16, #tpu.memory_space<vmem>>, vector<1x128x128xbf16>
    %51 = vector.shape_cast %50 : vector<1x128x128xbf16> to vector<128x128xbf16>
    %c0_38 = arith.constant 0 : index
    %c0_39 = arith.constant 0 : index
    %c0_40 = arith.constant 0 : index
    %52 = vector.load %arg10[%c0_38, %c0_39, %c0_40] : memref<1x1x128xf32, #tpu.memory_space<vmem>>, vector<1x1x128xf32>
    %53 = vector.shape_cast %52 : vector<1x1x128xf32> to vector<1x128xf32>
    %c0_41 = arith.constant 0 : index
    %c0_42 = arith.constant 0 : index
    %c0_43 = arith.constant 0 : index
    %54 = vector.load %arg11[%c0_41, %c0_42, %c0_43] : memref<1x24x128xf32, #tpu.memory_space<vmem>>, vector<1x24x128xf32>
    %55 = vector.shape_cast %54 : vector<1x24x128xf32> to vector<24x128xf32>
    %cst_44 = arith.constant dense<0.000000e+00> : vector<24x128xf32>
    %56 = tpu.matmul %49, %51, %cst_44 {dimension_numbers = #tpu.dot_dimension_numbers<[1], [0], [0], [1], [0, 0, 1, 1], [], []>} : vector<24x128xbf16>, vector<128x128xbf16>, vector<24x128xf32> -> vector<24x128xf32>
    %57 = vector.broadcast %53 : vector<1x128xf32> to vector<24x128xf32>
    %58 = arith.addf %56, %57 : vector<24x128xf32>
    %cst_45 = arith.constant 2.000000e-01 : f32
    %59 = vector.broadcast %cst_45 : f32 to vector<24x128xf32>
    %60 = arith.cmpf ogt, %55, %59 : vector<24x128xf32>
    %cst_46 = arith.constant 2.000000e-01 : f32
    %61 = vector.broadcast %cst_46 : f32 to vector<24x128xf32>
    %62 = arith.mulf %55, %61 : vector<24x128xf32>
    %cst_47 = arith.constant 0.000000e+00 : f32
    %63 = vector.broadcast %cst_47 : f32 to vector<24x128xf32>
    %64 = arith.select %60, %63, %62 : vector<24x128xi1>, vector<24x128xf32>
    %65 = arith.addf %64, %58 : vector<24x128xf32>
    %c0_48 = arith.constant 0 : index
    %c0_49 = arith.constant 0 : index
    %c0_50 = arith.constant 0 : index
    %66 = vector.load %arg14[%c0_48, %c0_49, %c0_50] : memref<1x24x128xf32, #tpu.memory_space<vmem>>, vector<1x24x128xf32>
    %67 = vector.shape_cast %66 : vector<1x24x128xf32> to vector<24x128xf32>
    %68 = vector.shape_cast %65 : vector<24x128xf32> to vector<1x24x128xf32>
    tpu.vector_store %arg14[%c0_48, %c0_49, %c0_50], %68 {strides = array<i32>} : memref<1x24x128xf32, #tpu.memory_space<vmem>>, vector<1x24x128xf32>,
    %cst_51 = arith.constant 2.000000e-01 : f32
    %69 = vector.broadcast %cst_51 : f32 to vector<24x128xf32>
    %70 = arith.cmpf ogt, %65, %69 : vector<24x128xf32>
    %71 = arith.extui %70 : vector<24x128xi1> to vector<24x128xi32>
    %72 = arith.sitofp %71 : vector<24x128xi32> to vector<24x128xf32>
    %73 = arith.truncf %72 : vector<24x128xf32> to vector<24x128xbf16>
    %c0_52 = arith.constant 0 : index
    %c0_53 = arith.constant 0 : index
    %c0_54 = arith.constant 0 : index
    %74 = vector.load %arg15[%c0_52, %c0_53, %c0_54] : memref<1x24x128xbf16, #tpu.memory_space<vmem>>, vector<1x24x128xbf16>
    %75 = vector.shape_cast %74 : vector<1x24x128xbf16> to vector<24x128xbf16>
    %76 = vector.shape_cast %73 : vector<24x128xbf16> to vector<1x24x128xbf16>
    tpu.vector_store %arg15[%c0_52, %c0_53, %c0_54], %76 {strides = array<i32>} : memref<1x24x128xbf16, #tpu.memory_space<vmem>>, vector<1x24x128xbf16>,
    return
  }
  func.func @transform_0(%arg0: i32, %arg1: i32) -> (i32, i32, i32) {
    %c0_i32 = arith.constant 0 : i32
    %c0_i32_0 = arith.constant 0 : i32
    return %arg0, %arg1, %c0_i32 : i32, i32, i32
  }
  func.func @transform_1(%arg0: i32, %arg1: i32) -> (i32, i32, i32) {
    %c0_i32 = arith.constant 0 : i32
    %c0_i32_0 = arith.constant 0 : i32
    %c0_i32_1 = arith.constant 0 : i32
    return %arg0, %c0_i32, %c0_i32_0 : i32, i32, i32
  }
  func.func @transform_2(%arg0: i32, %arg1: i32) -> (i32, i32, i32) {
    %c0_i32 = arith.constant 0 : i32
    %c0_i32_0 = arith.constant 0 : i32
    %c0_i32_1 = arith.constant 0 : i32
    return %arg0, %c0_i32, %c0_i32_0 : i32, i32, i32
  }
  func.func @transform_3(%arg0: i32, %arg1: i32) -> (i32, i32, i32) {
    %c0_i32 = arith.constant 0 : i32
    %c0_i32_0 = arith.constant 0 : i32
    return %arg0, %arg1, %c0_i32 : i32, i32, i32
  }
  func.func @transform_4(%arg0: i32, %arg1: i32) -> (i32, i32, i32) {
    %c0_i32 = arith.constant 0 : i32
    %c0_i32_0 = arith.constant 0 : i32
    %c0_i32_1 = arith.constant 0 : i32
    return %arg0, %c0_i32, %c0_i32_0 : i32, i32, i32
  }
  func.func @transform_5(%arg0: i32, %arg1: i32) -> (i32, i32, i32) {
    %c0_i32 = arith.constant 0 : i32
    %c0_i32_0 = arith.constant 0 : i32
    %c0_i32_1 = arith.constant 0 : i32
    return %arg0, %c0_i32, %c0_i32_0 : i32, i32, i32
  }
  func.func @transform_6(%arg0: i32, %arg1: i32) -> (i32, i32, i32) {
    %c0_i32 = arith.constant 0 : i32
    %c0_i32_0 = arith.constant 0 : i32
    return %arg0, %arg1, %c0_i32 : i32, i32, i32
  }
  func.func @transform_7(%arg0: i32, %arg1: i32) -> (i32, i32, i32) {
    %c0_i32 = arith.constant 0 : i32
    %c0_i32_0 = arith.constant 0 : i32
    %c0_i32_1 = arith.constant 0 : i32
    return %arg0, %c0_i32, %c0_i32_0 : i32, i32, i32
  }
  func.func @transform_8(%arg0: i32, %arg1: i32) -> (i32, i32, i32) {
    %c0_i32 = arith.constant 0 : i32
    %c0_i32_0 = arith.constant 0 : i32
    %c0_i32_1 = arith.constant 0 : i32
    return %arg0, %c0_i32, %c0_i32_0 : i32, i32, i32
  }
  func.func @transform_9(%arg0: i32, %arg1: i32) -> (i32, i32, i32) {
    %c0_i32 = arith.constant 0 : i32
    %c0_i32_0 = arith.constant 0 : i32
    return %arg0, %arg1, %c0_i32 : i32, i32, i32
  }
  func.func @transform_10(%arg0: i32, %arg1: i32) -> (i32, i32, i32) {
    %c0_i32 = arith.constant 0 : i32
    %c0_i32_0 = arith.constant 0 : i32
    return %arg0, %arg1, %c0_i32 : i32, i32, i32
  }
  func.func @transform_11(%arg0: i32, %arg1: i32) -> (i32, i32, i32) {
    %c0_i32 = arith.constant 0 : i32
    %c0_i32_0 = arith.constant 0 : i32
    return %arg0, %arg1, %c0_i32 : i32, i32, i32
  }
  func.func @transform_12(%arg0: i32, %arg1: i32) -> (i32, i32, i32) {
    %c0_i32 = arith.constant 0 : i32
    %c0_i32_0 = arith.constant 0 : i32
    return %arg0, %arg1, %c0_i32 : i32, i32, i32
  }
  func.func @transform_13(%arg0: i32, %arg1: i32) -> (i32, i32, i32) {
    %c0_i32 = arith.constant 0 : i32
    %c0_i32_0 = arith.constant 0 : i32
    return %arg0, %arg1, %c0_i32 : i32, i32, i32
  }
}

module attributes {stable_mosaic.version = 11 : i64} {
  func.func @_tail_kernel(%arg0: i32, %arg1: memref<1x2x512xbf16, #tpu.memory_space<vmem>>, %arg2: memref<1x512x128xbf16, #tpu.memory_space<vmem>>, %arg3: memref<1x1x128xf32, #tpu.memory_space<vmem>>, %arg4: memref<1x2x128xf32, #tpu.memory_space<vmem>>, %arg5: memref<1x128x128xbf16, #tpu.memory_space<vmem>>, %arg6: memref<1x1x128xf32, #tpu.memory_space<vmem>>, %arg7: memref<1x2x128xf32, #tpu.memory_space<vmem>>, %arg8: memref<1x128x128xbf16, #tpu.memory_space<vmem>>, %arg9: memref<1x1x128xf32, #tpu.memory_space<vmem>>, %arg10: memref<1x2x128xf32, #tpu.memory_space<vmem>>, %arg11: memref<1x128x384xbf16, #tpu.memory_space<vmem>>, %arg12: memref<1x1x384xf32, #tpu.memory_space<vmem>>, %arg13: memref<1x2x384xf32, #tpu.memory_space<vmem>>, %arg14: memref<1x384x128xbf16, #tpu.memory_space<vmem>>, %arg15: memref<1x128xf32, #tpu.memory_space<vmem>>, %arg16: memref<2x128xf32, #tpu.memory_space<vmem>>, %arg17: memref<128x128xbf16, #tpu.memory_space<vmem>>, %arg18: memref<1x128xf32, #tpu.memory_space<vmem>>, %arg19: memref<2x128xf32, #tpu.memory_space<vmem>>, %arg20: memref<2x128xf32, #tpu.memory_space<vmem>>, %arg21: memref<1x2x128xf32, #tpu.memory_space<vmem>>, %arg22: memref<1x2x128xf32, #tpu.memory_space<vmem>>, %arg23: memref<1x2x128xf32, #tpu.memory_space<vmem>>, %arg24: memref<1x2x384xf32, #tpu.memory_space<vmem>>, %arg25: memref<2x128xf32, #tpu.memory_space<vmem>>, %arg26: memref<2x128xf32, #tpu.memory_space<vmem>>, %arg27: memref<2x128xf32, #tpu.memory_space<vmem>>, %arg28: memref<2x128xf32, #tpu.memory_space<vmem>>) attributes {dimension_semantics = [#tpu.dimension_semantics<arbitrary>], iteration_bounds = array<i64: 8>, scalar_prefetch = 0 : i64, scratch_operands = 1 : i64, tpu.core_type = #tpu.core_type<tc>, window_params = [{transform_indices = @transform_0, window_bounds = array<i64: 1, 2, 512>}, {transform_indices = @transform_1, window_bounds = array<i64: 1, 512, 128>}, {transform_indices = @transform_2, window_bounds = array<i64: 1, 1, 128>}, {transform_indices = @transform_3, window_bounds = array<i64: 1, 2, 128>}, {transform_indices = @transform_4, window_bounds = array<i64: 1, 128, 128>}, {transform_indices = @transform_5, window_bounds = array<i64: 1, 1, 128>}, {transform_indices = @transform_6, window_bounds = array<i64: 1, 2, 128>}, {transform_indices = @transform_7, window_bounds = array<i64: 1, 128, 128>}, {transform_indices = @transform_8, window_bounds = array<i64: 1, 1, 128>}, {transform_indices = @transform_9, window_bounds = array<i64: 1, 2, 128>}, {transform_indices = @transform_10, window_bounds = array<i64: 1, 128, 384>}, {transform_indices = @transform_11, window_bounds = array<i64: 1, 1, 384>}, {transform_indices = @transform_12, window_bounds = array<i64: 1, 2, 384>}, {transform_indices = @transform_13, window_bounds = array<i64: 1, 384, 128>}, {pipeline_mode = #tpu.pipeline_mode<synchronous>, transform_indices = @transform_14, window_bounds = array<i64: 1, 128>}, {pipeline_mode = #tpu.pipeline_mode<synchronous>, transform_indices = @transform_15, window_bounds = array<i64: 2, 128>}, {pipeline_mode = #tpu.pipeline_mode<synchronous>, transform_indices = @transform_16, window_bounds = array<i64: 128, 128>}, {pipeline_mode = #tpu.pipeline_mode<synchronous>, transform_indices = @transform_17, window_bounds = array<i64: 1, 128>}, {pipeline_mode = #tpu.pipeline_mode<synchronous>, transform_indices = @transform_18, window_bounds = array<i64: 2, 128>}, {pipeline_mode = #tpu.pipeline_mode<synchronous>, transform_indices = @transform_19, window_bounds = array<i64: 2, 128>}, {transform_indices = @transform_20, window_bounds = array<i64: 1, 2, 128>}, {transform_indices = @transform_21, window_bounds = array<i64: 1, 2, 128>}, {transform_indices = @transform_22, window_bounds = array<i64: 1, 2, 128>}, {transform_indices = @transform_23, window_bounds = array<i64: 1, 2, 384>}, {pipeline_mode = #tpu.pipeline_mode<synchronous>, transform_indices = @transform_24, window_bounds = array<i64: 2, 128>}, {pipeline_mode = #tpu.pipeline_mode<synchronous>, transform_indices = @transform_25, window_bounds = array<i64: 2, 128>}, {pipeline_mode = #tpu.pipeline_mode<synchronous>, transform_indices = @transform_26, window_bounds = array<i64: 2, 128>}]} {
    %c0_i32 = arith.constant 0 : i32
    %0 = arith.cmpi eq, %arg0, %c0_i32 : i32
    %1 = arith.extui %0 : i1 to i32
    %c0_i32_0 = arith.constant 0 : i32
    %2 = arith.cmpi ne, %1, %c0_i32_0 : i32
    scf.if %2 {
      %cst_79 = arith.constant 0.000000e+00 : f32
      %110 = vector.broadcast %cst_79 : f32 to vector<2x128xf32>
      %c0_80 = arith.constant 0 : index
      %c0_81 = arith.constant 0 : index
      %111 = vector.load %arg28[%c0_80, %c0_81] : memref<2x128xf32, #tpu.memory_space<vmem>>, vector<2x128xf32>
      tpu.vector_store %arg28[%c0_80, %c0_81], %110 {strides = array<i32>} : memref<2x128xf32, #tpu.memory_space<vmem>>, vector<2x128xf32>,
    } else {
    }
    %c0 = arith.constant 0 : index
    %c0_1 = arith.constant 0 : index
    %c0_2 = arith.constant 0 : index
    %3 = vector.load %arg4[%c0, %c0_1, %c0_2] : memref<1x2x128xf32, #tpu.memory_space<vmem>>, vector<1x2x128xf32>
    %4 = vector.shape_cast %3 : vector<1x2x128xf32> to vector<2x128xf32>
    %c0_3 = arith.constant 0 : index
    %c0_4 = arith.constant 0 : index
    %c0_5 = arith.constant 0 : index
    %5 = vector.load %arg1[%c0_3, %c0_4, %c0_5] : memref<1x2x512xbf16, #tpu.memory_space<vmem>>, vector<1x2x512xbf16>
    %6 = vector.shape_cast %5 : vector<1x2x512xbf16> to vector<2x512xbf16>
    %c0_6 = arith.constant 0 : index
    %c0_7 = arith.constant 0 : index
    %c0_8 = arith.constant 0 : index
    %7 = vector.load %arg2[%c0_6, %c0_7, %c0_8] : memref<1x512x128xbf16, #tpu.memory_space<vmem>>, vector<1x512x128xbf16>
    %8 = vector.shape_cast %7 : vector<1x512x128xbf16> to vector<512x128xbf16>
    %cst = arith.constant dense<0.000000e+00> : vector<2x128xf32>
    %9 = tpu.matmul %6, %8, %cst {dimension_numbers = #tpu.dot_dimension_numbers<[1], [0], [0], [1], [0, 0, 1, 1], [], []>} : vector<2x512xbf16>, vector<512x128xbf16>, vector<2x128xf32> -> vector<2x128xf32>
    %c0_9 = arith.constant 0 : index
    %c0_10 = arith.constant 0 : index
    %c0_11 = arith.constant 0 : index
    %10 = vector.load %arg3[%c0_9, %c0_10, %c0_11] : memref<1x1x128xf32, #tpu.memory_space<vmem>>, vector<1x1x128xf32>
    %11 = vector.shape_cast %10 : vector<1x1x128xf32> to vector<1x128xf32>
    %12 = vector.broadcast %11 : vector<1x128xf32> to vector<2x128xf32>
    %13 = arith.addf %9, %12 : vector<2x128xf32>
    %cst_12 = arith.constant 2.000000e-01 : f32
    %14 = vector.broadcast %cst_12 : f32 to vector<2x128xf32>
    %15 = arith.cmpf ogt, %4, %14 : vector<2x128xf32>
    %cst_13 = arith.constant 2.000000e-01 : f32
    %16 = vector.broadcast %cst_13 : f32 to vector<2x128xf32>
    %17 = arith.mulf %4, %16 : vector<2x128xf32>
    %cst_14 = arith.constant 0.000000e+00 : f32
    %18 = vector.broadcast %cst_14 : f32 to vector<2x128xf32>
    %19 = arith.select %15, %18, %17 : vector<2x128xi1>, vector<2x128xf32>
    %20 = arith.addf %19, %13 : vector<2x128xf32>
    %cst_15 = arith.constant 2.000000e-01 : f32
    %21 = vector.broadcast %cst_15 : f32 to vector<2x128xf32>
    %22 = arith.cmpf ogt, %20, %21 : vector<2x128xf32>
    %23 = arith.extui %22 : vector<2x128xi1> to vector<2x128xi32>
    %24 = arith.sitofp %23 : vector<2x128xi32> to vector<2x128xf32>
    %25 = arith.truncf %24 : vector<2x128xf32> to vector<2x128xbf16>
    %c0_16 = arith.constant 0 : index
    %c0_17 = arith.constant 0 : index
    %c0_18 = arith.constant 0 : index
    %26 = vector.load %arg21[%c0_16, %c0_17, %c0_18] : memref<1x2x128xf32, #tpu.memory_space<vmem>>, vector<1x2x128xf32>
    %27 = vector.shape_cast %26 : vector<1x2x128xf32> to vector<2x128xf32>
    %28 = vector.shape_cast %20 : vector<2x128xf32> to vector<1x2x128xf32>
    tpu.vector_store %arg21[%c0_16, %c0_17, %c0_18], %28 {strides = array<i32>} : memref<1x2x128xf32, #tpu.memory_space<vmem>>, vector<1x2x128xf32>,
    %c0_19 = arith.constant 0 : index
    %c0_20 = arith.constant 0 : index
    %c0_21 = arith.constant 0 : index
    %29 = vector.load %arg7[%c0_19, %c0_20, %c0_21] : memref<1x2x128xf32, #tpu.memory_space<vmem>>, vector<1x2x128xf32>
    %30 = vector.shape_cast %29 : vector<1x2x128xf32> to vector<2x128xf32>
    %c0_22 = arith.constant 0 : index
    %c0_23 = arith.constant 0 : index
    %c0_24 = arith.constant 0 : index
    %31 = vector.load %arg5[%c0_22, %c0_23, %c0_24] : memref<1x128x128xbf16, #tpu.memory_space<vmem>>, vector<1x128x128xbf16>
    %32 = vector.shape_cast %31 : vector<1x128x128xbf16> to vector<128x128xbf16>
    %cst_25 = arith.constant dense<0.000000e+00> : vector<2x128xf32>
    %33 = tpu.matmul %25, %32, %cst_25 {dimension_numbers = #tpu.dot_dimension_numbers<[1], [0], [0], [1], [0, 0, 1, 1], [], []>} : vector<2x128xbf16>, vector<128x128xbf16>, vector<2x128xf32> -> vector<2x128xf32>
    %c0_26 = arith.constant 0 : index
    %c0_27 = arith.constant 0 : index
    %c0_28 = arith.constant 0 : index
    %34 = vector.load %arg6[%c0_26, %c0_27, %c0_28] : memref<1x1x128xf32, #tpu.memory_space<vmem>>, vector<1x1x128xf32>
    %35 = vector.shape_cast %34 : vector<1x1x128xf32> to vector<1x128xf32>
    %36 = vector.broadcast %35 : vector<1x128xf32> to vector<2x128xf32>
    %37 = arith.addf %33, %36 : vector<2x128xf32>
    %cst_29 = arith.constant 2.000000e-01 : f32
    %38 = vector.broadcast %cst_29 : f32 to vector<2x128xf32>
    %39 = arith.cmpf ogt, %30, %38 : vector<2x128xf32>
    %cst_30 = arith.constant 2.000000e-01 : f32
    %40 = vector.broadcast %cst_30 : f32 to vector<2x128xf32>
    %41 = arith.mulf %30, %40 : vector<2x128xf32>
    %cst_31 = arith.constant 0.000000e+00 : f32
    %42 = vector.broadcast %cst_31 : f32 to vector<2x128xf32>
    %43 = arith.select %39, %42, %41 : vector<2x128xi1>, vector<2x128xf32>
    %44 = arith.addf %43, %37 : vector<2x128xf32>
    %cst_32 = arith.constant 2.000000e-01 : f32
    %45 = vector.broadcast %cst_32 : f32 to vector<2x128xf32>
    %46 = arith.cmpf ogt, %44, %45 : vector<2x128xf32>
    %47 = arith.extui %46 : vector<2x128xi1> to vector<2x128xi32>
    %48 = arith.sitofp %47 : vector<2x128xi32> to vector<2x128xf32>
    %49 = arith.truncf %48 : vector<2x128xf32> to vector<2x128xbf16>
    %c0_33 = arith.constant 0 : index
    %c0_34 = arith.constant 0 : index
    %c0_35 = arith.constant 0 : index
    %50 = vector.load %arg22[%c0_33, %c0_34, %c0_35] : memref<1x2x128xf32, #tpu.memory_space<vmem>>, vector<1x2x128xf32>
    %51 = vector.shape_cast %50 : vector<1x2x128xf32> to vector<2x128xf32>
    %52 = vector.shape_cast %44 : vector<2x128xf32> to vector<1x2x128xf32>
    tpu.vector_store %arg22[%c0_33, %c0_34, %c0_35], %52 {strides = array<i32>} : memref<1x2x128xf32, #tpu.memory_space<vmem>>, vector<1x2x128xf32>,
    %c0_36 = arith.constant 0 : index
    %c0_37 = arith.constant 0 : index
    %c0_38 = arith.constant 0 : index
    %53 = vector.load %arg10[%c0_36, %c0_37, %c0_38] : memref<1x2x128xf32, #tpu.memory_space<vmem>>, vector<1x2x128xf32>
    %54 = vector.shape_cast %53 : vector<1x2x128xf32> to vector<2x128xf32>
    %c0_39 = arith.constant 0 : index
    %c0_40 = arith.constant 0 : index
    %c0_41 = arith.constant 0 : index
    %55 = vector.load %arg8[%c0_39, %c0_40, %c0_41] : memref<1x128x128xbf16, #tpu.memory_space<vmem>>, vector<1x128x128xbf16>
    %56 = vector.shape_cast %55 : vector<1x128x128xbf16> to vector<128x128xbf16>
    %cst_42 = arith.constant dense<0.000000e+00> : vector<2x128xf32>
    %57 = tpu.matmul %49, %56, %cst_42 {dimension_numbers = #tpu.dot_dimension_numbers<[1], [0], [0], [1], [0, 0, 1, 1], [], []>} : vector<2x128xbf16>, vector<128x128xbf16>, vector<2x128xf32> -> vector<2x128xf32>
    %c0_43 = arith.constant 0 : index
    %c0_44 = arith.constant 0 : index
    %c0_45 = arith.constant 0 : index
    %58 = vector.load %arg9[%c0_43, %c0_44, %c0_45] : memref<1x1x128xf32, #tpu.memory_space<vmem>>, vector<1x1x128xf32>
    %59 = vector.shape_cast %58 : vector<1x1x128xf32> to vector<1x128xf32>
    %60 = vector.broadcast %59 : vector<1x128xf32> to vector<2x128xf32>
    %61 = arith.addf %57, %60 : vector<2x128xf32>
    %cst_46 = arith.constant 2.000000e-01 : f32
    %62 = vector.broadcast %cst_46 : f32 to vector<2x128xf32>
    %63 = arith.cmpf ogt, %54, %62 : vector<2x128xf32>
    %cst_47 = arith.constant 2.000000e-01 : f32
    %64 = vector.broadcast %cst_47 : f32 to vector<2x128xf32>
    %65 = arith.mulf %54, %64 : vector<2x128xf32>
    %cst_48 = arith.constant 0.000000e+00 : f32
    %66 = vector.broadcast %cst_48 : f32 to vector<2x128xf32>
    %67 = arith.select %63, %66, %65 : vector<2x128xi1>, vector<2x128xf32>
    %68 = arith.addf %67, %61 : vector<2x128xf32>
    %cst_49 = arith.constant 2.000000e-01 : f32
    %69 = vector.broadcast %cst_49 : f32 to vector<2x128xf32>
    %70 = arith.cmpf ogt, %68, %69 : vector<2x128xf32>
    %71 = arith.extui %70 : vector<2x128xi1> to vector<2x128xi32>
    %72 = arith.sitofp %71 : vector<2x128xi32> to vector<2x128xf32>
    %73 = arith.truncf %72 : vector<2x128xf32> to vector<2x128xbf16>
    %c0_50 = arith.constant 0 : index
    %c0_51 = arith.constant 0 : index
    %c0_52 = arith.constant 0 : index
    %74 = vector.load %arg23[%c0_50, %c0_51, %c0_52] : memref<1x2x128xf32, #tpu.memory_space<vmem>>, vector<1x2x128xf32>
    %75 = vector.shape_cast %74 : vector<1x2x128xf32> to vector<2x128xf32>
    %76 = vector.shape_cast %68 : vector<2x128xf32> to vector<1x2x128xf32>
    tpu.vector_store %arg23[%c0_50, %c0_51, %c0_52], %76 {strides = array<i32>} : memref<1x2x128xf32, #tpu.memory_space<vmem>>, vector<1x2x128xf32>,
    %c0_53 = arith.constant 0 : index
    %c0_54 = arith.constant 0 : index
    %c0_55 = arith.constant 0 : index
    %77 = vector.load %arg13[%c0_53, %c0_54, %c0_55] : memref<1x2x384xf32, #tpu.memory_space<vmem>>, vector<1x2x384xf32>
    %78 = vector.shape_cast %77 : vector<1x2x384xf32> to vector<2x384xf32>
    %c0_56 = arith.constant 0 : index
    %c0_57 = arith.constant 0 : index
    %c0_58 = arith.constant 0 : index
    %79 = vector.load %arg11[%c0_56, %c0_57, %c0_58] : memref<1x128x384xbf16, #tpu.memory_space<vmem>>, vector<1x128x384xbf16>
    %80 = vector.shape_cast %79 : vector<1x128x384xbf16> to vector<128x384xbf16>
    %cst_59 = arith.constant dense<0.000000e+00> : vector<2x384xf32>
    %81 = tpu.matmul %73, %80, %cst_59 {dimension_numbers = #tpu.dot_dimension_numbers<[1], [0], [0], [1], [0, 0, 1, 1], [], []>} : vector<2x128xbf16>, vector<128x384xbf16>, vector<2x384xf32> -> vector<2x384xf32>
    %c0_60 = arith.constant 0 : index
    %c0_61 = arith.constant 0 : index
    %c0_62 = arith.constant 0 : index
    %82 = vector.load %arg12[%c0_60, %c0_61, %c0_62] : memref<1x1x384xf32, #tpu.memory_space<vmem>>, vector<1x1x384xf32>
    %83 = vector.shape_cast %82 : vector<1x1x384xf32> to vector<1x384xf32>
    %84 = vector.broadcast %83 : vector<1x384xf32> to vector<2x384xf32>
    %85 = arith.addf %81, %84 : vector<2x384xf32>
    %cst_63 = arith.constant 2.000000e-01 : f32
    %86 = vector.broadcast %cst_63 : f32 to vector<2x384xf32>
    %87 = arith.cmpf ogt, %78, %86 : vector<2x384xf32>
    %cst_64 = arith.constant 2.000000e-01 : f32
    %88 = vector.broadcast %cst_64 : f32 to vector<2x384xf32>
    %89 = arith.mulf %78, %88 : vector<2x384xf32>
    %cst_65 = arith.constant 0.000000e+00 : f32
    %90 = vector.broadcast %cst_65 : f32 to vector<2x384xf32>
    %91 = arith.select %87, %90, %89 : vector<2x384xi1>, vector<2x384xf32>
    %92 = arith.addf %91, %85 : vector<2x384xf32>
    %cst_66 = arith.constant 2.000000e-01 : f32
    %93 = vector.broadcast %cst_66 : f32 to vector<2x384xf32>
    %94 = arith.cmpf ogt, %92, %93 : vector<2x384xf32>
    %95 = arith.extui %94 : vector<2x384xi1> to vector<2x384xi32>
    %96 = arith.sitofp %95 : vector<2x384xi32> to vector<2x384xf32>
    %97 = arith.truncf %96 : vector<2x384xf32> to vector<2x384xbf16>
    %c0_67 = arith.constant 0 : index
    %c0_68 = arith.constant 0 : index
    %c0_69 = arith.constant 0 : index
    %98 = vector.load %arg24[%c0_67, %c0_68, %c0_69] : memref<1x2x384xf32, #tpu.memory_space<vmem>>, vector<1x2x384xf32>
    %99 = vector.shape_cast %98 : vector<1x2x384xf32> to vector<2x384xf32>
    %100 = vector.shape_cast %92 : vector<2x384xf32> to vector<1x2x384xf32>
    tpu.vector_store %arg24[%c0_67, %c0_68, %c0_69], %100 {strides = array<i32>} : memref<1x2x384xf32, #tpu.memory_space<vmem>>, vector<1x2x384xf32>,
    %c0_70 = arith.constant 0 : index
    %c0_71 = arith.constant 0 : index
    %101 = vector.load %arg28[%c0_70, %c0_71] : memref<2x128xf32, #tpu.memory_space<vmem>>, vector<2x128xf32>
    %c0_72 = arith.constant 0 : index
    %c0_73 = arith.constant 0 : index
    %c0_74 = arith.constant 0 : index
    %102 = vector.load %arg14[%c0_72, %c0_73, %c0_74] : memref<1x384x128xbf16, #tpu.memory_space<vmem>>, vector<1x384x128xbf16>
    %103 = vector.shape_cast %102 : vector<1x384x128xbf16> to vector<384x128xbf16>
    %cst_75 = arith.constant dense<0.000000e+00> : vector<2x128xf32>
    %104 = tpu.matmul %97, %103, %cst_75 {dimension_numbers = #tpu.dot_dimension_numbers<[1], [0], [0], [1], [0, 0, 1, 1], [], []>} : vector<2x384xbf16>, vector<384x128xbf16>, vector<2x128xf32> -> vector<2x128xf32>
    %105 = arith.addf %101, %104 : vector<2x128xf32>
    %c0_76 = arith.constant 0 : index
    %c0_77 = arith.constant 0 : index
    %106 = vector.load %arg28[%c0_76, %c0_77] : memref<2x128xf32, #tpu.memory_space<vmem>>, vector<2x128xf32>
    tpu.vector_store %arg28[%c0_76, %c0_77], %105 {strides = array<i32>} : memref<2x128xf32, #tpu.memory_space<vmem>>, vector<2x128xf32>,
    %c7_i32 = arith.constant 7 : i32
    %107 = arith.cmpi eq, %arg0, %c7_i32 : i32
    %108 = arith.extui %107 : i1 to i32
    %c0_i32_78 = arith.constant 0 : i32
    %109 = arith.cmpi ne, %108, %c0_i32_78 : i32
    scf.if %109 {
      %c0_79 = arith.constant 0 : index
      %c0_80 = arith.constant 0 : index
      %110 = vector.load %arg16[%c0_79, %c0_80] : memref<2x128xf32, #tpu.memory_space<vmem>>, vector<2x128xf32>
      %c0_81 = arith.constant 0 : index
      %c0_82 = arith.constant 0 : index
      %111 = vector.load %arg28[%c0_81, %c0_82] : memref<2x128xf32, #tpu.memory_space<vmem>>, vector<2x128xf32>
      %c0_83 = arith.constant 0 : index
      %c0_84 = arith.constant 0 : index
      %112 = vector.load %arg15[%c0_83, %c0_84] : memref<1x128xf32, #tpu.memory_space<vmem>>, vector<1x128xf32>
      %113 = vector.broadcast %112 : vector<1x128xf32> to vector<2x128xf32>
      %114 = arith.addf %111, %113 : vector<2x128xf32>
      %cst_85 = arith.constant 2.000000e-01 : f32
      %115 = vector.broadcast %cst_85 : f32 to vector<2x128xf32>
      %116 = arith.cmpf ogt, %110, %115 : vector<2x128xf32>
      %cst_86 = arith.constant 2.000000e-01 : f32
      %117 = vector.broadcast %cst_86 : f32 to vector<2x128xf32>
      %118 = arith.mulf %110, %117 : vector<2x128xf32>
      %cst_87 = arith.constant 0.000000e+00 : f32
      %119 = vector.broadcast %cst_87 : f32 to vector<2x128xf32>
      %120 = arith.select %116, %119, %118 : vector<2x128xi1>, vector<2x128xf32>
      %121 = arith.addf %120, %114 : vector<2x128xf32>
      %cst_88 = arith.constant 2.000000e-01 : f32
      %122 = vector.broadcast %cst_88 : f32 to vector<2x128xf32>
      %123 = arith.cmpf ogt, %121, %122 : vector<2x128xf32>
      %124 = arith.extui %123 : vector<2x128xi1> to vector<2x128xi32>
      %125 = arith.sitofp %124 : vector<2x128xi32> to vector<2x128xf32>
      %126 = arith.truncf %125 : vector<2x128xf32> to vector<2x128xbf16>
      %c0_89 = arith.constant 0 : index
      %c0_90 = arith.constant 0 : index
      %127 = vector.load %arg25[%c0_89, %c0_90] : memref<2x128xf32, #tpu.memory_space<vmem>>, vector<2x128xf32>
      tpu.vector_store %arg25[%c0_89, %c0_90], %121 {strides = array<i32>} : memref<2x128xf32, #tpu.memory_space<vmem>>, vector<2x128xf32>,
      %c0_91 = arith.constant 0 : index
      %c0_92 = arith.constant 0 : index
      %128 = vector.load %arg17[%c0_91, %c0_92] : memref<128x128xbf16, #tpu.memory_space<vmem>>, vector<128x128xbf16>
      %cst_93 = arith.constant dense<0.000000e+00> : vector<2x128xf32>
      %129 = tpu.matmul %126, %128, %cst_93 {dimension_numbers = #tpu.dot_dimension_numbers<[1], [0], [0], [1], [0, 0, 1, 1], [], []>} : vector<2x128xbf16>, vector<128x128xbf16>, vector<2x128xf32> -> vector<2x128xf32>
      %c0_94 = arith.constant 0 : index
      %c0_95 = arith.constant 0 : index
      %130 = vector.load %arg18[%c0_94, %c0_95] : memref<1x128xf32, #tpu.memory_space<vmem>>, vector<1x128xf32>
      %131 = vector.broadcast %130 : vector<1x128xf32> to vector<2x128xf32>
      %132 = arith.addf %129, %131 : vector<2x128xf32>
      %c0_96 = arith.constant 0 : index
      %c0_97 = arith.constant 0 : index
      %133 = vector.load %arg19[%c0_96, %c0_97] : memref<2x128xf32, #tpu.memory_space<vmem>>, vector<2x128xf32>
      %cst_98 = arith.constant 2.000000e-01 : f32
      %134 = vector.broadcast %cst_98 : f32 to vector<2x128xf32>
      %135 = arith.cmpf ogt, %133, %134 : vector<2x128xf32>
      %cst_99 = arith.constant 2.000000e-01 : f32
      %136 = vector.broadcast %cst_99 : f32 to vector<2x128xf32>
      %137 = arith.mulf %133, %136 : vector<2x128xf32>
      %cst_100 = arith.constant 0.000000e+00 : f32
      %138 = vector.broadcast %cst_100 : f32 to vector<2x128xf32>
      %139 = arith.select %135, %138, %137 : vector<2x128xi1>, vector<2x128xf32>
      %140 = arith.addf %139, %132 : vector<2x128xf32>
      %cst_101 = arith.constant 2.000000e-01 : f32
      %141 = vector.broadcast %cst_101 : f32 to vector<2x128xf32>
      %142 = arith.cmpf ogt, %140, %141 : vector<2x128xf32>
      %143 = arith.extui %142 : vector<2x128xi1> to vector<2x128xi32>
      %144 = arith.sitofp %143 : vector<2x128xi32> to vector<2x128xf32>
      %145 = arith.truncf %144 : vector<2x128xf32> to vector<2x128xbf16>
      %c0_102 = arith.constant 0 : index
      %c0_103 = arith.constant 0 : index
      %146 = vector.load %arg26[%c0_102, %c0_103] : memref<2x128xf32, #tpu.memory_space<vmem>>, vector<2x128xf32>
      tpu.vector_store %arg26[%c0_102, %c0_103], %140 {strides = array<i32>} : memref<2x128xf32, #tpu.memory_space<vmem>>, vector<2x128xf32>,
      %c0_104 = arith.constant 0 : index
      %c0_105 = arith.constant 0 : index
      %147 = vector.load %arg20[%c0_104, %c0_105] : memref<2x128xf32, #tpu.memory_space<vmem>>, vector<2x128xf32>
      %148 = arith.extf %145 : vector<2x128xbf16> to vector<2x128xf32>
      %149 = arith.addf %147, %148 : vector<2x128xf32>
      %c0_106 = arith.constant 0 : index
      %c0_107 = arith.constant 0 : index
      %150 = vector.load %arg27[%c0_106, %c0_107] : memref<2x128xf32, #tpu.memory_space<vmem>>, vector<2x128xf32>
      tpu.vector_store %arg27[%c0_106, %c0_107], %149 {strides = array<i32>} : memref<2x128xf32, #tpu.memory_space<vmem>>, vector<2x128xf32>,
    } else {
    }
    return
  }
  func.func @transform_0(%arg0: i32) -> (i32, i32, i32) {
    %c0_i32 = arith.constant 0 : i32
    %c0_i32_0 = arith.constant 0 : i32
    %c0_i32_1 = arith.constant 0 : i32
    return %arg0, %c0_i32, %c0_i32_0 : i32, i32, i32
  }
  func.func @transform_1(%arg0: i32) -> (i32, i32, i32) {
    %c0_i32 = arith.constant 0 : i32
    %c0_i32_0 = arith.constant 0 : i32
    %c0_i32_1 = arith.constant 0 : i32
    return %arg0, %c0_i32, %c0_i32_0 : i32, i32, i32
  }
  func.func @transform_2(%arg0: i32) -> (i32, i32, i32) {
    %c0_i32 = arith.constant 0 : i32
    %c0_i32_0 = arith.constant 0 : i32
    %c0_i32_1 = arith.constant 0 : i32
    return %arg0, %c0_i32, %c0_i32_0 : i32, i32, i32
  }
  func.func @transform_3(%arg0: i32) -> (i32, i32, i32) {
    %c0_i32 = arith.constant 0 : i32
    %c0_i32_0 = arith.constant 0 : i32
    %c0_i32_1 = arith.constant 0 : i32
    return %arg0, %c0_i32, %c0_i32_0 : i32, i32, i32
  }
  func.func @transform_4(%arg0: i32) -> (i32, i32, i32) {
    %c0_i32 = arith.constant 0 : i32
    %c0_i32_0 = arith.constant 0 : i32
    %c0_i32_1 = arith.constant 0 : i32
    return %arg0, %c0_i32, %c0_i32_0 : i32, i32, i32
  }
  func.func @transform_5(%arg0: i32) -> (i32, i32, i32) {
    %c0_i32 = arith.constant 0 : i32
    %c0_i32_0 = arith.constant 0 : i32
    %c0_i32_1 = arith.constant 0 : i32
    return %arg0, %c0_i32, %c0_i32_0 : i32, i32, i32
  }
  func.func @transform_6(%arg0: i32) -> (i32, i32, i32) {
    %c0_i32 = arith.constant 0 : i32
    %c0_i32_0 = arith.constant 0 : i32
    %c0_i32_1 = arith.constant 0 : i32
    return %arg0, %c0_i32, %c0_i32_0 : i32, i32, i32
  }
  func.func @transform_7(%arg0: i32) -> (i32, i32, i32) {
    %c0_i32 = arith.constant 0 : i32
    %c0_i32_0 = arith.constant 0 : i32
    %c0_i32_1 = arith.constant 0 : i32
    return %arg0, %c0_i32, %c0_i32_0 : i32, i32, i32
  }
  func.func @transform_8(%arg0: i32) -> (i32, i32, i32) {
    %c0_i32 = arith.constant 0 : i32
    %c0_i32_0 = arith.constant 0 : i32
    %c0_i32_1 = arith.constant 0 : i32
    return %arg0, %c0_i32, %c0_i32_0 : i32, i32, i32
  }
  func.func @transform_9(%arg0: i32) -> (i32, i32, i32) {
    %c0_i32 = arith.constant 0 : i32
    %c0_i32_0 = arith.constant 0 : i32
    %c0_i32_1 = arith.constant 0 : i32
    return %arg0, %c0_i32, %c0_i32_0 : i32, i32, i32
  }
  func.func @transform_10(%arg0: i32) -> (i32, i32, i32) {
    %c0_i32 = arith.constant 0 : i32
    %c0_i32_0 = arith.constant 0 : i32
    %c0_i32_1 = arith.constant 0 : i32
    return %arg0, %c0_i32, %c0_i32_0 : i32, i32, i32
  }
  func.func @transform_11(%arg0: i32) -> (i32, i32, i32) {
    %c0_i32 = arith.constant 0 : i32
    %c0_i32_0 = arith.constant 0 : i32
    %c0_i32_1 = arith.constant 0 : i32
    return %arg0, %c0_i32, %c0_i32_0 : i32, i32, i32
  }
  func.func @transform_12(%arg0: i32) -> (i32, i32, i32) {
    %c0_i32 = arith.constant 0 : i32
    %c0_i32_0 = arith.constant 0 : i32
    %c0_i32_1 = arith.constant 0 : i32
    return %arg0, %c0_i32, %c0_i32_0 : i32, i32, i32
  }
  func.func @transform_13(%arg0: i32) -> (i32, i32, i32) {
    %c0_i32 = arith.constant 0 : i32
    %c0_i32_0 = arith.constant 0 : i32
    %c0_i32_1 = arith.constant 0 : i32
    return %arg0, %c0_i32, %c0_i32_0 : i32, i32, i32
  }
  func.func @transform_14(%arg0: i32) -> (i32, i32) {
    %c0_i32 = arith.constant 0 : i32
    %c0_i32_0 = arith.constant 0 : i32
    %c0_i32_1 = arith.constant 0 : i32
    return %c0_i32, %c0_i32_0 : i32, i32
  }
  func.func @transform_15(%arg0: i32) -> (i32, i32) {
    %c0_i32 = arith.constant 0 : i32
    %c0_i32_0 = arith.constant 0 : i32
    %c0_i32_1 = arith.constant 0 : i32
    return %c0_i32, %c0_i32_0 : i32, i32
  }
  func.func @transform_16(%arg0: i32) -> (i32, i32) {
    %c0_i32 = arith.constant 0 : i32
    %c0_i32_0 = arith.constant 0 : i32
    %c0_i32_1 = arith.constant 0 : i32
    return %c0_i32, %c0_i32_0 : i32, i32
  }
  func.func @transform_17(%arg0: i32) -> (i32, i32) {
    %c0_i32 = arith.constant 0 : i32
    %c0_i32_0 = arith.constant 0 : i32
    %c0_i32_1 = arith.constant 0 : i32
    return %c0_i32, %c0_i32_0 : i32, i32
  }
  func.func @transform_18(%arg0: i32) -> (i32, i32) {
    %c0_i32 = arith.constant 0 : i32
    %c0_i32_0 = arith.constant 0 : i32
    %c0_i32_1 = arith.constant 0 : i32
    return %c0_i32, %c0_i32_0 : i32, i32
  }
  func.func @transform_19(%arg0: i32) -> (i32, i32) {
    %c0_i32 = arith.constant 0 : i32
    %c0_i32_0 = arith.constant 0 : i32
    %c0_i32_1 = arith.constant 0 : i32
    return %c0_i32, %c0_i32_0 : i32, i32
  }
  func.func @transform_20(%arg0: i32) -> (i32, i32, i32) {
    %c0_i32 = arith.constant 0 : i32
    %c0_i32_0 = arith.constant 0 : i32
    %c0_i32_1 = arith.constant 0 : i32
    return %arg0, %c0_i32, %c0_i32_0 : i32, i32, i32
  }
  func.func @transform_21(%arg0: i32) -> (i32, i32, i32) {
    %c0_i32 = arith.constant 0 : i32
    %c0_i32_0 = arith.constant 0 : i32
    %c0_i32_1 = arith.constant 0 : i32
    return %arg0, %c0_i32, %c0_i32_0 : i32, i32, i32
  }
  func.func @transform_22(%arg0: i32) -> (i32, i32, i32) {
    %c0_i32 = arith.constant 0 : i32
    %c0_i32_0 = arith.constant 0 : i32
    %c0_i32_1 = arith.constant 0 : i32
    return %arg0, %c0_i32, %c0_i32_0 : i32, i32, i32
  }
  func.func @transform_23(%arg0: i32) -> (i32, i32, i32) {
    %c0_i32 = arith.constant 0 : i32
    %c0_i32_0 = arith.constant 0 : i32
    %c0_i32_1 = arith.constant 0 : i32
    return %arg0, %c0_i32, %c0_i32_0 : i32, i32, i32
  }
  func.func @transform_24(%arg0: i32) -> (i32, i32) {
    %c0_i32 = arith.constant 0 : i32
    %c0_i32_0 = arith.constant 0 : i32
    %c0_i32_1 = arith.constant 0 : i32
    return %c0_i32, %c0_i32_0 : i32, i32
  }
  func.func @transform_25(%arg0: i32) -> (i32, i32) {
    %c0_i32 = arith.constant 0 : i32
    %c0_i32_0 = arith.constant 0 : i32
    %c0_i32_1 = arith.constant 0 : i32
    return %c0_i32, %c0_i32_0 : i32, i32
  }
  func.func @transform_26(%arg0: i32) -> (i32, i32) {
    %c0_i32 = arith.constant 0 : i32
    %c0_i32_0 = arith.constant 0 : i32
    %c0_i32_1 = arith.constant 0 : i32
    return %c0_i32, %c0_i32_0 : i32, i32
  }
}

</mosaic_0001>

<bundles_post_ra>
// kernel: closed_call.129
= control target key start
LH: loop header
LB: loop body
LE: loop exit
PB: predicated region body
PF: predicated region fallthrough
CT: control target
= control target key end

     0   :  { %s2280_s18 = smov 0   ;;  %s2282_s19 = smov 0   ;;  %s3055_s0 = inlined_call_operand.vmem [shape: bf16[1,2048,56], index: 0, kind: input, shape index: {}]   ;;  %s3056_s1 = inlined_call_operand.vmem [shape: bf16[1,56,128], index: 1, kind: input, shape index: {}]   ;;  %s3057_s2 = inlined_call_operand.vmem [shape: f32[1,1,128], index: 2, kind: input, shape index: {}]   ;;  %s3058_s3 = inlined_call_operand.vmem [shape: f32[1,2048,128], index: 3, kind: input, shape index: {}, may-alias: {3,4}]   ;;  %s3059_s4 = inlined_call_operand.vmem [shape: f32[1,2048,128], index: 4, kind: output, shape index: {0}, may-alias: {3,4}]   ;;  %s3060_s5 = inlined_call_operand.vmem [shape: bf16[1,2048,128], index: 5, kind: output, shape index: {1}]  }
   0x1   :  { %s2284_s20 = smov 0  }
   0x2 LB: > { %s25_s21 = sadd.s32 1, %s2243_s19  ;;  %p1777_p0 = scmp.ge.s32.totalorder %s2247_s20, 1  ;;  %s2247_s20 = sphi %s2284_s20, %s16_s20   ;;  %s2243_s19 = sphi %s2282_s19, %s3110_s19   ;;  %s2239_s18 = sphi %s2280_s18, %s3109_s18  }
   0x3   : > { %p26_p1 = scmp.ge.s32.totalorder %s25_s21, 4  ;;  %p248_p2 = scmp.lt.s32.totalorder %s2247_s20, 5 }
   0x5   : > { %s3112_s21 = smov (%p26_p1, %s25_s21), 0  ;;  %p249_p3 = pnand %p1777_p0, %p248_p2 }
   0x7   : > { %252 = sbr.rel (%p249_p3) target bundleno = 296 (0x128), region = 36 }
   0xc   : > { %v429_v0 = vld [vmem:[%s3056_s1 + $0x18] sm:$0xf]  ;;  %s1778_s24 = sshll.u32 %s2239_s18, 6  ;;  %vm776_vm0 = vcmask 1043456   ;;  %v2058_v4 = vld [vmem:[%s3056_s1 + $0x10] sm:$0xff]  ;;  %v2057_v5 = vld [vmem:[%s3056_s1 + $0x8] sm:$0xff] }
   0xd   : > { %v671_v1 = vunpack.c.l.b16 %v429_v0  ;;  %p313_p4 = scmp.lt.s32.totalorder %s1778_s24, 255  ;;  %v2056_v6 = vld [vmem:[%s3056_s1] sm:$0xff]  ;;  %vm679_vm1 = vcmask 457728  }
   0xe   : > { %v2397_v43 = vld [vmem:[%s3057_s2] ss:$0 sm:$0xff] }
   0xf   : > { %v675_v2 = vpack.c.b16 %v671_v1, %v671_v1  ;;  %s3114_s24 = smov (!%p313_p4, %s1778_s24), 255 }
  0x10   : > { %s1779_s29 = sshll.u32 %s3114_s24, 2  ;;  %s1781_s10 = sshll.u32 %s3114_s24, 3 }
  0x11   : > { %v778_v3 = vsel %vm776_vm0, %v675_v2, 0  ;;  %s2318_s9 = scalar_lea.vmem %s3055_s0, %s1779_s29  ;;  %s2390_s13 = scalar_lea.vmem %s3058_s3, %s1781_s10 }
  0x12   : > { %784 = vmatpush.bf16.msra.mxu0 %v778_v3  ;;  %2186 = vmatpush.bf16.msra.mxu1 %v778_v3  ;;  %v2024_v7 = vld [vmem:[%s2318_s9] sm:$0xff]  ;;  %v2025_v11 = vld [vmem:[%s2318_s9 + $0x8] sm:$0xff]  ;;  %v2026_v15 = vld [vmem:[%s2318_s9 + $0x10] sm:$0xff]  ;;  %s2574_s18 = scalar_lea.vmem %s3059_s4, %s1781_s10  ;;  %s2623_s25 = scalar_lea.vmem %s3060_s5, %s1779_s29 }
  0x13   : > { %2187 = vmatpush.bf16.msra.mxu2 %v778_v3  ;;  %2188 = vmatpush.bf16.msra.mxu3 %v778_v3  ;;  %v2032_v8 = vld [vmem:[%s2318_s9 + $0x40] sm:$0xff]  ;;  %v2033_v12 = vld [vmem:[%s2318_s9 + $0x48] sm:$0xff]  ;;  %v2034_v16 = vld [vmem:[%s2318_s9 + $0x50] sm:$0xff] }
  0x14   : > { %v2040_v9 = vld [vmem:[%s2318_s9 + $0x80] sm:$0xff]  ;;  %v2041_v13 = vld [vmem:[%s2318_s9 + $0x88] sm:$0xff]  ;;  %v2042_v17 = vld [vmem:[%s2318_s9 + $0x90] sm:$0xff] }
  0x15   : > { %v2048_v10 = vld [vmem:[%s2318_s9 + $0xc0] sm:$0xff]  ;;  %v2049_v14 = vld [vmem:[%s2318_s9 + $0xc8] sm:$0xff]  ;;  %v2050_v18 = vld [vmem:[%s2318_s9 + $0xd0] sm:$0xff] }
  0x16   : > { %785 = vmatpush.bf16.msra.mxu0 %v2058_v4  ;;  %2189 = vmatpush.bf16.msra.mxu1 %v2058_v4  ;;  %v2027_v19 = vld [vmem:[%s2318_s9 + $0x18] sm:$0xff]  ;;  %v2028_v23 = vld [vmem:[%s2318_s9 + $0x20] sm:$0xff]  ;;  %v2029_v27 = vld [vmem:[%s2318_s9 + $0x28] sm:$0xff] }
  0x17   : > { %2190 = vmatpush.bf16.msra.mxu2 %v2058_v4  ;;  %2191 = vmatpush.bf16.msra.mxu3 %v2058_v4  ;;  %v2035_v20 = vld [vmem:[%s2318_s9 + $0x58] sm:$0xff]  ;;  %v2036_v24 = vld [vmem:[%s2318_s9 + $0x60] sm:$0xff]  ;;  %v2037_v28 = vld [vmem:[%s2318_s9 + $0x68] sm:$0xff] }
  0x18   : > { %v2043_v21 = vld [vmem:[%s2318_s9 + $0x98] sm:$0xff]  ;;  %v2044_v25 = vld [vmem:[%s2318_s9 + $0xa0] sm:$0xff]  ;;  %v2045_v29 = vld [vmem:[%s2318_s9 + $0xa8] sm:$0xff] }
  0x19   : > { %v2051_v22 = vld [vmem:[%s2318_s9 + $0xd8] sm:$0xff]  ;;  %v2052_v26 = vld [vmem:[%s2318_s9 + $0xe0] sm:$0xff]  ;;  %v2053_v30 = vld [vmem:[%s2318_s9 + $0xe8] sm:$0xff] }
  0x1a   : > { %786 = vmatpush.bf16.msra.mxu0 %v2057_v5  ;;  %2192 = vmatpush.bf16.msra.mxu1 %v2057_v5  ;;  %v2030_v31 = vld [vmem:[%s2318_s9 + $0x30] sm:$0xff]  ;;  %v2031_v35 = vld [vmem:[%s2318_s9 + $0x38] sm:$0xff]  ;;  %v431_v39 = vld [vmem:[%s2390_s13] sm:$0xff] }
  0x1b   : > { %2193 = vmatpush.bf16.msra.mxu2 %v2057_v5  ;;  %2194 = vmatpush.bf16.msra.mxu3 %v2057_v5  ;;  %v2038_v32 = vld [vmem:[%s2318_s9 + $0x70] sm:$0xff]  ;;  %v2039_v36 = vld [vmem:[%s2318_s9 + $0x78] sm:$0xff]  ;;  %v447_v40 = vld [vmem:[%s2390_s13 + $0x80] sm:$0xff]  ;;  %v1013_v41 = vmul.f32 0.2, %v431_v39 }
  0x1c   : > { %v2046_v33 = vld [vmem:[%s2318_s9 + $0xb0] sm:$0xff]  ;;  %v2047_v37 = vld [vmem:[%s2318_s9 + $0xb8] sm:$0xff]  ;;  %v1029_v42 = vmul.f32 0.2, %v447_v40  ;;  %vm949_vm2 = vcmp.gt.f32.partialorder %v431_v39, 0.2 }
  0x1d   : > { %v2054_v34 = vld [vmem:[%s2318_s9 + $0xf0] sm:$0xff]  ;;  %v2055_v38 = vld [vmem:[%s2318_s9 + $0xf8] sm:$0xff]  ;;  %vm965_vm3 = vcmp.gt.f32.partialorder %v447_v40, 0.2  ;;  %v2400_v44 = vld [vmem:[%s2390_s13 + $0x100] sm:$0xff]  ;;  %v1077_v48 = vsel %vm949_vm2, 0.0, %v1013_v41 }
  0x1e   : > { %787 = vmatpush.bf16.msra.mxu0 %v2056_v6  ;;  %2195 = vmatpush.bf16.msra.mxu1 %v2056_v6  ;;  %v2403_v45 = vld [vmem:[%s2390_s13 + $0x8] sm:$0xff]  ;;  %v1093_v50 = vsel %vm965_vm3, 0.0, %v1029_v42  ;;  %v2409_v51 = vld [vmem:[%s2390_s13 + $0x180] sm:$0xff]  ;;  %v2418_v54 = vld [vmem:[%s2390_s13 + $0x10] sm:$0xff]  ;;  %vm981_vm4 = vcmp.gt.f32.partialorder %v2400_v44, 0.2 }
  0x1f   : > { %2196 = vmatpush.bf16.msra.mxu2 %v2056_v6  ;;  %2197 = vmatpush.bf16.msra.mxu3 %v2056_v6  ;;  %v2406_v46 = vld [vmem:[%s2390_s13 + $0x88] sm:$0xff]  ;;  %v2421_v55 = vld [vmem:[%s2390_s13 + $0x90] sm:$0xff]  ;;  %v2430_v58 = vld [vmem:[%s2390_s13 + $0x18] sm:$0xff]  ;;  %vm950_vm5 = vcmp.gt.f32.partialorder %v2403_v45, 0.2 }
  0x20   : > { %v2412_v52 = vld [vmem:[%s2390_s13 + $0x108] sm:$0xff]  ;;  %v2424_v56 = vld [vmem:[%s2390_s13 + $0x110] sm:$0xff]  ;;  %v2433_v59 = vld [vmem:[%s2390_s13 + $0x98] sm:$0xff]  ;;  %vm966_vm6 = vcmp.gt.f32.partialorder %v2406_v46, 0.2 }
  0x21   : > { %1926 = vmatmul.msk.bf16.vlgmr.msra.gmra.mxu0 %vm679_vm1, %v2024_v7  ;;  %1934 = vmatmul.msk.bf16.vlgmr.msra.gmra.mxu1 %vm679_vm1, %v2032_v8  ;;  %v2415_v53 = vld [vmem:[%s2390_s13 + $0x188] sm:$0xff]  ;;  %v2427_v57 = vld [vmem:[%s2390_s13 + $0x190] sm:$0xff]  ;;  %v2436_v60 = vld [vmem:[%s2390_s13 + $0x118] sm:$0xff]  ;;  %vm997_vm7 = vcmp.gt.f32.partialorder %v2409_v51, 0.2 }
  0x22   : > { %1942 = vmatmul.msk.bf16.vlgmr.msra.gmra.mxu2 %vm679_vm1, %v2040_v9  ;;  %1950 = vmatmul.msk.bf16.vlgmr.msra.gmra.mxu3 %vm679_vm1, %v2048_v10  ;;  %v2439_v61 = vld [vmem:[%s2390_s13 + $0x198] sm:$0xff]  ;;  %v2442_v62 = vld [vmem:[%s2390_s13 + $0x20] sm:$0xff]  ;;  %v2454_v2 = vld [vmem:[%s2390_s13 + $0x28] sm:$0xff]  ;;  %vm982_vm8 = vcmp.gt.f32.partialorder %v2412_v52, 0.2 }
  0x23   : > { %v2445_v63 = vld [vmem:[%s2390_s13 + $0xa0] sm:$0xff]  ;;  %v2457_v3 = vld [vmem:[%s2390_s13 + $0xa8] sm:$0xff]  ;;  %v2466_v6 = vld [vmem:[%s2390_s13 + $0x30] sm:$0xff]  ;;  %vm998_vm10 = vcmp.gt.f32.partialorder %v2415_v53, 0.2 }
  0x24   : > { %v2448_v0 = vld [vmem:[%s2390_s13 + $0x120] sm:$0xff]  ;;  %v2460_v4 = vld [vmem:[%s2390_s13 + $0x128] sm:$0xff]  ;;  %v2469_v7 = vld [vmem:[%s2390_s13 + $0xb0] sm:$0xff]  ;;  %vm951_vm12 = vcmp.gt.f32.partialorder %v2418_v54, 0.2 }
  0x25   : > { %v2451_v1 = vld [vmem:[%s2390_s13 + $0x1a0] sm:$0xff]  ;;  %v2463_v5 = vld [vmem:[%s2390_s13 + $0x1a8] sm:$0xff]  ;;  %v2472_v8 = vld [vmem:[%s2390_s13 + $0x130] sm:$0xff]  ;;  %vm967_vm13 = vcmp.gt.f32.partialorder %v2421_v55, 0.2 }
  0x26   : > { %v2475_v9 = vld [vmem:[%s2390_s13 + $0x1b0] sm:$0xff]  ;;  %v2478_v10 = vld [vmem:[%s2390_s13 + $0x38] sm:$0xff]  ;;  %v2561_v39 = vld [vmem:[%s2390_s13 + $0x1e8] sm:$0xff]  ;;  %vm983_vm0 = vcmp.gt.f32.partialorder %v2424_v56, 0.2 }
  0x27   : > { %3084 = vst [vmem:[#allocation9_spill] sm:$0xff] %v2561_v39  ;;  %v2564_v40 = vld [vmem:[%s2390_s13 + $0x70] sm:$0xff] }
  0x28   : > { %3085 = vst [vmem:[#allocation10_spill] sm:$0xff] %v2564_v40  ;;  %v2567_v41 = vld [vmem:[%s2390_s13 + $0xf0] sm:$0xff]  ;;  %v1045_v40 = vmul.f32 0.2, %v2400_v44 }
  0x29   : > { %3086 = vst [vmem:[#allocation11_spill] sm:$0xff] %v2567_v41  ;;  %v2577_v42 = vld [vmem:[%s2390_s13 + $0x170] sm:$0xff]  ;;  %v2590_v41 = vld [vmem:[%s2390_s13 + $0x178] sm:$0xff] }
  0x2a   : > { %3087 = vst [vmem:[#allocation12_spill] sm:$0xff] %v2577_v42  ;;  %v1030_v42 = vmul.f32 0.2, %v2406_v46 }
  0x2b   : > { %3091 = vst [vmem:[#allocation16_spill] sm:$0xff] %v2590_v41 }
  0x31   : > { %1927 = vmatmul.msk.bf16.gmra.mxu0 %vm679_vm1, %v2025_v11  ;;  %1935 = vmatmul.msk.bf16.gmra.mxu1 %vm679_vm1, %v2033_v12  ;;  %v2481_v11 = vld [vmem:[%s2390_s13 + $0xb8] sm:$0xff] }
  0x32   : > { %1943 = vmatmul.msk.bf16.gmra.mxu2 %vm679_vm1, %v2041_v13  ;;  %1951 = vmatmul.msk.bf16.gmra.mxu3 %vm679_vm1, %v2049_v14  ;;  %v2484_v12 = vld [vmem:[%s2390_s13 + $0x138] sm:$0xff]  ;;  %v2490_v14 = vld [vmem:[%s2390_s13 + $0x40] sm:$0xff] }
  0x33   : > { %v2487_v13 = vld [vmem:[%s2390_s13 + $0x1b8] sm:$0xff] }
  0x41   : > { %1928 = vmatmul.msk.bf16.gmra.mxu0 %vm679_vm1, %v2026_v15  ;;  %1936 = vmatmul.msk.bf16.gmra.mxu1 %vm679_vm1, %v2034_v16  ;;  %v2493_v15 = vld [vmem:[%s2390_s13 + $0xc0] sm:$0xff] }
  0x42   : > { %1944 = vmatmul.msk.bf16.gmra.mxu2 %vm679_vm1, %v2042_v17  ;;  %1952 = vmatmul.msk.bf16.gmra.mxu3 %vm679_vm1, %v2050_v18  ;;  %v2496_v16 = vld [vmem:[%s2390_s13 + $0x140] sm:$0xff]  ;;  %v2502_v18 = vld [vmem:[%s2390_s13 + $0x48] sm:$0xff] }
  0x43   : > { %v2499_v17 = vld [vmem:[%s2390_s13 + $0x1c0] sm:$0xff] }
  0x51   : > { %1929 = vmatmul.msk.bf16.gmra.mxu0 %vm679_vm1, %v2027_v19  ;;  %1937 = vmatmul.msk.bf16.gmra.mxu1 %vm679_vm1, %v2035_v20  ;;  %v2505_v19 = vld [vmem:[%s2390_s13 + $0xc8] sm:$0xff] }
  0x52   : > { %1945 = vmatmul.msk.bf16.gmra.mxu2 %vm679_vm1, %v2043_v21  ;;  %1953 = vmatmul.msk.bf16.gmra.mxu3 %vm679_vm1, %v2051_v22  ;;  %v2508_v20 = vld [vmem:[%s2390_s13 + $0x148] sm:$0xff]  ;;  %v2514_v22 = vld [vmem:[%s2390_s13 + $0x50] sm:$0xff] }
  0x53   : > { %v2511_v21 = vld [vmem:[%s2390_s13 + $0x1c8] sm:$0xff] }
  0x61   : > { %1930 = vmatmul.msk.bf16.gmra.mxu0 %vm679_vm1, %v2028_v23  ;;  %1938 = vmatmul.msk.bf16.gmra.mxu1 %vm679_vm1, %v2036_v24  ;;  %v2517_v23 = vld [vmem:[%s2390_s13 + $0xd0] sm:$0xff] }
  0x62   : > { %1946 = vmatmul.msk.bf16.gmra.mxu2 %vm679_vm1, %v2044_v25  ;;  %1954 = vmatmul.msk.bf16.gmra.mxu3 %vm679_vm1, %v2052_v26  ;;  %v2520_v24 = vld [vmem:[%s2390_s13 + $0x150] sm:$0xff]  ;;  %v2526_v26 = vld [vmem:[%s2390_s13 + $0x58] sm:$0xff] }
  0x63   : > { %v2523_v25 = vld [vmem:[%s2390_s13 + $0x1d0] sm:$0xff] }
  0x71   : > { %1931 = vmatmul.msk.bf16.gmra.mxu0 %vm679_vm1, %v2029_v27  ;;  %1939 = vmatmul.msk.bf16.gmra.mxu1 %vm679_vm1, %v2037_v28  ;;  %v2529_v27 = vld [vmem:[%s2390_s13 + $0xd8] sm:$0xff] }
  0x72   : > { %1947 = vmatmul.msk.bf16.gmra.mxu2 %vm679_vm1, %v2045_v29  ;;  %1955 = vmatmul.msk.bf16.gmra.mxu3 %vm679_vm1, %v2053_v30  ;;  %v2532_v28 = vld [vmem:[%s2390_s13 + $0x158] sm:$0xff]  ;;  %v2538_v30 = vld [vmem:[%s2390_s13 + $0x60] sm:$0xff] }
  0x73   : > { %v2535_v29 = vld [vmem:[%s2390_s13 + $0x1d8] sm:$0xff]  ;;  %3077 = vst [vmem:[#allocation2_spill] sm:$0xff] %v2538_v30 }
  0x81   : > { %1932 = vmatmul.msk.bf16.gmra.mxu0 %vm679_vm1, %v2030_v31  ;;  %1940 = vmatmul.msk.bf16.gmra.mxu1 %vm679_vm1, %v2038_v32  ;;  %v2541_v31 = vld [vmem:[%s2390_s13 + $0xe0] sm:$0xff] }
  0x82   : > { %1948 = vmatmul.msk.bf16.gmra.mxu2 %vm679_vm1, %v2046_v33  ;;  %1956 = vmatmul.msk.bf16.gmra.mxu3 %vm679_vm1, %v2054_v34  ;;  %3078 = vst [vmem:[#allocation3_spill] sm:$0xff] %v2541_v31  ;;  %v2544_v32 = vld [vmem:[%s2390_s13 + $0x160] sm:$0xff]  ;;  %v2550_v34 = vld [vmem:[%s2390_s13 + $0x68] sm:$0xff] }
  0x83   : > { %3079 = vst [vmem:[#allocation4_spill] sm:$0xff] %v2544_v32  ;;  %v2547_v33 = vld [vmem:[%s2390_s13 + $0x1e0] sm:$0xff] }
  0x84   : > { %3080 = vst [vmem:[#allocation5_spill] sm:$0xff] %v2547_v33  ;;  %v1014_v33 = vmul.f32 0.2, %v2403_v45 }
  0x85   : > { %3081 = vst [vmem:[#allocation6_spill] sm:$0xff] %v2550_v34  ;;  %v2593_v34 = vld [vmem:[%s2390_s13 + $0x1f8] sm:$0xff] }
  0x86   : > { %3092 = vst [vmem:[#allocation17_spill] sm:$0xff] %v2593_v34  ;;  %v1078_v41 = vsel %vm950_vm5, 0.0, %v1014_v33  ;;  %v1015_v33 = vmul.f32 0.2, %v2418_v54 }
  0x91   : > { %1933 = vmatmul.msk.bf16.gmra.mxu0 %vm679_vm1, %v2031_v35  ;;  %1941 = vmatmul.msk.bf16.gmra.mxu1 %vm679_vm1, %v2039_v36  ;;  %v2553_v35 = vld [vmem:[%s2390_s13 + $0xe8] sm:$0xff] }
  0x92   : > { %1949 = vmatmul.msk.bf16.gmra.mxu2 %vm679_vm1, %v2047_v37  ;;  %1957 = vmatmul.msk.bf16.gmra.mxu3 %vm679_vm1, %v2055_v38  ;;  %3082 = vst [vmem:[#allocation7_spill] sm:$0xff] %v2553_v35  ;;  %v2556_v36 = vld [vmem:[%s2390_s13 + $0x168] sm:$0xff]  ;;  %v2587_v35 = vld [vmem:[%s2390_s13 + $0xf8] sm:$0xff]  ;;  %vm952_vm1 = vcmp.gt.f32.partialorder %v2430_v58, 0.2 }
  0x93   : > { %3083 = vst [vmem:[#allocation8_spill] sm:$0xff] %v2556_v36  ;;  %v2580_v36 = vld [vmem:[%s2390_s13 + $0x1f0] sm:$0xff] }
  0x94   : > { %3088 = vst [vmem:[#allocation13_spill] sm:$0xff] %v2580_v36  ;;  %v1061_v36 = vmul.f32 0.2, %v2409_v51  ;;  %v1062_v51 = vmul.f32 0.2, %v2415_v53 }
  0x95   : > { %3090 = vst [vmem:[#allocation15_spill] sm:$0xff] %v2587_v35 }
  0x96   : > { %v1125_v45 = vsel %vm997_vm7, 0.0, %v1061_v36  ;;  %v1126_v53 = vsel %vm998_vm10, 0.0, %v1062_v51  ;;  %vm999_vm7 = vcmp.gt.f32.partialorder %v2427_v57, 0.2  ;;  %vm1000_vm10 = vcmp.gt.f32.partialorder %v2439_v61, 0.2 }
  0x9e   : > { %v789_v47 = vpop.f32.mrf.mxu0  ;;  %v829_v49 = vpop.f32.mrf.mxu1 }
  0x9f   : > { %v790_v37 = vadd.f32 %v2397_v43, %v789_v47  ;;  %v830_v38 = vadd.f32 %v2397_v43, %v829_v49  ;;  %v2583_v47 = vld [vmem:[%s2390_s13 + $0x78] sm:$0xff] }
  0xa0   : > { %3089 = vst [vmem:[#allocation14_spill] sm:$0xff] %v2583_v47  ;;  %v1094_v47 = vsel %vm966_vm6, 0.0, %v1030_v42 }
  0xa1   : > { %v1141_v49 = vadd.f32 %v1077_v48, %v790_v37  ;;  %v1157_v39 = vadd.f32 %v1093_v50, %v830_v38  ;;  %v1046_v48 = vmul.f32 0.2, %v2412_v52  ;;  %v1109_v38 = vsel %vm981_vm4, 0.0, %v1045_v40 }
  0xa2   : > { %vm968_vm4 = vcmp.gt.f32.partialorder %v2433_v59, 0.2 }
  0xa3   : > { %1205 = vst [vmem:[%s2574_s18] sm:$0xff] %v1141_v49  ;;  %vm1269_vm9 = vcmp.gt.f32.partialorder %v1141_v49, 0.2  ;;  %v1110_v30 = vsel %vm982_vm8, 0.0, %v1046_v48  ;;  %vm1285_vm11 = vcmp.gt.f32.partialorder %v1157_v39, 0.2 }
  0xa4   : > { %1221 = vst [vmem:[%s2574_s18 + $0x80] sm:$0xff] %v1157_v39  ;;  %vm984_vm8 = vcmp.gt.f32.partialorder %v2436_v60, 0.2 }
  0xa5   : > { %v869_v50 = vpop.f32.mrf.mxu2  ;;  %v909_v37 = vpop.f32.mrf.mxu3 }
  0xa6   : > { %v870_v44 = vadd.f32 %v2397_v43, %v869_v50  ;;  %v791_v34 = vpop.f32.mrf.mxu0  ;;  %v831_v35 = vpop.f32.mrf.mxu1  ;;  %v910_v31 = vadd.f32 %v2397_v43, %v909_v37 }
  0xa7   : > { %v792_v46 = vadd.f32 %v2397_v43, %v791_v34  ;;  %v832_v32 = vadd.f32 %v2397_v43, %v831_v35  ;;  %v1031_v34 = vmul.f32 0.2, %v2421_v55  ;;  %v2249_v35 = vmov 0.0  }
  0xa8   : > { %v1173_v36 = vadd.f32 %v1109_v38, %v870_v44  ;;  %v1958_v42 = vsel %vm1269_vm9, 1.0, %v2249_v35  ;;  %v1974_v39 = vsel %vm1285_vm11, 1.0, %v2249_v35 }
  0xa9   : > { %v1142_v52 = vadd.f32 %v1078_v41, %v792_v46  ;;  %v1158_v40 = vadd.f32 %v1094_v47, %v832_v32  ;;  %v1189_v32 = vadd.f32 %v1125_v45, %v910_v31  ;;  %v1047_v31 = vmul.f32 0.2, %v2424_v56 }
  0xaa   : > { %v1079_v46 = vsel %vm951_vm12, 0.0, %v1015_v33  ;;  %1237 = vst [vmem:[%s2574_s18 + $0x100] sm:$0xff] %v1173_v36  ;;  %vm1301_vm2 = vcmp.gt.f32.partialorder %v1173_v36, 0.2  ;;  %vm953_vm12 = vcmp.gt.f32.partialorder %v2442_v62, 0.2 }
  0xab   : > { %vm1270_vm14 = vcmp.gt.f32.partialorder %v1142_v52, 0.2  ;;  %vm1286_vm15 = vcmp.gt.f32.partialorder %v1158_v40, 0.2  ;;  %1206 = vst [vmem:[%s2574_s18 + $0x8] sm:$0xff] %v1142_v52  ;;  %v1095_v52 = vsel %vm967_vm13, 0.0, %v1031_v34 }
  0xac   : > { %v1959_v41 = vsel %vm1270_vm14, 1.0, %v2249_v35  ;;  %v1975_v47 = vsel %vm1286_vm15, 1.0, %v2249_v35  ;;  %1222 = vst [vmem:[%s2574_s18 + $0x88] sm:$0xff] %v1158_v40  ;;  %vm1317_vm3 = vcmp.gt.f32.partialorder %v1189_v32, 0.2 }
  0xad   : > { %v2060_v49 = vpack.c.bf16 %v1959_v41, %v1958_v42  ;;  %v2084_v48 = vpack.c.bf16 %v1975_v47, %v1974_v39  ;;  %v871_v50 = vpop.f32.mrf.mxu2  ;;  %v911_v37 = vpop.f32.mrf.mxu3  ;;  %v1016_v39 = vmul.f32 0.2, %v2430_v58  ;;  %v1032_v41 = vmul.f32 0.2, %v2433_v59  ;;  %1253 = vst [vmem:[%s2574_s18 + $0x180] sm:$0xff] %v1189_v32 }
  0xae   : > { %v872_v44 = vadd.f32 %v2397_v43, %v871_v50  ;;  %v912_v38 = vadd.f32 %v2397_v43, %v911_v37  ;;  %v794_v45 = vpop.f32.mrf.mxu0  ;;  %v834_v51 = vpop.f32.mrf.mxu1  ;;  %v1990_v47 = vsel %vm1301_vm2, 1.0, %v2249_v35  ;;  %v2006_v36 = vsel %vm1317_vm3, 1.0, %v2249_v35 }
  0xaf   : > { %2061 = vst [vmem:[%s2623_s25] sm:$0xff] %v2060_v49   ;;  %v795_v42 = vadd.f32 %v2397_v43, %v794_v45  ;;  %v835_v40 = vadd.f32 %v2397_v43, %v834_v51  ;;  %v1063_v50 = vmul.f32 0.2, %v2427_v57  ;;  %v1111_v37 = vsel %vm983_vm0, 0.0, %v1047_v31 }
  0xb0   : > { %2162 = vst [vmem:[%s2623_s25 + $0x40] sm:$0xff] %v2084_v48   ;;  %v1174_v54 = vadd.f32 %v1110_v30, %v872_v44  ;;  %v1190_v33 = vadd.f32 %v1126_v53, %v912_v38  ;;  %vm969_vm13 = vcmp.gt.f32.partialorder %v2445_v63, 0.2  ;;  %vm985_vm0 = vcmp.gt.f32.partialorder %v2448_v0, 0.2 }
  0xb1   : > { %v1143_v55 = vadd.f32 %v1079_v46, %v795_v42  ;;  %v1159_v34 = vadd.f32 %v1095_v52, %v835_v40  ;;  %v1080_v46 = vsel %vm952_vm1, 0.0, %v1016_v39  ;;  %v1096_v52 = vsel %vm968_vm4, 0.0, %v1032_v41 }
  0xb2   : > { %vm1302_vm5 = vcmp.gt.f32.partialorder %v1174_v54, 0.2  ;;  %vm1318_vm6 = vcmp.gt.f32.partialorder %v1190_v33, 0.2  ;;  %1238 = vst [vmem:[%s2574_s18 + $0x108] sm:$0xff] %v1174_v54  ;;  %v1127_v58 = vsel %vm999_vm7, 0.0, %v1063_v50 }
  0xb3   : > { %v1991_v30 = vsel %vm1302_vm5, 1.0, %v2249_v35  ;;  %v2007_v53 = vsel %vm1318_vm6, 1.0, %v2249_v35  ;;  %1207 = vst [vmem:[%s2574_s18 + $0x10] sm:$0xff] %v1143_v55  ;;  %v1048_v42 = vmul.f32 0.2, %v2436_v60 }
  0xb4   : > { %v2108_v49 = vpack.c.bf16 %v1991_v30, %v1990_v47  ;;  %v2132_v48 = vpack.c.bf16 %v2007_v53, %v2006_v36  ;;  %1223 = vst [vmem:[%s2574_s18 + $0x90] sm:$0xff] %v1159_v34  ;;  %v1064_v40 = vmul.f32 0.2, %v2439_v61  ;;  %vm1271_vm9 = vcmp.gt.f32.partialorder %v1143_v55, 0.2 }
  0xb5   : > { %v874_v32 = vpop.f32.mrf.mxu2  ;;  %v914_v44 = vpop.f32.mrf.mxu3  ;;  %1254 = vst [vmem:[%s2574_s18 + $0x188] sm:$0xff] %v1190_v33  ;;  %vm1287_vm11 = vcmp.gt.f32.partialorder %v1159_v34, 0.2  ;;  %v1017_v41 = vmul.f32 0.2, %v2442_v62  ;;  %v1960_v57 = vsel %vm1271_vm9, 1.0, %v2249_v35 }
  0xb6   : > { %2170 = vst [vmem:[%s2623_s25 + $0x80] sm:$0xff] %v2108_v49   ;;  %v875_v38 = vadd.f32 %v2397_v43, %v874_v32  ;;  %v796_v45 = vpop.f32.mrf.mxu0  ;;  %v836_v51 = vpop.f32.mrf.mxu1  ;;  %v915_v54 = vadd.f32 %v2397_v43, %v914_v44  ;;  %v1033_v55 = vmul.f32 0.2, %v2445_v63  ;;  %v1112_v33 = vsel %vm984_vm8, 0.0, %v1048_v42 }
  0xb7   : > { %2178 = vst [vmem:[%s2623_s25 + $0xc0] sm:$0xff] %v2132_v48   ;;  %v797_v56 = vadd.f32 %v2397_v43, %v796_v45  ;;  %v837_v31 = vadd.f32 %v2397_v43, %v836_v51  ;;  %v1976_v34 = vsel %vm1287_vm11, 1.0, %v2249_v35  ;;  %v1081_v60 = vsel %vm953_vm12, 0.0, %v1017_v41 }
  0xb8   : > { %v1175_v47 = vadd.f32 %v1111_v37, %v875_v38  ;;  %v1191_v36 = vadd.f32 %v1127_v58, %v915_v54  ;;  %v1128_v37 = vsel %vm1000_vm10, 0.0, %v1064_v40  ;;  %v1097_v51 = vsel %vm969_vm13, 0.0, %v1033_v55 }
  0xb9   : > { %v1144_v59 = vadd.f32 %v1080_v46, %v797_v56  ;;  %v1160_v39 = vadd.f32 %v1096_v52, %v837_v31  ;;  %v1049_v52 = vmul.f32 0.2, %v2448_v0  ;;  %vm954_vm1 = vcmp.gt.f32.partialorder %v2454_v2, 0.2 }
  0xba   : > { %1239 = vst [vmem:[%s2574_s18 + $0x110] sm:$0xff] %v1175_v47  ;;  %vm1303_vm2 = vcmp.gt.f32.partialorder %v1175_v47, 0.2  ;;  %vm1319_vm3 = vcmp.gt.f32.partialorder %v1191_v36, 0.2 }
  0xbb   : > { %vm1272_vm14 = vcmp.gt.f32.partialorder %v1144_v59, 0.2  ;;  %vm1288_vm15 = vcmp.gt.f32.partialorder %v1160_v39, 0.2  ;;  %1208 = vst [vmem:[%s2574_s18 + $0x18] sm:$0xff] %v1144_v59  ;;  %v1992_v58 = vsel %vm1303_vm2, 1.0, %v2249_v35 }
  0xbc   : > { %v1961_v30 = vsel %vm1272_vm14, 1.0, %v2249_v35  ;;  %v1977_v53 = vsel %vm1288_vm15, 1.0, %v2249_v35  ;;  %1224 = vst [vmem:[%s2574_s18 + $0x98] sm:$0xff] %v1160_v39  ;;  %v1018_v40 = vmul.f32 0.2, %v2454_v2  ;;  %v2008_v59 = vsel %vm1319_vm3, 1.0, %v2249_v35 }
  0xbd   : > { %v2063_v49 = vpack.c.bf16 %v1961_v30, %v1960_v57  ;;  %v2087_v48 = vpack.c.bf16 %v1977_v53, %v1976_v34  ;;  %v876_v50 = vpop.f32.mrf.mxu2  ;;  %v916_v32 = vpop.f32.mrf.mxu3  ;;  %vm970_vm4 = vcmp.gt.f32.partialorder %v2457_v3, 0.2  ;;  %1255 = vst [vmem:[%s2574_s18 + $0x190] sm:$0xff] %v1191_v36  ;;  %v1034_v54 = vmul.f32 0.2, %v2457_v3 }
  0xbe   : > { %v877_v44 = vadd.f32 %v2397_v43, %v876_v50  ;;  %v917_v38 = vadd.f32 %v2397_v43, %v916_v32  ;;  %v799_v45 = vpop.f32.mrf.mxu0  ;;  %v839_v46 = vpop.f32.mrf.mxu1  ;;  %v1065_v57 = vmul.f32 0.2, %v2451_v1  ;;  %v1113_v34 = vsel %vm985_vm0, 0.0, %v1049_v52 }
  0xbf   : > { %2155 = vst [vmem:[%s2623_s25 + $0x8] sm:$0xff] %v2063_v49   ;;  %v800_v61 = vadd.f32 %v2397_v43, %v799_v45  ;;  %v840_v62 = vadd.f32 %v2397_v43, %v839_v46  ;;  %vm1001_vm7 = vcmp.gt.f32.partialorder %v2451_v1, 0.2  ;;  %v1082_v49 = vsel %vm954_vm1, 0.0, %v1018_v40 }
  0xc0   : > { %2163 = vst [vmem:[%s2623_s25 + $0x48] sm:$0xff] %v2087_v48   ;;  %v1176_v42 = vadd.f32 %v1112_v33, %v877_v44  ;;  %v1192_v56 = vadd.f32 %v1128_v37, %v917_v38  ;;  %v1098_v50 = vsel %vm970_vm4, 0.0, %v1034_v54  ;;  %vm986_vm8 = vcmp.gt.f32.partialorder %v2460_v4, 0.2 }
  0xc1   : > { %v1145_v63 = vadd.f32 %v1081_v60, %v800_v61  ;;  %v1161_v31 = vadd.f32 %v1097_v51, %v840_v62  ;;  %v1050_v37 = vmul.f32 0.2, %v2460_v4  ;;  %vm1002_vm9 = vcmp.gt.f32.partialorder %v2463_v5, 0.2 }
  0xc2   : > { %vm1304_vm5 = vcmp.gt.f32.partialorder %v1176_v42, 0.2  ;;  %vm1320_vm6 = vcmp.gt.f32.partialorder %v1192_v56, 0.2  ;;  %v1129_v60 = vsel %vm1001_vm7, 0.0, %v1065_v57  ;;  %1240 = vst [vmem:[%s2574_s18 + $0x118] sm:$0xff] %v1176_v42 }
  0xc3   : > { %v1993_v39 = vsel %vm1304_vm5, 1.0, %v2249_v35  ;;  %v2009_v41 = vsel %vm1320_vm6, 1.0, %v2249_v35  ;;  %1209 = vst [vmem:[%s2574_s18 + $0x20] sm:$0xff] %v1145_v63  ;;  %vm1273_vm10 = vcmp.gt.f32.partialorder %v1145_v63, 0.2  ;;  %v1114_v61 = vsel %vm986_vm8, 0.0, %v1050_v37 }
  0xc4   : > { %v2111_v47 = vpack.c.bf16 %v1993_v39, %v1992_v58  ;;  %v2135_v55 = vpack.c.bf16 %v2009_v41, %v2008_v59  ;;  %1225 = vst [vmem:[%s2574_s18 + $0xa0] sm:$0xff] %v1161_v31  ;;  %v1066_v3 = vmul.f32 0.2, %v2463_v5  ;;  %vm1289_vm11 = vcmp.gt.f32.partialorder %v1161_v31, 0.2 }
  0xc5   : > { %v879_v33 = vpop.f32.mrf.mxu2  ;;  %v919_v36 = vpop.f32.mrf.mxu3  ;;  %v1019_v45 = vmul.f32 0.2, %v2466_v6  ;;  %1256 = vst [vmem:[%s2574_s18 + $0x198] sm:$0xff] %v1192_v56  ;;  %vm955_vm12 = vcmp.gt.f32.partialorder %v2466_v6, 0.2  ;;  %v1962_v1 = vsel %vm1273_vm10, 1.0, %v2249_v35 }
  0xc6   : > { %2171 = vst [vmem:[%s2623_s25 + $0x88] sm:$0xff] %v2111_v47   ;;  %v880_v30 = vadd.f32 %v2397_v43, %v879_v33  ;;  %v801_v53 = vpop.f32.mrf.mxu0  ;;  %v841_v48 = vpop.f32.mrf.mxu1  ;;  %v920_v2 = vadd.f32 %v2397_v43, %v919_v36  ;;  %vm971_vm13 = vcmp.gt.f32.partialorder %v2469_v7, 0.2  ;;  %v1035_v51 = vmul.f32 0.2, %v2469_v7 }
  0xc7   : > { %2179 = vst [vmem:[%s2623_s25 + $0xc8] sm:$0xff] %v2135_v55   ;;  %v802_v0 = vadd.f32 %v2397_v43, %v801_v53  ;;  %v842_v32 = vadd.f32 %v2397_v43, %v841_v48  ;;  %v1978_v62 = vsel %vm1289_vm11, 1.0, %v2249_v35  ;;  %v1130_v58 = vsel %vm1002_vm9, 0.0, %v1066_v3 }
  0xc8   : > { %v1177_v46 = vadd.f32 %v1113_v34, %v880_v30  ;;  %v1193_v52 = vadd.f32 %v1129_v60, %v920_v2  ;;  %v1083_v4 = vsel %vm955_vm12, 0.0, %v1019_v45  ;;  %v1099_v55 = vsel %vm971_vm13, 0.0, %v1035_v51 }
  0xc9   : > { %v1146_v44 = vadd.f32 %v1082_v49, %v802_v0  ;;  %v1162_v38 = vadd.f32 %v1098_v50, %v842_v32  ;;  %vm987_vm0 = vcmp.gt.f32.partialorder %v2472_v8, 0.2  ;;  %v1051_v57 = vmul.f32 0.2, %v2472_v8 }
  0xca   : > { %1241 = vst [vmem:[%s2574_s18 + $0x120] sm:$0xff] %v1177_v46  ;;  %vm956_vm1 = vcmp.gt.f32.partialorder %v2478_v10, 0.2  ;;  %vm1305_vm2 = vcmp.gt.f32.partialorder %v1177_v46, 0.2 }
  0xcb   : > { %vm1274_vm14 = vcmp.gt.f32.partialorder %v1146_v44, 0.2  ;;  %vm1290_vm15 = vcmp.gt.f32.partialorder %v1162_v38, 0.2  ;;  %1210 = vst [vmem:[%s2574_s18 + $0x28] sm:$0xff] %v1146_v44  ;;  %v1994_v49 = vsel %vm1305_vm2, 1.0, %v2249_v35 }
  0xcc   : > { %v1963_v42 = vsel %vm1274_vm14, 1.0, %v2249_v35  ;;  %v1979_v56 = vsel %vm1290_vm15, 1.0, %v2249_v35  ;;  %1226 = vst [vmem:[%s2574_s18 + $0xa8] sm:$0xff] %v1162_v38  ;;  %vm1321_vm3 = vcmp.gt.f32.partialorder %v1193_v52, 0.2  ;;  %v1115_v3 = vsel %vm987_vm0, 0.0, %v1051_v57 }
  0xcd   : > { %v2066_v63 = vpack.c.bf16 %v1963_v42, %v1962_v1  ;;  %v2090_v31 = vpack.c.bf16 %v1979_v56, %v1978_v62  ;;  %v881_v40 = vpop.f32.mrf.mxu2  ;;  %v921_v54 = vpop.f32.mrf.mxu3  ;;  %v1020_v30 = vmul.f32 0.2, %v2478_v10  ;;  %vm972_vm4 = vcmp.gt.f32.partialorder %v2481_v11, 0.2  ;;  %1257 = vst [vmem:[%s2574_s18 + $0x1a0] sm:$0xff] %v1193_v52 }
  0xce   : > { %v882_v59 = vadd.f32 %v2397_v43, %v881_v40  ;;  %v922_v39 = vadd.f32 %v2397_v43, %v921_v54  ;;  %v804_v41 = vpop.f32.mrf.mxu0  ;;  %v844_v47 = vpop.f32.mrf.mxu1  ;;  %v1036_v53 = vmul.f32 0.2, %v2481_v11  ;;  %v2010_v48 = vsel %vm1321_vm3, 1.0, %v2249_v35 }
  0xcf   : > { %2156 = vst [vmem:[%s2623_s25 + $0x10] sm:$0xff] %v2066_v63   ;;  %v805_v5 = vadd.f32 %v2397_v43, %v804_v41  ;;  %v845_v6 = vadd.f32 %v2397_v43, %v844_v47  ;;  %v1067_v2 = vmul.f32 0.2, %v2475_v9  ;;  %vm1003_vm7 = vcmp.gt.f32.partialorder %v2475_v9, 0.2 }
  0xd0   : > { %2164 = vst [vmem:[%s2623_s25 + $0x50] sm:$0xff] %v2090_v31   ;;  %v1178_v33 = vadd.f32 %v1114_v61, %v882_v59  ;;  %v1194_v34 = vadd.f32 %v1130_v58, %v922_v39  ;;  %v1084_v46 = vsel %vm956_vm1, 0.0, %v1020_v30  ;;  %v1100_v1 = vsel %vm972_vm4, 0.0, %v1036_v53 }
  0xd1   : > { %v1147_v7 = vadd.f32 %v1083_v4, %v805_v5  ;;  %v1163_v36 = vadd.f32 %v1099_v55, %v845_v6  ;;  %vm988_vm8 = vcmp.gt.f32.partialorder %v2484_v12, 0.2  ;;  %v1052_v62 = vmul.f32 0.2, %v2484_v12 }
  0xd2   : > { %vm1306_vm5 = vcmp.gt.f32.partialorder %v1178_v33, 0.2  ;;  %vm1322_vm6 = vcmp.gt.f32.partialorder %v1194_v34, 0.2  ;;  %vm1004_vm9 = vcmp.gt.f32.partialorder %v2487_v13, 0.2 }
  0xd3   : > { %v1995_v50 = vsel %vm1306_vm5, 1.0, %v2249_v35  ;;  %v2011_v0 = vsel %vm1322_vm6, 1.0, %v2249_v35  ;;  %1211 = vst [vmem:[%s2574_s18 + $0x30] sm:$0xff] %v1147_v7  ;;  %vm1275_vm10 = vcmp.gt.f32.partialorder %v1147_v7, 0.2  ;;  %v1131_v52 = vsel %vm1003_vm7, 0.0, %v1067_v2 }
  0xd4   : > { %v2114_v32 = vpack.c.bf16 %v1995_v50, %v1994_v49  ;;  %v2138_v37 = vpack.c.bf16 %v2011_v0, %v2010_v48  ;;  %1227 = vst [vmem:[%s2574_s18 + $0xb0] sm:$0xff] %v1163_v36  ;;  %v1068_v11 = vmul.f32 0.2, %v2487_v13  ;;  %vm1291_vm11 = vcmp.gt.f32.partialorder %v1163_v36, 0.2 }
  0xd5   : > { %v884_v60 = vpop.f32.mrf.mxu2  ;;  %v924_v44 = vpop.f32.mrf.mxu3  ;;  %1242 = vst [vmem:[%s2574_s18 + $0x128] sm:$0xff] %v1178_v33  ;;  %v1021_v63 = vmul.f32 0.2, %v2490_v14  ;;  %vm957_vm12 = vcmp.gt.f32.partialorder %v2490_v14, 0.2  ;;  %v1964_v9 = vsel %vm1275_vm10, 1.0, %v2249_v35 }
  0xd6   : > { %2172 = vst [vmem:[%s2623_s25 + $0x90] sm:$0xff] %v2114_v32   ;;  %v885_v38 = vadd.f32 %v2397_v43, %v884_v60  ;;  %v806_v45 = vpop.f32.mrf.mxu0  ;;  %v846_v51 = vpop.f32.mrf.mxu1  ;;  %v925_v10 = vadd.f32 %v2397_v43, %v924_v44  ;;  %vm973_vm13 = vcmp.gt.f32.partialorder %v2493_v15, 0.2  ;;  %v1037_v40 = vmul.f32 0.2, %v2493_v15 }
  0xd7   : > { %2180 = vst [vmem:[%s2623_s25 + $0xd0] sm:$0xff] %v2138_v37   ;;  %v807_v8 = vadd.f32 %v2397_v43, %v806_v45  ;;  %v847_v61 = vadd.f32 %v2397_v43, %v846_v51  ;;  %v1116_v54 = vsel %vm988_vm8, 0.0, %v1052_v62  ;;  %v1980_v58 = vsel %vm1291_vm11, 1.0, %v2249_v35 }
  0xd8   : > { %1258 = vst [vmem:[%s2574_s18 + $0x1a8] sm:$0xff] %v1194_v34  ;;  %v1179_v31 = vadd.f32 %v1115_v3, %v885_v38  ;;  %v1195_v4 = vadd.f32 %v1131_v52, %v925_v10  ;;  %v1132_v6 = vsel %vm1004_vm9, 0.0, %v1068_v11  ;;  %v1085_v12 = vsel %vm957_vm12, 0.0, %v1021_v63 }
  0xd9   : > { %v1148_v42 = vadd.f32 %v1084_v46, %v807_v8  ;;  %v1164_v56 = vadd.f32 %v1100_v1, %v847_v61  ;;  %v1101_v36 = vsel %vm973_vm13, 0.0, %v1037_v40  ;;  %vm989_vm0 = vcmp.gt.f32.partialorder %v2496_v16, 0.2 }
  0xda   : > { %1243 = vst [vmem:[%s2574_s18 + $0x130] sm:$0xff] %v1179_v31  ;;  %v1053_v30 = vmul.f32 0.2, %v2496_v16  ;;  %vm958_vm1 = vcmp.gt.f32.partialorder %v2502_v18, 0.2 }
  0xdb   : > { %vm1276_vm14 = vcmp.gt.f32.partialorder %v1148_v42, 0.2  ;;  %vm1292_vm15 = vcmp.gt.f32.partialorder %v1164_v56, 0.2  ;;  %1212 = vst [vmem:[%s2574_s18 + $0x38] sm:$0xff] %v1148_v42 }
  0xdc   : > { %v1965_v59 = vsel %vm1276_vm14, 1.0, %v2249_v35  ;;  %v1981_v39 = vsel %vm1292_vm15, 1.0, %v2249_v35  ;;  %1228 = vst [vmem:[%s2574_s18 + $0xb8] sm:$0xff] %v1164_v56  ;;  %vm1307_vm2 = vcmp.gt.f32.partialorder %v1179_v31, 0.2  ;;  %v1117_v46 = vsel %vm989_vm0, 0.0, %v1053_v30 }
  0xdd   : > { %v2069_v41 = vpack.c.bf16 %v1965_v59, %v1964_v9  ;;  %v2093_v47 = vpack.c.bf16 %v1981_v39, %v1980_v58  ;;  %v886_v55 = vpop.f32.mrf.mxu2  ;;  %v926_v5 = vpop.f32.mrf.mxu3  ;;  %vm1323_vm3 = vcmp.gt.f32.partialorder %v1195_v4, 0.2  ;;  %v1022_v50 = vmul.f32 0.2, %v2502_v18  ;;  %1259 = vst [vmem:[%s2574_s18 + $0x1b0] sm:$0xff] %v1195_v4 }
  0xde   : > { %v887_v57 = vadd.f32 %v2397_v43, %v886_v55  ;;  %v927_v33 = vadd.f32 %v2397_v43, %v926_v5  ;;  %v809_v34 = vpop.f32.mrf.mxu0  ;;  %v849_v7 = vpop.f32.mrf.mxu1  ;;  %vm974_vm4 = vcmp.gt.f32.partialorder %v2505_v19, 0.2  ;;  %v1038_v0 = vmul.f32 0.2, %v2505_v19 }
  0xdf   : > { %2157 = vst [vmem:[%s2623_s25 + $0x18] sm:$0xff] %v2069_v41   ;;  %v810_v13 = vadd.f32 %v2397_v43, %v809_v34  ;;  %v850_v14 = vadd.f32 %v2397_v43, %v849_v7  ;;  %v1996_v32 = vsel %vm1307_vm2, 1.0, %v2249_v35  ;;  %v2012_v37 = vsel %vm1323_vm3, 1.0, %v2249_v35 }
  0xe0   : > { %2165 = vst [vmem:[%s2623_s25 + $0x58] sm:$0xff] %v2093_v47   ;;  %v1180_v53 = vadd.f32 %v1116_v54, %v887_v57  ;;  %v1196_v49 = vadd.f32 %v1132_v6, %v927_v33  ;;  %v1069_v38 = vmul.f32 0.2, %v2499_v17  ;;  %vm1005_vm7 = vcmp.gt.f32.partialorder %v2499_v17, 0.2 }
  0xe1   : > { %v1149_v15 = vadd.f32 %v1085_v12, %v810_v13  ;;  %v1165_v48 = vadd.f32 %v1101_v36, %v850_v14  ;;  %v1086_v61 = vsel %vm958_vm1, 0.0, %v1022_v50  ;;  %v1102_v10 = vsel %vm974_vm4, 0.0, %v1038_v0 }
  0xe2   : > { %vm1308_vm5 = vcmp.gt.f32.partialorder %v1180_v53, 0.2  ;;  %vm1324_vm6 = vcmp.gt.f32.partialorder %v1196_v49, 0.2  ;;  %vm990_vm8 = vcmp.gt.f32.partialorder %v2508_v20, 0.2 }
  0xe3   : > { %v1997_v2 = vsel %vm1308_vm5, 1.0, %v2249_v35  ;;  %v2013_v60 = vsel %vm1324_vm6, 1.0, %v2249_v35  ;;  %1213 = vst [vmem:[%s2574_s18 + $0x40] sm:$0xff] %v1149_v15  ;;  %v1054_v11 = vmul.f32 0.2, %v2508_v20  ;;  %v1133_v42 = vsel %vm1005_vm7, 0.0, %v1069_v38 }
  0xe4   : > { %v2117_v3 = vpack.c.bf16 %v1997_v2, %v1996_v32  ;;  %v2141_v44 = vpack.c.bf16 %v2013_v60, %v2012_v37  ;;  %1229 = vst [vmem:[%s2574_s18 + $0xc0] sm:$0xff] %v1165_v48  ;;  %vm1006_vm9 = vcmp.gt.f32.partialorder %v2511_v21, 0.2  ;;  %vm1277_vm10 = vcmp.gt.f32.partialorder %v1149_v15, 0.2 }
  0xe5   : > { %v889_v45 = vpop.f32.mrf.mxu2  ;;  %v929_v51 = vpop.f32.mrf.mxu3  ;;  %v1070_v19 = vmul.f32 0.2, %v2511_v21  ;;  %1244 = vst [vmem:[%s2574_s18 + $0x138] sm:$0xff] %v1180_v53  ;;  %vm1293_vm11 = vcmp.gt.f32.partialorder %v1165_v48, 0.2  ;;  %v1966_v17 = vsel %vm1277_vm10, 1.0, %v2249_v35 }
  0xe6   : > { %2173 = vst [vmem:[%s2623_s25 + $0x98] sm:$0xff] %v2117_v3   ;;  %v890_v1 = vadd.f32 %v2397_v43, %v889_v45  ;;  %v811_v8 = vpop.f32.mrf.mxu0  ;;  %v851_v62 = vpop.f32.mrf.mxu1  ;;  %v930_v18 = vadd.f32 %v2397_v43, %v929_v51  ;;  %v1023_v31 = vmul.f32 0.2, %v2514_v22  ;;  %vm959_vm12 = vcmp.gt.f32.partialorder %v2514_v22, 0.2 }
  0xe7   : > { %2181 = vst [vmem:[%s2623_s25 + $0xd8] sm:$0xff] %v2141_v44   ;;  %v812_v16 = vadd.f32 %v2397_v43, %v811_v8  ;;  %v852_v52 = vadd.f32 %v2397_v43, %v851_v62  ;;  %vm975_vm13 = vcmp.gt.f32.partialorder %v2517_v23, 0.2  ;;  %v1039_v9 = vmul.f32 0.2, %v2517_v23  ;;  %v3093_v62 = vld [vmem:[#allocation2_spill] sm:$0xff] }
  0xe8   : > { %1260 = vst [vmem:[%s2574_s18 + $0x1b8] sm:$0xff] %v1196_v49  ;;  %v1181_v40 = vadd.f32 %v1117_v46, %v890_v1  ;;  %v1118_v54 = vsel %vm990_vm8, 0.0, %v1054_v11  ;;  %v1982_v58 = vsel %vm1293_vm11, 1.0, %v2249_v35  ;;  %v1197_v4 = vadd.f32 %v1133_v42, %v930_v18  ;;  %v3094_v18 = vld [vmem:[#allocation3_spill] sm:$0xff] }
  0xe9   : > { %v1150_v56 = vadd.f32 %v1086_v61, %v812_v16  ;;  %v1166_v63 = vadd.f32 %v1102_v10, %v852_v52  ;;  %v1134_v6 = vsel %vm1006_vm9, 0.0, %v1070_v19  ;;  %v1087_v20 = vsel %vm959_vm12, 0.0, %v1023_v31 }
  0xea   : > { %v1103_v7 = vsel %vm975_vm13, 0.0, %v1039_v9  ;;  %vm991_vm0 = vcmp.gt.f32.partialorder %v2520_v24, 0.2  ;;  %1245 = vst [vmem:[%s2574_s18 + $0x140] sm:$0xff] %v1181_v40  ;;  %v1055_v36 = vmul.f32 0.2, %v2520_v24 }
  0xeb   : > { %vm1278_vm14 = vcmp.gt.f32.partialorder %v1150_v56, 0.2  ;;  %vm1294_vm15 = vcmp.gt.f32.partialorder %v1166_v63, 0.2  ;;  %1214 = vst [vmem:[%s2574_s18 + $0x48] sm:$0xff] %v1150_v56 }
  0xec   : > { %v1967_v59 = vsel %vm1278_vm14, 1.0, %v2249_v35  ;;  %v1983_v39 = vsel %vm1294_vm15, 1.0, %v2249_v35  ;;  %1230 = vst [vmem:[%s2574_s18 + $0xc8] sm:$0xff] %v1166_v63  ;;  %vm960_vm1 = vcmp.gt.f32.partialorder %v2526_v26, 0.2  ;;  %v1119_v2 = vsel %vm991_vm0, 0.0, %v1055_v36 }
  0xed   : > { %v2072_v41 = vpack.c.bf16 %v1967_v59, %v1966_v17  ;;  %v2096_v47 = vpack.c.bf16 %v1983_v39, %v1982_v58  ;;  %v891_v55 = vpop.f32.mrf.mxu2  ;;  %v931_v5 = vpop.f32.mrf.mxu3  ;;  %vm1309_vm2 = vcmp.gt.f32.partialorder %v1181_v40, 0.2  ;;  %vm1325_vm3 = vcmp.gt.f32.partialorder %v1197_v4, 0.2  ;;  %1261 = vst [vmem:[%s2574_s18 + $0x1c0] sm:$0xff] %v1197_v4  ;;  %v3095_v59 = vld [vmem:[#allocation4_spill] sm:$0xff] }
  0xee   : > { %v892_v12 = vadd.f32 %v2397_v43, %v891_v55  ;;  %v932_v57 = vadd.f32 %v2397_v43, %v931_v5  ;;  %v814_v33 = vpop.f32.mrf.mxu0  ;;  %v854_v34 = vpop.f32.mrf.mxu1  ;;  %v1024_v53 = vmul.f32 0.2, %v2526_v26  ;;  %vm976_vm4 = vcmp.gt.f32.partialorder %v2529_v27, 0.2  ;;  %v2931_v39 = vld [vmem:[%s3057_s2] ss:$0 sm:$0xff] }
  0xef   : > { %2158 = vst [vmem:[%s2623_s25 + $0x20] sm:$0xff] %v2072_v41   ;;  %v815_v21 = vadd.f32 %v2397_v43, %v814_v33  ;;  %v855_v22 = vadd.f32 %v2397_v43, %v854_v34  ;;  %v1040_v49 = vmul.f32 0.2, %v2529_v27  ;;  %v1998_v15 = vsel %vm1309_vm2, 1.0, %v2249_v35  ;;  %v3097_v34 = vld [vmem:[#allocation6_spill] sm:$0xff] }
  0xf0   : > { %2166 = vst [vmem:[%s2623_s25 + $0x60] sm:$0xff] %v2096_v47   ;;  %v1182_v13 = vadd.f32 %v1118_v54, %v892_v12  ;;  %v1198_v14 = vadd.f32 %v1134_v6, %v932_v57  ;;  %v2014_v48 = vsel %vm1325_vm3, 1.0, %v2249_v35  ;;  %v1071_v60 = vmul.f32 0.2, %v2523_v25 }
  0xf1   : > { %v1151_v23 = vadd.f32 %v1087_v20, %v815_v21  ;;  %v1167_v30 = vadd.f32 %v1103_v7, %v855_v22  ;;  %vm1007_vm7 = vcmp.gt.f32.partialorder %v2523_v25, 0.2  ;;  %v1088_v38 = vsel %vm960_vm1, 0.0, %v1024_v53  ;;  %v3096_v20 = vld [vmem:[#allocation5_spill] sm:$0xff] }
  0xf2   : > { %vm1310_vm5 = vcmp.gt.f32.partialorder %v1182_v13, 0.2  ;;  %vm1326_vm6 = vcmp.gt.f32.partialorder %v1198_v14, 0.2  ;;  %vm992_vm8 = vcmp.gt.f32.partialorder %v2532_v28, 0.2 }
  0xf3   : > { %v1999_v50 = vsel %vm1310_vm5, 1.0, %v2249_v35  ;;  %v2015_v0 = vsel %vm1326_vm6, 1.0, %v2249_v35  ;;  %1215 = vst [vmem:[%s2574_s18 + $0x50] sm:$0xff] %v1151_v23  ;;  %v1104_v51 = vsel %vm976_vm4, 0.0, %v1040_v49  ;;  %v1056_v1 = vmul.f32 0.2, %v2532_v28 }
  0xf4   : > { %v2120_v32 = vpack.c.bf16 %v1999_v50, %v1998_v15  ;;  %v2144_v37 = vpack.c.bf16 %v2015_v0, %v2014_v48  ;;  %1231 = vst [vmem:[%s2574_s18 + $0xd0] sm:$0xff] %v1167_v30  ;;  %v1072_v8 = vmul.f32 0.2, %v2535_v29  ;;  %vm1008_vm9 = vcmp.gt.f32.partialorder %v2535_v29, 0.2 }
  0xf5   : > { %v894_v3 = vpop.f32.mrf.mxu2  ;;  %v934_v44 = vpop.f32.mrf.mxu3  ;;  %v1025_v10 = vmul.f32 0.2, %v3093_v62  ;;  %vm1279_vm10 = vcmp.gt.f32.partialorder %v1151_v23, 0.2  ;;  %v1135_v27 = vsel %vm1007_vm7, 0.0, %v1071_v60  ;;  %1246 = vst [vmem:[%s2574_s18 + $0x148] sm:$0xff] %v1182_v13 }
  0xf6   : > { %2174 = vst [vmem:[%s2623_s25 + $0xa0] sm:$0xff] %v2120_v32   ;;  %v895_v45 = vadd.f32 %v2397_v43, %v894_v3  ;;  %v816_v24 = vpop.f32.mrf.mxu0  ;;  %v856_v46 = vpop.f32.mrf.mxu1  ;;  %v935_v16 = vadd.f32 %v2397_v43, %v934_v44  ;;  %vm961_vm11 = vcmp.gt.f32.partialorder %v3093_v62, 0.2  ;;  %vm1295_vm12 = vcmp.gt.f32.partialorder %v1167_v30, 0.2  ;;  %v3099_v44 = vld [vmem:[#allocation8_spill] sm:$0xff] }
  0xf7   : > { %2182 = vst [vmem:[%s2623_s25 + $0xe0] sm:$0xff] %v2144_v37   ;;  %v817_v26 = vadd.f32 %v2397_v43, %v816_v24  ;;  %v857_v61 = vadd.f32 %v2397_v43, %v856_v46  ;;  %v1041_v42 = vmul.f32 0.2, %v3094_v18  ;;  %v1120_v29 = vsel %vm992_vm8, 0.0, %v1056_v1  ;;  %v3100_v1 = vld [vmem:[#allocation9_spill] sm:$0xff]  ;;  %v3101_v62 = vld [vmem:[#allocation10_spill] sm:$0xff] }
  0xf8   : > { %1262 = vst [vmem:[%s2574_s18 + $0x1c8] sm:$0xff] %v1198_v14  ;;  %v1183_v19 = vadd.f32 %v1119_v2, %v895_v45  ;;  %v1136_v56 = vsel %vm1008_vm9, 0.0, %v1072_v8  ;;  %vm977_vm13 = vcmp.gt.f32.partialorder %v3094_v18, 0.2  ;;  %v1968_v43 = vsel %vm1279_vm10, 1.0, %v2249_v35  ;;  %v3098_v14 = vld [vmem:[#allocation7_spill] sm:$0xff] }
  0xf9   : > { %v1152_v52 = vadd.f32 %v1088_v38, %v817_v26  ;;  %v1168_v11 = vadd.f32 %v1104_v51, %v857_v61  ;;  %v1089_v25 = vsel %vm961_vm11, 0.0, %v1025_v10  ;;  %v1984_v63 = vsel %vm1295_vm12, 1.0, %v2249_v35 }
  0xfa   : > { %v1199_v31 = vadd.f32 %v1135_v27, %v935_v16  ;;  %v1105_v4 = vsel %vm977_vm13, 0.0, %v1041_v42  ;;  %vm993_vm0 = vcmp.gt.f32.partialorder %v3095_v59, 0.2  ;;  %v1057_v6 = vmul.f32 0.2, %v3095_v59  ;;  %1247 = vst [vmem:[%s2574_s18 + $0x150] sm:$0xff] %v1183_v19 }
  0xfb   : > { %vm1280_vm14 = vcmp.gt.f32.partialorder %v1152_v52, 0.2  ;;  %vm1296_vm15 = vcmp.gt.f32.partialorder %v1168_v11, 0.2  ;;  %1216 = vst [vmem:[%s2574_s18 + $0x58] sm:$0xff] %v1152_v52  ;;  %v3102_v27 = vld [vmem:[#allocation11_spill] sm:$0xff] }
  0xfc   : > { %v1969_v40 = vsel %vm1280_vm14, 1.0, %v2249_v35  ;;  %v1985_v9 = vsel %vm1296_vm15, 1.0, %v2249_v35  ;;  %1232 = vst [vmem:[%s2574_s18 + $0xd8] sm:$0xff] %v1168_v11  ;;  %vm1009_vm1 = vcmp.gt.f32.partialorder %v3096_v20, 0.2  ;;  %v1121_v0 = vsel %vm993_vm0, 0.0, %v1057_v6 }
  0xfd   : > { %v2075_v28 = vpack.c.bf16 %v1969_v40, %v1968_v43  ;;  %v2099_v17 = vpack.c.bf16 %v1985_v9, %v1984_v63  ;;  %v896_v54 = vpop.f32.mrf.mxu2  ;;  %v936_v58 = vpop.f32.mrf.mxu3  ;;  %v1073_v33 = vmul.f32 0.2, %v3096_v20  ;;  %vm962_vm2 = vcmp.gt.f32.partialorder %v3097_v34, 0.2  ;;  %1263 = vst [vmem:[%s2574_s18 + $0x1d0] sm:$0xff] %v1199_v31 }
  0xfe   : > { %v897_v41 = vadd.f32 %v2931_v39, %v896_v54  ;;  %v937_v47 = vadd.f32 %v2931_v39, %v936_v58  ;;  %v819_v55 = vpop.f32.mrf.mxu0  ;;  %v859_v5 = vpop.f32.mrf.mxu1  ;;  %vm1311_vm3 = vcmp.gt.f32.partialorder %v1183_v19, 0.2  ;;  %vm1327_vm4 = vcmp.gt.f32.partialorder %v1199_v31, 0.2  ;;  %v3103_v58 = vld [vmem:[#allocation12_spill] sm:$0xff] }
  0xff   : > { %2159 = vst [vmem:[%s2623_s25 + $0x28] sm:$0xff] %v2075_v28   ;;  %v820_v12 = vadd.f32 %v2931_v39, %v819_v55  ;;  %v860_v57 = vadd.f32 %v2931_v39, %v859_v5  ;;  %v1026_v13 = vmul.f32 0.2, %v3097_v34  ;;  %v1042_v23 = vmul.f32 0.2, %v3098_v14  ;;  %v3104_v5 = vld [vmem:[#allocation13_spill] sm:$0xff] }
 0x100   : > { %2167 = vst [vmem:[%s2623_s25 + $0x68] sm:$0xff] %v2099_v17   ;;  %v1184_v7 = vadd.f32 %v1120_v29, %v897_v41  ;;  %v1200_v21 = vadd.f32 %v1136_v56, %v937_v47  ;;  %vm978_vm7 = vcmp.gt.f32.partialorder %v3098_v14, 0.2  ;;  %v2000_v30 = vsel %vm1311_vm3, 1.0, %v2249_v35 }
 0x101   : > { %v1153_v22 = vadd.f32 %v1089_v25, %v820_v12  ;;  %v1169_v36 = vadd.f32 %v1105_v4, %v860_v57  ;;  %v2016_v53 = vsel %vm1327_vm4, 1.0, %v2249_v35  ;;  %v1137_v2 = vsel %vm1009_vm1, 0.0, %v1073_v33  ;;  %v3105_v57 = vld [vmem:[#allocation14_spill] sm:$0xff] }
 0x102   : > { %vm1312_vm5 = vcmp.gt.f32.partialorder %v1184_v7, 0.2  ;;  %vm1328_vm6 = vcmp.gt.f32.partialorder %v1200_v21, 0.2  ;;  %v1090_v60 = vsel %vm962_vm2, 0.0, %v1026_v13  ;;  %v1106_v3 = vsel %vm978_vm7, 0.0, %v1042_v23 }
 0x103   : > { %v2001_v49 = vsel %vm1312_vm5, 1.0, %v2249_v35  ;;  %v2017_v15 = vsel %vm1328_vm6, 1.0, %v2249_v35  ;;  %1217 = vst [vmem:[%s2574_s18 + $0x60] sm:$0xff] %v1153_v22  ;;  %vm994_vm8 = vcmp.gt.f32.partialorder %v3099_v44, 0.2 }
 0x104   : > { %v2123_v48 = vpack.c.bf16 %v2001_v49, %v2000_v30  ;;  %v2147_v50 = vpack.c.bf16 %v2017_v15, %v2016_v53  ;;  %1233 = vst [vmem:[%s2574_s18 + $0xe0] sm:$0xff] %v1169_v36  ;;  %v1058_v51 = vmul.f32 0.2, %v3099_v44  ;;  %vm1010_vm9 = vcmp.gt.f32.partialorder %v3100_v1, 0.2 }
 0x105   : > { %v899_v32 = vpop.f32.mrf.mxu2  ;;  %v939_v37 = vpop.f32.mrf.mxu3  ;;  %v1074_v61 = vmul.f32 0.2, %v3100_v1  ;;  %v1027_v10 = vmul.f32 0.2, %v3101_v62  ;;  %vm963_vm10 = vcmp.gt.f32.partialorder %v3101_v62, 0.2 }
 0x106   : > { %2175 = vst [vmem:[%s2623_s25 + $0xa8] sm:$0xff] %v2123_v48   ;;  %v900_v38 = vadd.f32 %v2931_v39, %v899_v32  ;;  %v940_v45 = vadd.f32 %v2931_v39, %v939_v37  ;;  %v821_v24 = vpop.f32.mrf.mxu0  ;;  %v861_v46 = vpop.f32.mrf.mxu1  ;;  %v1043_v52 = vmul.f32 0.2, %v3102_v27  ;;  %vm1281_vm11 = vcmp.gt.f32.partialorder %v1153_v22, 0.2 }
 0x107   : > { %2183 = vst [vmem:[%s2623_s25 + $0xe8] sm:$0xff] %v2147_v50   ;;  %v822_v8 = vadd.f32 %v2931_v39, %v821_v24  ;;  %v862_v26 = vadd.f32 %v2931_v39, %v861_v46  ;;  %vm1297_vm12 = vcmp.gt.f32.partialorder %v1169_v36, 0.2  ;;  %v1122_v19 = vsel %vm994_vm8, 0.0, %v1058_v51  ;;  %v3106_v36 = vld [vmem:[#allocation15_spill] sm:$0xff]  ;;  %v3107_v51 = vld [vmem:[#allocation16_spill] sm:$0xff] }
 0x108   : > { %v1185_v16 = vadd.f32 %v1121_v0, %v900_v38  ;;  %1248 = vst [vmem:[%s2574_s18 + $0x158] sm:$0xff] %v1184_v7  ;;  %v1201_v42 = vadd.f32 %v1137_v2, %v940_v45  ;;  %vm979_vm13 = vcmp.gt.f32.partialorder %v3102_v27, 0.2  ;;  %v1138_v29 = vsel %vm1010_vm9, 0.0, %v1074_v61 }
 0x109   : > { %v1154_v11 = vadd.f32 %v1090_v60, %v822_v8  ;;  %v1170_v18 = vadd.f32 %v1106_v3, %v862_v26  ;;  %1264 = vst [vmem:[%s2574_s18 + $0x1d8] sm:$0xff] %v1200_v21  ;;  %v1091_v56 = vsel %vm963_vm10, 0.0, %v1027_v10  ;;  %v1970_v43 = vsel %vm1281_vm11, 1.0, %v2249_v35  ;;  %v3108_v8 = vld [vmem:[#allocation17_spill] sm:$0xff] }
 0x10a   : > { %1249 = vst [vmem:[%s2574_s18 + $0x160] sm:$0xff] %v1185_v16  ;;  %v1986_v25 = vsel %vm1297_vm12, 1.0, %v2249_v35  ;;  %v1107_v54 = vsel %vm979_vm13, 0.0, %v1043_v52  ;;  %vm995_vm0 = vcmp.gt.f32.partialorder %v3103_v58, 0.2 }
 0x10b   : > { %vm1282_vm14 = vcmp.gt.f32.partialorder %v1154_v11, 0.2  ;;  %vm1298_vm15 = vcmp.gt.f32.partialorder %v1170_v18, 0.2  ;;  %1218 = vst [vmem:[%s2574_s18 + $0x68] sm:$0xff] %v1154_v11 }
 0x10c   : > { %v1971_v63 = vsel %vm1282_vm14, 1.0, %v2249_v35  ;;  %v1987_v31 = vsel %vm1298_vm15, 1.0, %v2249_v35  ;;  %1234 = vst [vmem:[%s2574_s18 + $0xe8] sm:$0xff] %v1170_v18  ;;  %v1059_v55 = vmul.f32 0.2, %v3103_v58 }
 0x10d   : > { %v2078_v40 = vpack.c.bf16 %v1971_v63, %v1970_v43  ;;  %v2102_v9 = vpack.c.bf16 %v1987_v31, %v1986_v25  ;;  %v901_v28 = vpop.f32.mrf.mxu2  ;;  %v941_v17 = vpop.f32.mrf.mxu3  ;;  %v1075_v6 = vmul.f32 0.2, %v3104_v5  ;;  %1265 = vst [vmem:[%s2574_s18 + $0x1e0] sm:$0xff] %v1201_v42  ;;  %vm964_vm1 = vcmp.gt.f32.partialorder %v3105_v57, 0.2 }
 0x10e   : > { %v902_v4 = vadd.f32 %v2931_v39, %v901_v28  ;;  %v942_v59 = vadd.f32 %v2931_v39, %v941_v17  ;;  %v824_v41 = vpop.f32.mrf.mxu0  ;;  %v864_v47 = vpop.f32.mrf.mxu1  ;;  %v1028_v33 = vmul.f32 0.2, %v3105_v57  ;;  %vm1313_vm2 = vcmp.gt.f32.partialorder %v1185_v16, 0.2 }
 0x10f   : > { %2160 = vst [vmem:[%s2623_s25 + $0x30] sm:$0xff] %v2078_v40   ;;  %v825_v20 = vadd.f32 %v2931_v39, %v824_v41  ;;  %v865_v12 = vadd.f32 %v2931_v39, %v864_v47  ;;  %vm1329_vm3 = vcmp.gt.f32.partialorder %v1201_v42, 0.2  ;;  %vm980_vm4 = vcmp.gt.f32.partialorder %v3106_v36, 0.2 }
 0x110   : > { %2168 = vst [vmem:[%s2623_s25 + $0x70] sm:$0xff] %v2102_v9   ;;  %v1186_v34 = vadd.f32 %v1122_v19, %v902_v4  ;;  %v1202_v7 = vadd.f32 %v1138_v29, %v942_v59  ;;  %v1044_v13 = vmul.f32 0.2, %v3106_v36  ;;  %v2002_v14 = vsel %vm1313_vm2, 1.0, %v2249_v35 }
 0x111   : > { %v1155_v21 = vadd.f32 %v1091_v56, %v825_v20  ;;  %v1171_v22 = vadd.f32 %v1107_v54, %v865_v12  ;;  %v2018_v23 = vsel %vm1329_vm3, 1.0, %v2249_v35  ;;  %vm1011_vm7 = vcmp.gt.f32.partialorder %v3104_v5, 0.2 }
 0x112   : > { %vm1314_vm5 = vcmp.gt.f32.partialorder %v1186_v34, 0.2  ;;  %vm1330_vm6 = vcmp.gt.f32.partialorder %v1202_v7, 0.2  ;;  %1250 = vst [vmem:[%s2574_s18 + $0x168] sm:$0xff] %v1186_v34  ;;  %v1123_v50 = vsel %vm995_vm0, 0.0, %v1059_v55 }
 0x113   : > { %v2003_v30 = vsel %vm1314_vm5, 1.0, %v2249_v35  ;;  %v2019_v53 = vsel %vm1330_vm6, 1.0, %v2249_v35  ;;  %1219 = vst [vmem:[%s2574_s18 + $0x70] sm:$0xff] %v1155_v21  ;;  %v1092_v60 = vsel %vm964_vm1, 0.0, %v1028_v33  ;;  %v1108_v44 = vsel %vm980_vm4, 0.0, %v1044_v13 }
 0x114   : > { %v2126_v49 = vpack.c.bf16 %v2003_v30, %v2002_v14  ;;  %v2150_v15 = vpack.c.bf16 %v2019_v53, %v2018_v23  ;;  %1235 = vst [vmem:[%s2574_s18 + $0xf0] sm:$0xff] %v1171_v22  ;;  %v1139_v38 = vsel %vm1011_vm7, 0.0, %v1075_v6  ;;  %v1060_v1 = vmul.f32 0.2, %v3107_v51 }
 0x115   : > { %v904_v48 = vpop.f32.mrf.mxu2  ;;  %v944_v0 = vpop.f32.mrf.mxu3  ;;  %v1076_v26 = vmul.f32 0.2, %v3108_v8  ;;  %1266 = vst [vmem:[%s2574_s18 + $0x1e8] sm:$0xff] %v1202_v7  ;;  %vm1283_vm8 = vcmp.gt.f32.partialorder %v1155_v21, 0.2 }
 0x116   : > { %2176 = vst [vmem:[%s2623_s25 + $0xb0] sm:$0xff] %v2126_v49   ;;  %v905_v32 = vadd.f32 %v2931_v39, %v904_v48  ;;  %v945_v37 = vadd.f32 %v2931_v39, %v944_v0  ;;  %v826_v2 = vpop.f32.mrf.mxu0  ;;  %v866_v3 = vpop.f32.mrf.mxu1  ;;  %vm1299_vm9 = vcmp.gt.f32.partialorder %v1171_v22, 0.2  ;;  %vm996_vm10 = vcmp.gt.f32.partialorder %v3107_v51, 0.2 }
 0x117   : > { %2184 = vst [vmem:[%s2623_s25 + $0xf0] sm:$0xff] %v2150_v15   ;;  %v827_v45 = vadd.f32 %v2931_v39, %v826_v2  ;;  %v867_v24 = vadd.f32 %v2931_v39, %v866_v3  ;;  %vm1012_vm11 = vcmp.gt.f32.partialorder %v3108_v8, 0.2  ;;  %v1972_v16 = vsel %vm1283_vm8, 1.0, %v2249_v35 }
 0x118   : > { %v1187_v46 = vadd.f32 %v1123_v50, %v905_v32  ;;  %v1203_v10 = vadd.f32 %v1139_v38, %v945_v37  ;;  %v1988_v27 = vsel %vm1299_vm9, 1.0, %v2249_v35  ;;  %v1124_v29 = vsel %vm996_vm10, 0.0, %v1060_v1 }
 0x119   : > { %v1156_v61 = vadd.f32 %v1092_v60, %v827_v45  ;;  %v1172_v62 = vadd.f32 %v1108_v44, %v867_v24  ;;  %v1140_v43 = vsel %vm1012_vm11, 0.0, %v1076_v26 }
 0x11a   : > { %1251 = vst [vmem:[%s2574_s18 + $0x170] sm:$0xff] %v1187_v46  ;;  %vm1315_vm14 = vcmp.gt.f32.partialorder %v1187_v46, 0.2  ;;  %vm1331_vm15 = vcmp.gt.f32.partialorder %v1203_v10, 0.2 }
 0x11b   : > { %vm1284_vm12 = vcmp.gt.f32.partialorder %v1156_v61, 0.2  ;;  %vm1300_vm13 = vcmp.gt.f32.partialorder %v1172_v62, 0.2  ;;  %1220 = vst [vmem:[%s2574_s18 + $0x78] sm:$0xff] %v1156_v61  ;;  %v2004_v9 = vsel %vm1315_vm14, 1.0, %v2249_v35 }
 0x11c   : > { %v1973_v52 = vsel %vm1284_vm12, 1.0, %v2249_v35  ;;  %v1989_v11 = vsel %vm1300_vm13, 1.0, %v2249_v35  ;;  %1236 = vst [vmem:[%s2574_s18 + $0xf8] sm:$0xff] %v1172_v62  ;;  %v2020_v28 = vsel %vm1331_vm15, 1.0, %v2249_v35 }
 0x11d   : > { %v2081_v18 = vpack.c.bf16 %v1973_v52, %v1972_v16  ;;  %v2105_v42 = vpack.c.bf16 %v1989_v11, %v1988_v27  ;;  %v906_v19 = vpop.f32.mrf.mxu2  ;;  %v946_v56 = vpop.f32.mrf.mxu3  ;;  %1267 = vst [vmem:[%s2574_s18 + $0x1f0] sm:$0xff] %v1203_v10 }
 0x11e   : > { %v907_v25 = vadd.f32 %v2931_v39, %v906_v19  ;;  %v947_v63 = vadd.f32 %v2931_v39, %v946_v56 }
 0x11f   : > { %2161 = vst [vmem:[%s2623_s25 + $0x38] sm:$0xff] %v2081_v18  }
 0x120   : > { %2169 = vst [vmem:[%s2623_s25 + $0x78] sm:$0xff] %v2105_v42   ;;  %v1188_v31 = vadd.f32 %v1124_v29, %v907_v25  ;;  %v1204_v40 = vadd.f32 %v1140_v43, %v947_v63 }
 0x122   : > { %vm1316_vm0 = vcmp.gt.f32.partialorder %v1188_v31, 0.2  ;;  %1252 = vst [vmem:[%s2574_s18 + $0x178] sm:$0xff] %v1188_v31  ;;  %vm1332_vm1 = vcmp.gt.f32.partialorder %v1204_v40, 0.2 }
 0x123   : > { %v2005_v17 = vsel %vm1316_vm0, 1.0, %v2249_v35  ;;  %1268 = vst [vmem:[%s2574_s18 + $0x1f8] sm:$0xff] %v1204_v40  ;;  %v2021_v39 = vsel %vm1332_vm1, 1.0, %v2249_v35 }
 0x124   : > { %v2129_v54 = vpack.c.bf16 %v2005_v17, %v2004_v9  ;;  %v2153_v58 = vpack.c.bf16 %v2021_v39, %v2020_v28 }
 0x126   : > { %2177 = vst [vmem:[%s2623_s25 + $0xb8] sm:$0xff] %v2129_v54  }
 0x127   : > { %2185 = vst [vmem:[%s2623_s25 + $0xf8] sm:$0xff] %v2153_v58  }
 0x128 PF: > { %s16_s20 = sadd.s32 1, %s2247_s20   ;;  %s3109_s18 = smov %s2243_s19 }
 0x129   : > { %p13_p5 = scmp.ge.s32.totalorder %s16_s20, 6   ;;  %s3110_s19 = smov %s3112_s21 }
 0x12b   :  { %15 = sbr.rel (!%p13_p5) target bundleno = 2 (0x2), region = 87 }

// kernel: closed_call.130
= control target key start
LH: loop header
LB: loop body
LE: loop exit
PB: predicated region body
PF: predicated region fallthrough
CT: control target
= control target key end

     0   :  { %s3062_s30 = smov 0   ;;  %s3064_s10 = smov 0   ;;  %s4082_s0 = inlined_call_operand.vmem [shape: bf16[2,392,96], index: 0, kind: input, shape index: {}]   ;;  %s4083_s1 = inlined_call_operand.vmem [shape: bf16[2,96,128], index: 1, kind: input, shape index: {}]   ;;  %s4084_s2 = inlined_call_operand.vmem [shape: f32[2,1,128], index: 2, kind: input, shape index: {}]   ;;  %s4085_s3 = inlined_call_operand.vmem [shape: f32[2,392,128], index: 3, kind: input, shape index: {}, may-alias: {3,7}]   ;;  %s4086_s4 = inlined_call_operand.vmem [shape: bf16[2,128,128], index: 4, kind: input, shape index: {}]   ;;  %s4087_s5 = inlined_call_operand.vmem [shape: f32[2,1,128], index: 5, kind: input, shape index: {}]   ;;  %s4088_s6 = inlined_call_operand.vmem [shape: f32[2,392,128], index: 6, kind: input, shape index: {}, may-alias: {6,8}]   ;;  %s4089_s7 = inlined_call_operand.vmem [shape: f32[2,392,128], index: 7, kind: output, shape index: {0}, may-alias: {3,7}]   ;;  %s4090_s8 = inlined_call_operand.vmem [shape: f32[2,392,128], index: 8, kind: output, shape index: {1}, may-alias: {6,8}]   ;;  %s4091_s9 = inlined_call_operand.vmem [shape: bf16[2,392,128], index: 9, kind: output, shape index: {2}]  }
   0x1   :  { %s3066_s11 = smov 0  }
   0x2 LB: > { %s32_s12 = sadd.s32 1, %s3004_s10  ;;  %p2468_p0 = scmp.ge.s32.totalorder %s3008_s11, 1  ;;  %s3008_s11 = sphi %s3066_s11, %s20_s11   ;;  %s3004_s10 = sphi %s3064_s10, %s4186_s10   ;;  %s3000_s30 = sphi %s3062_s30, %s4185_s30  }
   0x3   : > { %p34_p1 = scmp.ge.s32.totalorder %s32_s12, 2  ;;  %p387_p2 = scmp.lt.s32.totalorder %s3008_s11, 3 }
   0x5   : > { %s4188_s12 = smov (%p34_p1, %s32_s12), 0  ;;  %p388_p3 = pnand %p2468_p0, %p387_p2 }
   0x7   : > { %391 = sbr.rel (%p388_p3) target bundleno = 707 (0x2c3), region = 48 }
   0xc   : > { %p484_p4 = scmp.lt.s32.totalorder %s3000_s30, 1  ;;  %vm833_vm0 = vcmask 785408  }
   0xe   : > { %s4190_s30 = smov (!%p484_p4, %s3000_s30), 1 }
   0xf   : > { %s2954_s13 = smul.u32 48, %s4190_s30  ;;  %s3090_s19 = scalar_lea.vmem %s4084_s2, %s4190_s30 }
  0x10   : > { %s2953_s20 = smul.u32 196, %s4190_s30  ;;  %s2805_s24 = sshll.u32 %s4190_s30, 6  ;;  %v3131_v24 = vld [vmem:[%s3090_s19] ss:$0 sm:$0xff] }
  0x11   : > { %s497_s16 = scalar_lea.vmem %s4083_s1, %s2954_s13  ;;  %s515_s27 = scalar_lea.vmem %s4086_s4, %s2805_s24 }
  0x12   : > { %v2835_v0 = vld [vmem:[%s497_s16 + $0x28] sm:$0xff]  ;;  %v2834_v1 = vld [vmem:[%s497_s16 + $0x20] sm:$0xff]  ;;  %v2833_v2 = vld [vmem:[%s497_s16 + $0x18] sm:$0xff]  ;;  %s3098_s23 = scalar_lea.vmem %s4082_s0, %s2953_s20  ;;  %s3120_s28 = smul.u32 392, %s4190_s30 }
  0x13   : > { %911 = vmatpush.bf16.msra.mxu0 %v2835_v0  ;;  %2939 = vmatpush.bf16.msra.mxu3 %v2835_v0  ;;  %v2832_v3 = vld [vmem:[%s497_s16 + $0x10] sm:$0xff]  ;;  %v2831_v4 = vld [vmem:[%s497_s16 + $0x8] sm:$0xff]  ;;  %v2830_v5 = vld [vmem:[%s497_s16] sm:$0xff]  ;;  %s3290_s22 = scalar_lea.vmem %s4087_s5, %s4190_s30  ;;  %s3577_s15 = scalar_lea.vmem %s4091_s9, %s2953_s20 }
  0x14   : > { %v2806_v6 = vld [vmem:[%s3098_s23] sm:$0xff]  ;;  %v2807_v7 = vld [vmem:[%s3098_s23 + $0x8] sm:$0xff]  ;;  %v2808_v8 = vld [vmem:[%s3098_s23 + $0x10] sm:$0xff]  ;;  %s3127_s14 = scalar_lea.vmem %s4085_s3, %s3120_s28  ;;  %s3272_s17 = scalar_lea.vmem %s4089_s7, %s3120_s28 }
  0x15   : > { %v2809_v9 = vld [vmem:[%s3098_s23 + $0x18] sm:$0xff]  ;;  %v2810_v10 = vld [vmem:[%s3098_s23 + $0x20] sm:$0xff]  ;;  %v2811_v12 = vld [vmem:[%s3098_s23 + $0x28] sm:$0xff]  ;;  %s3384_s26 = scalar_lea.vmem %s4088_s6, %s3120_s28  ;;  %s3546_s13 = scalar_lea.vmem %s4090_s8, %s3120_s28 }
  0x16   : > { %v2843_v11 = vld [vmem:[%s515_s27 + $0x38] sm:$0xff]  ;;  %v2842_v13 = vld [vmem:[%s515_s27 + $0x30] sm:$0xff]  ;;  %v2841_v14 = vld [vmem:[%s515_s27 + $0x28] sm:$0xff] }
  0x17   : > { %912 = vmatpush.bf16.msra.mxu0 %v2834_v1  ;;  %2940 = vmatpush.bf16.msra.mxu3 %v2834_v1  ;;  %v2840_v15 = vld [vmem:[%s515_s27 + $0x20] sm:$0xff]  ;;  %v2839_v16 = vld [vmem:[%s515_s27 + $0x18] sm:$0xff]  ;;  %v2812_v17 = vld [vmem:[%s3098_s23 + $0x30] sm:$0xff] }
  0x18   : > { %1576 = vmatpush.bf16.msra.mxu1 %v2843_v11  ;;  %2945 = vmatpush.bf16.msra.mxu2 %v2843_v11  ;;  %v2838_v18 = vld [vmem:[%s515_s27 + $0x10] sm:$0xff]  ;;  %v2837_v19 = vld [vmem:[%s515_s27 + $0x8] sm:$0xff]  ;;  %v2836_v20 = vld [vmem:[%s515_s27] sm:$0xff] }
  0x19   : > { %v2813_v21 = vld [vmem:[%s3098_s23 + $0x38] sm:$0xff]  ;;  %v622_v22 = vld [vmem:[%s3127_s14] sm:$0xff]  ;;  %v623_v28 = vld [vmem:[%s3127_s14 + $0x8] sm:$0xff] }
  0x1a   : > { %v1091_v23 = vmul.f32 0.2, %v622_v22  ;;  %vm1042_vm1 = vcmp.gt.f32.partialorder %v622_v22, 0.2  ;;  %v2814_v25 = vld [vmem:[%s3098_s23 + $0x40] sm:$0xff]  ;;  %v3136_v29 = vld [vmem:[%s3127_s14 + $0x10] sm:$0xff] }
  0x1b   : > { %913 = vmatpush.bf16.msra.mxu0 %v2833_v2  ;;  %2941 = vmatpush.bf16.msra.mxu3 %v2833_v2  ;;  %v3139_v30 = vld [vmem:[%s3127_s14 + $0x18] sm:$0xff]  ;;  %v3142_v31 = vld [vmem:[%s3127_s14 + $0x20] sm:$0xff]  ;;  %v3145_v32 = vld [vmem:[%s3127_s14 + $0x28] sm:$0xff]  ;;  %vm1043_vm2 = vcmp.gt.f32.partialorder %v623_v28, 0.2 }
  0x1c   : > { %1577 = vmatpush.bf16.msra.mxu1 %v2842_v13  ;;  %2946 = vmatpush.bf16.msra.mxu2 %v2842_v13  ;;  %v1140_v27 = vsel %vm1042_vm1, 0.0, %v1091_v23  ;;  %v3148_v33 = vld [vmem:[%s3127_s14 + $0x30] sm:$0xff]  ;;  %v3151_v34 = vld [vmem:[%s3127_s14 + $0x38] sm:$0xff]  ;;  %v3154_v35 = vld [vmem:[%s3127_s14 + $0x40] sm:$0xff]  ;;  %vm1044_vm3 = vcmp.gt.f32.partialorder %v3136_v29, 0.2 }
  0x1d   : > { %v3157_v36 = vld [vmem:[%s3127_s14 + $0x48] sm:$0xff]  ;;  %v3160_v37 = vld [vmem:[%s3127_s14 + $0x50] sm:$0xff]  ;;  %v3163_v38 = vld [vmem:[%s3127_s14 + $0x58] sm:$0xff]  ;;  %vm1045_vm7 = vcmp.gt.f32.partialorder %v3139_v30, 0.2 }
  0x1e   : > { %v3166_v39 = vld [vmem:[%s3127_s14 + $0x60] sm:$0xff]  ;;  %v3169_v40 = vld [vmem:[%s3127_s14 + $0x68] sm:$0xff]  ;;  %v3172_v41 = vld [vmem:[%s3127_s14 + $0x70] sm:$0xff]  ;;  %vm1046_vm8 = vcmp.gt.f32.partialorder %v3142_v31, 0.2 }
  0x1f   : > { %914 = vmatpush.bf16.msra.mxu0 %v2832_v3  ;;  %2942 = vmatpush.bf16.msra.mxu3 %v2832_v3  ;;  %v3175_v42 = vld [vmem:[%s3127_s14 + $0x78] sm:$0xff]  ;;  %v3178_v43 = vld [vmem:[%s3127_s14 + $0x80] sm:$0xff]  ;;  %v3181_v44 = vld [vmem:[%s3127_s14 + $0x88] sm:$0xff]  ;;  %vm1047_vm12 = vcmp.gt.f32.partialorder %v3145_v32, 0.2 }
  0x20   : > { %1578 = vmatpush.bf16.msra.mxu1 %v2841_v14  ;;  %2947 = vmatpush.bf16.msra.mxu2 %v2841_v14  ;;  %v3184_v45 = vld [vmem:[%s3127_s14 + $0x90] sm:$0xff]  ;;  %v3187_v46 = vld [vmem:[%s3127_s14 + $0x98] sm:$0xff]  ;;  %v3190_v47 = vld [vmem:[%s3127_s14 + $0xa0] sm:$0xff]  ;;  %v1092_v14 = vmul.f32 0.2, %v623_v28 }
  0x21   : > { %v3193_v48 = vld [vmem:[%s3127_s14 + $0xa8] sm:$0xff]  ;;  %v3196_v49 = vld [vmem:[%s3127_s14 + $0xb0] sm:$0xff]  ;;  %v3199_v50 = vld [vmem:[%s3127_s14 + $0xb8] sm:$0xff]  ;;  %vm1048_vm13 = vcmp.gt.f32.partialorder %v3148_v33, 0.2 }
  0x22   : > { %v3202_v51 = vld [vmem:[%s3127_s14 + $0xc0] sm:$0xff]  ;;  %v3205_v52 = vld [vmem:[%s3127_s14 + $0xc8] sm:$0xff]  ;;  %v3208_v53 = vld [vmem:[%s3127_s14 + $0xd0] sm:$0xff] }
  0x23   : > { %915 = vmatpush.bf16.msra.mxu0 %v2831_v4  ;;  %2943 = vmatpush.bf16.msra.mxu3 %v2831_v4  ;;  %v3211_v54 = vld [vmem:[%s3127_s14 + $0xd8] sm:$0xff]  ;;  %v3214_v55 = vld [vmem:[%s3127_s14 + $0xe0] sm:$0xff]  ;;  %v3217_v56 = vld [vmem:[%s3127_s14 + $0xe8] sm:$0xff] }
  0x24   : > { %1579 = vmatpush.bf16.msra.mxu1 %v2840_v15  ;;  %2948 = vmatpush.bf16.msra.mxu2 %v2840_v15  ;;  %v3220_v57 = vld [vmem:[%s3127_s14 + $0xf0] sm:$0xff]  ;;  %v3223_v58 = vld [vmem:[%s3127_s14 + $0xf8] sm:$0xff]  ;;  %v3226_v59 = vld [vmem:[%s3127_s14 + $0x100] sm:$0xff] }
  0x25   : > { %v3229_v60 = vld [vmem:[%s3127_s14 + $0x108] sm:$0xff]  ;;  %v3232_v61 = vld [vmem:[%s3127_s14 + $0x110] sm:$0xff]  ;;  %v3235_v62 = vld [vmem:[%s3127_s14 + $0x118] sm:$0xff] }
  0x26   : > { %v3238_v63 = vld [vmem:[%s3127_s14 + $0x120] sm:$0xff]  ;;  %v3241_v0 = vld [vmem:[%s3127_s14 + $0x128] sm:$0xff]  ;;  %v3244_v1 = vld [vmem:[%s3127_s14 + $0x130] sm:$0xff] }
  0x27   : > { %916 = vmatpush.bf16.msra.mxu0 %v2830_v5  ;;  %2944 = vmatpush.bf16.msra.mxu3 %v2830_v5  ;;  %v3247_v2 = vld [vmem:[%s3127_s14 + $0x138] sm:$0xff]  ;;  %v3250_v3 = vld [vmem:[%s3127_s14 + $0x140] sm:$0xff]  ;;  %v3253_v4 = vld [vmem:[%s3127_s14 + $0x148] sm:$0xff] }
  0x28   : > { %1580 = vmatpush.bf16.msra.mxu1 %v2839_v16  ;;  %2949 = vmatpush.bf16.msra.mxu2 %v2839_v16  ;;  %v3256_v5 = vld [vmem:[%s3127_s14 + $0x150] sm:$0xff]  ;;  %v3278_v11 = vld [vmem:[%s3127_s14 + $0x178] sm:$0xff]  ;;  %v1141_v16 = vsel %vm1043_vm2, 0.0, %v1092_v14  ;;  %v1095_v14 = vmul.f32 0.2, %v3142_v31 }
  0x29   : > { %4127 = vst [vmem:[#allocation5_spill] sm:$0xff] %v3278_v11  ;;  %v1096_v31 = vmul.f32 0.2, %v3145_v32  ;;  %v2817_v32 = vld [vmem:[%s3098_s23 + $0x58] sm:$0xff]  ;;  %vm1049_vm2 = vcmp.gt.f32.partialorder %v3151_v34, 0.2 }
  0x2a   : > { %2598 = vmatmul.msk.bf16.vlgmr.msra.gmra.mxu0 %vm833_vm0, %v2806_v6  ;;  %v3483_v11 = vld [vmem:[%s3384_s26 + $0xe0] sm:$0xff] }
  0x2b   : > { %4135 = vst [vmem:[#allocation13_spill] sm:$0xff] %v3483_v11  ;;  %v3507_v11 = vld [vmem:[%s3384_s26 + $0x120] sm:$0xff] }
  0x2c   : > { %1581 = vmatpush.bf16.msra.mxu1 %v2838_v18  ;;  %2950 = vmatpush.bf16.msra.mxu2 %v2838_v18 }
  0x30   : > { %1582 = vmatpush.bf16.msra.mxu1 %v2837_v19  ;;  %2951 = vmatpush.bf16.msra.mxu2 %v2837_v19  ;;  %v1093_v19 = vmul.f32 0.2, %v3136_v29 }
  0x32   : > { %v1142_v23 = vsel %vm1044_vm3, 0.0, %v1093_v19  ;;  %v2819_v19 = vld [vmem:[%s3098_s23 + $0x68] sm:$0xff]  ;;  %vm1050_vm3 = vcmp.gt.f32.partialorder %v3154_v35, 0.2 }
  0x33   : > { %2611 = vmatmul.msk.bf16.vlgmr.msra.gmra.mxu3 %vm833_vm0, %v2819_v19 }
  0x34   : > { %1583 = vmatpush.bf16.msra.mxu1 %v2836_v20  ;;  %2952 = vmatpush.bf16.msra.mxu2 %v2836_v20  ;;  %v4092_v20 = vmov 1.0|1.0  }
  0x3a   : > { %2599 = vmatmul.msk.bf16.gmra.mxu0 %vm833_vm0, %v2807_v7  ;;  %v3260_v7 = vld [vmem:[%s3127_s14 + $0x158] sm:$0xff] }
  0x4a   : > { %2600 = vmatmul.msk.bf16.gmra.mxu0 %vm833_vm0, %v2808_v8  ;;  %v3263_v8 = vld [vmem:[%s3127_s14 + $0x160] sm:$0xff] }
  0x4b   : > { %4124 = vst [vmem:[#allocation2_spill] sm:$0xff] %v3263_v8  ;;  %v3510_v8 = vld [vmem:[%s3384_s26 + $0x128] sm:$0xff] }
  0x4c   : > { %4143 = vst [vmem:[#allocation21_spill] sm:$0xff] %v3510_v8 }
  0x5a   : > { %2601 = vmatmul.msk.bf16.gmra.mxu0 %vm833_vm0, %v2809_v9  ;;  %v3266_v9 = vld [vmem:[%s3127_s14 + $0x168] sm:$0xff] }
  0x5b   : > { %4125 = vst [vmem:[#allocation3_spill] sm:$0xff] %v3266_v9  ;;  %v3489_v9 = vld [vmem:[%s3384_s26 + $0xf0] sm:$0xff] }
  0x5c   : > { %4137 = vst [vmem:[#allocation15_spill] sm:$0xff] %v3489_v9  ;;  %v3525_v9 = vld [vmem:[%s3384_s26 + $0x150] sm:$0xff] }
  0x5d   : > { %4147 = vst [vmem:[#allocation25_spill] sm:$0xff] %v3525_v9 }
  0x6a   : > { %2602 = vmatmul.msk.bf16.gmra.mxu0 %vm833_vm0, %v2810_v10  ;;  %v3275_v10 = vld [vmem:[%s3127_s14 + $0x170] sm:$0xff] }
  0x6b   : > { %4126 = vst [vmem:[#allocation4_spill] sm:$0xff] %v3275_v10  ;;  %v3486_v10 = vld [vmem:[%s3384_s26 + $0xe8] sm:$0xff] }
  0x6c   : > { %4136 = vst [vmem:[#allocation14_spill] sm:$0xff] %v3486_v10  ;;  %v3513_v10 = vld [vmem:[%s3384_s26 + $0x130] sm:$0xff] }
  0x7a   : > { %2603 = vmatmul.msk.bf16.gmra.mxu0 %vm833_vm0, %v2811_v12  ;;  %v3281_v12 = vld [vmem:[%s3127_s14 + $0x180] sm:$0xff] }
  0x7b   : > { %4128 = vst [vmem:[#allocation6_spill] sm:$0xff] %v3281_v12  ;;  %v3480_v12 = vld [vmem:[%s3384_s26 + $0xd8] sm:$0xff] }
  0x7c   : > { %4134 = vst [vmem:[#allocation12_spill] sm:$0xff] %v3480_v12  ;;  %v3504_v12 = vld [vmem:[%s3384_s26 + $0x118] sm:$0xff] }
  0x7d   : > { %4142 = vst [vmem:[#allocation20_spill] sm:$0xff] %v3504_v12  ;;  %v3531_v12 = vld [vmem:[%s3384_s26 + $0x160] sm:$0xff] }
  0x7e   : > { %4149 = vst [vmem:[#allocation27_spill] sm:$0xff] %v3531_v12  ;;  %v3552_v12 = vld [vmem:[%s3384_s26 + $0x180] sm:$0xff] }
  0x7f   : > { %4153 = vst [vmem:[#allocation31_spill] sm:$0xff] %v3552_v12 }
  0x8a   : > { %2604 = vmatmul.msk.bf16.gmra.mxu0 %vm833_vm0, %v2812_v17 }
  0x9a   : > { %2605 = vmatmul.msk.bf16.gmra.mxu0 %vm833_vm0, %v2813_v21  ;;  %v2815_v21 = vld [vmem:[%s3098_s23 + $0x48] sm:$0xff] }
  0xa7   : > { %v918_v26 = vpop.f32.mrf.mxu0 }
  0xa8   : > { %v919_v6 = vadd.f32 %v3131_v24, %v918_v26 }
  0xaa   : > { %v1189_v13 = vadd.f32 %v1140_v27, %v919_v6  ;;  %2606 = vmatmul.msk.bf16.gmra.mxu0 %vm833_vm0, %v2814_v25  ;;  %v1094_v27 = vmul.f32 0.2, %v3139_v30 }
  0xac   : > { %1238 = vst [vmem:[%s3272_s17] sm:$0xff] %v1189_v13  ;;  %vm1287_vm4 = vcmp.gt.f32.partialorder %v1189_v13, 0.2  ;;  %v1143_v29 = vsel %vm1045_vm7, 0.0, %v1094_v27  ;;  %vm1051_vm7 = vcmp.gt.f32.partialorder %v3157_v36, 0.2 }
  0xaf   : > { %v920_v15 = vpop.f32.mrf.mxu0 }
  0xb0   : > { %v921_v17 = vadd.f32 %v3131_v24, %v920_v15  ;;  %v2816_v15 = vld [vmem:[%s3098_s23 + $0x50] sm:$0xff] }
  0xb2   : > { %v1190_v18 = vadd.f32 %v1141_v16, %v921_v17  ;;  %v1144_v16 = vsel %vm1046_vm8, 0.0, %v1095_v14  ;;  %vm1052_vm8 = vcmp.gt.f32.partialorder %v3160_v37, 0.2 }
  0xb4   : > { %vm1288_vm5 = vcmp.gt.f32.partialorder %v1190_v18, 0.2  ;;  %1239 = vst [vmem:[%s3272_s17 + $0x8] sm:$0xff] %v1190_v18 }
  0xb5   : > { %vm2704_vm6 = vmpackc.low %vm1288_vm5, %vm1287_vm4 }
  0xb6   : > { %2705 = vmatmul.msk.bf16.vlgmr.msra.gmra.mxu1 %vm2704_vm6, %v4092_v20 }
  0xb7   : > { %v923_v22 = vpop.f32.mrf.mxu0 }
  0xb8   : > { %v924_v25 = vadd.f32 %v3131_v24, %v923_v22  ;;  %v1145_v22 = vsel %vm1047_vm12, 0.0, %v1096_v31  ;;  %vm1053_vm12 = vcmp.gt.f32.partialorder %v3163_v38, 0.2 }
  0xba   : > { %v1191_v26 = vadd.f32 %v1142_v23, %v924_v25  ;;  %2607 = vmatmul.msk.bf16.gmra.mxu0 %vm833_vm0, %v2815_v21 }
  0xbc   : > { %1240 = vst [vmem:[%s3272_s17 + $0x10] sm:$0xff] %v1191_v26  ;;  %vm1289_vm9 = vcmp.gt.f32.partialorder %v1191_v26, 0.2  ;;  %v1097_v26 = vmul.f32 0.2, %v3148_v33 }
  0xbd   : > { %v1098_v33 = vmul.f32 0.2, %v3151_v34  ;;  %v2818_v34 = vld [vmem:[%s3098_s23 + $0x60] sm:$0xff] }
  0xbf   : > { %v925_v28 = vpop.f32.mrf.mxu0 }
  0xc0   : > { %v926_v6 = vadd.f32 %v3131_v24, %v925_v28  ;;  %v1146_v28 = vsel %vm1048_vm13, 0.0, %v1097_v26  ;;  %vm1054_vm13 = vcmp.gt.f32.partialorder %v3166_v39, 0.2 }
  0xc2   : > { %v1192_v13 = vadd.f32 %v1143_v29, %v926_v6 }
  0xc4   : > { %vm1290_vm10 = vcmp.gt.f32.partialorder %v1192_v13, 0.2  ;;  %1241 = vst [vmem:[%s3272_s17 + $0x18] sm:$0xff] %v1192_v13  ;;  %v2820_v13 = vld [vmem:[%s3098_s23 + $0x70] sm:$0xff] }
  0xc5   : > { %vm2706_vm11 = vmpackc.low %vm1290_vm10, %vm1289_vm9  ;;  %2612 = vmatmul.msk.bf16.gmra.mxu3 %vm833_vm0, %v2820_v13  ;;  %v2822_v13 = vld [vmem:[%s3098_s23 + $0x80] sm:$0xff] }
  0xc6   : > { %2707 = vmatmul.msk.bf16.gmra.mxu1 %vm2706_vm11, %v4092_v20 }
  0xc7   : > { %v928_v30 = vpop.f32.mrf.mxu0 }
  0xc8   : > { %v929_v17 = vadd.f32 %v3131_v24, %v928_v30 }
  0xca   : > { %v1193_v18 = vadd.f32 %v1144_v16, %v929_v17  ;;  %2608 = vmatmul.msk.bf16.gmra.mxu0 %vm833_vm0, %v2816_v15  ;;  %v1147_v15 = vsel %vm1049_vm2, 0.0, %v1098_v33  ;;  %v1099_v17 = vmul.f32 0.2, %v3154_v35  ;;  %v1102_v33 = vmul.f32 0.2, %v3163_v38 }
  0xcb   : > { %vm1055_vm2 = vcmp.gt.f32.partialorder %v3169_v40, 0.2 }
  0xcc   : > { %1242 = vst [vmem:[%s3272_s17 + $0x20] sm:$0xff] %v1193_v18  ;;  %vm1291_vm14 = vcmp.gt.f32.partialorder %v1193_v18, 0.2  ;;  %v1148_v19 = vsel %vm1050_vm3, 0.0, %v1099_v17  ;;  %vm1056_vm3 = vcmp.gt.f32.partialorder %v3172_v41, 0.2 }
  0xcf   : > { %v930_v21 = vpop.f32.mrf.mxu0 }
  0xd0   : > { %v931_v23 = vadd.f32 %v3131_v24, %v930_v21 }
  0xd2   : > { %v1194_v25 = vadd.f32 %v1145_v22, %v931_v23  ;;  %v2821_v22 = vld [vmem:[%s3098_s23 + $0x78] sm:$0xff]  ;;  %v1100_v23 = vmul.f32 0.2, %v3157_v36 }
  0xd4   : > { %vm1292_vm15 = vcmp.gt.f32.partialorder %v1194_v25, 0.2  ;;  %1243 = vst [vmem:[%s3272_s17 + $0x28] sm:$0xff] %v1194_v25  ;;  %v1149_v25 = vsel %vm1051_vm7, 0.0, %v1100_v23  ;;  %vm1057_vm7 = vcmp.gt.f32.partialorder %v3175_v42, 0.2 }
  0xd5   : > { %vm2708_vm1 = vmpackc.low %vm1292_vm15, %vm1291_vm14  ;;  %2613 = vmatmul.msk.bf16.gmra.mxu3 %vm833_vm0, %v2821_v22 }
  0xd6   : > { %2709 = vmatmul.msk.bf16.gmra.mxu1 %vm2708_vm1, %v4092_v20 }
  0xd7   : > { %v933_v27 = vpop.f32.mrf.mxu0 }
  0xd8   : > { %v934_v29 = vadd.f32 %v3131_v24, %v933_v27  ;;  %v1101_v27 = vmul.f32 0.2, %v3160_v37 }
  0xda   : > { %v1195_v6 = vadd.f32 %v1146_v28, %v934_v29  ;;  %2609 = vmatmul.msk.bf16.gmra.mxu0 %vm833_vm0, %v2817_v32  ;;  %v1150_v28 = vsel %vm1052_vm8, 0.0, %v1101_v27  ;;  %v2824_v27 = vld [vmem:[%s3098_s23 + $0x90] sm:$0xff]  ;;  %vm1058_vm8 = vcmp.gt.f32.partialorder %v3178_v43, 0.2 }
  0xdc   : > { %1244 = vst [vmem:[%s3272_s17 + $0x30] sm:$0xff] %v1195_v6  ;;  %vm1293_vm4 = vcmp.gt.f32.partialorder %v1195_v6, 0.2 }
  0xdf   : > { %v935_v14 = vpop.f32.mrf.mxu0 }
  0xe0   : > { %v936_v30 = vadd.f32 %v3131_v24, %v935_v14  ;;  %v1151_v14 = vsel %vm1053_vm12, 0.0, %v1102_v33  ;;  %vm1059_vm12 = vcmp.gt.f32.partialorder %v3181_v44, 0.2 }
  0xe2   : > { %v1196_v16 = vadd.f32 %v1147_v15, %v936_v30 }
  0xe4   : > { %vm1294_vm5 = vcmp.gt.f32.partialorder %v1196_v16, 0.2  ;;  %1245 = vst [vmem:[%s3272_s17 + $0x38] sm:$0xff] %v1196_v16  ;;  %v1103_v16 = vmul.f32 0.2, %v3166_v39 }
  0xe5   : > { %vm2710_vm6 = vmpackc.low %vm1294_vm5, %vm1293_vm4  ;;  %2614 = vmatmul.msk.bf16.gmra.mxu3 %vm833_vm0, %v2822_v13  ;;  %v1107_v13 = vmul.f32 0.2, %v3178_v43  ;;  %v2825_v43 = vld [vmem:[%s3098_s23 + $0x98] sm:$0xff] }
  0xe6   : > { %2711 = vmatmul.msk.bf16.gmra.mxu1 %vm2710_vm6, %v4092_v20  ;;  %v1152_v17 = vsel %vm1054_vm13, 0.0, %v1103_v16 }
  0xe7   : > { %v938_v18 = vpop.f32.mrf.mxu0  ;;  %v1156_v33 = vsel %vm1058_vm8, 0.0, %v1107_v13  ;;  %v3444_v13 = vld [vmem:[%s3384_s26 + $0x78] sm:$0xff] }
  0xe8   : > { %v939_v31 = vadd.f32 %v3131_v24, %v938_v18 }
  0xea   : > { %v1197_v21 = vadd.f32 %v1148_v19, %v939_v31  ;;  %2610 = vmatmul.msk.bf16.gmra.mxu0 %vm833_vm0, %v2818_v34  ;;  %v2823_v19 = vld [vmem:[%s3098_s23 + $0x88] sm:$0xff]  ;;  %v1104_v31 = vmul.f32 0.2, %v3169_v40 }
  0xec   : > { %1246 = vst [vmem:[%s3272_s17 + $0x40] sm:$0xff] %v1197_v21  ;;  %vm1295_vm9 = vcmp.gt.f32.partialorder %v1197_v21, 0.2  ;;  %v1153_v21 = vsel %vm1055_vm2, 0.0, %v1104_v31 }
  0xef   : > { %v940_v35 = vpop.f32.mrf.mxu0 }
  0xf0   : > { %v941_v26 = vadd.f32 %v3131_v24, %v940_v35  ;;  %v1105_v35 = vmul.f32 0.2, %v3172_v41 }
  0xf2   : > { %v1198_v32 = vadd.f32 %v1149_v25, %v941_v26  ;;  %v1154_v25 = vsel %vm1056_vm3, 0.0, %v1105_v35  ;;  %v3411_v35 = vld [vmem:[%s3384_s26 + $0x20] sm:$0xff] }
  0xf4   : > { %vm1296_vm10 = vcmp.gt.f32.partialorder %v1198_v32, 0.2  ;;  %1247 = vst [vmem:[%s3272_s17 + $0x48] sm:$0xff] %v1198_v32 }
  0xf5   : > { %vm2712_vm11 = vmpackc.low %vm1296_vm10, %vm1295_vm9  ;;  %2615 = vmatmul.msk.bf16.gmra.mxu3 %vm833_vm0, %v2823_v19  ;;  %v1109_v19 = vmul.f32 0.2, %v3184_v45 }
  0xf6   : > { %2713 = vmatmul.msk.bf16.gmra.mxu1 %vm2712_vm11, %v4092_v20 }
  0xf7   : > { %v943_v36 = vpop.f32.mrf.mxu0 }
  0xf8   : > { %v944_v29 = vadd.f32 %v3131_v24, %v943_v36  ;;  %v1106_v36 = vmul.f32 0.2, %v3175_v42 }
  0xfa   : > { %v1199_v6 = vadd.f32 %v1150_v28, %v944_v29  ;;  %v1155_v28 = vsel %vm1057_vm7, 0.0, %v1106_v36  ;;  %v3429_v36 = vld [vmem:[%s3384_s26 + $0x50] sm:$0xff] }
  0xfc   : > { %1248 = vst [vmem:[%s3272_s17 + $0x50] sm:$0xff] %v1199_v6  ;;  %vm1297_vm14 = vcmp.gt.f32.partialorder %v1199_v6, 0.2 }
  0xff   : > { %v945_v37 = vpop.f32.mrf.mxu0 }
 0x100   : > { %v946_v15 = vadd.f32 %v3131_v24, %v945_v37 }
 0x102   : > { %v1200_v30 = vadd.f32 %v1151_v14, %v946_v15  ;;  %v1108_v15 = vmul.f32 0.2, %v3181_v44 }
 0x104   : > { %vm1298_vm15 = vcmp.gt.f32.partialorder %v1200_v30, 0.2  ;;  %1249 = vst [vmem:[%s3272_s17 + $0x58] sm:$0xff] %v1200_v30  ;;  %v1476_v30 = vld [vmem:[%s3384_s26] sm:$0xff] }
 0x105   : > { %vm2714_vm1 = vmpackc.low %vm1298_vm15, %vm1297_vm14  ;;  %2616 = vmatmul.msk.bf16.gmra.mxu3 %vm833_vm0, %v2824_v27  ;;  %vm1709_vm13 = vcmp.gt.f32.partialorder %v1476_v30, 0.2  ;;  %vm1060_vm14 = vcmp.gt.f32.partialorder %v3184_v45, 0.2  ;;  %v3426_v27 = vld [vmem:[%s3384_s26 + $0x48] sm:$0xff] }
 0x106   : > { %2715 = vmatmul.msk.bf16.gmra.mxu1 %vm2714_vm1, %v4092_v20 }
 0x107   : > { %v948_v38 = vpop.f32.mrf.mxu0 }
 0x108   : > { %v949_v34 = vadd.f32 %v3131_v24, %v948_v38  ;;  %v1157_v38 = vsel %vm1059_vm12, 0.0, %v1108_v15  ;;  %v3459_v15 = vld [vmem:[%s3384_s26 + $0xa0] sm:$0xff] }
 0x10a   : > { %v1201_v18 = vadd.f32 %v1152_v17, %v949_v34  ;;  %v1758_v17 = vmul.f32 0.2, %v1476_v30  ;;  %v3462_v30 = vld [vmem:[%s3384_s26 + $0xa8] sm:$0xff] }
 0x10c   : > { %1250 = vst [vmem:[%s3272_s17 + $0x60] sm:$0xff] %v1201_v18  ;;  %vm1299_vm4 = vcmp.gt.f32.partialorder %v1201_v18, 0.2  ;;  %v3397_v18 = vld [vmem:[%s3290_s22] ss:$0 sm:$0xff] }
 0x10f   : > { %v950_v39 = vpop.f32.mrf.mxu0 }
 0x110   : > { %v951_v22 = vadd.f32 %v3131_v24, %v950_v39  ;;  %v1807_v39 = vsel %vm1709_vm13, 0.0, %v1758_v17  ;;  %v3471_v17 = vld [vmem:[%s3384_s26 + $0xc0] sm:$0xff]  ;;  %vm1063_vm13 = vcmp.gt.f32.partialorder %v3193_v48, 0.2 }
 0x111   : > { %4131 = vst [vmem:[#allocation9_spill] sm:$0xff] %v3471_v17  ;;  %v3495_v17 = vld [vmem:[%s3384_s26 + $0x100] sm:$0xff] }
 0x112   : > { %v1202_v23 = vadd.f32 %v1153_v21, %v951_v22  ;;  %v3402_v21 = vld [vmem:[%s3384_s26 + $0x8] sm:$0xff]  ;;  %v3405_v22 = vld [vmem:[%s3384_s26 + $0x10] sm:$0xff]  ;;  %4139 = vst [vmem:[#allocation17_spill] sm:$0xff] %v3495_v17  ;;  %v3519_v17 = vld [vmem:[%s3384_s26 + $0x140] sm:$0xff] }
 0x113   : > { %4145 = vst [vmem:[#allocation23_spill] sm:$0xff] %v3519_v17  ;;  %vm1710_vm3 = vcmp.gt.f32.partialorder %v3402_v21, 0.2  ;;  %v2826_v17 = vld [vmem:[%s3098_s23 + $0xa0] sm:$0xff]  ;;  %vm1711_vm7 = vcmp.gt.f32.partialorder %v3405_v22, 0.2 }
 0x114   : > { %vm1300_vm5 = vcmp.gt.f32.partialorder %v1202_v23, 0.2  ;;  %1251 = vst [vmem:[%s3272_s17 + $0x68] sm:$0xff] %v1202_v23  ;;  %v3408_v23 = vld [vmem:[%s3384_s26 + $0x18] sm:$0xff] }
 0x115   : > { %vm2716_vm6 = vmpackc.low %vm1300_vm5, %vm1299_vm4  ;;  %2617 = vmatmul.msk.bf16.gmra.mxu3 %vm833_vm0, %v2825_v43  ;;  %v3456_v43 = vld [vmem:[%s3384_s26 + $0x98] sm:$0xff]  ;;  %vm1061_vm4 = vcmp.gt.f32.partialorder %v3187_v46, 0.2  ;;  %vm1712_vm12 = vcmp.gt.f32.partialorder %v3408_v23, 0.2 }
 0x116   : > { %2717 = vmatmul.msk.bf16.gmra.mxu1 %vm2716_vm6, %v4092_v20 }
 0x117   : > { %v953_v40 = vpop.f32.mrf.mxu0 }
 0x118   : > { %v954_v26 = vadd.f32 %v3131_v24, %v953_v40  ;;  %v3414_v40 = vld [vmem:[%s3384_s26 + $0x28] sm:$0xff] }
 0x11a   : > { %v1203_v32 = vadd.f32 %v1154_v25, %v954_v26  ;;  %v3417_v25 = vld [vmem:[%s3384_s26 + $0x30] sm:$0xff]  ;;  %v3420_v26 = vld [vmem:[%s3384_s26 + $0x38] sm:$0xff] }
 0x11c   : > { %1252 = vst [vmem:[%s3272_s17 + $0x70] sm:$0xff] %v1203_v32  ;;  %vm1301_vm9 = vcmp.gt.f32.partialorder %v1203_v32, 0.2  ;;  %v3423_v32 = vld [vmem:[%s3384_s26 + $0x40] sm:$0xff] }
 0x11f   : > { %v955_v41 = vpop.f32.mrf.mxu0 }
 0x120   : > { %v956_v29 = vadd.f32 %v3131_v24, %v955_v41  ;;  %v3432_v41 = vld [vmem:[%s3384_s26 + $0x58] sm:$0xff] }
 0x122   : > { %v1204_v6 = vadd.f32 %v1155_v28, %v956_v29  ;;  %v3435_v28 = vld [vmem:[%s3384_s26 + $0x60] sm:$0xff]  ;;  %v3438_v29 = vld [vmem:[%s3384_s26 + $0x68] sm:$0xff] }
 0x124   : > { %vm1302_vm10 = vcmp.gt.f32.partialorder %v1204_v6, 0.2  ;;  %1253 = vst [vmem:[%s3272_s17 + $0x78] sm:$0xff] %v1204_v6  ;;  %v3441_v6 = vld [vmem:[%s3384_s26 + $0x70] sm:$0xff] }
 0x125   : > { %vm2718_vm11 = vmpackc.low %vm1302_vm10, %vm1301_vm9  ;;  %2618 = vmatmul.msk.bf16.gmra.mxu3 %vm833_vm0, %v2826_v17  ;;  %vm1062_vm10 = vcmp.gt.f32.partialorder %v3190_v47, 0.2 }
 0x126   : > { %2719 = vmatmul.msk.bf16.gmra.mxu1 %vm2718_vm11, %v4092_v20  ;;  %v3477_v20 = vld [vmem:[%s3384_s26 + $0xd0] sm:$0xff] }
 0x127   : > { %v958_v42 = vpop.f32.mrf.mxu0  ;;  %4133 = vst [vmem:[#allocation11_spill] sm:$0xff] %v3477_v20  ;;  %v3501_v20 = vld [vmem:[%s3384_s26 + $0x110] sm:$0xff] }
 0x128   : > { %v959_v37 = vadd.f32 %v3131_v24, %v958_v42  ;;  %v3447_v42 = vld [vmem:[%s3384_s26 + $0x80] sm:$0xff]  ;;  %4141 = vst [vmem:[#allocation19_spill] sm:$0xff] %v3501_v20  ;;  %v3528_v20 = vld [vmem:[%s3384_s26 + $0x158] sm:$0xff] }
 0x129   : > { %4148 = vst [vmem:[#allocation26_spill] sm:$0xff] %v3528_v20  ;;  %v3549_v20 = vld [vmem:[%s3384_s26 + $0x178] sm:$0xff] }
 0x12a   : > { %v3386_v14 = vadd.f32 %v1156_v33, %v959_v37  ;;  %v3450_v33 = vld [vmem:[%s3384_s26 + $0x88] sm:$0xff]  ;;  %v3453_v37 = vld [vmem:[%s3384_s26 + $0x90] sm:$0xff]  ;;  %4152 = vst [vmem:[#allocation30_spill] sm:$0xff] %v3549_v20 }
 0x12c   : > { %1254 = vst [vmem:[%s3272_s17 + $0x80] sm:$0xff] %v3386_v14  ;;  %vm1303_vm15 = vcmp.gt.f32.partialorder %v3386_v14, 0.2 }
 0x12f   : > { %v960_v16 = vpop.f32.mrf.mxu0 }
 0x130   : > { %v961_v34 = vadd.f32 %v3131_v24, %v960_v16  ;;  %v3465_v16 = vld [vmem:[%s3384_s26 + $0xb0] sm:$0xff] }
 0x131   : > { %4129 = vst [vmem:[#allocation7_spill] sm:$0xff] %v3465_v16  ;;  %v3534_v16 = vld [vmem:[%s3384_s26 + $0x168] sm:$0xff] }
 0x132   : > { %v1206_v44 = vadd.f32 %v1157_v38, %v961_v34  ;;  %v3468_v38 = vld [vmem:[%s3384_s26 + $0xb8] sm:$0xff]  ;;  %v3474_v34 = vld [vmem:[%s3384_s26 + $0xc8] sm:$0xff]  ;;  %4150 = vst [vmem:[#allocation28_spill] sm:$0xff] %v3534_v16 }
 0x133   : > { %v1585_v31 = vpop.f32.mrf.mxu1  ;;  %4130 = vst [vmem:[#allocation8_spill] sm:$0xff] %v3468_v38  ;;  %v3492_v38 = vld [vmem:[%s3384_s26 + $0xf8] sm:$0xff] }
 0x134   : > { %4132 = vst [vmem:[#allocation10_spill] sm:$0xff] %v3474_v34  ;;  %v3498_v34 = vld [vmem:[%s3384_s26 + $0x108] sm:$0xff]  ;;  %v1586_v8 = vadd.f32 %v3397_v18, %v1585_v31  ;;  %vm1304_vm1 = vcmp.gt.f32.partialorder %v1206_v44, 0.2  ;;  %v4154_v31 = vmov 1.0|1.0  }
 0x135   : > { %4138 = vst [vmem:[#allocation16_spill] sm:$0xff] %v3492_v38  ;;  %v3516_v38 = vld [vmem:[%s3384_s26 + $0x138] sm:$0xff]  ;;  %vm2720_vm2 = vmpackc.low %vm1304_vm1, %vm1303_vm15  ;;  %vm1713_vm15 = vcmp.gt.f32.partialorder %v3411_v35, 0.2 }
 0x136   : > { %4140 = vst [vmem:[#allocation18_spill] sm:$0xff] %v3498_v34  ;;  %v3522_v34 = vld [vmem:[%s3384_s26 + $0x148] sm:$0xff]  ;;  %v1856_v16 = vadd.f32 %v1807_v39, %v1586_v8  ;;  %2721 = vmatmul.msk.bf16.gmra.mxu1 %vm2720_vm2, %v4154_v31  ;;  %v1110_v8 = vmul.f32 0.2, %v3187_v46 }
 0x137   : > { %4144 = vst [vmem:[#allocation22_spill] sm:$0xff] %v3516_v38  ;;  %v3540_v38 = vld [vmem:[%s3384_s26 + $0x170] sm:$0xff]  ;;  %v963_v14 = vpop.f32.mrf.mxu0 }
 0x138   : > { %4146 = vst [vmem:[#allocation24_spill] sm:$0xff] %v3522_v34  ;;  %v964_v9 = vadd.f32 %v3131_v24, %v963_v14  ;;  %vm1954_vm5 = vcmp.gt.f32.partialorder %v1856_v16, 0.2 }
 0x139   : > { %1255 = vst [vmem:[%s3272_s17 + $0x88] sm:$0xff] %v1206_v44  ;;  %v1158_v44 = vsel %vm1060_vm14, 0.0, %v1109_v19 }
 0x13a   : > { %4151 = vst [vmem:[#allocation29_spill] sm:$0xff] %v3540_v38  ;;  %v1759_v38 = vmul.f32 0.2, %v3402_v21  ;;  %v1207_v34 = vadd.f32 %v1158_v44, %v964_v9  ;;  %v1159_v21 = vsel %vm1061_vm4, 0.0, %v1110_v8  ;;  %v1760_v9 = vmul.f32 0.2, %v3405_v22 }
 0x13b   : > { %1905 = vst [vmem:[%s3546_s13] sm:$0xff] %v1856_v16  ;;  %v1587_v20 = vpop.f32.mrf.mxu1  ;;  %v1111_v22 = vmul.f32 0.2, %v3190_v47 }
 0x13c   : > { %v1808_v12 = vsel %vm1710_vm3, 0.0, %v1759_v38  ;;  %v1588_v39 = vadd.f32 %v3397_v18, %v1587_v20  ;;  %1256 = vst [vmem:[%s3272_s17 + $0x90] sm:$0xff] %v1207_v34  ;;  %v3011_v38 = vmov 0.0   ;;  %v1809_v44 = vsel %vm1711_vm7, 0.0, %v1760_v9 }
 0x13d   : > { %v2754_v20 = vsel %vm1954_vm5, 1.0, %v3011_v38  ;;  %vm1305_vm8 = vcmp.gt.f32.partialorder %v1207_v34, 0.2  ;;  %v2827_v34 = vld [vmem:[%s3098_s23 + $0xa8] sm:$0xff]  ;;  %vm1064_vm3 = vcmp.gt.f32.partialorder %v3196_v49, 0.2 }
 0x13e   : > { %v1857_v45 = vadd.f32 %v1808_v12, %v1588_v39  ;;  %2619 = vmatmul.msk.bf16.gmra.mxu3 %vm833_vm0, %v2827_v34  ;;  %v1113_v34 = vmul.f32 0.2, %v3196_v49  ;;  %vm1068_vm5 = vcmp.gt.f32.partialorder %v3208_v53, 0.2  ;;  %vm1714_vm7 = vcmp.gt.f32.partialorder %v3414_v40, 0.2 }
 0x13f   : > { %v965_v19 = vpop.f32.mrf.mxu0 }
 0x140   : > { %vm1955_vm6 = vcmp.gt.f32.partialorder %v1857_v45, 0.2  ;;  %v966_v14 = vadd.f32 %v3131_v24, %v965_v19  ;;  %1906 = vst [vmem:[%s3546_s13 + $0x8] sm:$0xff] %v1857_v45  ;;  %v1160_v19 = vsel %vm1062_vm10, 0.0, %v1111_v22  ;;  %v983_v22 = vpop.f32.mrf.mxu3  ;;  %v1162_v49 = vsel %vm1064_vm3, 0.0, %v1113_v34 }
 0x141   : > { %v2755_v46 = vsel %vm1955_vm6, 1.0, %v3011_v38  ;;  %v1764_v34 = vmul.f32 0.2, %v3417_v25  ;;  %vm1716_vm3 = vcmp.gt.f32.partialorder %v3420_v26, 0.2 }
 0x142   : > { %v2845_v12 = vpack.c.bf16 %v2755_v46, %v2754_v20  ;;  %v1208_v16 = vadd.f32 %v1159_v21, %v966_v14  ;;  %v1761_v21 = vmul.f32 0.2, %v3408_v23  ;;  %v1112_v46 = vmul.f32 0.2, %v3193_v48 }
 0x143   : > { %v1590_v17 = vpop.f32.mrf.mxu1 }
 0x144   : > { %2846 = vst [vmem:[%s3577_s15] sm:$0xff] %v2845_v12   ;;  %v1591_v8 = vadd.f32 %v3397_v18, %v1590_v17  ;;  %vm1306_vm9 = vcmp.gt.f32.partialorder %v1208_v16, 0.2  ;;  %v1810_v47 = vsel %vm1712_vm12, 0.0, %v1761_v21  ;;  %v1762_v17 = vmul.f32 0.2, %v3411_v35 }
 0x145   : > { %vm2722_vm11 = vmpackc.low %vm1306_vm9, %vm1305_vm8  ;;  %1257 = vst [vmem:[%s3272_s17 + $0x98] sm:$0xff] %v1208_v16  ;;  %vm1069_vm8 = vcmp.gt.f32.partialorder %v3211_v54, 0.2  ;;  %vm1065_vm9 = vcmp.gt.f32.partialorder %v3199_v50, 0.2 }
 0x146   : > { %v1858_v39 = vadd.f32 %v1809_v44, %v1591_v8  ;;  %2723 = vmatmul.msk.bf16.gmra.mxu1 %vm2722_vm11, %v4154_v31  ;;  %v1161_v44 = vsel %vm1063_vm13, 0.0, %v1112_v46  ;;  %v1811_v21 = vsel %vm1713_vm15, 0.0, %v1762_v17  ;;  %vm1715_vm11 = vcmp.gt.f32.partialorder %v3417_v25, 0.2 }
 0x147   : > { %v968_v45 = vpop.f32.mrf.mxu0 }
 0x148   : > { %v969_v9 = vadd.f32 %v3131_v24, %v968_v45  ;;  %1907 = vst [vmem:[%s3546_s13 + $0x10] sm:$0xff] %v1858_v39  ;;  %vm1956_vm14 = vcmp.gt.f32.partialorder %v1858_v39, 0.2  ;;  %v985_v17 = vpop.f32.mrf.mxu3 }
 0x149   : > { %v2756_v45 = vsel %vm1956_vm14, 1.0, %v3011_v38  ;;  %vm1066_vm14 = vcmp.gt.f32.partialorder %v3202_v51, 0.2 }
 0x14a   : > { %v1209_v14 = vadd.f32 %v1160_v19, %v969_v9 }
 0x14b   : > { %v1592_v20 = vpop.f32.mrf.mxu1 }
 0x14c   : > { %v1593_v12 = vadd.f32 %v3397_v18, %v1592_v20  ;;  %1258 = vst [vmem:[%s3272_s17 + $0xa0] sm:$0xff] %v1209_v14  ;;  %vm1307_vm2 = vcmp.gt.f32.partialorder %v1209_v14, 0.2  ;;  %v984_v20 = vadd.f32 %v3131_v24, %v983_v22  ;;  %v986_v22 = vadd.f32 %v3131_v24, %v985_v17 }
 0x14e   : > { %v1859_v16 = vadd.f32 %v1810_v47, %v1593_v12  ;;  %v1117_v47 = vmul.f32 0.2, %v3208_v53  ;;  %v1763_v12 = vmul.f32 0.2, %v3414_v40 }
 0x14f   : > { %v970_v23 = vpop.f32.mrf.mxu0 }
 0x150   : > { %vm1957_vm1 = vcmp.gt.f32.partialorder %v1859_v16, 0.2  ;;  %v971_v8 = vadd.f32 %v3131_v24, %v970_v23  ;;  %1908 = vst [vmem:[%s3546_s13 + $0x18] sm:$0xff] %v1859_v16  ;;  %v1166_v16 = vsel %vm1068_vm5, 0.0, %v1117_v47  ;;  %v1118_v23 = vmul.f32 0.2, %v3211_v54  ;;  %v988_v47 = vpop.f32.mrf.mxu3 }
 0x151   : > { %v2757_v48 = vsel %vm1957_vm1, 1.0, %v3011_v38  ;;  %v3615_v53 = vadd.f32 %v1166_v16, %v984_v20  ;;  %v1813_v16 = vsel %vm1715_vm11, 0.0, %v1764_v34  ;;  %vm1070_vm1 = vcmp.gt.f32.partialorder %v3214_v55, 0.2 }
 0x152   : > { %v2848_v19 = vpack.c.bf16 %v2757_v48, %v2756_v45  ;;  %v1210_v39 = vadd.f32 %v1161_v44, %v971_v8  ;;  %v1167_v45 = vsel %vm1069_vm8, 0.0, %v1118_v23  ;;  %v2828_v48 = vld [vmem:[%s3098_s23 + $0xb0] sm:$0xff]  ;;  %v1115_v23 = vmul.f32 0.2, %v3202_v51 }
 0x153   : > { %v1595_v9 = vpop.f32.mrf.mxu1  ;;  %1264 = vst [vmem:[%s3272_s17 + $0xd0] sm:$0xff] %v3615_v53  ;;  %v3624_v40 = vadd.f32 %v1167_v45, %v986_v22  ;;  %2620 = vmatmul.msk.bf16.gmra.mxu3 %vm833_vm0, %v2828_v48  ;;  %v1119_v22 = vmul.f32 0.2, %v3214_v55  ;;  %v1765_v48 = vmul.f32 0.2, %v3420_v26 }
 0x154   : > { %2916 = vst [vmem:[%s3577_s15 + $0x8] sm:$0xff] %v2848_v19   ;;  %v1596_v35 = vadd.f32 %v3397_v18, %v1595_v9  ;;  %vm1308_vm4 = vcmp.gt.f32.partialorder %v1210_v39, 0.2  ;;  %v1164_v51 = vsel %vm1066_vm14, 0.0, %v1115_v23  ;;  %vm1067_vm5 = vcmp.gt.f32.partialorder %v3205_v52, 0.2 }
 0x155   : > { %vm2724_vm6 = vmpackc.low %vm1308_vm4, %vm1307_vm2  ;;  %1259 = vst [vmem:[%s3272_s17 + $0xa8] sm:$0xff] %v1210_v39  ;;  %v1812_v39 = vsel %vm1714_vm7, 0.0, %v1763_v12  ;;  %vm1071_vm4 = vcmp.gt.f32.partialorder %v3217_v56, 0.2  ;;  %vm1717_vm8 = vcmp.gt.f32.partialorder %v3423_v32, 0.2 }
 0x156   : > { %v1860_v46 = vadd.f32 %v1811_v21, %v1596_v35  ;;  %2725 = vmatmul.msk.bf16.gmra.mxu1 %vm2724_vm6, %v4154_v31  ;;  %v1114_v21 = vmul.f32 0.2, %v3199_v50  ;;  %1265 = vst [vmem:[%s3272_s17 + $0xd8] sm:$0xff] %v3624_v40  ;;  %vm1072_vm11 = vcmp.gt.f32.partialorder %v3220_v57, 0.2 }
 0x157   : > { %v973_v14 = vpop.f32.mrf.mxu0  ;;  %vm1073_vm14 = vcmp.gt.f32.partialorder %v3223_v58, 0.2 }
 0x158   : > { %v974_v44 = vadd.f32 %v3131_v24, %v973_v14  ;;  %1909 = vst [vmem:[%s3546_s13 + $0x20] sm:$0xff] %v1860_v46  ;;  %vm1958_vm10 = vcmp.gt.f32.partialorder %v1860_v46, 0.2  ;;  %v1163_v20 = vsel %vm1065_vm9, 0.0, %v1114_v21  ;;  %v1120_v21 = vmul.f32 0.2, %v3217_v56 }
 0x159   : > { %v2758_v50 = vsel %vm1958_vm10, 1.0, %v3011_v38 }
 0x15a   : > { %v1211_v8 = vadd.f32 %v1162_v49, %v974_v44  ;;  %v989_v44 = vadd.f32 %v3131_v24, %v988_v47 }
 0x15b   : > { %v1597_v19 = vpop.f32.mrf.mxu1 }
 0x15c   : > { %v1598_v9 = vadd.f32 %v3397_v18, %v1597_v19  ;;  %1260 = vst [vmem:[%s3272_s17 + $0xb0] sm:$0xff] %v1211_v8  ;;  %vm1309_vm13 = vcmp.gt.f32.partialorder %v1211_v8, 0.2  ;;  %v1168_v19 = vsel %vm1070_vm1, 0.0, %v1119_v22 }
 0x15d   : > { %v3651_v55 = vadd.f32 %v1168_v19, %v989_v44 }
 0x15e   : > { %v1861_v54 = vadd.f32 %v1812_v39, %v1598_v9  ;;  %v990_v39 = vpop.f32.mrf.mxu3 }
 0x15f   : > { %v975_v35 = vpop.f32.mrf.mxu0  ;;  %1266 = vst [vmem:[%s3272_s17 + $0xe0] sm:$0xff] %v3651_v55 }
 0x160   : > { %vm1959_vm12 = vcmp.gt.f32.partialorder %v1861_v54, 0.2  ;;  %v976_v14 = vadd.f32 %v3131_v24, %v975_v35  ;;  %1910 = vst [vmem:[%s3546_s13 + $0x28] sm:$0xff] %v1861_v54  ;;  %v991_v54 = vadd.f32 %v3131_v24, %v990_v39  ;;  %v1169_v35 = vsel %vm1071_vm4, 0.0, %v1120_v21 }
 0x161   : > { %v2759_v46 = vsel %vm1959_vm12, 1.0, %v3011_v38  ;;  %v1767_v39 = vmul.f32 0.2, %v3426_v27  ;;  %vm1314_vm4 = vcmp.gt.f32.partialorder %v3624_v40, 0.2 }
 0x162   : > { %v2851_v49 = vpack.c.bf16 %v2759_v46, %v2758_v50  ;;  %v1212_v12 = vadd.f32 %v1163_v20, %v976_v14  ;;  %v2829_v20 = vld [vmem:[%s3098_s23 + $0xb8] sm:$0xff]  ;;  %v1814_v14 = vsel %vm1716_vm3, 0.0, %v1765_v48  ;;  %v1116_v50 = vmul.f32 0.2, %v3205_v52 }
 0x163   : > { %v1600_v17 = vpop.f32.mrf.mxu1  ;;  %v3660_v26 = vadd.f32 %v1169_v35, %v991_v54  ;;  %2621 = vmatmul.msk.bf16.gmra.mxu3 %vm833_vm0, %v2829_v20  ;;  %v1122_v54 = vmul.f32 0.2, %v3223_v58  ;;  %v608_v58 = vld [vmem:[%s3098_s23 + $0xc0] sm:$0xf]  ;;  %vm1313_vm3 = vcmp.gt.f32.partialorder %v3615_v53, 0.2 }
 0x164   : > { %2917 = vst [vmem:[%s3577_s15 + $0x10] sm:$0xff] %v2851_v49   ;;  %v1601_v25 = vadd.f32 %v3397_v18, %v1600_v17  ;;  %vm1310_vm15 = vcmp.gt.f32.partialorder %v1212_v12, 0.2 }
 0x165   : > { %vm2726_vm2 = vmpackc.low %vm1310_vm15, %vm1309_vm13  ;;  %1261 = vst [vmem:[%s3272_s17 + $0xb8] sm:$0xff] %v1212_v12  ;;  %v1165_v12 = vsel %vm1067_vm5, 0.0, %v1116_v50  ;;  %vm1718_vm13 = vcmp.gt.f32.partialorder %v3426_v27, 0.2  ;;  %vm1074_vm5 = vcmp.gt.f32.partialorder %v3226_v59, 0.2 }
 0x166   : > { %v1862_v45 = vadd.f32 %v1813_v16, %v1601_v25  ;;  %2727 = vmatmul.msk.bf16.gmra.mxu1 %vm2726_vm2, %v4154_v31  ;;  %1267 = vst [vmem:[%s3272_s17 + $0xe8] sm:$0xff] %v3660_v26  ;;  %v1766_v16 = vmul.f32 0.2, %v3423_v32  ;;  %v993_v17 = vpop.f32.mrf.mxu3  ;;  %v1121_v32 = vmul.f32 0.2, %v3220_v57  ;;  %v1171_v57 = vsel %vm1073_vm14, 0.0, %v1122_v54 }
 0x167   : > { %v978_v8 = vpop.f32.mrf.mxu0  ;;  %v994_v48 = vadd.f32 %v3131_v24, %v993_v17  ;;  %vm1719_vm2 = vcmp.gt.f32.partialorder %v3429_v36, 0.2  ;;  %v1770_v54 = vmul.f32 0.2, %v3435_v28 }
 0x168   : > { %v979_v9 = vadd.f32 %v3131_v24, %v978_v8  ;;  %1911 = vst [vmem:[%s3546_s13 + $0x30] sm:$0xff] %v1862_v45  ;;  %vm1960_vm6 = vcmp.gt.f32.partialorder %v1862_v45, 0.2  ;;  %v1815_v8 = vsel %vm1717_vm8, 0.0, %v1766_v16  ;;  %v1170_v21 = vsel %vm1072_vm11, 0.0, %v1121_v32 }
 0x169   : > { %v2760_v52 = vsel %vm1960_vm6, 1.0, %v3011_v38  ;;  %vm2730_vm6 = vmpackc.low %vm1314_vm4, %vm1313_vm3  ;;  %vm1315_vm11 = vcmp.gt.f32.partialorder %v3651_v55, 0.2  ;;  %vm1723_vm4 = vcmp.gt.f32.partialorder %v3441_v6, 0.2 }
 0x16a   : > { %v1213_v34 = vadd.f32 %v1164_v51, %v979_v9 }
 0x16b   : > { %v1602_v47 = vpop.f32.mrf.mxu1 }
 0x16c   : > { %v1603_v46 = vadd.f32 %v3397_v18, %v1602_v47  ;;  %1262 = vst [vmem:[%s3272_s17 + $0xc0] sm:$0xff] %v1213_v34  ;;  %vm1311_vm9 = vcmp.gt.f32.partialorder %v1213_v34, 0.2  ;;  %v3684_v34 = vadd.f32 %v1170_v21, %v994_v48  ;;  %v1124_v48 = vmul.f32 0.2, %v3229_v60 }
 0x16e   : > { %v1863_v56 = vadd.f32 %v1814_v14, %v1603_v46  ;;  %v995_v9 = vpop.f32.mrf.mxu3  ;;  %1268 = vst [vmem:[%s3272_s17 + $0xf0] sm:$0xff] %v3684_v34  ;;  %v1816_v14 = vsel %vm1718_vm13, 0.0, %v1767_v39  ;;  %vm1076_vm13 = vcmp.gt.f32.partialorder %v3232_v61, 0.2 }
 0x16f   : > { %v980_v49 = vpop.f32.mrf.mxu0  ;;  %v996_v35 = vadd.f32 %v3131_v24, %v995_v9 }
 0x170   : > { %vm1961_vm7 = vcmp.gt.f32.partialorder %v1863_v56, 0.2  ;;  %v981_v23 = vadd.f32 %v3131_v24, %v980_v49  ;;  %1912 = vst [vmem:[%s3546_s13 + $0x38] sm:$0xff] %v1863_v56  ;;  %v1768_v24 = vmul.f32 0.2, %v3429_v36  ;;  %v771_v56 = vunpack.c.l.b16 %v608_v58 }
 0x171   : > { %v2761_v25 = vsel %vm1961_vm7, 1.0, %v3011_v38  ;;  %v3689_v20 = vadd.f32 %v1171_v57, %v996_v35  ;;  %vm1720_vm7 = vcmp.gt.f32.partialorder %v3432_v41, 0.2 }
 0x172   : > { %v2854_v44 = vpack.c.bf16 %v2761_v25, %v2760_v52  ;;  %v1214_v22 = vadd.f32 %v1165_v12, %v981_v23  ;;  %v796_v17 = vpack.c.b16 %v771_v56, %v771_v56  ;;  %v1817_v52 = vsel %vm1719_vm2, 0.0, %v1768_v24 }
 0x173   : > { %v1605_v45 = vpop.f32.mrf.mxu1  ;;  %1269 = vst [vmem:[%s3272_s17 + $0xf8] sm:$0xff] %v3689_v20 }
 0x174   : > { %2918 = vst [vmem:[%s3577_s15 + $0x18] sm:$0xff] %v2854_v44   ;;  %v1606_v51 = vadd.f32 %v3397_v18, %v1605_v45  ;;  %vm1312_vm10 = vcmp.gt.f32.partialorder %v1214_v22, 0.2  ;;  %v3707_v44 = vld [vmem:[%s3090_s19] ss:$0 sm:$0xff]  ;;  %2622 = vmatmul.msk.bf16.gmra.mxu3 %vm833_vm0, %v796_v17 }
 0x175   : > { %vm2728_vm12 = vmpackc.low %vm1312_vm10, %vm1311_vm9  ;;  %1263 = vst [vmem:[%s3272_s17 + $0xc8] sm:$0xff] %v1214_v22  ;;  %v1123_v22 = vmul.f32 0.2, %v3226_v59  ;;  %v1769_v45 = vmul.f32 0.2, %v3432_v41 }
 0x176   : > { %v1864_v19 = vadd.f32 %v1815_v8, %v1606_v51  ;;  %2729 = vmatmul.msk.bf16.vlgmr.msra.gmra.mxu2 %vm2728_vm12, %v4154_v31  ;;  %v998_v46 = vpop.f32.mrf.mxu3  ;;  %vm1075_vm0 = vcmp.gt.f32.partialorder %v3229_v60, 0.2  ;;  %vm1721_vm10 = vcmp.gt.f32.partialorder %v3435_v28, 0.2  ;;  %vm1316_vm12 = vcmp.gt.f32.partialorder %v3660_v26, 0.2 }
 0x177   : > { %v999_v36 = vadd.f32 %v3707_v44, %v998_v46  ;;  %v1172_v40 = vsel %vm1074_vm5, 0.0, %v1123_v22  ;;  %v1173_v59 = vsel %vm1075_vm0, 0.0, %v1124_v48  ;;  %v1818_v21 = vsel %vm1720_vm7, 0.0, %v1769_v45  ;;  %vm2732_vm14 = vmpackc.low %vm1316_vm12, %vm1315_vm11 }
 0x178   : > { %1913 = vst [vmem:[%s3546_s13 + $0x40] sm:$0xff] %v1864_v19  ;;  %vm1962_vm15 = vcmp.gt.f32.partialorder %v1864_v19, 0.2  ;;  %v1125_v28 = vmul.f32 0.2, %v3232_v61 }
 0x179   : > { %v2762_v49 = vsel %vm1962_vm15, 1.0, %v3011_v38  ;;  %v3715_v8 = vadd.f32 %v1172_v40, %v999_v36  ;;  %v1771_v26 = vmul.f32 0.2, %v3438_v29  ;;  %vm1722_vm15 = vcmp.gt.f32.partialorder %v3438_v29, 0.2 }
 0x17a   : > { %v1174_v55 = vsel %vm1076_vm13, 0.0, %v1125_v28  ;;  %vm1317_vm5 = vcmp.gt.f32.partialorder %v3684_v34, 0.2  ;;  %vm1078_vm7 = vcmp.gt.f32.partialorder %v3238_v63, 0.2 }
 0x17b   : > { %v1607_v47 = vpop.f32.mrf.mxu1  ;;  %1270 = vst [vmem:[%s3272_s17 + $0x100] sm:$0xff] %v3715_v8  ;;  %vm1725_vm12 = vcmp.gt.f32.partialorder %v3447_v42, 0.2  ;;  %vm1319_vm13 = vcmp.gt.f32.partialorder %v3715_v8, 0.2 }
 0x17c   : > { %v1608_v50 = vadd.f32 %v3397_v18, %v1607_v47 }
 0x17e   : > { %v1865_v27 = vadd.f32 %v1816_v14, %v1608_v50  ;;  %v1000_v51 = vpop.f32.mrf.mxu3  ;;  %v1819_v50 = vsel %vm1721_vm10, 0.0, %v1770_v54 }
 0x17f   : > { %v1001_v32 = vadd.f32 %v3707_v44, %v1000_v51 }
 0x180   : > { %vm1963_vm1 = vcmp.gt.f32.partialorder %v1865_v27, 0.2  ;;  %1914 = vst [vmem:[%s3546_s13 + $0x48] sm:$0xff] %v1865_v27 }
 0x181   : > { %v2763_v12 = vsel %vm1963_vm1, 1.0, %v3011_v38  ;;  %v3724_v19 = vadd.f32 %v1173_v59, %v1001_v32  ;;  %vm1077_vm1 = vcmp.gt.f32.partialorder %v3235_v62, 0.2 }
 0x182   : > { %v2857_v16 = vpack.c.bf16 %v2763_v12, %v2762_v49  ;;  %v1126_v49 = vmul.f32 0.2, %v3235_v62 }
 0x183   : > { %v1610_v23 = vpop.f32.mrf.mxu1  ;;  %1271 = vst [vmem:[%s3272_s17 + $0x108] sm:$0xff] %v3724_v19 }
 0x184   : > { %2919 = vst [vmem:[%s3577_s15 + $0x20] sm:$0xff] %v2857_v16   ;;  %v1611_v25 = vadd.f32 %v3397_v18, %v1610_v23  ;;  %v1175_v61 = vsel %vm1077_vm1, 0.0, %v1126_v49  ;;  %v1820_v23 = vsel %vm1722_vm15, 0.0, %v1771_v26  ;;  %vm1080_vm15 = vcmp.gt.f32.partialorder %v3244_v1, 0.2 }
 0x185   : > { %v1130_v49 = vmul.f32 0.2, %v3247_v2 }
 0x186   : > { %v1866_v53 = vadd.f32 %v1817_v52, %v1611_v25  ;;  %2731 = vmatmul.msk.bf16.gmra.mxu2 %vm2730_vm6, %v4154_v31  ;;  %v1003_v35 = vpop.f32.mrf.mxu3  ;;  %v1772_v25 = vmul.f32 0.2, %v3441_v6  ;;  %vm1318_vm6 = vcmp.gt.f32.partialorder %v3689_v20, 0.2  ;;  %v1127_v6 = vmul.f32 0.2, %v3238_v63 }
 0x187   : > { %v1004_v24 = vadd.f32 %v3707_v44, %v1003_v35  ;;  %vm2734_vm0 = vmpackc.low %vm1318_vm6, %vm1317_vm5  ;;  %v1773_v20 = vmul.f32 0.2, %v3444_v13  ;;  %vm1727_vm6 = vcmp.gt.f32.partialorder %v3453_v37, 0.2 }
 0x188   : > { %1915 = vst [vmem:[%s3546_s13 + $0x50] sm:$0xff] %v1866_v53  ;;  %vm1964_vm8 = vcmp.gt.f32.partialorder %v1866_v53, 0.2  ;;  %v1821_v45 = vsel %vm1723_vm4, 0.0, %v1772_v25  ;;  %v1176_v34 = vsel %vm1078_vm7, 0.0, %v1127_v6 }
 0x189   : > { %v2764_v60 = vsel %vm1964_vm8, 1.0, %v3011_v38  ;;  %v3743_v58 = vadd.f32 %v1174_v55, %v1004_v24  ;;  %vm1724_vm8 = vcmp.gt.f32.partialorder %v3444_v13, 0.2 }
 0x18a   : > { %v1822_v35 = vsel %vm1724_vm8, 0.0, %v1773_v20  ;;  %vm1082_vm8 = vcmp.gt.f32.partialorder %v3250_v3, 0.2 }
 0x18b   : > { %v1612_v39 = vpop.f32.mrf.mxu1  ;;  %1272 = vst [vmem:[%s3272_s17 + $0x110] sm:$0xff] %v3743_v58  ;;  %vm1321_vm7 = vcmp.gt.f32.partialorder %v3743_v58, 0.2 }
 0x18c   : > { %v1613_v9 = vadd.f32 %v3397_v18, %v1612_v39 }
 0x18e   : > { %v1867_v41 = vadd.f32 %v1818_v21, %v1613_v9  ;;  %v1005_v56 = vpop.f32.mrf.mxu3  ;;  %v1128_v21 = vmul.f32 0.2, %v3241_v0 }
 0x18f   : > { %v1006_v12 = vadd.f32 %v3707_v44, %v1005_v56 }
 0x190   : > { %vm1965_vm9 = vcmp.gt.f32.partialorder %v1867_v41, 0.2  ;;  %1916 = vst [vmem:[%s3546_s13 + $0x58] sm:$0xff] %v1867_v41 }
 0x191   : > { %v2765_v57 = vsel %vm1965_vm9, 1.0, %v3011_v38  ;;  %v3752_v16 = vadd.f32 %v1175_v61, %v1006_v12  ;;  %vm1079_vm9 = vcmp.gt.f32.partialorder %v3241_v0, 0.2 }
 0x192   : > { %v2860_v47 = vpack.c.bf16 %v2765_v57, %v2764_v60  ;;  %v1177_v63 = vsel %vm1079_vm9, 0.0, %v1128_v21  ;;  %v1774_v57 = vmul.f32 0.2, %v3447_v42  ;;  %v1129_v42 = vmul.f32 0.2, %v3244_v1 }
 0x193   : > { %v1615_v14 = vpop.f32.mrf.mxu1  ;;  %1273 = vst [vmem:[%s3272_s17 + $0x118] sm:$0xff] %v3752_v16 }
 0x194   : > { %2920 = vst [vmem:[%s3577_s15 + $0x28] sm:$0xff] %v2860_v47   ;;  %v1616_v27 = vadd.f32 %v3397_v18, %v1615_v14  ;;  %v1823_v24 = vsel %vm1725_vm12, 0.0, %v1774_v57  ;;  %v1178_v8 = vsel %vm1080_vm15, 0.0, %v1129_v42 }
 0x196   : > { %v1868_v46 = vadd.f32 %v1819_v50, %v1616_v27  ;;  %2733 = vmatmul.msk.bf16.gmra.mxu2 %vm2732_vm14, %v4154_v31  ;;  %v1008_v36 = vpop.f32.mrf.mxu3  ;;  %vm1320_vm14 = vcmp.gt.f32.partialorder %v3724_v19, 0.2  ;;  %v1775_v19 = vmul.f32 0.2, %v3450_v33 }
 0x197   : > { %v1009_v48 = vadd.f32 %v3707_v44, %v1008_v36  ;;  %vm2736_vm1 = vmpackc.low %vm1320_vm14, %vm1319_vm13  ;;  %vm1729_vm14 = vcmp.gt.f32.partialorder %v3459_v15, 0.2 }
 0x198   : > { %1917 = vst [vmem:[%s3546_s13 + $0x60] sm:$0xff] %v1868_v46  ;;  %vm1966_vm2 = vcmp.gt.f32.partialorder %v1868_v46, 0.2 }
 0x199   : > { %v2766_v62 = vsel %vm1966_vm2, 1.0, %v3011_v38  ;;  %v3771_v59 = vadd.f32 %v1176_v34, %v1009_v48  ;;  %vm1726_vm2 = vcmp.gt.f32.partialorder %v3450_v33, 0.2 }
 0x19b   : > { %v1617_v17 = vpop.f32.mrf.mxu1  ;;  %1274 = vst [vmem:[%s3272_s17 + $0x120] sm:$0xff] %v3771_v59  ;;  %vm1323_vm15 = vcmp.gt.f32.partialorder %v3771_v59, 0.2 }
 0x19c   : > { %v1618_v52 = vadd.f32 %v3397_v18, %v1617_v17 }
 0x19e   : > { %v1869_v29 = vadd.f32 %v1820_v23, %v1618_v52  ;;  %v1010_v39 = vpop.f32.mrf.mxu3  ;;  %v1824_v23 = vsel %vm1726_vm2, 0.0, %v1775_v19  ;;  %vm1084_vm2 = vcmp.gt.f32.partialorder %v3256_v5, 0.2  ;;  %v4155_v19 = vld [vmem:[#allocation7_spill] sm:$0xff] }
 0x19f   : > { %v1011_v9 = vadd.f32 %v3707_v44, %v1010_v39 }
 0x1a0   : > { %vm1967_vm3 = vcmp.gt.f32.partialorder %v1869_v29, 0.2  ;;  %1918 = vst [vmem:[%s3546_s13 + $0x68] sm:$0xff] %v1869_v29  ;;  %v1776_v29 = vmul.f32 0.2, %v3453_v37 }
 0x1a1   : > { %v2767_v22 = vsel %vm1967_vm3, 1.0, %v3011_v38  ;;  %v3780_v41 = vadd.f32 %v1177_v63, %v1011_v9  ;;  %vm1081_vm3 = vcmp.gt.f32.partialorder %v3247_v2, 0.2  ;;  %v1131_v37 = vmul.f32 0.2, %v3250_v3 }
 0x1a2   : > { %v2863_v53 = vpack.c.bf16 %v2767_v22, %v2766_v62  ;;  %v1179_v1 = vsel %vm1081_vm3, 0.0, %v1130_v49  ;;  %v1778_v63 = vmul.f32 0.2, %v3459_v15  ;;  %v1133_v15 = vmul.f32 0.2, %v3256_v5  ;;  %v4156_v49 = vld [vmem:[#allocation2_spill] sm:$0xff] }
 0x1a3   : > { %v1620_v40 = vpop.f32.mrf.mxu1  ;;  %1275 = vst [vmem:[%s3272_s17 + $0x128] sm:$0xff] %v3780_v41  ;;  %v1180_v58 = vsel %vm1082_vm8, 0.0, %v1131_v37  ;;  %vm1731_vm8 = vcmp.gt.f32.partialorder %v4155_v19, 0.2 }
 0x1a4   : > { %2921 = vst [vmem:[%s3577_s15 + $0x30] sm:$0xff] %v2863_v53   ;;  %v1621_v51 = vadd.f32 %v3397_v18, %v1620_v40  ;;  %v1825_v53 = vsel %vm1727_vm6, 0.0, %v1776_v29  ;;  %v1827_v57 = vsel %vm1729_vm14, 0.0, %v1778_v63  ;;  %v1182_v59 = vsel %vm1084_vm2, 0.0, %v1133_v15 }
 0x1a6   : > { %v1870_v32 = vadd.f32 %v1821_v45, %v1621_v51  ;;  %2735 = vmatmul.msk.bf16.gmra.mxu2 %vm2734_vm0, %v4154_v31  ;;  %v1013_v47 = vpop.f32.mrf.mxu3  ;;  %vm1322_vm0 = vcmp.gt.f32.partialorder %v3752_v16, 0.2  ;;  %v1777_v16 = vmul.f32 0.2, %v3456_v43 }
 0x1a7   : > { %v1014_v46 = vadd.f32 %v3707_v44, %v1013_v47  ;;  %vm2738_vm9 = vmpackc.low %vm1322_vm0, %vm1321_vm7  ;;  %vm1086_vm7 = vcmp.gt.f32.partialorder %v4156_v49, 0.2 }
 0x1a8   : > { %1919 = vst [vmem:[%s3546_s13 + $0x70] sm:$0xff] %v1870_v32  ;;  %vm1968_vm10 = vcmp.gt.f32.partialorder %v1870_v32, 0.2  ;;  %v1132_v32 = vmul.f32 0.2, %v3253_v4 }
 0x1a9   : > { %v2768_v0 = vsel %vm1968_vm10, 1.0, %v3011_v38  ;;  %v3799_v26 = vadd.f32 %v1178_v8, %v1014_v46  ;;  %vm1728_vm10 = vcmp.gt.f32.partialorder %v3456_v43, 0.2 }
 0x1aa   : > { %v1826_v21 = vsel %vm1728_vm10, 0.0, %v1777_v16 }
 0x1ab   : > { %v1622_v54 = vpop.f32.mrf.mxu1  ;;  %1276 = vst [vmem:[%s3272_s17 + $0x130] sm:$0xff] %v3799_v26 }
 0x1ac   : > { %v1623_v60 = vadd.f32 %v3397_v18, %v1622_v54 }
 0x1ae   : > { %v1871_v13 = vadd.f32 %v1822_v35, %v1623_v60  ;;  %v1015_v56 = vpop.f32.mrf.mxu3 }
 0x1af   : > { %v1016_v12 = vadd.f32 %v3707_v44, %v1015_v56  ;;  %v1780_v56 = vmul.f32 0.2, %v4155_v19 }
 0x1b0   : > { %vm1969_vm11 = vcmp.gt.f32.partialorder %v1871_v13, 0.2  ;;  %1920 = vst [vmem:[%s3546_s13 + $0x78] sm:$0xff] %v1871_v13 }
 0x1b1   : > { %v2769_v14 = vsel %vm1969_vm11, 1.0, %v3011_v38  ;;  %v3808_v61 = vadd.f32 %v1179_v1, %v1016_v12  ;;  %vm1083_vm11 = vcmp.gt.f32.partialorder %v3253_v4, 0.2  ;;  %v1135_v12 = vmul.f32 0.2, %v4156_v49 }
 0x1b2   : > { %v2866_v50 = vpack.c.bf16 %v2769_v14, %v2768_v0  ;;  %v1181_v3 = vsel %vm1083_vm11, 0.0, %v1132_v32 }
 0x1b3   : > { %v1625_v27 = vpop.f32.mrf.mxu1  ;;  %1277 = vst [vmem:[%s3272_s17 + $0x138] sm:$0xff] %v3808_v61  ;;  %vm1326_vm10 = vcmp.gt.f32.partialorder %v3808_v61, 0.2 }
 0x1b4   : > { %2922 = vst [vmem:[%s3577_s15 + $0x38] sm:$0xff] %v2866_v50   ;;  %v1626_v28 = vadd.f32 %v3397_v18, %v1625_v27  ;;  %v1779_v50 = vmul.f32 0.2, %v3462_v30 }
 0x1b6   : > { %v1872_v55 = vadd.f32 %v1823_v24, %v1626_v28  ;;  %2737 = vmatmul.msk.bf16.gmra.mxu2 %vm2736_vm1, %v4154_v31  ;;  %v1018_v25 = vpop.f32.mrf.mxu3  ;;  %vm1324_vm1 = vcmp.gt.f32.partialorder %v3780_v41, 0.2  ;;  %v1134_v41 = vmul.f32 0.2, %v3260_v7 }
 0x1b7   : > { %v1019_v45 = vadd.f32 %v3707_v44, %v1018_v25  ;;  %vm2740_vm3 = vmpackc.low %vm1324_vm1, %vm1323_vm15  ;;  %v1829_v25 = vsel %vm1731_vm8, 0.0, %v1780_v56 }
 0x1b8   : > { %1921 = vst [vmem:[%s3546_s13 + $0x80] sm:$0xff] %v1872_v55  ;;  %vm1970_vm4 = vcmp.gt.f32.partialorder %v1872_v55, 0.2 }
 0x1b9   : > { %v2770_v2 = vsel %vm1970_vm4, 1.0, %v3011_v38  ;;  %v3827_v48 = vadd.f32 %v1180_v58, %v1019_v45  ;;  %vm1085_vm4 = vcmp.gt.f32.partialorder %v3260_v7, 0.2 }
 0x1ba   : > { %v1183_v5 = vsel %vm1085_vm4, 0.0, %v1134_v41 }
 0x1bb   : > { %v1627_v17 = vpop.f32.mrf.mxu1  ;;  %1278 = vst [vmem:[%s3272_s17 + $0x140] sm:$0xff] %v3827_v48  ;;  %vm1327_vm2 = vcmp.gt.f32.partialorder %v3827_v48, 0.2 }
 0x1bc   : > { %v1628_v52 = vadd.f32 %v3397_v18, %v1627_v17 }
 0x1be   : > { %v1873_v33 = vadd.f32 %v1824_v23, %v1628_v52  ;;  %v1020_v6 = vpop.f32.mrf.mxu3  ;;  %v1184_v23 = vsel %vm1086_vm7, 0.0, %v1135_v12 }
 0x1bf   : > { %v1021_v34 = vadd.f32 %v3707_v44, %v1020_v6 }
 0x1c0   : > { %vm1971_vm5 = vcmp.gt.f32.partialorder %v1873_v33, 0.2  ;;  %1922 = vst [vmem:[%s3546_s13 + $0x88] sm:$0xff] %v1873_v33 }
 0x1c1   : > { %v2771_v36 = vsel %vm1971_vm5, 1.0, %v3011_v38  ;;  %v3836_v20 = vadd.f32 %v1181_v3, %v1021_v34  ;;  %vm1730_vm5 = vcmp.gt.f32.partialorder %v3462_v30, 0.2  ;;  %v4159_v3 = vld [vmem:[#allocation4_spill] sm:$0xff] }
 0x1c2   : > { %v2869_v62 = vpack.c.bf16 %v2771_v36, %v2770_v2  ;;  %v1828_v55 = vsel %vm1730_vm5, 0.0, %v1779_v50  ;;  %v3883_v2 = vld [vmem:[%s3290_s22] ss:$0 sm:$0xff]  ;;  %vm1088_vm15 = vcmp.gt.f32.partialorder %v4159_v3, 0.2 }
 0x1c3   : > { %v1630_v22 = vpop.f32.mrf.mxu1  ;;  %1279 = vst [vmem:[%s3272_s17 + $0x148] sm:$0xff] %v3836_v20  ;;  %v4162_v50 = vld [vmem:[#allocation10_spill] sm:$0xff] }
 0x1c4   : > { %2923 = vst [vmem:[%s3577_s15 + $0x40] sm:$0xff] %v2869_v62   ;;  %v1631_v40 = vadd.f32 %v3397_v18, %v1630_v22  ;;  %vm1734_vm7 = vcmp.gt.f32.partialorder %v4162_v50, 0.2 }
 0x1c6   : > { %v1874_v51 = vadd.f32 %v1825_v53, %v1631_v40  ;;  %2739 = vmatmul.msk.bf16.gmra.mxu2 %vm2738_vm9, %v4154_v31  ;;  %v1023_v54 = vpop.f32.mrf.mxu3  ;;  %vm1325_vm9 = vcmp.gt.f32.partialorder %v3799_v26, 0.2  ;;  %v4157_v26 = vld [vmem:[#allocation8_spill] sm:$0xff]  ;;  %v4158_v53 = vld [vmem:[#allocation3_spill] sm:$0xff] }
 0x1c7   : > { %v1024_v0 = vadd.f32 %v3707_v44, %v1023_v54  ;;  %vm2742_vm11 = vmpackc.low %vm1326_vm10, %vm1325_vm9  ;;  %v1781_v22 = vmul.f32 0.2, %v4157_v26  ;;  %v1136_v40 = vmul.f32 0.2, %v4158_v53 }
 0x1c8   : > { %1923 = vst [vmem:[%s3546_s13 + $0x90] sm:$0xff] %v1874_v51  ;;  %vm1972_vm12 = vcmp.gt.f32.partialorder %v1874_v51, 0.2 }
 0x1c9   : > { %v2772_v4 = vsel %vm1972_vm12, 1.0, %v3011_v38  ;;  %v3857_v27 = vadd.f32 %v1182_v59, %v1024_v0  ;;  %vm1732_vm12 = vcmp.gt.f32.partialorder %v4157_v26, 0.2 }
 0x1ca   : > { %v1830_v16 = vsel %vm1732_vm12, 0.0, %v1781_v22 }
 0x1cb   : > { %v1632_v39 = vpop.f32.mrf.mxu1  ;;  %1280 = vst [vmem:[%s3272_s17 + $0x150] sm:$0xff] %v3857_v27 }
 0x1cc   : > { %v1633_v9 = vadd.f32 %v3397_v18, %v1632_v39  ;;  %v1137_v39 = vmul.f32 0.2, %v4159_v3 }
 0x1ce   : > { %v1875_v43 = vadd.f32 %v1826_v21, %v1633_v9  ;;  %v1025_v24 = vpop.f32.mrf.mxu3  ;;  %v1186_v63 = vsel %vm1088_vm15, 0.0, %v1137_v39 }
 0x1cf   : > { %v1026_v28 = vadd.f32 %v3707_v44, %v1025_v24  ;;  %v1783_v24 = vmul.f32 0.2, %v4162_v50 }
 0x1d0   : > { %vm1973_vm13 = vcmp.gt.f32.partialorder %v1875_v43, 0.2  ;;  %1924 = vst [vmem:[%s3546_s13 + $0x98] sm:$0xff] %v1875_v43 }
 0x1d1   : > { %v2773_v35 = vsel %vm1973_vm13, 1.0, %v3011_v38  ;;  %v3864_v46 = vadd.f32 %v1183_v5, %v1026_v28  ;;  %vm1087_vm13 = vcmp.gt.f32.partialorder %v4158_v53, 0.2  ;;  %v1832_v5 = vsel %vm1734_vm7, 0.0, %v1783_v24  ;;  %v4166_v53 = vld [vmem:[#allocation13_spill] sm:$0xff] }
 0x1d2   : > { %v2872_v60 = vpack.c.bf16 %v2773_v35, %v2772_v4  ;;  %v1185_v37 = vsel %vm1087_vm13, 0.0, %v1136_v40  ;;  %v4160_v35 = vld [vmem:[#allocation9_spill] sm:$0xff]  ;;  %v1786_v40 = vmul.f32 0.2, %v4166_v53 }
 0x1d3   : > { %v1635_v13 = vpop.f32.mrf.mxu1  ;;  %1281 = vst [vmem:[%s3272_s17 + $0x158] sm:$0xff] %v3864_v46  ;;  %vm1733_vm5 = vcmp.gt.f32.partialorder %v4160_v35, 0.2  ;;  %vm1330_vm8 = vcmp.gt.f32.partialorder %v3864_v46, 0.2 }
 0x1d4   : > { %2924 = vst [vmem:[%s3577_s15 + $0x48] sm:$0xff] %v2872_v60   ;;  %v1636_v47 = vadd.f32 %v3397_v18, %v1635_v13  ;;  %v1782_v60 = vmul.f32 0.2, %v4160_v35 }
 0x1d6   : > { %v1876_v14 = vadd.f32 %v1827_v57, %v1636_v47  ;;  %2741 = vmatmul.msk.bf16.gmra.mxu2 %vm2740_vm3, %v4154_v31  ;;  %v1028_v30 = vpop.f32.mrf.mxu3  ;;  %vm1328_vm3 = vcmp.gt.f32.partialorder %v3836_v20, 0.2  ;;  %v4161_v57 = vld [vmem:[#allocation5_spill] sm:$0xff]  ;;  %v1831_v0 = vsel %vm1733_vm5, 0.0, %v1782_v60  ;;  %vm1737_vm5 = vcmp.gt.f32.partialorder %v4166_v53, 0.2 }
 0x1d7   : > { %v1029_v1 = vadd.f32 %v3707_v44, %v1028_v30  ;;  %vm2744_vm4 = vmpackc.low %vm1328_vm3, %vm1327_vm2  ;;  %v1138_v47 = vmul.f32 0.2, %v4161_v57  ;;  %v1794_v53 = vmul.f32 0.2, %v3507_v11 }
 0x1d8   : > { %1925 = vst [vmem:[%s3546_s13 + $0xa0] sm:$0xff] %v1876_v14  ;;  %vm1974_vm6 = vcmp.gt.f32.partialorder %v1876_v14, 0.2 }
 0x1d9   : > { %v3879_v33 = vadd.f32 %v1184_v23, %v1029_v1 }
 0x1db   : > { %v1637_v42 = vpop.f32.mrf.mxu1  ;;  %1282 = vst [vmem:[%s3272_s17 + $0x160] sm:$0xff] %v3879_v33  ;;  %vm1331_vm15 = vcmp.gt.f32.partialorder %v3879_v33, 0.2 }
 0x1dc   : > { %v1638_v7 = vadd.f32 %v3397_v18, %v1637_v42  ;;  %v2774_v18 = vsel %vm1974_vm6, 1.0, %v3011_v38  ;;  %vm1089_vm6 = vcmp.gt.f32.partialorder %v4161_v57, 0.2 }
 0x1dd   : > { %v1187_v15 = vsel %vm1089_vm6, 0.0, %v1138_v47 }
 0x1de   : > { %v1877_v8 = vadd.f32 %v1828_v55, %v1638_v7  ;;  %v1030_v61 = vpop.f32.mrf.mxu3  ;;  %v4163_v7 = vld [vmem:[#allocation11_spill] sm:$0xff] }
 0x1df   : > { %v1031_v45 = vadd.f32 %v3707_v44, %v1030_v61  ;;  %vm1735_vm12 = vcmp.gt.f32.partialorder %v4163_v7, 0.2 }
 0x1e0   : > { %vm1975_vm0 = vcmp.gt.f32.partialorder %v1877_v8, 0.2  ;;  %1926 = vst [vmem:[%s3546_s13 + $0xa8] sm:$0xff] %v1877_v8  ;;  %v1784_v8 = vmul.f32 0.2, %v4163_v7 }
 0x1e1   : > { %v2775_v17 = vsel %vm1975_vm0, 1.0, %v3011_v38  ;;  %v3895_v51 = vadd.f32 %v1185_v37, %v1031_v45  ;;  %vm1329_vm0 = vcmp.gt.f32.partialorder %v3857_v27, 0.2 }
 0x1e2   : > { %v2875_v52 = vpack.c.bf16 %v2775_v17, %v2774_v18  ;;  %vm2746_vm10 = vmpackc.low %vm1330_vm8, %vm1329_vm0  ;;  %v1833_v49 = vsel %vm1735_vm12, 0.0, %v1784_v8  ;;  %v4164_v18 = vld [vmem:[#allocation6_spill] sm:$0xff] }
 0x1e3   : > { %v1640_v29 = vpop.f32.mrf.mxu1  ;;  %1283 = vst [vmem:[%s3272_s17 + $0x168] sm:$0xff] %v3895_v51  ;;  %vm1090_vm13 = vcmp.gt.f32.partialorder %v4164_v18, 0.2  ;;  %v1139_v17 = vmul.f32 0.2, %v4164_v18 }
 0x1e4   : > { %2925 = vst [vmem:[%s3577_s15 + $0x50] sm:$0xff] %v2875_v52   ;;  %v1641_v36 = vadd.f32 %v3883_v2, %v1640_v29  ;;  %v4165_v29 = vld [vmem:[#allocation12_spill] sm:$0xff] }
 0x1e5   : > { %v1188_v52 = vsel %vm1090_vm13, 0.0, %v1139_v17 }
 0x1e6   : > { %v1878_v62 = vadd.f32 %v1829_v25, %v1641_v36  ;;  %2743 = vmatmul.msk.bf16.gmra.mxu2 %vm2742_vm11, %v4154_v31  ;;  %v1033_v34 = vpop.f32.mrf.mxu3  ;;  %v1785_v25 = vmul.f32 0.2, %v4165_v29 }
 0x1e7   : > { %v1034_v21 = vadd.f32 %v3707_v44, %v1033_v34 }
 0x1e8   : > { %1927 = vst [vmem:[%s3546_s13 + $0xb0] sm:$0xff] %v1878_v62  ;;  %vm1976_vm14 = vcmp.gt.f32.partialorder %v1878_v62, 0.2 }
 0x1e9   : > { %v2776_v9 = vsel %vm1976_vm14, 1.0, %v3011_v38  ;;  %v3908_v4 = vadd.f32 %v1186_v63, %v1034_v21  ;;  %vm1736_vm14 = vcmp.gt.f32.partialorder %v4165_v29, 0.2 }
 0x1ea   : > { %v1834_v22 = vsel %vm1736_vm14, 0.0, %v1785_v25 }
 0x1eb   : > { %v1642_v58 = vpop.f32.mrf.mxu1  ;;  %1284 = vst [vmem:[%s3272_s17 + $0x170] sm:$0xff] %v3908_v4  ;;  %vm1333_vm7 = vcmp.gt.f32.partialorder %v3908_v4, 0.2 }
 0x1ec   : > { %v1643_v6 = vadd.f32 %v3883_v2, %v1642_v58 }
 0x1ee   : > { %v1879_v32 = vadd.f32 %v1830_v16, %v1643_v6  ;;  %v1035_v13 = vpop.f32.mrf.mxu3  ;;  %v1835_v16 = vsel %vm1737_vm5, 0.0, %v1786_v40 }
 0x1ef   : > { %v1036_v48 = vadd.f32 %v3707_v44, %v1035_v13 }
 0x1f0   : > { %vm1977_vm1 = vcmp.gt.f32.partialorder %v1879_v32, 0.2  ;;  %1928 = vst [vmem:[%s3546_s13 + $0xb8] sm:$0xff] %v1879_v32  ;;  %v4167_v32 = vld [vmem:[#allocation14_spill] sm:$0xff] }
 0x1f1   : > { %v2777_v43 = vsel %vm1977_vm1, 1.0, %v3011_v38  ;;  %v3920_v59 = vadd.f32 %v1187_v15, %v1036_v48  ;;  %vm1332_vm1 = vcmp.gt.f32.partialorder %v3895_v51, 0.2  ;;  %v1787_v34 = vmul.f32 0.2, %v4167_v32  ;;  %v4169_v48 = vld [vmem:[#allocation16_spill] sm:$0xff] }
 0x1f2   : > { %v2878_v54 = vpack.c.bf16 %v2777_v43, %v2776_v9  ;;  %vm2748_vm3 = vmpackc.low %vm1332_vm1, %vm1331_vm15  ;;  %vm1738_vm6 = vcmp.gt.f32.partialorder %v4167_v32, 0.2  ;;  %v4168_v43 = vld [vmem:[#allocation15_spill] sm:$0xff]  ;;  %vm1740_vm12 = vcmp.gt.f32.partialorder %v4169_v48, 0.2 }
 0x1f3   : > { %1285 = vst [vmem:[%s3272_s17 + $0x178] sm:$0xff] %v3920_v59  ;;  %v1836_v39 = vsel %vm1738_vm6, 0.0, %v1787_v34  ;;  %vm1334_vm0 = vcmp.gt.f32.partialorder %v3920_v59, 0.2  ;;  %v1788_v63 = vmul.f32 0.2, %v4168_v43 }
 0x1f4   : > { %2926 = vst [vmem:[%s3577_s15 + $0x58] sm:$0xff] %v2878_v54  }
 0x1f6   : > { %2745 = vmatmul.msk.bf16.gmra.mxu2 %vm2744_vm4, %v4154_v31 }
 0x1f7   : > { %v1038_v27 = vpop.f32.mrf.mxu3 }
 0x1f8   : > { %v1039_v1 = vadd.f32 %v3707_v44, %v1038_v27 }
 0x1f9   : > { %v1645_v20 = vpop.f32.mrf.mxu2 }
 0x1fa   : > { %v1646_v14 = vadd.f32 %v3883_v2, %v1645_v20  ;;  %v1237_v36 = vadd.f32 %v1188_v52, %v1039_v1  ;;  %v1789_v20 = vmul.f32 0.2, %v4169_v48 }
 0x1fc   : > { %v1880_v41 = vadd.f32 %v1831_v0, %v1646_v14  ;;  %1286 = vst [vmem:[%s3272_s17 + $0x180] sm:$0xff] %v1237_v36  ;;  %vm1335_vm13 = vcmp.gt.f32.partialorder %v1237_v36, 0.2  ;;  %v1838_v15 = vsel %vm1740_vm12, 0.0, %v1789_v20  ;;  %v4173_v36 = vld [vmem:[#allocation20_spill] sm:$0xff] }
 0x1fd   : > { %vm2752_vm14 = vmpackc.low %vm1335_vm13, %vm1335_vm13  ;;  %vm1747_vm13 = vcmp.gt.f32.partialorder %v3513_v10, 0.2 }
 0x1fe   : > { %1929 = vst [vmem:[%s3546_s13 + $0xc0] sm:$0xff] %v1880_v41  ;;  %vm1978_vm9 = vcmp.gt.f32.partialorder %v1880_v41, 0.2  ;;  %v4170_v41 = vld [vmem:[#allocation17_spill] sm:$0xff] }
 0x1ff   : > { %v2778_v19 = vsel %vm1978_vm9, 1.0, %v3011_v38  ;;  %v1040_v62 = vpop.f32.mrf.mxu3  ;;  %vm2750_vm9 = vmpackc.low %vm1334_vm0, %vm1333_vm7  ;;  %v1790_v50 = vmul.f32 0.2, %v4170_v41  ;;  %vm1744_vm7 = vcmp.gt.f32.partialorder %v4173_v36, 0.2 }
 0x200   : > { %v1793_v62 = vmul.f32 0.2, %v4173_v36 }
 0x201   : > { %v1647_v28 = vpop.f32.mrf.mxu2 }
 0x202   : > { %v1648_v42 = vadd.f32 %v3883_v2, %v1647_v28 }
 0x204   : > { %v1881_v55 = vadd.f32 %v1832_v5, %v1648_v42 }
 0x206   : > { %vm1979_vm11 = vcmp.gt.f32.partialorder %v1881_v55, 0.2  ;;  %2747 = vmatmul.msk.bf16.gmra.mxu2 %vm2746_vm10, %v4154_v31  ;;  %1930 = vst [vmem:[%s3546_s13 + $0xc8] sm:$0xff] %v1881_v55 }
 0x207   : > { %v2779_v56 = vsel %vm1979_vm11, 1.0, %v3011_v38  ;;  %vm1739_vm11 = vcmp.gt.f32.partialorder %v4168_v43, 0.2 }
 0x208   : > { %v2881_v30 = vpack.c.bf16 %v2779_v56, %v2778_v19  ;;  %v1837_v13 = vsel %vm1739_vm11, 0.0, %v1788_v63  ;;  %v4171_v19 = vld [vmem:[#allocation18_spill] sm:$0xff] }
 0x209   : > { %v1650_v46 = vpop.f32.mrf.mxu2  ;;  %v1791_v56 = vmul.f32 0.2, %v4171_v19 }
 0x20a   : > { %2927 = vst [vmem:[%s3577_s15 + $0x60] sm:$0xff] %v2881_v30   ;;  %v1651_v12 = vadd.f32 %v3883_v2, %v1650_v46 }
 0x20c   : > { %v1882_v23 = vadd.f32 %v1833_v49, %v1651_v12  ;;  %v4172_v49 = vld [vmem:[#allocation19_spill] sm:$0xff] }
 0x20d   : > { %v1792_v12 = vmul.f32 0.2, %v4172_v49  ;;  %vm1743_vm6 = vcmp.gt.f32.partialorder %v4172_v49, 0.2 }
 0x20e   : > { %1931 = vst [vmem:[%s3546_s13 + $0xd0] sm:$0xff] %v1882_v23  ;;  %vm1980_vm2 = vcmp.gt.f32.partialorder %v1882_v23, 0.2 }
 0x20f   : > { %v2780_v45 = vsel %vm1980_vm2, 1.0, %v3011_v38  ;;  %vm1741_vm2 = vcmp.gt.f32.partialorder %v4170_v41, 0.2  ;;  %v1841_v52 = vsel %vm1743_vm6, 0.0, %v1792_v12 }
 0x210   : > { %v1839_v55 = vsel %vm1741_vm2, 0.0, %v1790_v50 }
 0x211   : > { %v1652_v26 = vpop.f32.mrf.mxu2 }
 0x212   : > { %v1653_v61 = vadd.f32 %v3883_v2, %v1652_v26 }
 0x214   : > { %v1883_v44 = vadd.f32 %v1834_v22, %v1653_v61  ;;  %v1842_v22 = vsel %vm1744_vm7, 0.0, %v1793_v62 }
 0x216   : > { %vm1981_vm4 = vcmp.gt.f32.partialorder %v1883_v44, 0.2  ;;  %2749 = vmatmul.msk.bf16.gmra.mxu2 %vm2748_vm3, %v4154_v31  ;;  %1932 = vst [vmem:[%s3546_s13 + $0xd8] sm:$0xff] %v1883_v44  ;;  %vm1742_vm3 = vcmp.gt.f32.partialorder %v4171_v19, 0.2 }
 0x217   : > { %v2781_v37 = vsel %vm1981_vm4, 1.0, %v3011_v38  ;;  %v1840_v27 = vsel %vm1742_vm3, 0.0, %v1791_v56 }
 0x218   : > { %v2884_v58 = vpack.c.bf16 %v2781_v37, %v2780_v45 }
 0x219   : > { %v1655_v33 = vpop.f32.mrf.mxu2 }
 0x21a   : > { %2928 = vst [vmem:[%s3577_s15 + $0x68] sm:$0xff] %v2884_v58   ;;  %v1656_v51 = vadd.f32 %v3883_v2, %v1655_v33 }
 0x21c   : > { %v1884_v6 = vadd.f32 %v1835_v16, %v1656_v51 }
 0x21e   : > { %1933 = vst [vmem:[%s3546_s13 + $0xe0] sm:$0xff] %v1884_v6  ;;  %vm1982_vm8 = vcmp.gt.f32.partialorder %v1884_v6, 0.2  ;;  %v4174_v6 = vld [vmem:[#allocation21_spill] sm:$0xff] }
 0x21f   : > { %v2782_v54 = vsel %vm1982_vm8, 1.0, %v3011_v38  ;;  %v1795_v32 = vmul.f32 0.2, %v4174_v6 }
 0x221   : > { %v1657_v3 = vpop.f32.mrf.mxu2 }
 0x222   : > { %v1658_v21 = vadd.f32 %v3883_v2, %v1657_v3 }
 0x224   : > { %v1885_v9 = vadd.f32 %v1836_v39, %v1658_v21  ;;  %v1796_v21 = vmul.f32 0.2, %v3513_v10 }
 0x226   : > { %vm1983_vm10 = vcmp.gt.f32.partialorder %v1885_v9, 0.2  ;;  %2751 = vmatmul.msk.bf16.gmra.mxu2 %vm2750_vm9, %v4154_v31  ;;  %1934 = vst [vmem:[%s3546_s13 + $0xe8] sm:$0xff] %v1885_v9  ;;  %vm1745_vm9 = vcmp.gt.f32.partialorder %v3507_v11, 0.2 }
 0x227   : > { %v2783_v35 = vsel %vm1983_vm10, 1.0, %v3011_v38  ;;  %v1843_v33 = vsel %vm1745_vm9, 0.0, %v1794_v53  ;;  %vm1746_vm10 = vcmp.gt.f32.partialorder %v4174_v6, 0.2 }
 0x228   : > { %v2887_v60 = vpack.c.bf16 %v2783_v35, %v2782_v54  ;;  %v1844_v34 = vsel %vm1746_vm10, 0.0, %v1795_v32  ;;  %v1845_v35 = vsel %vm1747_vm13, 0.0, %v1796_v21 }
 0x229   : > { %v1660_v4 = vpop.f32.mrf.mxu2 }
 0x22a   : > { %2929 = vst [vmem:[%s3577_s15 + $0x70] sm:$0xff] %v2887_v60   ;;  %v1661_v57 = vadd.f32 %v3883_v2, %v1660_v4 }
 0x22c   : > { %v1886_v47 = vadd.f32 %v1837_v13, %v1661_v57  ;;  %v4175_v13 = vld [vmem:[#allocation22_spill] sm:$0xff] }
 0x22d   : > { %v1797_v57 = vmul.f32 0.2, %v4175_v13 }
 0x22e   : > { %1935 = vst [vmem:[%s3546_s13 + $0xf0] sm:$0xff] %v1886_v47  ;;  %vm1984_vm15 = vcmp.gt.f32.partialorder %v1886_v47, 0.2 }
 0x22f   : > { %v2784_v24 = vsel %vm1984_vm15, 1.0, %v3011_v38 }
 0x231   : > { %v1662_v0 = vpop.f32.mrf.mxu2 }
 0x232   : > { %v1663_v14 = vadd.f32 %v3883_v2, %v1662_v0  ;;  %v4176_v0 = vld [vmem:[#allocation23_spill] sm:$0xff] }
 0x233   : > { %vm1749_vm2 = vcmp.gt.f32.partialorder %v4176_v0, 0.2 }
 0x234   : > { %v1887_v59 = vadd.f32 %v1838_v15, %v1663_v14  ;;  %v1798_v15 = vmul.f32 0.2, %v4176_v0 }
 0x236   : > { %vm1985_vm1 = vcmp.gt.f32.partialorder %v1887_v59, 0.2  ;;  %2753 = vmatmul.msk.bf16.gmra.mxu2 %vm2752_vm14, %v4154_v31  ;;  %1936 = vst [vmem:[%s3546_s13 + $0xf8] sm:$0xff] %v1887_v59  ;;  %vm1748_vm14 = vcmp.gt.f32.partialorder %v4175_v13, 0.2 }
 0x237   : > { %v2785_v28 = vsel %vm1985_vm1, 1.0, %v3011_v38  ;;  %v1846_v47 = vsel %vm1748_vm14, 0.0, %v1797_v57 }
 0x238   : > { %v2890_v5 = vpack.c.bf16 %v2785_v28, %v2784_v24  ;;  %v1847_v24 = vsel %vm1749_vm2, 0.0, %v1798_v15 }
 0x239   : > { %v1665_v42 = vpop.f32.mrf.mxu2 }
 0x23a   : > { %2930 = vst [vmem:[%s3577_s15 + $0x78] sm:$0xff] %v2890_v5   ;;  %v1666_v7 = vadd.f32 %v3883_v2, %v1665_v42  ;;  %v4177_v42 = vld [vmem:[#allocation24_spill] sm:$0xff] }
 0x23b   : > { %vm1750_vm3 = vcmp.gt.f32.partialorder %v4177_v42, 0.2 }
 0x23c   : > { %v1888_v8 = vadd.f32 %v1839_v55, %v1666_v7  ;;  %v1799_v55 = vmul.f32 0.2, %v4177_v42 }
 0x23e   : > { %1937 = vst [vmem:[%s3546_s13 + $0x100] sm:$0xff] %v1888_v8  ;;  %vm1986_vm4 = vcmp.gt.f32.partialorder %v1888_v8, 0.2  ;;  %v1848_v8 = vsel %vm1750_vm3, 0.0, %v1799_v55 }
 0x23f   : > { %v2786_v1 = vsel %vm1986_vm4, 1.0, %v3011_v38 }
 0x241   : > { %v1667_v31 = vpop.f32.mrf.mxu2 }
 0x242   : > { %v1668_v30 = vadd.f32 %v3883_v2, %v1667_v31  ;;  %v4178_v31 = vld [vmem:[#allocation25_spill] sm:$0xff] }
 0x243   : > { %vm1751_vm6 = vcmp.gt.f32.partialorder %v4178_v31, 0.2 }
 0x244   : > { %v1889_v46 = vadd.f32 %v1840_v27, %v1668_v30  ;;  %v1800_v27 = vmul.f32 0.2, %v4178_v31 }
 0x246   : > { %vm1987_vm5 = vcmp.gt.f32.partialorder %v1889_v46, 0.2  ;;  %1938 = vst [vmem:[%s3546_s13 + $0x108] sm:$0xff] %v1889_v46 }
 0x247   : > { %v2787_v18 = vsel %vm1987_vm5, 1.0, %v3011_v38 }
 0x248   : > { %v2893_v17 = vpack.c.bf16 %v2787_v18, %v2786_v1  ;;  %v1849_v1 = vsel %vm1751_vm6, 0.0, %v1800_v27 }
 0x249   : > { %v1670_v23 = vpop.f32.mrf.mxu2 }
 0x24a   : > { %2931 = vst [vmem:[%s3577_s15 + $0x80] sm:$0xff] %v2893_v17   ;;  %v1671_v29 = vadd.f32 %v3883_v2, %v1670_v23  ;;  %v4179_v23 = vld [vmem:[#allocation26_spill] sm:$0xff] }
 0x24b   : > { %vm1752_vm7 = vcmp.gt.f32.partialorder %v4179_v23, 0.2 }
 0x24c   : > { %v1890_v25 = vadd.f32 %v1841_v52, %v1671_v29  ;;  %v1801_v52 = vmul.f32 0.2, %v4179_v23 }
 0x24e   : > { %1939 = vst [vmem:[%s3546_s13 + $0x110] sm:$0xff] %v1890_v25  ;;  %vm1988_vm0 = vcmp.gt.f32.partialorder %v1890_v25, 0.2  ;;  %v1850_v25 = vsel %vm1752_vm7, 0.0, %v1801_v52 }
 0x24f   : > { %v2788_v40 = vsel %vm1988_vm0, 1.0, %v3011_v38 }
 0x251   : > { %v1672_v26 = vpop.f32.mrf.mxu2 }
 0x252   : > { %v1673_v61 = vadd.f32 %v3883_v2, %v1672_v26  ;;  %v4180_v26 = vld [vmem:[#allocation27_spill] sm:$0xff] }
 0x253   : > { %vm1753_vm9 = vcmp.gt.f32.partialorder %v4180_v26, 0.2 }
 0x254   : > { %v1891_v44 = vadd.f32 %v1842_v22, %v1673_v61  ;;  %v1802_v22 = vmul.f32 0.2, %v4180_v26 }
 0x256   : > { %vm1989_vm8 = vcmp.gt.f32.partialorder %v1891_v44, 0.2  ;;  %1940 = vst [vmem:[%s3546_s13 + $0x118] sm:$0xff] %v1891_v44 }
 0x257   : > { %v2789_v45 = vsel %vm1989_vm8, 1.0, %v3011_v38 }
 0x258   : > { %v2896_v37 = vpack.c.bf16 %v2789_v45, %v2788_v40  ;;  %v1851_v45 = vsel %vm1753_vm9, 0.0, %v1802_v22 }
 0x259   : > { %v1675_v58 = vpop.f32.mrf.mxu2 }
 0x25a   : > { %2932 = vst [vmem:[%s3577_s15 + $0x88] sm:$0xff] %v2896_v37   ;;  %v1676_v16 = vadd.f32 %v3883_v2, %v1675_v58 }
 0x25c   : > { %v1892_v51 = vadd.f32 %v1843_v33, %v1676_v16  ;;  %v4181_v33 = vld [vmem:[#allocation28_spill] sm:$0xff] }
 0x25d   : > { %v1803_v16 = vmul.f32 0.2, %v4181_v33  ;;  %vm1754_vm10 = vcmp.gt.f32.partialorder %v4181_v33, 0.2 }
 0x25e   : > { %1941 = vst [vmem:[%s3546_s13 + $0x120] sm:$0xff] %v1892_v51  ;;  %vm1990_vm11 = vcmp.gt.f32.partialorder %v1892_v51, 0.2 }
 0x25f   : > { %v2790_v9 = vsel %vm1990_vm11, 1.0, %v3011_v38  ;;  %v1852_v6 = vsel %vm1754_vm10, 0.0, %v1803_v16 }
 0x261   : > { %v1677_v11 = vpop.f32.mrf.mxu2 }
 0x262   : > { %v1678_v3 = vadd.f32 %v3883_v2, %v1677_v11 }
 0x264   : > { %v1893_v39 = vadd.f32 %v1844_v34, %v1678_v3  ;;  %v4182_v34 = vld [vmem:[#allocation29_spill] sm:$0xff] }
 0x265   : > { %v1804_v3 = vmul.f32 0.2, %v4182_v34  ;;  %vm1755_vm13 = vcmp.gt.f32.partialorder %v4182_v34, 0.2 }
 0x266   : > { %vm1991_vm12 = vcmp.gt.f32.partialorder %v1893_v39, 0.2  ;;  %1942 = vst [vmem:[%s3546_s13 + $0x128] sm:$0xff] %v1893_v39 }
 0x267   : > { %v2791_v43 = vsel %vm1991_vm12, 1.0, %v3011_v38 }
 0x268   : > { %v2899_v63 = vpack.c.bf16 %v2791_v43, %v2790_v9 }
 0x269   : > { %v1680_v54 = vpop.f32.mrf.mxu2 }
 0x26a   : > { %2933 = vst [vmem:[%s3577_s15 + $0x90] sm:$0xff] %v2899_v63   ;;  %v1681_v60 = vadd.f32 %v3883_v2, %v1680_v54  ;;  %v1853_v63 = vsel %vm1755_vm13, 0.0, %v1804_v3 }
 0x26c   : > { %v1894_v4 = vadd.f32 %v1845_v35, %v1681_v60  ;;  %v4183_v60 = vld [vmem:[#allocation30_spill] sm:$0xff] }
 0x26d   : > { %vm1756_vm14 = vcmp.gt.f32.partialorder %v4183_v60, 0.2 }
 0x26e   : > { %1943 = vst [vmem:[%s3546_s13 + $0x130] sm:$0xff] %v1894_v4  ;;  %vm1992_vm15 = vcmp.gt.f32.partialorder %v1894_v4, 0.2  ;;  %v1805_v4 = vmul.f32 0.2, %v4183_v60 }
 0x26f   : > { %v2792_v14 = vsel %vm1992_vm15, 1.0, %v3011_v38 }
 0x270   : > { %v1854_v57 = vsel %vm1756_vm14, 0.0, %v1805_v4 }
 0x271   : > { %v1682_v10 = vpop.f32.mrf.mxu2 }
 0x272   : > { %v1683_v48 = vadd.f32 %v3883_v2, %v1682_v10 }
 0x274   : > { %v1895_v20 = vadd.f32 %v1846_v47, %v1683_v48  ;;  %v4184_v48 = vld [vmem:[#allocation31_spill] sm:$0xff] }
 0x275   : > { %vm1757_vm2 = vcmp.gt.f32.partialorder %v4184_v48, 0.2 }
 0x276   : > { %vm1993_vm1 = vcmp.gt.f32.partialorder %v1895_v20, 0.2  ;;  %1944 = vst [vmem:[%s3546_s13 + $0x138] sm:$0xff] %v1895_v20  ;;  %v1806_v20 = vmul.f32 0.2, %v4184_v48 }
 0x277   : > { %v2793_v59 = vsel %vm1993_vm1, 1.0, %v3011_v38 }
 0x278   : > { %v2902_v41 = vpack.c.bf16 %v2793_v59, %v2792_v14 }
 0x279   : > { %v1685_v50 = vpop.f32.mrf.mxu2 }
 0x27a   : > { %2934 = vst [vmem:[%s3577_s15 + $0x98] sm:$0xff] %v2902_v41   ;;  %v1686_v28 = vadd.f32 %v3883_v2, %v1685_v50  ;;  %v1855_v41 = vsel %vm1757_vm2, 0.0, %v1806_v20 }
 0x27c   : > { %v1896_v5 = vadd.f32 %v1847_v24, %v1686_v28 }
 0x27e   : > { %1945 = vst [vmem:[%s3546_s13 + $0x140] sm:$0xff] %v1896_v5  ;;  %vm1994_vm4 = vcmp.gt.f32.partialorder %v1896_v5, 0.2 }
 0x27f   : > { %v2794_v30 = vsel %vm1994_vm4, 1.0, %v3011_v38 }
 0x281   : > { %v1687_v7 = vpop.f32.mrf.mxu2 }
 0x282   : > { %v1688_v19 = vadd.f32 %v3883_v2, %v1687_v7 }
 0x284   : > { %v1897_v56 = vadd.f32 %v1848_v8, %v1688_v19 }
 0x286   : > { %vm1995_vm5 = vcmp.gt.f32.partialorder %v1897_v56, 0.2  ;;  %1946 = vst [vmem:[%s3546_s13 + $0x148] sm:$0xff] %v1897_v56 }
 0x287   : > { %v2795_v46 = vsel %vm1995_vm5, 1.0, %v3011_v38 }
 0x288   : > { %v2905_v49 = vpack.c.bf16 %v2795_v46, %v2794_v30 }
 0x289   : > { %v1690_v12 = vpop.f32.mrf.mxu2 }
 0x28a   : > { %2935 = vst [vmem:[%s3577_s15 + $0xa0] sm:$0xff] %v2905_v49   ;;  %v1691_v18 = vadd.f32 %v3883_v2, %v1690_v12 }
 0x28c   : > { %v1898_v17 = vadd.f32 %v1849_v1, %v1691_v18 }
 0x28e   : > { %1947 = vst [vmem:[%s3546_s13 + $0x150] sm:$0xff] %v1898_v17  ;;  %vm1996_vm0 = vcmp.gt.f32.partialorder %v1898_v17, 0.2 }
 0x28f   : > { %v2796_v61 = vsel %vm1996_vm0, 1.0, %v3011_v38 }
 0x291   : > { %v1692_v29 = vpop.f32.mrf.mxu2 }
 0x292   : > { %v1693_v36 = vadd.f32 %v3883_v2, %v1692_v29 }
 0x294   : > { %v1899_v62 = vadd.f32 %v1850_v25, %v1693_v36 }
 0x296   : > { %vm1997_vm8 = vcmp.gt.f32.partialorder %v1899_v62, 0.2  ;;  %1948 = vst [vmem:[%s3546_s13 + $0x158] sm:$0xff] %v1899_v62 }
 0x297   : > { %v2797_v44 = vsel %vm1997_vm8, 1.0, %v3011_v38 }
 0x298   : > { %v2908_v53 = vpack.c.bf16 %v2797_v44, %v2796_v61 }
 0x299   : > { %v1695_v40 = vpop.f32.mrf.mxu2 }
 0x29a   : > { %2936 = vst [vmem:[%s3577_s15 + $0xa8] sm:$0xff] %v2908_v53   ;;  %v1696_v37 = vadd.f32 %v3883_v2, %v1695_v40 }
 0x29c   : > { %v1900_v58 = vadd.f32 %v1851_v45, %v1696_v37 }
 0x29e   : > { %1949 = vst [vmem:[%s3546_s13 + $0x160] sm:$0xff] %v1900_v58  ;;  %vm1998_vm11 = vcmp.gt.f32.partialorder %v1900_v58, 0.2 }
 0x29f   : > { %v2798_v39 = vsel %vm1998_vm11, 1.0, %v3011_v38 }
 0x2a1   : > { %v1697_v51 = vpop.f32.mrf.mxu2 }
 0x2a2   : > { %v1698_v32 = vadd.f32 %v3883_v2, %v1697_v51 }
 0x2a4   : > { %v1901_v11 = vadd.f32 %v1852_v6, %v1698_v32 }
 0x2a6   : > { %vm1999_vm12 = vcmp.gt.f32.partialorder %v1901_v11, 0.2  ;;  %1950 = vst [vmem:[%s3546_s13 + $0x168] sm:$0xff] %v1901_v11 }
 0x2a7   : > { %v2799_v21 = vsel %vm1999_vm12, 1.0, %v3011_v38 }
 0x2a8   : > { %v2911_v9 = vpack.c.bf16 %v2799_v21, %v2798_v39 }
 0x2a9   : > { %v1700_v43 = vpop.f32.mrf.mxu2 }
 0x2aa   : > { %2937 = vst [vmem:[%s3577_s15 + $0xb0] sm:$0xff] %v2911_v9   ;;  %v1701_v54 = vadd.f32 %v3883_v2, %v1700_v43 }
 0x2ac   : > { %v1902_v35 = vadd.f32 %v1853_v63, %v1701_v54 }
 0x2ae   : > { %1951 = vst [vmem:[%s3546_s13 + $0x170] sm:$0xff] %v1902_v35  ;;  %vm2000_vm15 = vcmp.gt.f32.partialorder %v1902_v35, 0.2 }
 0x2af   : > { %v2800_v0 = vsel %vm2000_vm15, 1.0, %v3011_v38 }
 0x2b1   : > { %v1702_v13 = vpop.f32.mrf.mxu2 }
 0x2b2   : > { %v1703_v10 = vadd.f32 %v3883_v2, %v1702_v13 }
 0x2b4   : > { %v1903_v47 = vadd.f32 %v1854_v57, %v1703_v10 }
 0x2b6   : > { %vm2001_vm1 = vcmp.gt.f32.partialorder %v1903_v47, 0.2  ;;  %1952 = vst [vmem:[%s3546_s13 + $0x178] sm:$0xff] %v1903_v47 }
 0x2b7   : > { %v2801_v15 = vsel %vm2001_vm1, 1.0, %v3011_v38 }
 0x2b8   : > { %v2914_v14 = vpack.c.bf16 %v2801_v15, %v2800_v0 }
 0x2b9   : > { %v1705_v59 = vpop.f32.mrf.mxu2 }
 0x2ba   : > { %2938 = vst [vmem:[%s3577_s15 + $0xb8] sm:$0xff] %v2914_v14   ;;  %v1706_v50 = vadd.f32 %v3883_v2, %v1705_v59 }
 0x2bc   : > { %v1904_v24 = vadd.f32 %v1855_v41, %v1706_v50 }
 0x2be   : > { %1953 = vst [vmem:[%s3546_s13 + $0x180] sm:$0xff] %v1904_v24  ;;  %vm2002_vm3 = vcmp.gt.f32.partialorder %v1904_v24, 0.2 }
 0x2bf   : > { %v2802_v28 = vsel %vm2002_vm3, 1.0, %v3011_v38 }
 0x2c0   : > { %v2149_v5 = vpack.c.bf16 %v2802_v28, %v2802_v28 }
 0x2c1   : > { %v1707_v42 = vpop.f32.mrf.mxu2 }
 0x2c2   : > { %2198 = vst [vmem:[%s3577_s15 + $0xc0] sm:$0xf] %v2149_v5 }
 0x2c3 PF: > { %s20_s11 = sadd.s32 1, %s3008_s11   ;;  %s4185_s30 = smov %s3004_s10 }
 0x2c4   : > { %p17_p5 = scmp.ge.s32.totalorder %s20_s11, 4   ;;  %s4186_s10 = smov %s4188_s12 }
 0x2c6   :  { %19 = sbr.rel (!%p17_p5) target bundleno = 2 (0x2), region = 120 }

// kernel: closed_call.131
= control target key start
LH: loop header
LB: loop body
LE: loop exit
PB: predicated region body
PF: predicated region fallthrough
CT: control target
= control target key end

     0   :  { %s1689_s18 = smov 0   ;;  %s1691_s19 = smov 0   ;;  %s1920_s0 = inlined_call_operand.vmem [shape: bf16[2,104,512], index: 0, kind: input, shape index: {}]   ;;  %s1921_s1 = inlined_call_operand.vmem [shape: bf16[2,512,128], index: 1, kind: input, shape index: {}]   ;;  %s1922_s2 = inlined_call_operand.vmem [shape: f32[2,1,128], index: 2, kind: input, shape index: {}]   ;;  %s1923_s3 = inlined_call_operand.vmem [shape: f32[2,104,128], index: 3, kind: input, shape index: {}, may-alias: {3,4}]   ;;  %s1924_s4 = inlined_call_operand.vmem [shape: f32[2,104,128], index: 4, kind: output, shape index: {0}, may-alias: {3,4}]   ;;  %s1925_s5 = inlined_call_operand.vmem [shape: bf16[2,104,128], index: 5, kind: output, shape index: {1}]  }
   0x1   :  { %s1693_s20 = smov 0  }
   0x2 LB: > { %s28_s21 = sadd.s32 1, %s1652_s19  ;;  %p1279_p0 = scmp.ge.s32.totalorder %s1656_s20, 1  ;;  %s1656_s20 = sphi %s1693_s20, %s16_s20   ;;  %s1652_s19 = sphi %s1691_s19, %s1927_s19   ;;  %s1648_s18 = sphi %s1689_s18, %s1926_s18  }
   0x3   : > { %p30_p1 = scmp.ge.s32.totalorder %s28_s21, 2  ;;  %p249_p2 = scmp.lt.s32.totalorder %s1656_s20, 3 }
   0x5   : > { %s1929_s21 = smov (%p30_p1, %s28_s21), 0  ;;  %p250_p3 = pnand %p1279_p0, %p249_p2 }
   0x6   : > { %p313_p4 = scmp.lt.s32.totalorder (!%p250_p3), %s1648_s18, 1 }
   0x7   : > { %253 = sbr.rel (%p250_p3) target bundleno = 288 (0x120), region = 36 }
   0xc   : > { %s1931_s18 = smov (!%p313_p4, %s1648_s18), 1 }
   0xd   : > { %s1525_s22 = sshll.u32 %s1931_s18, 8  ;;  %s330_s28 = scalar_lea.vmem %s1922_s2, %s1931_s18 }
   0xe   : > { %s1713_s25 = scalar_lea.vmem %s1921_s1, %s1525_s22  ;;  %s1605_s29 = smul.u32 208, %s1931_s18 }
   0xf   : > { %v1557_v0 = vld [vmem:[%s1713_s25 + $0x38] sm:$0xff]  ;;  %v1556_v4 = vld [vmem:[%s1713_s25 + $0x30] sm:$0xff]  ;;  %v1555_v8 = vld [vmem:[%s1713_s25 + $0x28] sm:$0xff]  ;;  %s1606_s8 = smul.u32 104, %s1931_s18 }
  0x10   : > { %v1565_v1 = vld [vmem:[%s1713_s25 + $0x78] sm:$0xff]  ;;  %794 = vmatpush.bf16.msra.mxu0 %v1557_v0  ;;  %v1564_v5 = vld [vmem:[%s1713_s25 + $0x70] sm:$0xff]  ;;  %v1563_v9 = vld [vmem:[%s1713_s25 + $0x68] sm:$0xff]  ;;  %s1749_s7 = scalar_lea.vmem %s1920_s0, %s1605_s29  ;;  %s1607_s17 = smul.u32 52, %s1931_s18 }
  0x11   : > { %v1573_v2 = vld [vmem:[%s1713_s25 + $0xb8] sm:$0xff]  ;;  %837 = vmatpush.bf16.msra.mxu1 %v1565_v1  ;;  %v1572_v6 = vld [vmem:[%s1713_s25 + $0xb0] sm:$0xff]  ;;  %v1571_v10 = vld [vmem:[%s1713_s25 + $0xa8] sm:$0xff]  ;;  %s339_s13 = scalar_lea.vmem %s1923_s3, %s1606_s8  ;;  %s1835_s16 = scalar_lea.vmem %s1924_s4, %s1606_s8 }
  0x12   : > { %v1581_v3 = vld [vmem:[%s1713_s25 + $0xf8] sm:$0xff]  ;;  %880 = vmatpush.bf16.msra.mxu2 %v1573_v2  ;;  %v1580_v7 = vld [vmem:[%s1713_s25 + $0xf0] sm:$0xff]  ;;  %v1579_v11 = vld [vmem:[%s1713_s25 + $0xe8] sm:$0xff]  ;;  %s1851_s24 = scalar_lea.vmem %s1925_s5, %s1607_s17 }
  0x13   : > { %923 = vmatpush.bf16.msra.mxu3 %v1581_v3  ;;  %v1554_v12 = vld [vmem:[%s1713_s25 + $0x20] sm:$0xff]  ;;  %v1553_v16 = vld [vmem:[%s1713_s25 + $0x18] sm:$0xff]  ;;  %v1552_v20 = vld [vmem:[%s1713_s25 + $0x10] sm:$0xff] }
  0x14   : > { %795 = vmatpush.bf16.msra.mxu0 %v1556_v4  ;;  %v1562_v13 = vld [vmem:[%s1713_s25 + $0x60] sm:$0xff]  ;;  %v1561_v17 = vld [vmem:[%s1713_s25 + $0x58] sm:$0xff]  ;;  %v1560_v21 = vld [vmem:[%s1713_s25 + $0x50] sm:$0xff] }
  0x15   : > { %838 = vmatpush.bf16.msra.mxu1 %v1564_v5  ;;  %v1570_v14 = vld [vmem:[%s1713_s25 + $0xa0] sm:$0xff]  ;;  %v1569_v18 = vld [vmem:[%s1713_s25 + $0x98] sm:$0xff]  ;;  %v1568_v22 = vld [vmem:[%s1713_s25 + $0x90] sm:$0xff] }
  0x16   : > { %881 = vmatpush.bf16.msra.mxu2 %v1572_v6  ;;  %v1578_v15 = vld [vmem:[%s1713_s25 + $0xe0] sm:$0xff]  ;;  %v1577_v19 = vld [vmem:[%s1713_s25 + $0xd8] sm:$0xff]  ;;  %v1576_v23 = vld [vmem:[%s1713_s25 + $0xd0] sm:$0xff] }
  0x17   : > { %924 = vmatpush.bf16.msra.mxu3 %v1580_v7  ;;  %v1551_v24 = vld [vmem:[%s1713_s25 + $0x8] sm:$0xff]  ;;  %v1550_v28 = vld [vmem:[%s1713_s25] sm:$0xff]  ;;  %v1528_v33 = vld [vmem:[%s1749_s7 + $0xc] sm:$0xf0] }
  0x18   : > { %796 = vmatpush.bf16.msra.mxu0 %v1555_v8  ;;  %v1559_v25 = vld [vmem:[%s1713_s25 + $0x48] sm:$0xff]  ;;  %v1558_v29 = vld [vmem:[%s1713_s25 + $0x40] sm:$0xff]  ;;  %v1290_v35 = vld [vmem:[%s1749_s7 + $0x10] sm:$0xf0] }
  0x19   : > { %839 = vmatpush.bf16.msra.mxu1 %v1563_v9  ;;  %v1567_v26 = vld [vmem:[%s1713_s25 + $0x88] sm:$0xff]  ;;  %v1566_v30 = vld [vmem:[%s1713_s25 + $0x80] sm:$0xff]  ;;  %v1529_v37 = vld [vmem:[%s1749_s7 + $0x14] sm:$0xf0] }
  0x1a   : > { %882 = vmatpush.bf16.msra.mxu2 %v1571_v10  ;;  %v1575_v27 = vld [vmem:[%s1713_s25 + $0xc8] sm:$0xff]  ;;  %v1574_v31 = vld [vmem:[%s1713_s25 + $0xc0] sm:$0xff]  ;;  %v1298_v39 = vld [vmem:[%s1749_s7 + $0x18] sm:$0xf0] }
  0x1b   : > { %925 = vmatpush.bf16.msra.mxu3 %v1579_v11  ;;  %v1288_v32 = vld [vmem:[%s1749_s7] sm:$0xf]  ;;  %v1526_v34 = vld [vmem:[%s1749_s7 + $0x4] sm:$0xf]  ;;  %v1296_v36 = vld [vmem:[%s1749_s7 + $0x8] sm:$0xf] }
  0x1c   : > { %797 = vmatpush.bf16.msra.mxu0 %v1554_v12  ;;  %v1527_v38 = vld [vmem:[%s1749_s7 + $0xc] sm:$0xf]  ;;  %v1289_v40 = vor.u32 %v1528_v33, %v1288_v32  ;;  %v1293_v41 = vor.u32 %v1526_v34, %v1290_v35  ;;  %v1297_v42 = vor.u32 %v1529_v37, %v1296_v36  ;;  %v1304_v44 = vld [vmem:[%s1749_s7 + $0x20] sm:$0xf]  ;;  %v1532_v45 = vld [vmem:[%s1749_s7 + $0x2c] sm:$0xf0] }
  0x1d   : > { %840 = vmatpush.bf16.msra.mxu1 %v1562_v13  ;;  %v1301_v43 = vor.u32 %v1527_v38, %v1298_v39  ;;  %v1530_v46 = vld [vmem:[%s1749_s7 + $0x24] sm:$0xf]  ;;  %v1306_v47 = vld [vmem:[%s1749_s7 + $0x30] sm:$0xf0]  ;;  %v1312_v48 = vld [vmem:[%s1749_s7 + $0x28] sm:$0xf]  ;;  %v1305_v52 = vor.u32 %v1532_v45, %v1304_v44 }
  0x1e   : > { %883 = vmatpush.bf16.msra.mxu2 %v1570_v14  ;;  %v1533_v49 = vld [vmem:[%s1749_s7 + $0x34] sm:$0xf0]  ;;  %v1531_v50 = vld [vmem:[%s1749_s7 + $0x2c] sm:$0xf]  ;;  %v1314_v51 = vld [vmem:[%s1749_s7 + $0x38] sm:$0xf0]  ;;  %v1309_v53 = vor.u32 %v1530_v46, %v1306_v47 }
  0x1f   : > { %926 = vmatpush.bf16.msra.mxu3 %v1578_v15  ;;  %v1313_v54 = vor.u32 %v1533_v49, %v1312_v48  ;;  %v1317_v55 = vor.u32 %v1531_v50, %v1314_v51  ;;  %v1320_v56 = vld [vmem:[%s1749_s7 + $0x40] sm:$0xf]  ;;  %v1536_v57 = vld [vmem:[%s1749_s7 + $0x4c] sm:$0xf0]  ;;  %v1534_v58 = vld [vmem:[%s1749_s7 + $0x44] sm:$0xf] }
  0x20   : > { %798 = vmatpush.bf16.msra.mxu0 %v1553_v16  ;;  %v1322_v59 = vld [vmem:[%s1749_s7 + $0x50] sm:$0xf0]  ;;  %v1328_v60 = vld [vmem:[%s1749_s7 + $0x48] sm:$0xf]  ;;  %v1537_v61 = vld [vmem:[%s1749_s7 + $0x54] sm:$0xf0]  ;;  %v1321_v0 = vor.u32 %v1536_v57, %v1320_v56 }
  0x21   : > { %841 = vmatpush.bf16.msra.mxu1 %v1561_v17  ;;  %v1535_v62 = vld [vmem:[%s1749_s7 + $0x4c] sm:$0xf]  ;;  %v1330_v63 = vld [vmem:[%s1749_s7 + $0x58] sm:$0xf0]  ;;  %v1325_v1 = vor.u32 %v1534_v58, %v1322_v59  ;;  %v1329_v2 = vor.u32 %v1537_v61, %v1328_v60  ;;  %v1336_v4 = vld [vmem:[%s1749_s7 + $0x60] sm:$0xf] }
  0x22   : > { %884 = vmatpush.bf16.msra.mxu2 %v1569_v18  ;;  %v1333_v3 = vor.u32 %v1535_v62, %v1330_v63  ;;  %v1540_v5 = vld [vmem:[%s1749_s7 + $0x6c] sm:$0xf0]  ;;  %v1538_v6 = vld [vmem:[%s1749_s7 + $0x64] sm:$0xf]  ;;  %v1338_v7 = vld [vmem:[%s1749_s7 + $0x70] sm:$0xf0] }
  0x23   : > { %927 = vmatpush.bf16.msra.mxu3 %v1577_v19  ;;  %v1344_v8 = vld [vmem:[%s1749_s7 + $0x68] sm:$0xf]  ;;  %v1541_v9 = vld [vmem:[%s1749_s7 + $0x74] sm:$0xf0]  ;;  %v1539_v10 = vld [vmem:[%s1749_s7 + $0x6c] sm:$0xf]  ;;  %v1337_v12 = vor.u32 %v1540_v5, %v1336_v4  ;;  %v1341_v13 = vor.u32 %v1538_v6, %v1338_v7 }
  0x24   : > { %799 = vmatpush.bf16.msra.mxu0 %v1552_v20  ;;  %v1346_v11 = vld [vmem:[%s1749_s7 + $0x78] sm:$0xf0]  ;;  %v1345_v14 = vor.u32 %v1541_v9, %v1344_v8  ;;  %v1352_v16 = vld [vmem:[%s1749_s7 + $0x80] sm:$0xf]  ;;  %v1544_v17 = vld [vmem:[%s1749_s7 + $0x8c] sm:$0xf0] }
  0x25   : > { %842 = vmatpush.bf16.msra.mxu1 %v1560_v21  ;;  %v1349_v15 = vor.u32 %v1539_v10, %v1346_v11  ;;  %v1542_v18 = vld [vmem:[%s1749_s7 + $0x84] sm:$0xf]  ;;  %v1354_v19 = vld [vmem:[%s1749_s7 + $0x90] sm:$0xf0]  ;;  %v1360_v20 = vld [vmem:[%s1749_s7 + $0x88] sm:$0xf] }
  0x26   : > { %885 = vmatpush.bf16.msra.mxu2 %v1568_v22  ;;  %v1545_v21 = vld [vmem:[%s1749_s7 + $0x94] sm:$0xf0]  ;;  %v1543_v22 = vld [vmem:[%s1749_s7 + $0x8c] sm:$0xf]  ;;  %v1376_v32 = vld [vmem:[%s1749_s7 + $0xa8] sm:$0xf] }
  0x27   : > { %928 = vmatpush.bf16.msra.mxu3 %v1576_v23  ;;  %v1362_v23 = vld [vmem:[%s1749_s7 + $0x98] sm:$0xf0]  ;;  %v1549_v33 = vld [vmem:[%s1749_s7 + $0xb4] sm:$0xf0]  ;;  %v1547_v34 = vld [vmem:[%s1749_s7 + $0xac] sm:$0xf] }
  0x28   : > { %800 = vmatpush.bf16.msra.mxu0 %v1551_v24  ;;  %v1353_v24 = vor.u32 %v1544_v17, %v1352_v16  ;;  %v1378_v35 = vld [vmem:[%s1749_s7 + $0xb8] sm:$0xf0]  ;;  %v1377_v38 = vor.u32 %v1549_v33, %v1376_v32  ;;  %v1813_v50 = vld [vmem:[%s330_s28] ss:$0 sm:$0xff]  ;;  %v453_v63 = vld [vmem:[%s339_s13 + $0x8] sm:$0xff] }
  0x29   : > { %843 = vmatpush.bf16.msra.mxu1 %v1559_v25  ;;  %v1357_v25 = vor.u32 %v1542_v18, %v1354_v19  ;;  %v1381_v39 = vor.u32 %v1547_v34, %v1378_v35  ;;  %v1823_v4 = vld [vmem:[%s339_s13 + $0x30] sm:$0xff]  ;;  %v1826_v7 = vld [vmem:[%s339_s13 + $0x38] sm:$0xff]  ;;  %v1828_v8 = vld [vmem:[%s339_s13 + $0x40] sm:$0xff]  ;;  %vm967_vm1 = vcmp.gt.f32.partialorder %v453_v63, 0.2 }
  0x2a   : > { %886 = vmatpush.bf16.msra.mxu2 %v1567_v26  ;;  %v1361_v26 = vor.u32 %v1545_v21, %v1360_v20  ;;  %v1830_v9 = vld [vmem:[%s339_s13 + $0x48] sm:$0xff]  ;;  %v1837_v10 = vld [vmem:[%s339_s13 + $0x50] sm:$0xff]  ;;  %v1839_v11 = vld [vmem:[%s339_s13 + $0x58] sm:$0xff]  ;;  %vm972_vm12 = vcmp.gt.f32.partialorder %v1823_v4, 0.2 }
  0x2b   : > { %929 = vmatpush.bf16.msra.mxu3 %v1575_v27  ;;  %v1365_v27 = vor.u32 %v1543_v22, %v1362_v23  ;;  %vm973_vm13 = vcmp.gt.f32.partialorder %v1826_v7, 0.2 }
  0x2c   : > { %801 = vmatpush.bf16.msra.mxu0 %v1550_v28  ;;  %v1368_v28 = vld [vmem:[%s1749_s7 + $0xa0] sm:$0xf] }
  0x2d   : > { %844 = vmatpush.bf16.msra.mxu1 %v1558_v29  ;;  %v1548_v29 = vld [vmem:[%s1749_s7 + $0xac] sm:$0xf0] }
  0x2e   : > { %887 = vmatpush.bf16.msra.mxu2 %v1566_v30  ;;  %v1546_v30 = vld [vmem:[%s1749_s7 + $0xa4] sm:$0xf]  ;;  %v1369_v36 = vor.u32 %v1548_v29, %v1368_v28 }
  0x2f   : > { %930 = vmatpush.bf16.msra.mxu3 %v1574_v31  ;;  %802 = vmatmul.bf16.vlgmr.msra.gmra.mxu0 %v1289_v40  ;;  %v1370_v31 = vld [vmem:[%s1749_s7 + $0xb0] sm:$0xf0]  ;;  %v385_v40 = vld [vmem:[%s1749_s7 + $0xc0] sm:$0xff] }
  0x30   : > { %845 = vmatmul.bf16.vlgmr.msra.gmra.mxu1 %v1293_v41  ;;  %v1373_v37 = vor.u32 %v1546_v30, %v1370_v31  ;;  %v386_v41 = vld [vmem:[%s1749_s7 + $0xc8] sm:$0xff] }
  0x31   : > { %888 = vmatmul.bf16.vlgmr.msra.gmra.mxu2 %v1297_v42  ;;  %v542_v42 = vunpack.c.l.b16 %v385_v40  ;;  %v544_v44 = vunpack.c.l.b16 %v386_v41  ;;  %v545_v45 = vunpack.c.h.b16 %v386_v41 }
  0x32   : > { %931 = vmatmul.bf16.vlgmr.msra.gmra.mxu3 %v1301_v43  ;;  %v543_v43 = vunpack.c.h.b16 %v385_v40 }
  0x33   : > { %v570_v46 = vpack.c.b16 %v542_v42, %v542_v42  ;;  %v572_v48 = vpack.c.b16 %v544_v44, %v544_v44  ;;  %v573_v49 = vpack.c.b16 %v545_v45, %v545_v45 }
  0x34   : > { %v571_v47 = vpack.c.b16 %v543_v43, %v543_v43 }
  0x3f   : > { %807 = vmatmul.bf16.gmra.mxu0 %v1305_v52 }
  0x40   : > { %850 = vmatmul.bf16.gmra.mxu1 %v1309_v53 }
  0x41   : > { %893 = vmatmul.bf16.gmra.mxu2 %v1313_v54  ;;  %v452_v54 = vld [vmem:[%s339_s13] sm:$0xff] }
  0x42   : > { %936 = vmatmul.bf16.gmra.mxu3 %v1317_v55  ;;  %v979_v56 = vmul.f32 0.2, %v452_v54  ;;  %vm966_vm0 = vcmp.gt.f32.partialorder %v452_v54, 0.2 }
  0x44   : > { %v992_v62 = vsel %vm966_vm0, 0.0, %v979_v56  ;;  %vm974_vm0 = vcmp.gt.f32.partialorder %v1828_v8, 0.2 }
  0x4f   : > { %812 = vmatmul.bf16.gmra.mxu0 %v1321_v0  ;;  %v454_v0 = vld [vmem:[%s339_s13 + $0x10] sm:$0xff] }
  0x50   : > { %855 = vmatmul.bf16.gmra.mxu1 %v1325_v1  ;;  %v455_v1 = vld [vmem:[%s339_s13 + $0x18] sm:$0xff]  ;;  %vm968_vm4 = vcmp.gt.f32.partialorder %v454_v0, 0.2 }
  0x51   : > { %898 = vmatmul.bf16.gmra.mxu2 %v1329_v2  ;;  %v1819_v2 = vld [vmem:[%s339_s13 + $0x20] sm:$0xff]  ;;  %v982_v40 = vmul.f32 0.2, %v455_v1  ;;  %vm969_vm5 = vcmp.gt.f32.partialorder %v455_v1, 0.2 }
  0x52   : > { %941 = vmatmul.bf16.gmra.mxu3 %v1333_v3  ;;  %v1821_v3 = vld [vmem:[%s339_s13 + $0x28] sm:$0xff]  ;;  %vm970_vm8 = vcmp.gt.f32.partialorder %v1819_v2, 0.2 }
  0x53   : > { %vm971_vm9 = vcmp.gt.f32.partialorder %v1821_v3, 0.2 }
  0x5f   : > { %817 = vmatmul.bf16.gmra.mxu0 %v1337_v12  ;;  %v1841_v12 = vld [vmem:[%s339_s13 + $0x60] sm:$0xff] }
  0x60   : > { %860 = vmatmul.bf16.gmra.mxu1 %v1341_v13 }
  0x61   : > { %903 = vmatmul.bf16.gmra.mxu2 %v1345_v14  ;;  %v980_v14 = vmul.f32 0.2, %v453_v63 }
  0x62   : > { %946 = vmatmul.bf16.gmra.mxu3 %v1349_v15 }
  0x63   : > { %v993_v21 = vsel %vm967_vm1, 0.0, %v980_v14  ;;  %vm975_vm1 = vcmp.gt.f32.partialorder %v1830_v9, 0.2 }
  0x6f   : > { %822 = vmatmul.bf16.gmra.mxu0 %v1353_v24 }
  0x70   : > { %865 = vmatmul.bf16.gmra.mxu1 %v1357_v25 }
  0x71   : > { %908 = vmatmul.bf16.gmra.mxu2 %v1361_v26  ;;  %v981_v26 = vmul.f32 0.2, %v454_v0 }
  0x72   : > { %951 = vmatmul.bf16.gmra.mxu3 %v1365_v27  ;;  %v1658_v27 = vmov 0.0  }
  0x7f   : > { %827 = vmatmul.bf16.gmra.mxu0 %v1369_v36  ;;  %v994_v36 = vsel %vm968_vm4, 0.0, %v981_v26  ;;  %vm976_vm4 = vcmp.gt.f32.partialorder %v1837_v10, 0.2 }
  0x80   : > { %870 = vmatmul.bf16.gmra.mxu1 %v1373_v37 }
  0x81   : > { %913 = vmatmul.bf16.gmra.mxu2 %v1377_v38 }
  0x82   : > { %956 = vmatmul.bf16.gmra.mxu3 %v1381_v39 }
  0x8f   : > { %832 = vmatmul.bf16.gmra.mxu0 %v570_v46 }
  0x90   : > { %875 = vmatmul.bf16.gmra.mxu1 %v571_v47  ;;  %v995_v47 = vsel %vm969_vm5, 0.0, %v982_v40  ;;  %vm977_vm5 = vcmp.gt.f32.partialorder %v1839_v11, 0.2 }
  0x91   : > { %918 = vmatmul.bf16.gmra.mxu2 %v572_v48 }
  0x92   : > { %961 = vmatmul.bf16.gmra.mxu3 %v573_v49 }
  0xac   : > { %v803_v51 = vpop.f32.mrf.mxu0 }
  0xad   : > { %v846_v52 = vpop.f32.mrf.mxu1  ;;  %v804_v53 = vadd.f32 %v1813_v50, %v803_v51 }
  0xaf   : > { %v847_v55 = vadd.f32 %v846_v52, %v804_v53  ;;  %v983_v53 = vmul.f32 0.2, %v1819_v2  ;;  %v984_v2 = vmul.f32 0.2, %v1821_v3 }
  0xb4   : > { %v889_v57 = vpop.f32.mrf.mxu2  ;;  %v805_v60 = vpop.f32.mrf.mxu0 }
  0xb5   : > { %v932_v58 = vpop.f32.mrf.mxu3  ;;  %v890_v59 = vadd.f32 %v889_v57, %v847_v55  ;;  %v848_v61 = vpop.f32.mrf.mxu1  ;;  %v806_v6 = vadd.f32 %v1813_v50, %v805_v60 }
  0xb7   : > { %v933_v5 = vadd.f32 %v932_v58, %v890_v59  ;;  %v849_v15 = vadd.f32 %v848_v61, %v806_v6 }
  0xb9   : > { %v1005_v13 = vadd.f32 %v992_v62, %v933_v5  ;;  %v996_v62 = vsel %vm970_vm8, 0.0, %v983_v53  ;;  %vm978_vm8 = vcmp.gt.f32.partialorder %v1841_v12, 0.2 }
  0xbb   : > { %1018 = vst [vmem:[%s1835_s16] sm:$0xff] %v1005_v13  ;;  %vm1031_vm2 = vcmp.gt.f32.partialorder %v1005_v13, 0.2 }
  0xbc   : > { %v891_v16 = vpop.f32.mrf.mxu2  ;;  %v808_v19 = vpop.f32.mrf.mxu0  ;;  %v1510_v28 = vsel %vm1031_vm2, 1.0, %v1658_v27 }
  0xbd   : > { %v934_v17 = vpop.f32.mrf.mxu3  ;;  %v892_v18 = vadd.f32 %v891_v16, %v849_v15  ;;  %v851_v20 = vpop.f32.mrf.mxu1  ;;  %v809_v22 = vadd.f32 %v1813_v50, %v808_v19 }
  0xbf   : > { %v935_v23 = vadd.f32 %v934_v17, %v892_v18  ;;  %v852_v25 = vadd.f32 %v851_v20, %v809_v22  ;;  %v997_v17 = vsel %vm971_vm9, 0.0, %v984_v2  ;;  %v985_v22 = vmul.f32 0.2, %v1823_v4 }
  0xc0   : > { %v986_v4 = vmul.f32 0.2, %v1826_v7 }
  0xc1   : > { %v1006_v24 = vadd.f32 %v993_v21, %v935_v23 }
  0xc3   : > { %vm1032_vm3 = vcmp.gt.f32.partialorder %v1006_v24, 0.2  ;;  %1019 = vst [vmem:[%s1835_s16 + $0x8] sm:$0xff] %v1006_v24 }
  0xc4   : > { %v1511_v29 = vsel %vm1032_vm3, 1.0, %v1658_v27  ;;  %v894_v30 = vpop.f32.mrf.mxu2  ;;  %v810_v34 = vpop.f32.mrf.mxu0 }
  0xc5   : > { %v937_v31 = vpop.f32.mrf.mxu3  ;;  %v1583_v32 = vpack.c.bf16 %v1511_v29, %v1510_v28  ;;  %v895_v33 = vadd.f32 %v894_v30, %v852_v25  ;;  %v853_v35 = vpop.f32.mrf.mxu1  ;;  %v811_v38 = vadd.f32 %v1813_v50, %v810_v34 }
  0xc7   : > { %1584 = vst [vmem:[%s1851_s24] sm:$0xff] %v1583_v32   ;;  %v938_v37 = vadd.f32 %v937_v31, %v895_v33  ;;  %v854_v41 = vadd.f32 %v853_v35, %v811_v38  ;;  %v998_v31 = vsel %vm972_vm12, 0.0, %v985_v22 }
  0xc9   : > { %v1007_v39 = vadd.f32 %v994_v36, %v938_v37 }
  0xcb   : > { %1020 = vst [vmem:[%s1835_s16 + $0x10] sm:$0xff] %v1007_v39  ;;  %vm1033_vm6 = vcmp.gt.f32.partialorder %v1007_v39, 0.2 }
  0xcc   : > { %v896_v42 = vpop.f32.mrf.mxu2  ;;  %v813_v45 = vpop.f32.mrf.mxu0  ;;  %v1512_v54 = vsel %vm1033_vm6, 1.0, %v1658_v27 }
  0xcd   : > { %v939_v43 = vpop.f32.mrf.mxu3  ;;  %v897_v44 = vadd.f32 %v896_v42, %v854_v41  ;;  %v856_v46 = vpop.f32.mrf.mxu1  ;;  %v814_v48 = vadd.f32 %v1813_v50, %v813_v45  ;;  %v999_v41 = vsel %vm973_vm13, 0.0, %v986_v4 }
  0xcf   : > { %v940_v49 = vadd.f32 %v939_v43, %v897_v44  ;;  %v857_v52 = vadd.f32 %v856_v46, %v814_v48  ;;  %v987_v46 = vmul.f32 0.2, %v1828_v8  ;;  %v988_v8 = vmul.f32 0.2, %v1830_v9 }
  0xd1   : > { %v1008_v51 = vadd.f32 %v995_v47, %v940_v49 }
  0xd3   : > { %vm1034_vm7 = vcmp.gt.f32.partialorder %v1008_v51, 0.2  ;;  %1021 = vst [vmem:[%s1835_s16 + $0x18] sm:$0xff] %v1008_v51 }
  0xd4   : > { %v1513_v55 = vsel %vm1034_vm7, 1.0, %v1658_v27  ;;  %v899_v56 = vpop.f32.mrf.mxu2  ;;  %v815_v60 = vpop.f32.mrf.mxu0 }
  0xd5   : > { %v942_v57 = vpop.f32.mrf.mxu3  ;;  %v1586_v58 = vpack.c.bf16 %v1513_v55, %v1512_v54  ;;  %v900_v59 = vadd.f32 %v899_v56, %v857_v52  ;;  %v858_v61 = vpop.f32.mrf.mxu1  ;;  %v816_v0 = vadd.f32 %v1813_v50, %v815_v60  ;;  %v1000_v55 = vsel %vm974_vm0, 0.0, %v987_v46 }
  0xd7   : > { %1600 = vst [vmem:[%s1851_s24 + $0x8] sm:$0xff] %v1586_v58   ;;  %v943_v63 = vadd.f32 %v942_v57, %v900_v59  ;;  %v859_v5 = vadd.f32 %v858_v61, %v816_v0 }
  0xd9   : > { %v1009_v1 = vadd.f32 %v996_v62, %v943_v63 }
  0xdb   : > { %1022 = vst [vmem:[%s1835_s16 + $0x20] sm:$0xff] %v1009_v1  ;;  %vm1035_vm10 = vcmp.gt.f32.partialorder %v1009_v1, 0.2  ;;  %v1001_v1 = vsel %vm975_vm1, 0.0, %v988_v8 }
  0xdc   : > { %v901_v6 = vpop.f32.mrf.mxu2  ;;  %v818_v15 = vpop.f32.mrf.mxu0  ;;  %v1514_v3 = vsel %vm1035_vm10, 1.0, %v1658_v27 }
  0xdd   : > { %v944_v13 = vpop.f32.mrf.mxu3  ;;  %v902_v14 = vadd.f32 %v901_v6, %v859_v5  ;;  %v861_v16 = vpop.f32.mrf.mxu1  ;;  %v819_v18 = vadd.f32 %v1813_v50, %v818_v15 }
  0xdf   : > { %v945_v19 = vadd.f32 %v944_v13, %v902_v14  ;;  %v862_v21 = vadd.f32 %v861_v16, %v819_v18  ;;  %v989_v14 = vmul.f32 0.2, %v1837_v10  ;;  %v990_v10 = vmul.f32 0.2, %v1839_v11 }
  0xe1   : > { %v1010_v20 = vadd.f32 %v997_v17, %v945_v19  ;;  %v1002_v22 = vsel %vm976_vm4, 0.0, %v989_v14 }
  0xe3   : > { %vm1036_vm11 = vcmp.gt.f32.partialorder %v1010_v20, 0.2  ;;  %1023 = vst [vmem:[%s1835_s16 + $0x28] sm:$0xff] %v1010_v20 }
  0xe4   : > { %v1515_v23 = vsel %vm1036_vm11, 1.0, %v1658_v27  ;;  %v904_v24 = vpop.f32.mrf.mxu2  ;;  %v820_v29 = vpop.f32.mrf.mxu0 }
  0xe5   : > { %v947_v25 = vpop.f32.mrf.mxu3  ;;  %v1589_v26 = vpack.c.bf16 %v1515_v23, %v1514_v3  ;;  %v905_v28 = vadd.f32 %v904_v24, %v862_v21  ;;  %v863_v30 = vpop.f32.mrf.mxu1  ;;  %v821_v33 = vadd.f32 %v1813_v50, %v820_v29 }
  0xe7   : > { %1601 = vst [vmem:[%s1851_s24 + $0x10] sm:$0xff] %v1589_v26   ;;  %v948_v32 = vadd.f32 %v947_v25, %v905_v28  ;;  %v864_v35 = vadd.f32 %v863_v30, %v821_v33 }
  0xe9   : > { %v1011_v34 = vadd.f32 %v998_v31, %v948_v32  ;;  %v1003_v32 = vsel %vm977_vm5, 0.0, %v990_v10 }
  0xeb   : > { %1024 = vst [vmem:[%s1835_s16 + $0x30] sm:$0xff] %v1011_v34  ;;  %vm1037_vm14 = vcmp.gt.f32.partialorder %v1011_v34, 0.2 }
  0xec   : > { %v906_v36 = vpop.f32.mrf.mxu2  ;;  %v823_v39 = vpop.f32.mrf.mxu0  ;;  %v1516_v7 = vsel %vm1037_vm14, 1.0, %v1658_v27 }
  0xed   : > { %v949_v37 = vpop.f32.mrf.mxu3  ;;  %v907_v38 = vadd.f32 %v906_v36, %v864_v35  ;;  %v866_v40 = vpop.f32.mrf.mxu1  ;;  %v824_v42 = vadd.f32 %v1813_v50, %v823_v39  ;;  %v991_v36 = vmul.f32 0.2, %v1841_v12 }
  0xef   : > { %v950_v43 = vadd.f32 %v949_v37, %v907_v38  ;;  %v867_v45 = vadd.f32 %v866_v40, %v824_v42 }
  0xf1   : > { %v1012_v44 = vadd.f32 %v999_v41, %v950_v43  ;;  %v1004_v43 = vsel %vm978_vm8, 0.0, %v991_v36 }
  0xf3   : > { %vm1038_vm15 = vcmp.gt.f32.partialorder %v1012_v44, 0.2  ;;  %1025 = vst [vmem:[%s1835_s16 + $0x38] sm:$0xff] %v1012_v44 }
  0xf4   : > { %v1517_v47 = vsel %vm1038_vm15, 1.0, %v1658_v27  ;;  %v909_v48 = vpop.f32.mrf.mxu2  ;;  %v825_v53 = vpop.f32.mrf.mxu0 }
  0xf5   : > { %v952_v49 = vpop.f32.mrf.mxu3  ;;  %v1592_v51 = vpack.c.bf16 %v1517_v47, %v1516_v7  ;;  %v910_v52 = vadd.f32 %v909_v48, %v867_v45  ;;  %v868_v54 = vpop.f32.mrf.mxu1  ;;  %v826_v57 = vadd.f32 %v1813_v50, %v825_v53 }
  0xf7   : > { %1602 = vst [vmem:[%s1851_s24 + $0x18] sm:$0xff] %v1592_v51   ;;  %v953_v56 = vadd.f32 %v952_v49, %v910_v52  ;;  %v869_v59 = vadd.f32 %v868_v54, %v826_v57 }
  0xf9   : > { %v1013_v58 = vadd.f32 %v1000_v55, %v953_v56 }
  0xfb   : > { %1026 = vst [vmem:[%s1835_s16 + $0x40] sm:$0xff] %v1013_v58  ;;  %vm1039_vm2 = vcmp.gt.f32.partialorder %v1013_v58, 0.2 }
  0xfc   : > { %v911_v60 = vpop.f32.mrf.mxu2  ;;  %v828_v63 = vpop.f32.mrf.mxu0  ;;  %v1518_v9 = vsel %vm1039_vm2, 1.0, %v1658_v27 }
  0xfd   : > { %v954_v61 = vpop.f32.mrf.mxu3  ;;  %v912_v62 = vadd.f32 %v911_v60, %v869_v59  ;;  %v871_v0 = vpop.f32.mrf.mxu1  ;;  %v829_v2 = vadd.f32 %v1813_v50, %v828_v63 }
  0xff   : > { %v955_v5 = vadd.f32 %v954_v61, %v912_v62  ;;  %v872_v13 = vadd.f32 %v871_v0, %v829_v2 }
 0x101   : > { %v1014_v6 = vadd.f32 %v1001_v1, %v955_v5 }
 0x103   : > { %vm1040_vm3 = vcmp.gt.f32.partialorder %v1014_v6, 0.2  ;;  %1027 = vst [vmem:[%s1835_s16 + $0x48] sm:$0xff] %v1014_v6 }
 0x104   : > { %v1519_v15 = vsel %vm1040_vm3, 1.0, %v1658_v27  ;;  %v914_v16 = vpop.f32.mrf.mxu2  ;;  %v830_v20 = vpop.f32.mrf.mxu0 }
 0x105   : > { %v957_v17 = vpop.f32.mrf.mxu3  ;;  %v1595_v18 = vpack.c.bf16 %v1519_v15, %v1518_v9  ;;  %v915_v19 = vadd.f32 %v914_v16, %v872_v13  ;;  %v873_v21 = vpop.f32.mrf.mxu1  ;;  %v831_v23 = vadd.f32 %v1813_v50, %v830_v20 }
 0x107   : > { %1603 = vst [vmem:[%s1851_s24 + $0x20] sm:$0xff] %v1595_v18   ;;  %v958_v3 = vadd.f32 %v957_v17, %v915_v19  ;;  %v874_v25 = vadd.f32 %v873_v21, %v831_v23 }
 0x109   : > { %v1015_v24 = vadd.f32 %v1002_v22, %v958_v3 }
 0x10b   : > { %1028 = vst [vmem:[%s1835_s16 + $0x50] sm:$0xff] %v1015_v24  ;;  %vm1041_vm6 = vcmp.gt.f32.partialorder %v1015_v24, 0.2 }
 0x10c   : > { %v916_v26 = vpop.f32.mrf.mxu2  ;;  %v833_v30 = vpop.f32.mrf.mxu0  ;;  %v1520_v11 = vsel %vm1041_vm6, 1.0, %v1658_v27 }
 0x10d   : > { %v959_v28 = vpop.f32.mrf.mxu3  ;;  %v917_v29 = vadd.f32 %v916_v26, %v874_v25  ;;  %v876_v31 = vpop.f32.mrf.mxu1  ;;  %v834_v33 = vadd.f32 %v1813_v50, %v833_v30 }
 0x10f   : > { %v960_v34 = vadd.f32 %v959_v28, %v917_v29  ;;  %v877_v35 = vadd.f32 %v876_v31, %v834_v33 }
 0x111   : > { %v1016_v4 = vadd.f32 %v1003_v32, %v960_v34 }
 0x113   : > { %vm1042_vm7 = vcmp.gt.f32.partialorder %v1016_v4, 0.2  ;;  %1029 = vst [vmem:[%s1835_s16 + $0x58] sm:$0xff] %v1016_v4 }
 0x114   : > { %v1521_v37 = vsel %vm1042_vm7, 1.0, %v1658_v27  ;;  %v919_v38 = vpop.f32.mrf.mxu2  ;;  %v835_v41 = vpop.f32.mrf.mxu0 }
 0x115   : > { %v962_v39 = vpop.f32.mrf.mxu3  ;;  %v1598_v50 = vpack.c.bf16 %v1521_v37, %v1520_v11  ;;  %v920_v40 = vadd.f32 %v919_v38, %v877_v35  ;;  %v878_v42 = vpop.f32.mrf.mxu1 }
 0x117   : > { %1604 = vst [vmem:[%s1851_s24 + $0x28] sm:$0xff] %v1598_v50   ;;  %v963_v44 = vadd.f32 %v962_v39, %v920_v40 }
 0x119   : > { %v1017_v45 = vadd.f32 %v1004_v43, %v963_v44 }
 0x11b   : > { %1030 = vst [vmem:[%s1835_s16 + $0x60] sm:$0xff] %v1017_v45  ;;  %vm1043_vm9 = vcmp.gt.f32.partialorder %v1017_v45, 0.2 }
 0x11c   : > { %v1522_v12 = vsel %vm1043_vm9, 1.0, %v1658_v27  ;;  %v921_v46 = vpop.f32.mrf.mxu2 }
 0x11d   : > { %v964_v7 = vpop.f32.mrf.mxu3  ;;  %v1082_v47 = vpack.c.bf16 %v1522_v12, %v1522_v12 }
 0x11f   : > { %1095 = vst [vmem:[%s1851_s24 + $0x30] sm:$0xf] %v1082_v47 }
 0x120 PF: > { %s16_s20 = sadd.s32 1, %s1656_s20   ;;  %s1926_s18 = smov %s1652_s19 }
 0x121   : > { %p13_p5 = scmp.ge.s32.totalorder %s16_s20, 4   ;;  %s1927_s19 = smov %s1929_s21 }
 0x123   :  { %15 = sbr.rel (!%p13_p5) target bundleno = 2 (0x2), region = 87 }

// kernel: closed_call.132
= control target key start
LH: loop header
LB: loop body
LE: loop exit
PB: predicated region body
PF: predicated region fallthrough
CT: control target
= control target key end

     0   :  { %s3745_s24 = smov 0   ;;  %s3747_s25 = smov 0   ;;  %s4344_s0 = inlined_call_operand.vmem [shape: bf16[4,104,576], index: 0, kind: input, shape index: {}]   ;;  %s4345_s1 = inlined_call_operand.vmem [shape: bf16[4,576,128], index: 1, kind: input, shape index: {}]   ;;  %s4346_s2 = inlined_call_operand.vmem [shape: f32[4,1,128], index: 2, kind: input, shape index: {}]   ;;  %s4347_s3 = inlined_call_operand.vmem [shape: f32[4,104,128], index: 3, kind: input, shape index: {}, may-alias: {3,13}]   ;;  %s4348_s4 = inlined_call_operand.vmem [shape: bf16[4,128,128], index: 4, kind: input, shape index: {}]   ;;  %s4349_s5 = inlined_call_operand.vmem [shape: f32[4,1,128], index: 5, kind: input, shape index: {}]   ;;  %s4350_s6 = inlined_call_operand.vmem [shape: f32[4,104,128], index: 6, kind: input, shape index: {}, may-alias: {6,14}]   ;;  %s4351_s7 = inlined_call_operand.vmem [shape: bf16[4,128,128], index: 7, kind: input, shape index: {}]   ;;  %s4352_s8 = inlined_call_operand.vmem [shape: f32[4,1,128], index: 8, kind: input, shape index: {}]   ;;  %s4353_s9 = inlined_call_operand.vmem [shape: f32[4,104,128], index: 9, kind: input, shape index: {}, may-alias: {9,15}]   ;;  %s4354_s10 = inlined_call_operand.vmem [shape: bf16[4,128,128], index: 10, kind: input, shape index: {}]   ;;  %s4355_s11 = inlined_call_operand.vmem [shape: f32[4,1,128], index: 11, kind: input, shape index: {}]   ;;  %s4356_s12 = inlined_call_operand.vmem [shape: f32[4,104,128], index: 12, kind: input, shape index: {}, may-alias: {12,16}]   ;;  %s4357_s13 = inlined_call_operand.vmem [shape: f32[4,104,128], index: 13, kind: output, shape index: {0}, may-alias: {3,13}]   ;;  %s4358_s14 = inlined_call_operand.vmem [shape: f32[4,104,128], index: 14, kind: output, shape index: {1}, may-alias: {6,14}]   ;;  %s4359_s15 = inlined_call_operand.vmem [shape: f32[4,104,128], index: 15, kind: output, shape index: {2}, may-alias: {9,15}]   ;;  %s4360_s16 = inlined_call_operand.vmem [shape: f32[4,104,128], index: 16, kind: output, shape index: {3}, may-alias: {12,16}]   ;;  %s4361_s17 = inlined_call_operand.vmem [shape: bf16[4,104,128], index: 17, kind: output, shape index: {4}]  }
   0x1   :  { %4362 = sst [smem:[#allocation2_spill]] %s4344_s0  ;;  %s3749_s26 = smov 0  }
   0x2   :  { %4363 = sst [smem:[#allocation3_spill]] %s4345_s1 }
   0x3   :  { %4364 = sst [smem:[#allocation4_spill]] %s4346_s2 }
   0x4 LB: > { %s40_s27 = sadd.s32 1, %s3647_s25  ;;  %p2998_p0 = scmp.ge.s32.totalorder %s3651_s26, 1  ;;  %s3651_s26 = sphi %s3749_s26, %s28_s26   ;;  %s3647_s25 = sphi %s3747_s25, %s4370_s25   ;;  %s3643_s24 = sphi %s3745_s24, %s4369_s24  }
   0x5   : > { %p42_p1 = scmp.ge.s32.totalorder %s40_s27, 4  ;;  %p666_p2 = scmp.lt.s32.totalorder %s3651_s26, 5 }
   0x7   : > { %s4372_s27 = smov (%p42_p1, %s40_s27), 0  ;;  %p667_p3 = pnand %p2998_p0, %p666_p2 }
   0x8   : > { %p832_p4 = scmp.lt.s32.totalorder (!%p667_p3), %s3643_s24, 3  ;;  %s4365_s30 = sld [smem:[#allocation3_spill]] (!%p667_p3) }
   0x9   : > { %670 = sbr.rel (%p667_p3) target bundleno = 825 (0x339), region = 72  ;;  %s4366_s2 = sld [smem:[#allocation4_spill]] (!%p667_p3) }
   0xe   : > { %s4374_s24 = smov (!%p832_p4, %s3643_s24), 3  ;;  %vm1476_vm0 = vcmask 523264  }
   0xf   : > { %s3596_s28 = smul.u32 288, %s4374_s24  ;;  %s849_s21 = scalar_lea.vmem %s4366_s2, %s4374_s24 }
  0x10   : > { %s3595_s19 = smul.u32 260, %s4374_s24  ;;  %s3868_s0 = sshll.u32 %s4374_s24, 6 }
  0x11   : > { %s3769_s18 = scalar_lea.vmem %s4365_s30, %s3596_s28  ;;  %s4367_s28 = sld [smem:[#allocation2_spill]] }
  0x12   : > { %v3519_v0 = vld [vmem:[%s3769_s18 + $0x38] sm:$0xff]  ;;  %v3518_v4 = vld [vmem:[%s3769_s18 + $0x30] sm:$0xff]  ;;  %v3517_v8 = vld [vmem:[%s3769_s18 + $0x28] sm:$0xff]  ;;  %s4368_s2 = scalar_lea.vmem %s4349_s5, %s4374_s24  ;;  %s4108_s1 = scalar_lea.vmem %s4354_s10, %s3868_s0 }
  0x13   : > { %v3535_v1 = vld [vmem:[%s3769_s18 + $0xb8] sm:$0xff]  ;;  %1498 = vmatpush.bf16.msra.mxu0 %v3519_v0  ;;  %v3534_v5 = vld [vmem:[%s3769_s18 + $0xb0] sm:$0xff]  ;;  %v3533_v9 = vld [vmem:[%s3769_s18 + $0xa8] sm:$0xff] }
  0x14   : > { %v3527_v2 = vld [vmem:[%s3769_s18 + $0x78] sm:$0xff]  ;;  %1584 = vmatpush.bf16.msra.mxu2 %v3535_v1  ;;  %v3526_v6 = vld [vmem:[%s3769_s18 + $0x70] sm:$0xff]  ;;  %v3525_v10 = vld [vmem:[%s3769_s18 + $0x68] sm:$0xff] }
  0x15   : > { %v3543_v3 = vld [vmem:[%s3769_s18 + $0xf8] sm:$0xff]  ;;  %1541 = vmatpush.bf16.msra.mxu1 %v3527_v2  ;;  %v3542_v7 = vld [vmem:[%s3769_s18 + $0xf0] sm:$0xff]  ;;  %v3541_v11 = vld [vmem:[%s3769_s18 + $0xe8] sm:$0xff] }
  0x16   : > { %1627 = vmatpush.bf16.msra.mxu3 %v3543_v3  ;;  %v3516_v12 = vld [vmem:[%s3769_s18 + $0x20] sm:$0xff]  ;;  %v3515_v16 = vld [vmem:[%s3769_s18 + $0x18] sm:$0xff]  ;;  %v3514_v20 = vld [vmem:[%s3769_s18 + $0x10] sm:$0xff] }
  0x17   : > { %1499 = vmatpush.bf16.msra.mxu0 %v3518_v4  ;;  %v3532_v13 = vld [vmem:[%s3769_s18 + $0xa0] sm:$0xff]  ;;  %v3531_v17 = vld [vmem:[%s3769_s18 + $0x98] sm:$0xff]  ;;  %v3530_v21 = vld [vmem:[%s3769_s18 + $0x90] sm:$0xff]  ;;  %s3805_s29 = scalar_lea.vmem %s4367_s28, %s3595_s19  ;;  %s3876_s19 = scalar_lea.vmem %s4348_s4, %s3868_s0 }
  0x18   : > { %1585 = vmatpush.bf16.msra.mxu2 %v3534_v5  ;;  %v3524_v14 = vld [vmem:[%s3769_s18 + $0x60] sm:$0xff]  ;;  %v3523_v18 = vld [vmem:[%s3769_s18 + $0x58] sm:$0xff]  ;;  %v3522_v22 = vld [vmem:[%s3769_s18 + $0x50] sm:$0xff]  ;;  %s3963_s28 = smul.u32 104, %s4374_s24 }
  0x19   : > { %1542 = vmatpush.bf16.msra.mxu1 %v3526_v6  ;;  %v3540_v15 = vld [vmem:[%s3769_s18 + $0xe0] sm:$0xff]  ;;  %v3539_v19 = vld [vmem:[%s3769_s18 + $0xd8] sm:$0xff]  ;;  %v3538_v23 = vld [vmem:[%s3769_s18 + $0xd0] sm:$0xff] }
  0x1a   : > { %1628 = vmatpush.bf16.msra.mxu3 %v3542_v7  ;;  %v3513_v24 = vld [vmem:[%s3769_s18 + $0x8] sm:$0xff]  ;;  %v3512_v28 = vld [vmem:[%s3769_s18] sm:$0xff]  ;;  %v3484_v33 = vld [vmem:[%s3805_s29 + $0x10] sm:$0xf0]  ;;  %s3989_s20 = scalar_lea.vmem %s4357_s13, %s3963_s28  ;;  %s876_s22 = scalar_lea.vmem %s4350_s6, %s3963_s28 }
  0x1b   : > { %1500 = vmatpush.bf16.msra.mxu0 %v3517_v8  ;;  %v3529_v25 = vld [vmem:[%s3769_s18 + $0x88] sm:$0xff]  ;;  %v3528_v29 = vld [vmem:[%s3769_s18 + $0x80] sm:$0xff]  ;;  %v3485_v35 = vld [vmem:[%s3805_s29 + $0x18] sm:$0xf0]  ;;  %s894_s23 = scalar_lea.vmem %s4353_s9, %s3963_s28 }
  0x1c   : > { %1586 = vmatpush.bf16.msra.mxu2 %v3533_v9  ;;  %v3521_v26 = vld [vmem:[%s3769_s18 + $0x48] sm:$0xff]  ;;  %v3520_v30 = vld [vmem:[%s3769_s18 + $0x40] sm:$0xff]  ;;  %v3020_v37 = vld [vmem:[%s3805_s29 + $0x14] sm:$0xf0] }
  0x1d   : > { %1543 = vmatpush.bf16.msra.mxu1 %v3525_v10  ;;  %v3537_v27 = vld [vmem:[%s3769_s18 + $0xc8] sm:$0xff]  ;;  %v3536_v31 = vld [vmem:[%s3769_s18 + $0xc0] sm:$0xff]  ;;  %v3547_v40 = vld [vmem:[%s3769_s18 + $0x118] sm:$0xff] }
  0x1e   : > { %1629 = vmatpush.bf16.msra.mxu3 %v3541_v11  ;;  %v3018_v32 = vld [vmem:[%s3805_s29] sm:$0xf]  ;;  %v3026_v34 = vld [vmem:[%s3805_s29 + $0x8] sm:$0xf]  ;;  %v3482_v36 = vld [vmem:[%s3805_s29 + $0x4] sm:$0xf] }
  0x1f   : > { %1501 = vmatpush.bf16.msra.mxu0 %v3516_v12  ;;  %v3483_v38 = vld [vmem:[%s3805_s29 + $0xc] sm:$0xf]  ;;  %v3028_v39 = vld [vmem:[%s3805_s29 + $0x1c] sm:$0xf0]  ;;  %v3019_v41 = vor.u32 %v3484_v33, %v3018_v32  ;;  %v3027_v42 = vor.u32 %v3485_v35, %v3026_v34  ;;  %v3023_v43 = vor.u32 %v3482_v36, %v3020_v37  ;;  %v3546_v45 = vld [vmem:[%s3769_s18 + $0x110] sm:$0xff] }
  0x20   : > { %1587 = vmatpush.bf16.msra.mxu2 %v3532_v13  ;;  %v3031_v44 = vor.u32 %v3483_v38, %v3028_v39  ;;  %v3038_v46 = vld [vmem:[%s3805_s29 + $0x28] sm:$0xf]  ;;  %v3489_v47 = vld [vmem:[%s3805_s29 + $0x38] sm:$0xf0]  ;;  %v3046_v48 = vld [vmem:[%s3805_s29 + $0x30] sm:$0xf] }
  0x21   : > { %1544 = vmatpush.bf16.msra.mxu1 %v3524_v14  ;;  %v3490_v49 = vld [vmem:[%s3805_s29 + $0x40] sm:$0xf0]  ;;  %v3487_v50 = vld [vmem:[%s3805_s29 + $0x2c] sm:$0xf]  ;;  %v3040_v51 = vld [vmem:[%s3805_s29 + $0x3c] sm:$0xf0]  ;;  %v3039_v54 = vor.u32 %v3489_v47, %v3038_v46 }
  0x22   : > { %1630 = vmatpush.bf16.msra.mxu3 %v3540_v15  ;;  %v3488_v52 = vld [vmem:[%s3805_s29 + $0x34] sm:$0xf]  ;;  %v3048_v53 = vld [vmem:[%s3805_s29 + $0x44] sm:$0xf0]  ;;  %v3047_v55 = vor.u32 %v3490_v49, %v3046_v48  ;;  %v3043_v56 = vor.u32 %v3487_v50, %v3040_v51  ;;  %v3058_v59 = vld [vmem:[%s3805_s29 + $0x50] sm:$0xf] }
  0x23   : > { %1502 = vmatpush.bf16.msra.mxu0 %v3515_v16  ;;  %v3051_v57 = vor.u32 %v3488_v52, %v3048_v53  ;;  %v3545_v58 = vld [vmem:[%s3769_s18 + $0x108] sm:$0xff]  ;;  %v3494_v60 = vld [vmem:[%s3805_s29 + $0x60] sm:$0xf0]  ;;  %v3066_v61 = vld [vmem:[%s3805_s29 + $0x58] sm:$0xf] }
  0x24   : > { %1588 = vmatpush.bf16.msra.mxu2 %v3531_v17  ;;  %v3495_v62 = vld [vmem:[%s3805_s29 + $0x68] sm:$0xf0]  ;;  %v3492_v63 = vld [vmem:[%s3805_s29 + $0x54] sm:$0xf]  ;;  %v3060_v0 = vld [vmem:[%s3805_s29 + $0x64] sm:$0xf0]  ;;  %v3059_v3 = vor.u32 %v3494_v60, %v3058_v59 }
  0x25   : > { %1545 = vmatpush.bf16.msra.mxu1 %v3523_v18  ;;  %v3493_v1 = vld [vmem:[%s3805_s29 + $0x5c] sm:$0xf]  ;;  %v3068_v2 = vld [vmem:[%s3805_s29 + $0x6c] sm:$0xf0]  ;;  %v3067_v4 = vor.u32 %v3495_v62, %v3066_v61  ;;  %v3063_v5 = vor.u32 %v3492_v63, %v3060_v0  ;;  %v3078_v7 = vld [vmem:[%s3805_s29 + $0x78] sm:$0xf] }
  0x26   : > { %1631 = vmatpush.bf16.msra.mxu3 %v3539_v19  ;;  %v3071_v6 = vor.u32 %v3493_v1, %v3068_v2  ;;  %v3499_v8 = vld [vmem:[%s3805_s29 + $0x88] sm:$0xf0]  ;;  %v3086_v9 = vld [vmem:[%s3805_s29 + $0x80] sm:$0xf]  ;;  %v3500_v10 = vld [vmem:[%s3805_s29 + $0x90] sm:$0xf0] }
  0x27   : > { %1503 = vmatpush.bf16.msra.mxu0 %v3514_v20  ;;  %v3497_v11 = vld [vmem:[%s3805_s29 + $0x7c] sm:$0xf]  ;;  %v3080_v12 = vld [vmem:[%s3805_s29 + $0x8c] sm:$0xf0]  ;;  %v3498_v13 = vld [vmem:[%s3805_s29 + $0x84] sm:$0xf]  ;;  %v3079_v15 = vor.u32 %v3499_v8, %v3078_v7  ;;  %v3087_v16 = vor.u32 %v3500_v10, %v3086_v9 }
  0x28   : > { %1589 = vmatpush.bf16.msra.mxu2 %v3530_v21  ;;  %v3088_v14 = vld [vmem:[%s3805_s29 + $0x94] sm:$0xf0]  ;;  %v3083_v17 = vor.u32 %v3497_v11, %v3080_v12  ;;  %v3544_v19 = vld [vmem:[%s3769_s18 + $0x100] sm:$0xff]  ;;  %v3504_v21 = vld [vmem:[%s3805_s29 + $0xb0] sm:$0xf0]  ;;  %s858_s18 = scalar_lea.vmem %s4347_s3, %s3963_s28 }
  0x29   : > { %1546 = vmatpush.bf16.msra.mxu1 %v3522_v22  ;;  %v3091_v18 = vor.u32 %v3498_v13, %v3088_v14  ;;  %v3098_v20 = vld [vmem:[%s3805_s29 + $0xa0] sm:$0xf]  ;;  %v3106_v22 = vld [vmem:[%s3805_s29 + $0xa8] sm:$0xf]  ;;  %v3509_v33 = vld [vmem:[%s3805_s29 + $0xd8] sm:$0xf0] }
  0x2a   : > { %1632 = vmatpush.bf16.msra.mxu3 %v3538_v23  ;;  %v3505_v23 = vld [vmem:[%s3805_s29 + $0xb8] sm:$0xf0]  ;;  %v3118_v32 = vld [vmem:[%s3805_s29 + $0xc8] sm:$0xf]  ;;  %v3126_v34 = vld [vmem:[%s3805_s29 + $0xd0] sm:$0xf] }
  0x2b   : > { %1504 = vmatpush.bf16.msra.mxu0 %v3513_v24  ;;  %v3502_v24 = vld [vmem:[%s3805_s29 + $0xa4] sm:$0xf]  ;;  %v3507_v36 = vld [vmem:[%s3805_s29 + $0xcc] sm:$0xf]  ;;  %v3120_v37 = vld [vmem:[%s3805_s29 + $0xdc] sm:$0xf0] }
  0x2c   : > { %1590 = vmatpush.bf16.msra.mxu2 %v3529_v25  ;;  %v3100_v25 = vld [vmem:[%s3805_s29 + $0xb4] sm:$0xf0]  ;;  %v3510_v35 = vld [vmem:[%s3805_s29 + $0xe0] sm:$0xf0]  ;;  %v3508_v38 = vld [vmem:[%s3805_s29 + $0xd4] sm:$0xf] }
  0x2d   : > { %1547 = vmatpush.bf16.msra.mxu1 %v3521_v26  ;;  %v3503_v26 = vld [vmem:[%s3805_s29 + $0xac] sm:$0xf]  ;;  %v3128_v39 = vld [vmem:[%s3805_s29 + $0xe4] sm:$0xf0]  ;;  %v3054_v59 = vld [vmem:[%s3805_s29 + $0x38] sm:$0xf] }
  0x2e   : > { %1633 = vmatpush.bf16.msra.mxu3 %v3537_v27  ;;  %v3108_v27 = vld [vmem:[%s3805_s29 + $0xbc] sm:$0xf0]  ;;  %v3491_v60 = vld [vmem:[%s3805_s29 + $0x48] sm:$0xf0]  ;;  %v3496_v11 = vld [vmem:[%s3805_s29 + $0x70] sm:$0xf0] }
  0x2f   : > { %1505 = vmatpush.bf16.msra.mxu0 %v3512_v28  ;;  %v3099_v28 = vor.u32 %v3504_v21, %v3098_v20  ;;  %v3888_v61 = vld [vmem:[%s849_s21] ss:$0 sm:$0xff]  ;;  %v3055_v62 = vor.u32 %v3491_v60, %v3054_v59  ;;  %v3553_v9 = vld [vmem:[%s3876_s19 + $0x28] sm:$0xff] }
  0x30   : > { %1591 = vmatpush.bf16.msra.mxu2 %v3528_v29  ;;  %v3107_v29 = vor.u32 %v3505_v23, %v3106_v22  ;;  %v3074_v10 = vld [vmem:[%s3805_s29 + $0x60] sm:$0xf] }
  0x31   : > { %1548 = vmatpush.bf16.msra.mxu1 %v3520_v30  ;;  %v3103_v30 = vor.u32 %v3502_v24, %v3100_v25  ;;  %v3075_v14 = vor.u32 %v3496_v11, %v3074_v10  ;;  %v3552_v25 = vld [vmem:[%s3876_s19 + $0x20] sm:$0xff] }
  0x32   : > { %1634 = vmatpush.bf16.msra.mxu3 %v3536_v31  ;;  %1506 = vmatmul.bf16.vlgmr.msra.gmra.mxu0 %v3019_v41  ;;  %v3111_v31 = vor.u32 %v3503_v26, %v3108_v27  ;;  %v3127_v41 = vor.u32 %v3510_v35, %v3126_v34  ;;  %v3094_v26 = vld [vmem:[%s3805_s29 + $0x88] sm:$0xf]  ;;  %v3501_v27 = vld [vmem:[%s3805_s29 + $0x98] sm:$0xf0] }
  0x33   : > { %1674 = vmatpush.bf16.msrb.mxu0 %v3547_v40  ;;  %1592 = vmatmul.bf16.vlgmr.msra.gmra.mxu2 %v3027_v42  ;;  %v3119_v40 = vor.u32 %v3509_v33, %v3118_v32  ;;  %v3123_v42 = vor.u32 %v3507_v36, %v3120_v37 }
  0x34   : > { %1549 = vmatmul.bf16.vlgmr.msra.gmra.mxu1 %v3023_v43  ;;  %v3131_v43 = vor.u32 %v3508_v38, %v3128_v39  ;;  %v3551_v38 = vld [vmem:[%s3876_s19 + $0x18] sm:$0xff] }
  0x35   : > { %1635 = vmatmul.bf16.vlgmr.msra.gmra.mxu3 %v3031_v44  ;;  %v1001_v44 = vld [vmem:[%s3805_s29 + $0xf0] sm:$0xff] }
  0x36   : > { %v1192_v46 = vunpack.c.l.b16 %v1001_v44  ;;  %v1193_v48 = vunpack.c.h.b16 %v1001_v44  ;;  %v3114_v44 = vld [vmem:[%s3805_s29 + $0xb0] sm:$0xf] }
  0x37   : > { %1675 = vmatpush.bf16.msrb.mxu0 %v3546_v45  ;;  %v1002_v45 = vld [vmem:[%s3805_s29 + $0xf8] sm:$0xff] }
  0x38   : > { %v1194_v47 = vunpack.c.l.b16 %v1002_v45  ;;  %v1195_v49 = vunpack.c.h.b16 %v1002_v45  ;;  %v1227_v50 = vpack.c.b16 %v1192_v46, %v1192_v46  ;;  %v1228_v52 = vpack.c.b16 %v1193_v48, %v1193_v48  ;;  %v3506_v45 = vld [vmem:[%s3805_s29 + $0xc0] sm:$0xf0] }
  0x3a   : > { %v1229_v51 = vpack.c.b16 %v1194_v47, %v1194_v47  ;;  %v1230_v53 = vpack.c.b16 %v1195_v49, %v1195_v49  ;;  %v3115_v49 = vor.u32 %v3506_v45, %v3114_v44 }
  0x3b   : > { %1676 = vmatpush.bf16.msrb.mxu0 %v3545_v58  ;;  %v3554_v58 = vld [vmem:[%s3876_s19 + $0x30] sm:$0xff] }
  0x3f   : > { %1677 = vmatpush.bf16.msrb.mxu0 %v3544_v19 }
  0x42   : > { %1511 = vmatmul.bf16.gmra.mxu0 %v3039_v54  ;;  %v3034_v54 = vld [vmem:[%s3805_s29 + $0x10] sm:$0xf] }
  0x43   : > { %1597 = vmatmul.bf16.gmra.mxu2 %v3047_v55  ;;  %v3486_v55 = vld [vmem:[%s3805_s29 + $0x20] sm:$0xf0] }
  0x44   : > { %1554 = vmatmul.bf16.gmra.mxu1 %v3043_v56  ;;  %v3035_v56 = vor.u32 %v3486_v55, %v3034_v54  ;;  %v3550_v55 = vld [vmem:[%s3876_s19 + $0x10] sm:$0xff] }
  0x45   : > { %1640 = vmatmul.bf16.gmra.mxu3 %v3051_v57  ;;  %v3555_v57 = vld [vmem:[%s3876_s19 + $0x38] sm:$0xff] }
  0x46   : > { %1905 = vmatpush.bf16.msrb.mxu1 %v3555_v57 }
  0x4a   : > { %1906 = vmatpush.bf16.msrb.mxu1 %v3554_v58 }
  0x4e   : > { %1907 = vmatpush.bf16.msrb.mxu1 %v3553_v9 }
  0x52   : > { %1516 = vmatmul.bf16.gmra.mxu0 %v3059_v3  ;;  %1908 = vmatpush.bf16.msrb.mxu1 %v3552_v25  ;;  %v1003_v25 = vld [vmem:[%s3805_s29 + $0x100] sm:$0xf] }
  0x53   : > { %1602 = vmatmul.bf16.gmra.mxu2 %v3067_v4 }
  0x54   : > { %1559 = vmatmul.bf16.gmra.mxu1 %v3063_v5 }
  0x55   : > { %1645 = vmatmul.bf16.gmra.mxu3 %v3071_v6 }
  0x56   : > { %1909 = vmatpush.bf16.msrb.mxu1 %v3551_v38 }
  0x5a   : > { %1910 = vmatpush.bf16.msrb.mxu1 %v3550_v55 }
  0x62   : > { %1521 = vmatmul.bf16.gmra.mxu0 %v3079_v15 }
  0x63   : > { %1607 = vmatmul.bf16.gmra.mxu2 %v3087_v16 }
  0x64   : > { %1564 = vmatmul.bf16.gmra.mxu1 %v3083_v17 }
  0x65   : > { %1650 = vmatmul.bf16.gmra.mxu3 %v3091_v18 }
  0x72   : > { %1526 = vmatmul.bf16.gmra.mxu0 %v3099_v28 }
  0x73   : > { %1612 = vmatmul.bf16.gmra.mxu2 %v3107_v29 }
  0x74   : > { %1569 = vmatmul.bf16.gmra.mxu1 %v3103_v30  ;;  %v3095_v30 = vor.u32 %v3501_v27, %v3094_v26 }
  0x75   : > { %1655 = vmatmul.bf16.gmra.mxu3 %v3111_v31 }
  0x82   : > { %1531 = vmatmul.bf16.gmra.mxu0 %v3119_v40 }
  0x83   : > { %1617 = vmatmul.bf16.gmra.mxu2 %v3127_v41 }
  0x84   : > { %1574 = vmatmul.bf16.gmra.mxu1 %v3123_v42 }
  0x85   : > { %1660 = vmatmul.bf16.gmra.mxu3 %v3131_v43 }
  0x92   : > { %1536 = vmatmul.bf16.gmra.mxu0 %v1227_v50 }
  0x93   : > { %1622 = vmatmul.bf16.gmra.mxu2 %v1229_v51 }
  0x94   : > { %1579 = vmatmul.bf16.gmra.mxu1 %v1228_v52 }
  0x95   : > { %1665 = vmatmul.bf16.gmra.mxu3 %v1230_v53 }
  0xa2   : > { %3280 = vmatmul.msk.bf16.vlgmr.msrb.gmra.mxu0 %vm1476_vm0, %v3035_v56 }
  0xaf   : > { %v1507_v63 = vpop.f32.mrf.mxu0 }
  0xb0   : > { %v1508_v0 = vadd.f32 %v3888_v61, %v1507_v63 }
  0xb1   : > { %v1550_v1 = vpop.f32.mrf.mxu1 }
  0xb2   : > { %v1551_v2 = vadd.f32 %v1550_v1, %v1508_v0  ;;  %3281 = vmatmul.msk.bf16.gmra.mxu0 %vm1476_vm0, %v3055_v62  ;;  %v3134_v1 = vld [vmem:[%s3805_s29 + $0xd8] sm:$0xf] }
  0xb6   : > { %v1593_v3 = vpop.f32.mrf.mxu2 }
  0xb7   : > { %v1594_v4 = vadd.f32 %v1593_v3, %v1551_v2  ;;  %v3892_v6 = vpop.f32.mrf.mxu0  ;;  %v3511_v2 = vld [vmem:[%s3805_s29 + $0xe8] sm:$0xf0]  ;;  %s4004_s29 = scalar_lea.vmem %s4351_s7, %s3868_s0 }
  0xb8   : > { %v1636_v5 = vpop.f32.mrf.mxu3  ;;  %v3135_v9 = vor.u32 %v3511_v2, %v3134_v1 }
  0xb9   : > { %v3894_v7 = vadd.f32 %v1636_v5, %v1594_v4  ;;  %v3896_v8 = vpop.f32.mrf.mxu1 }
  0xbe   : > { %v3901_v12 = vpop.f32.mrf.mxu2 }
  0xbf   : > { %v1512_v15 = vpop.f32.mrf.mxu0 }
  0xc0   : > { %v3903_v13 = vpop.f32.mrf.mxu3  ;;  %v1513_v16 = vadd.f32 %v3888_v61, %v1512_v15 }
  0xc1   : > { %v1555_v17 = vpop.f32.mrf.mxu1 }
  0xc2   : > { %v1556_v18 = vadd.f32 %v1555_v17, %v1513_v16  ;;  %3282 = vmatmul.msk.bf16.gmra.mxu0 %vm1476_vm0, %v3075_v14  ;;  %v3549_v17 = vld [vmem:[%s3876_s19 + $0x8] sm:$0xff] }
  0xc3   : > { %1911 = vmatpush.bf16.msrb.mxu1 %v3549_v17 }
  0xc6   : > { %v1598_v19 = vpop.f32.mrf.mxu2 }
  0xc7   : > { %v1599_v20 = vadd.f32 %v1598_v19, %v1556_v18  ;;  %v3907_v22 = vpop.f32.mrf.mxu0 }
  0xc8   : > { %v1641_v21 = vpop.f32.mrf.mxu3 }
  0xc9   : > { %v3909_v23 = vadd.f32 %v1641_v21, %v1599_v20  ;;  %v3911_v24 = vpop.f32.mrf.mxu1 }
  0xce   : > { %v3916_v28 = vpop.f32.mrf.mxu2 }
  0xcf   : > { %v1517_v31 = vpop.f32.mrf.mxu0 }
  0xd0   : > { %v3918_v29 = vpop.f32.mrf.mxu3  ;;  %v1518_v32 = vadd.f32 %v3888_v61, %v1517_v31 }
  0xd1   : > { %v1560_v33 = vpop.f32.mrf.mxu1 }
  0xd2   : > { %v1561_v34 = vadd.f32 %v1560_v33, %v1518_v32  ;;  %3283 = vmatmul.msk.bf16.gmra.mxu0 %vm1476_vm0, %v3095_v30  ;;  %v1196_v32 = vunpack.c.l.b16 %v1003_v25  ;;  %v3973_v25 = vld [vmem:[%s858_s18 + $0x28] sm:$0xff] }
  0xd3   : > { %vm1718_vm12 = vcmp.gt.f32.partialorder %v3973_v25, 0.2 }
  0xd6   : > { %v1603_v35 = vpop.f32.mrf.mxu2 }
  0xd7   : > { %v1604_v36 = vadd.f32 %v1603_v35, %v1561_v34  ;;  %v1519_v39 = vpop.f32.mrf.mxu0 }
  0xd8   : > { %v1646_v37 = vpop.f32.mrf.mxu3  ;;  %v1520_v40 = vadd.f32 %v3888_v61, %v1519_v39 }
  0xd9   : > { %v3924_v41 = vadd.f32 %v1646_v37, %v1604_v36  ;;  %v1562_v42 = vpop.f32.mrf.mxu1  ;;  %v1231_v36 = vpack.c.b16 %v1196_v32, %v1196_v32  ;;  %v3981_v32 = vld [vmem:[%s858_s18 + $0x40] sm:$0xff] }
  0xda   : > { %v1563_v43 = vadd.f32 %v1562_v42, %v1520_v40 }
  0xde   : > { %v1605_v46 = vpop.f32.mrf.mxu2 }
  0xdf   : > { %v1606_v47 = vadd.f32 %v1605_v46, %v1563_v43  ;;  %v1522_v50 = vpop.f32.mrf.mxu0  ;;  %v3548_v43 = vld [vmem:[%s3876_s19] sm:$0xff]  ;;  %s885_s19 = scalar_lea.vmem %s4352_s8, %s4374_s24 }
  0xe0   : > { %v1648_v48 = vpop.f32.mrf.mxu3  ;;  %v1523_v51 = vadd.f32 %v3888_v61, %v1522_v50  ;;  %1912 = vmatpush.bf16.msrb.mxu1 %v3548_v43 }
  0xe1   : > { %v3929_v52 = vadd.f32 %v1648_v48, %v1606_v47  ;;  %v1565_v53 = vpop.f32.mrf.mxu1 }
  0xe2   : > { %v1566_v54 = vadd.f32 %v1565_v53, %v1523_v51  ;;  %3284 = vmatmul.msk.bf16.gmra.mxu0 %vm1476_vm0, %v3115_v49 }
  0xe6   : > { %v1608_v56 = vpop.f32.mrf.mxu2 }
  0xe7   : > { %v1609_v57 = vadd.f32 %v1608_v56, %v1566_v54  ;;  %v1524_v59 = vpop.f32.mrf.mxu0 }
  0xe8   : > { %v1651_v58 = vpop.f32.mrf.mxu3  ;;  %v1525_v60 = vadd.f32 %v3888_v61, %v1524_v59 }
  0xe9   : > { %v3934_v62 = vadd.f32 %v1651_v58, %v1609_v57  ;;  %v1567_v63 = vpop.f32.mrf.mxu1 }
  0xea   : > { %v1568_v0 = vadd.f32 %v1567_v63, %v1525_v60 }
  0xee   : > { %v1610_v3 = vpop.f32.mrf.mxu2 }
  0xef   : > { %v1611_v4 = vadd.f32 %v1610_v3, %v1568_v0  ;;  %v1527_v10 = vpop.f32.mrf.mxu0 }
  0xf0   : > { %v1653_v5 = vpop.f32.mrf.mxu3  ;;  %v1528_v11 = vadd.f32 %v3888_v61, %v1527_v10  ;;  %v1510_v10 = vadd.f32 %v3888_v61, %v3892_v6  ;;  %v3979_v6 = vld [vmem:[%s858_s18 + $0x38] sm:$0xff] }
  0xf1   : > { %v3939_v14 = vadd.f32 %v1653_v5, %v1611_v4  ;;  %v1570_v15 = vpop.f32.mrf.mxu1  ;;  %v1077_v4 = vld [vmem:[%s858_s18] sm:$0xff] }
  0xf2   : > { %v1571_v16 = vadd.f32 %v1570_v15, %v1528_v11  ;;  %3285 = vmatmul.msk.bf16.gmra.mxu0 %vm1476_vm0, %v3135_v9  ;;  %v1726_v9 = vmul.f32 0.2, %v1077_v4  ;;  %vm1713_vm1 = vcmp.gt.f32.partialorder %v1077_v4, 0.2 }
  0xf4   : > { %v1739_v17 = vsel %vm1713_vm1, 0.0, %v1726_v9  ;;  %vm1720_vm1 = vcmp.gt.f32.partialorder %v3979_v6, 0.2 }
  0xf6   : > { %v1613_v18 = vpop.f32.mrf.mxu2 }
  0xf7   : > { %v1614_v19 = vadd.f32 %v1613_v18, %v1571_v16  ;;  %v1529_v21 = vpop.f32.mrf.mxu0  ;;  %v1078_v18 = vld [vmem:[%s858_s18 + $0x8] sm:$0xff] }
  0xf8   : > { %v1656_v20 = vpop.f32.mrf.mxu3  ;;  %v1530_v26 = vadd.f32 %v3888_v61, %v1529_v21  ;;  %v1081_v21 = vld [vmem:[%s858_s18 + $0x20] sm:$0xff]  ;;  %vm1714_vm2 = vcmp.gt.f32.partialorder %v1078_v18, 0.2 }
  0xf9   : > { %v3945_v27 = vadd.f32 %v1656_v20, %v1614_v19  ;;  %v1572_v30 = vpop.f32.mrf.mxu1  ;;  %v1079_v19 = vld [vmem:[%s858_s18 + $0x10] sm:$0xff]  ;;  %v1080_v20 = vld [vmem:[%s858_s18 + $0x18] sm:$0xff]  ;;  %vm1717_vm8 = vcmp.gt.f32.partialorder %v1081_v21, 0.2 }
  0xfa   : > { %v1573_v31 = vadd.f32 %v1572_v30, %v1530_v26  ;;  %v3975_v26 = vld [vmem:[%s858_s18 + $0x30] sm:$0xff]  ;;  %v1553_v30 = vadd.f32 %v3896_v8, %v1510_v10  ;;  %v3995_v8 = vld [vmem:[%s858_s18 + $0x60] sm:$0xff]  ;;  %vm1715_vm3 = vcmp.gt.f32.partialorder %v1079_v19, 0.2  ;;  %vm1716_vm7 = vcmp.gt.f32.partialorder %v1080_v20, 0.2 }
  0xfb   : > { %vm1719_vm13 = vcmp.gt.f32.partialorder %v3975_v26, 0.2  ;;  %v1732_v10 = vmul.f32 0.2, %v3975_v26 }
  0xfe   : > { %v1615_v33 = vpop.f32.mrf.mxu2 }
  0xff   : > { %v1616_v34 = vadd.f32 %v1615_v33, %v1573_v31  ;;  %v1532_v37 = vpop.f32.mrf.mxu0  ;;  %v3983_v33 = vld [vmem:[%s858_s18 + $0x48] sm:$0xff] }
 0x100   : > { %v1658_v35 = vpop.f32.mrf.mxu3  ;;  %v1533_v38 = vadd.f32 %v3888_v61, %v1532_v37  ;;  %v1727_v37 = vmul.f32 0.2, %v1078_v18 }
 0x101   : > { %v3948_v39 = vadd.f32 %v1658_v35, %v1616_v34  ;;  %v1575_v40 = vpop.f32.mrf.mxu1  ;;  %v3991_v34 = vld [vmem:[%s858_s18 + $0x50] sm:$0xff]  ;;  %v3993_v35 = vld [vmem:[%s858_s18 + $0x58] sm:$0xff]  ;;  %s3598_s18 = smul.u32 52, %s4374_s24 }
 0x102   : > { %v1576_v42 = vadd.f32 %v1575_v40, %v1533_v38  ;;  %3286 = vmatmul.msk.bf16.gmra.mxu0 %vm1476_vm0, %v1231_v36 }
 0x106   : > { %v1618_v44 = vpop.f32.mrf.mxu2 }
 0x107   : > { %v1619_v45 = vadd.f32 %v1618_v44, %v1576_v42  ;;  %v1534_v47 = vpop.f32.mrf.mxu0  ;;  %v1740_v42 = vsel %vm1714_vm2, 0.0, %v1727_v37  ;;  %vm1721_vm2 = vcmp.gt.f32.partialorder %v3981_v32, 0.2 }
 0x108   : > { %v1661_v46 = vpop.f32.mrf.mxu3  ;;  %v1535_v48 = vadd.f32 %v3888_v61, %v1534_v47 }
 0x109   : > { %v3953_v49 = vadd.f32 %v1661_v46, %v1619_v45  ;;  %v1577_v50 = vpop.f32.mrf.mxu1  ;;  %v3563_v45 = vld [vmem:[%s4004_s29 + $0x38] sm:$0xff]  ;;  %v1515_v46 = vadd.f32 %v3888_v61, %v3907_v22  ;;  %v1729_v22 = vmul.f32 0.2, %v1080_v20 }
 0x10a   : > { %v1578_v51 = vadd.f32 %v1577_v50, %v1535_v48  ;;  %2140 = vmatpush.bf16.msrb.mxu2 %v3563_v45 }
 0x10b   : > { %v1558_v50 = vadd.f32 %v3911_v24, %v1515_v46  ;;  %v1730_v24 = vmul.f32 0.2, %v1081_v21 }
 0x10e   : > { %v1620_v53 = vpop.f32.mrf.mxu2 }
 0x10f   : > { %v1621_v54 = vadd.f32 %v1620_v53, %v1578_v51  ;;  %v1537_v56 = vpop.f32.mrf.mxu0  ;;  %v1601_v53 = vadd.f32 %v3916_v28, %v1558_v50  ;;  %v1743_v28 = vsel %vm1717_vm8, 0.0, %v1730_v24 }
 0x110   : > { %v1663_v55 = vpop.f32.mrf.mxu3  ;;  %v1538_v57 = vadd.f32 %v3888_v61, %v1537_v56  ;;  %v1742_v56 = vsel %vm1716_vm7, 0.0, %v1729_v22  ;;  %vm1723_vm7 = vcmp.gt.f32.partialorder %v3991_v34, 0.2 }
 0x111   : > { %v3960_v58 = vadd.f32 %v1663_v55, %v1621_v54  ;;  %v1580_v59 = vpop.f32.mrf.mxu1  ;;  %v1644_v54 = vadd.f32 %v3918_v29, %v1601_v53  ;;  %v4077_v53 = vld [vmem:[%s4368_s2] ss:$0 sm:$0xff] }
 0x112   : > { %v1581_v60 = vadd.f32 %v1580_v59, %v1538_v57 }
 0x116   : > { %v1623_v63 = vpop.f32.mrf.mxu2 }
 0x117   : > { %v1624_v0 = vadd.f32 %v1623_v63, %v1581_v60  ;;  %v1539_v2 = vpop.f32.mrf.mxu0  ;;  %v3562_v60 = vld [vmem:[%s4004_s29 + $0x30] sm:$0xff] }
 0x118   : > { %v1666_v1 = vpop.f32.mrf.mxu3  ;;  %2141 = vmatpush.bf16.msrb.mxu2 %v3562_v60  ;;  %v4079_v60 = vld [vmem:[%s876_s22 + $0x30] sm:$0xff] }
 0x119   : > { %v3969_v3 = vadd.f32 %v1666_v1, %v1624_v0  ;;  %v1582_v5 = vpop.f32.mrf.mxu1  ;;  %v3561_v0 = vld [vmem:[%s4004_s29 + $0x28] sm:$0xff]  ;;  %v1731_v1 = vmul.f32 0.2, %v3973_v25  ;;  %v1734_v25 = vmul.f32 0.2, %v3981_v32 }
 0x11b   : > { %v1744_v4 = vsel %vm1718_vm12, 0.0, %v1731_v1  ;;  %v1747_v26 = vsel %vm1721_vm2, 0.0, %v1734_v25  ;;  %vm1725_vm12 = vcmp.gt.f32.partialorder %v3995_v8, 0.2  ;;  %v4098_v1 = vld [vmem:[%s876_s22 + $0x60] sm:$0xff] }
 0x11c   : > { %2142 = vmatpush.bf16.msrb.mxu2 %v3561_v0  ;;  %v4096_v0 = vld [vmem:[%s876_s22 + $0x58] sm:$0xff] }
 0x11e   : > { %v1625_v11 = vpop.f32.mrf.mxu2 }
 0x11f   : > { %v1679_v16 = vpop.f32.mrf.mxu0  ;;  %v1745_v11 = vsel %vm1719_vm13, 0.0, %v1732_v10 }
 0x120   : > { %v1668_v15 = vpop.f32.mrf.mxu3  ;;  %v1680_v31 = vadd.f32 %v1679_v16, %v3894_v7  ;;  %v1596_v7 = vadd.f32 %v3901_v12, %v1553_v30  ;;  %v1728_v12 = vmul.f32 0.2, %v1079_v19 }
 0x122   : > { %v1752_v36 = vadd.f32 %v1739_v17, %v1680_v31  ;;  %v1639_v38 = vadd.f32 %v3903_v13, %v1596_v7  ;;  %v3653_v13 = vmov 1.0|1.0   ;;  %v1741_v48 = vsel %vm1715_vm3, 0.0, %v1728_v12  ;;  %v3560_v17 = vld [vmem:[%s4004_s29 + $0x20] sm:$0xff] }
 0x123   : > { %2143 = vmatpush.bf16.msrb.mxu2 %v3560_v17 }
 0x124   : > { %1765 = vst [vmem:[%s3989_s20] sm:$0xff] %v1752_v36  ;;  %vm1778_vm4 = vcmp.gt.f32.partialorder %v1752_v36, 0.2 }
 0x127   : > { %v1681_v40 = vpop.f32.mrf.mxu0 }
 0x128   : > { %v1682_v43 = vadd.f32 %v1681_v40, %v1639_v38 }
 0x12a   : > { %v1753_v44 = vadd.f32 %v1740_v42, %v1682_v43 }
 0x12c   : > { %vm1779_vm5 = vcmp.gt.f32.partialorder %v1753_v44, 0.2  ;;  %1766 = vst [vmem:[%s3989_s20 + $0x8] sm:$0xff] %v1753_v44  ;;  %v1737_v44 = vmul.f32 0.2, %v3993_v35 }
 0x12d   : > { %vm3332_vm6 = vmpackc.low %vm1779_vm5, %vm1778_vm4 }
 0x12e   : > { %3333 = vmatmul.msk.bf16.vlgmr.msrb.gmra.mxu1 %vm3332_vm6, %v3653_v13  ;;  %vm1722_vm6 = vcmp.gt.f32.partialorder %v3983_v33, 0.2 }
 0x12f   : > { %v1684_v47 = vpop.f32.mrf.mxu0 }
 0x130   : > { %v1685_v51 = vadd.f32 %v1684_v47, %v3909_v23 }
 0x132   : > { %v1754_v61 = vadd.f32 %v1741_v48, %v1685_v51  ;;  %v1841_v51 = vld [vmem:[%s876_s22] sm:$0xff] }
 0x133   : > { %vm1948_vm2 = vcmp.gt.f32.partialorder %v1841_v51, 0.2 }
 0x134   : > { %1767 = vst [vmem:[%s3989_s20 + $0x10] sm:$0xff] %v1754_v61  ;;  %vm1780_vm9 = vcmp.gt.f32.partialorder %v1754_v61, 0.2 }
 0x137   : > { %v1686_v55 = vpop.f32.mrf.mxu0 }
 0x138   : > { %v1687_v57 = vadd.f32 %v1686_v55, %v1644_v54  ;;  %v1842_v54 = vld [vmem:[%s876_s22 + $0x8] sm:$0xff]  ;;  %v1843_v55 = vld [vmem:[%s876_s22 + $0x10] sm:$0xff] }
 0x13a   : > { %v1755_v59 = vadd.f32 %v1742_v56, %v1687_v57  ;;  %v1844_v56 = vld [vmem:[%s876_s22 + $0x18] sm:$0xff]  ;;  %v1845_v57 = vld [vmem:[%s876_s22 + $0x20] sm:$0xff] }
 0x13c   : > { %vm1781_vm10 = vcmp.gt.f32.partialorder %v1755_v59, 0.2  ;;  %1768 = vst [vmem:[%s3989_s20 + $0x18] sm:$0xff] %v1755_v59  ;;  %v1846_v59 = vld [vmem:[%s876_s22 + $0x28] sm:$0xff] }
 0x13d   : > { %vm3334_vm11 = vmpackc.low %vm1781_vm10, %vm1780_vm9 }
 0x13e   : > { %3335 = vmatmul.msk.bf16.gmra.mxu1 %vm3334_vm11, %v3653_v13  ;;  %vm1724_vm11 = vcmp.gt.f32.partialorder %v3993_v35, 0.2 }
 0x13f   : > { %v1689_v23 = vpop.f32.mrf.mxu0  ;;  %v1750_v45 = vsel %vm1724_vm11, 0.0, %v1737_v44 }
 0x140   : > { %v1690_v29 = vadd.f32 %v1689_v23, %v3924_v41  ;;  %v4082_v23 = vld [vmem:[%s876_s22 + $0x38] sm:$0xff] }
 0x142   : > { %v1756_v63 = vadd.f32 %v1743_v28, %v1690_v29  ;;  %v4084_v28 = vld [vmem:[%s876_s22 + $0x40] sm:$0xff]  ;;  %v4086_v29 = vld [vmem:[%s876_s22 + $0x48] sm:$0xff] }
 0x144   : > { %1769 = vst [vmem:[%s3989_s20 + $0x20] sm:$0xff] %v1756_v63  ;;  %vm1782_vm14 = vcmp.gt.f32.partialorder %v1756_v63, 0.2  ;;  %v4094_v63 = vld [vmem:[%s876_s22 + $0x50] sm:$0xff]  ;;  %s903_s22 = scalar_lea.vmem %s4355_s11, %s4374_s24 }
 0x147   : > { %v1691_v2 = vpop.f32.mrf.mxu0 }
 0x148   : > { %v1692_v5 = vadd.f32 %v1691_v2, %v3929_v52  ;;  %v1733_v52 = vmul.f32 0.2, %v3979_v6  ;;  %v3559_v6 = vld [vmem:[%s4004_s29 + $0x18] sm:$0xff] }
 0x149   : > { %2144 = vmatpush.bf16.msrb.mxu2 %v3559_v6 }
 0x14a   : > { %v1757_v9 = vadd.f32 %v1744_v4, %v1692_v5  ;;  %v1746_v19 = vsel %vm1720_vm1, 0.0, %v1733_v52  ;;  %v1962_v4 = vmul.f32 0.2, %v1842_v54 }
 0x14c   : > { %vm1783_vm15 = vcmp.gt.f32.partialorder %v1757_v9, 0.2  ;;  %1770 = vst [vmem:[%s3989_s20 + $0x28] sm:$0xff] %v1757_v9 }
 0x14d   : > { %vm3336_vm0 = vmpackc.low %vm1783_vm15, %vm1782_vm14 }
 0x14e   : > { %3337 = vmatmul.msk.bf16.gmra.mxu1 %vm3336_vm0, %v3653_v13 }
 0x14f   : > { %v1694_v41 = vpop.f32.mrf.mxu0 }
 0x150   : > { %v1695_v15 = vadd.f32 %v1694_v41, %v3934_v62 }
 0x152   : > { %v1758_v16 = vadd.f32 %v1745_v11, %v1695_v15  ;;  %v1963_v11 = vmul.f32 0.2, %v1843_v55 }
 0x154   : > { %1771 = vst [vmem:[%s3989_s20 + $0x30] sm:$0xff] %v1758_v16  ;;  %vm1784_vm3 = vcmp.gt.f32.partialorder %v1758_v16, 0.2 }
 0x157   : > { %v1696_v18 = vpop.f32.mrf.mxu0 }
 0x158   : > { %v1697_v20 = vadd.f32 %v1696_v18, %v3939_v14  ;;  %v1735_v14 = vmul.f32 0.2, %v3983_v33  ;;  %v3558_v33 = vld [vmem:[%s4004_s29 + $0x10] sm:$0xff]  ;;  %v3571_v18 = vld [vmem:[%s4108_s1 + $0x38] sm:$0xff] }
 0x159   : > { %2145 = vmatpush.bf16.msrb.mxu2 %v3558_v33  ;;  %2375 = vmatpush.bf16.msrb.mxu3 %v3571_v18 }
 0x15a   : > { %v1759_v21 = vadd.f32 %v1746_v19, %v1697_v20  ;;  %v1748_v7 = vsel %vm1722_vm6, 0.0, %v1735_v14  ;;  %v1964_v19 = vmul.f32 0.2, %v1844_v56 }
 0x15c   : > { %vm1785_vm4 = vcmp.gt.f32.partialorder %v1759_v21, 0.2  ;;  %1772 = vst [vmem:[%s3989_s20 + $0x38] sm:$0xff] %v1759_v21 }
 0x15d   : > { %vm3338_vm5 = vmpackc.low %vm1785_vm4, %vm1784_vm3  ;;  %vm1949_vm3 = vcmp.gt.f32.partialorder %v1842_v54, 0.2  ;;  %vm1950_vm4 = vcmp.gt.f32.partialorder %v1843_v55, 0.2 }
 0x15e   : > { %3339 = vmatmul.msk.bf16.gmra.mxu1 %vm3338_vm5, %v3653_v13  ;;  %v1975_v9 = vsel %vm1949_vm3, 0.0, %v1962_v4  ;;  %v1976_v16 = vsel %vm1950_vm4, 0.0, %v1963_v11  ;;  %vm1956_vm3 = vcmp.gt.f32.partialorder %v4084_v28, 0.2 }
 0x15f   : > { %v1699_v62 = vpop.f32.mrf.mxu0 }
 0x160   : > { %v1700_v30 = vadd.f32 %v1699_v62, %v3945_v27  ;;  %v1736_v27 = vmul.f32 0.2, %v3991_v34 }
 0x162   : > { %v1760_v31 = vadd.f32 %v1747_v26, %v1700_v30  ;;  %v1749_v40 = vsel %vm1723_vm7, 0.0, %v1736_v27  ;;  %v1965_v26 = vmul.f32 0.2, %v1845_v57  ;;  %v3570_v30 = vld [vmem:[%s4108_s1 + $0x30] sm:$0xff] }
 0x163   : > { %2376 = vmatpush.bf16.msrb.mxu3 %v3570_v30 }
 0x164   : > { %1773 = vst [vmem:[%s3989_s20 + $0x40] sm:$0xff] %v1760_v31  ;;  %vm1786_vm8 = vcmp.gt.f32.partialorder %v1760_v31, 0.2 }
 0x167   : > { %v1701_v32 = vpop.f32.mrf.mxu0 }
 0x168   : > { %v1702_v36 = vadd.f32 %v1701_v32, %v3948_v39  ;;  %v3557_v39 = vld [vmem:[%s4004_s29 + $0x8] sm:$0xff] }
 0x169   : > { %2146 = vmatpush.bf16.msrb.mxu2 %v3557_v39 }
 0x16a   : > { %v1761_v37 = vadd.f32 %v1748_v7, %v1702_v36  ;;  %v1966_v7 = vmul.f32 0.2, %v1846_v59 }
 0x16c   : > { %vm1787_vm9 = vcmp.gt.f32.partialorder %v1761_v37, 0.2  ;;  %1774 = vst [vmem:[%s3989_s20 + $0x48] sm:$0xff] %v1761_v37 }
 0x16d   : > { %vm3340_vm10 = vmpackc.low %vm1787_vm9, %vm1786_vm8  ;;  %vm1951_vm8 = vcmp.gt.f32.partialorder %v1844_v56, 0.2  ;;  %vm1952_vm9 = vcmp.gt.f32.partialorder %v1845_v57, 0.2  ;;  %v1971_v56 = vmul.f32 0.2, %v4094_v63 }
 0x16e   : > { %3341 = vmatmul.msk.bf16.gmra.mxu1 %vm3340_vm10, %v3653_v13  ;;  %v1977_v21 = vsel %vm1951_vm8, 0.0, %v1964_v19  ;;  %v1978_v14 = vsel %vm1952_vm9, 0.0, %v1965_v26  ;;  %vm1958_vm8 = vcmp.gt.f32.partialorder %v4094_v63, 0.2  ;;  %v3566_v57 = vld [vmem:[%s4108_s1 + $0x10] sm:$0xff]  ;;  %v2077_v19 = vld [vmem:[%s894_s23 + $0x8] sm:$0xff] }
 0x16f   : > { %v1704_v38 = vpop.f32.mrf.mxu0  ;;  %v2082_v26 = vld [vmem:[%s894_s23 + $0x30] sm:$0xff] }
 0x170   : > { %v1705_v42 = vadd.f32 %v1704_v38, %v3953_v49  ;;  %v1738_v49 = vmul.f32 0.2, %v3995_v8  ;;  %v3556_v8 = vld [vmem:[%s4004_s29] sm:$0xff]  ;;  %s4092_s29 = scalar_lea.vmem %s4358_s14, %s3963_s28  ;;  %v3569_v38 = vld [vmem:[%s4108_s1 + $0x28] sm:$0xff] }
 0x171   : > { %2147 = vmatpush.bf16.msrb.mxu2 %v3556_v8  ;;  %2377 = vmatpush.bf16.msrb.mxu3 %v3569_v38 }
 0x172   : > { %v1762_v43 = vadd.f32 %v1749_v40, %v1705_v42  ;;  %v1751_v47 = vsel %vm1725_vm12, 0.0, %v1738_v49  ;;  %v1967_v40 = vmul.f32 0.2, %v4079_v60 }
 0x174   : > { %1775 = vst [vmem:[%s3989_s20 + $0x50] sm:$0xff] %v1762_v43  ;;  %vm1788_vm13 = vcmp.gt.f32.partialorder %v1762_v43, 0.2 }
 0x177   : > { %v1706_v34 = vpop.f32.mrf.mxu0 }
 0x178   : > { %v1707_v12 = vadd.f32 %v1706_v34, %v3960_v58  ;;  %v1968_v34 = vmul.f32 0.2, %v4082_v23 }
 0x17a   : > { %v1763_v46 = vadd.f32 %v1750_v45, %v1707_v12 }
 0x17c   : > { %vm1789_vm14 = vcmp.gt.f32.partialorder %v1763_v46, 0.2  ;;  %1776 = vst [vmem:[%s3989_s20 + $0x58] sm:$0xff] %v1763_v46 }
 0x17d   : > { %vm3342_vm15 = vmpackc.low %vm1789_vm14, %vm1788_vm13  ;;  %vm1953_vm13 = vcmp.gt.f32.partialorder %v1846_v59, 0.2  ;;  %vm1954_vm14 = vcmp.gt.f32.partialorder %v4079_v60, 0.2  ;;  %v1984_v60 = vsel %vm1958_vm8, 0.0, %v1971_v56 }
 0x17e   : > { %3343 = vmatmul.msk.bf16.gmra.mxu1 %vm3342_vm15, %v3653_v13  ;;  %v1979_v37 = vsel %vm1953_vm13, 0.0, %v1966_v7  ;;  %v1980_v39 = vsel %vm1954_vm14, 0.0, %v1967_v40  ;;  %vm1960_vm13 = vcmp.gt.f32.partialorder %v4098_v1, 0.2  ;;  %v4190_v7 = vld [vmem:[%s894_s23 + $0x58] sm:$0xff] }
 0x17f   : > { %v1709_v35 = vpop.f32.mrf.mxu0  ;;  %v2202_v56 = vmul.f32 0.2, %v2082_v26 }
 0x180   : > { %v1710_v48 = vadd.f32 %v1709_v35, %v3969_v3  ;;  %v1961_v3 = vmul.f32 0.2, %v1841_v51  ;;  %v3568_v35 = vld [vmem:[%s4108_s1 + $0x20] sm:$0xff]  ;;  %v1970_v51 = vmul.f32 0.2, %v4086_v29 }
 0x181   : > { %2378 = vmatpush.bf16.msrb.mxu3 %v3568_v35 }
 0x182   : > { %v1764_v58 = vadd.f32 %v1751_v47, %v1710_v48  ;;  %v1974_v22 = vsel %vm1948_vm2, 0.0, %v1961_v3  ;;  %vm1955_vm2 = vcmp.gt.f32.partialorder %v4082_v23, 0.2  ;;  %v1969_v47 = vmul.f32 0.2, %v4084_v28  ;;  %v3565_v23 = vld [vmem:[%s4108_s1 + $0x8] sm:$0xff] }
 0x183   : > { %v1981_v12 = vsel %vm1955_vm2, 0.0, %v1968_v34 }
 0x184   : > { %1777 = vst [vmem:[%s3989_s20 + $0x60] sm:$0xff] %v1764_v58  ;;  %vm1790_vm0 = vcmp.gt.f32.partialorder %v1764_v58, 0.2  ;;  %v1982_v58 = vsel %vm1956_vm3, 0.0, %v1969_v47  ;;  %s912_s20 = scalar_lea.vmem %s4356_s12, %s3963_s28 }
 0x185   : > { %vm3344_vm1 = vmpackc.low %vm1790_vm0, %vm1790_vm0 }
 0x187   : > { %v1711_v50 = vpop.f32.mrf.mxu0 }
 0x18e   : > { %3345 = vmatmul.msk.bf16.gmra.mxu1 %vm3344_vm1, %v3653_v13 }
 0x1ab   : > { %v1914_v61 = vpop.f32.mrf.mxu1 }
 0x1ac   : > { %v1915_v24 = vadd.f32 %v4077_v53, %v1914_v61 }
 0x1ae   : > { %v1987_v2 = vadd.f32 %v1974_v22, %v1915_v24  ;;  %v3567_v22 = vld [vmem:[%s4108_s1 + $0x18] sm:$0xff] }
 0x1af   : > { %2379 = vmatpush.bf16.msrb.mxu3 %v3567_v22 }
 0x1b0   : > { %2000 = vst [vmem:[%s4092_s29] sm:$0xff] %v1987_v2  ;;  %vm2013_vm5 = vcmp.gt.f32.partialorder %v1987_v2, 0.2 }
 0x1b3   : > { %v1916_v5 = vpop.f32.mrf.mxu1  ;;  %2380 = vmatpush.bf16.msrb.mxu3 %v3566_v57 }
 0x1b4   : > { %v1917_v10 = vadd.f32 %v4077_v53, %v1916_v5 }
 0x1b6   : > { %v1988_v41 = vadd.f32 %v1975_v9, %v1917_v10  ;;  %v1973_v9 = vmul.f32 0.2, %v4098_v1  ;;  %v3564_v1 = vld [vmem:[%s4108_s1] sm:$0xff]  ;;  %s4186_s1 = scalar_lea.vmem %s4359_s15, %s3963_s28 }
 0x1b7   : > { %2381 = vmatpush.bf16.msrb.mxu3 %v3565_v23 }
 0x1b8   : > { %vm2014_vm6 = vcmp.gt.f32.partialorder %v1988_v41, 0.2  ;;  %2001 = vst [vmem:[%s4092_s29 + $0x8] sm:$0xff] %v1988_v41  ;;  %v1986_v10 = vsel %vm1960_vm13, 0.0, %v1973_v9 }
 0x1b9   : > { %vm3391_vm7 = vmpackc.low %vm2014_vm6, %vm2013_vm5 }
 0x1ba   : > { %3392 = vmatmul.msk.bf16.vlgmr.msrb.gmra.mxu2 %vm3391_vm7, %v3653_v13  ;;  %vm1957_vm7 = vcmp.gt.f32.partialorder %v4086_v29, 0.2  ;;  %v1972_v29 = vmul.f32 0.2, %v4096_v0 }
 0x1bb   : > { %v1919_v15 = vpop.f32.mrf.mxu1  ;;  %v1983_v61 = vsel %vm1957_vm7, 0.0, %v1970_v51  ;;  %2382 = vmatpush.bf16.msrb.mxu3 %v3564_v1 }
 0x1bc   : > { %v1920_v17 = vadd.f32 %v4077_v53, %v1919_v15 }
 0x1be   : > { %v1989_v52 = vadd.f32 %v1976_v16, %v1920_v17  ;;  %v2076_v16 = vld [vmem:[%s894_s23] sm:$0xff] }
 0x1bf   : > { %v4173_v17 = vld [vmem:[%s885_s19] ss:$0 sm:$0xff]  ;;  %vm2183_vm3 = vcmp.gt.f32.partialorder %v2076_v16, 0.2 }
 0x1c0   : > { %2002 = vst [vmem:[%s4092_s29 + $0x10] sm:$0xff] %v1989_v52  ;;  %vm2015_vm10 = vcmp.gt.f32.partialorder %v1989_v52, 0.2 }
 0x1c3   : > { %v1921_v20 = vpop.f32.mrf.mxu1 }
 0x1c4   : > { %v1922_v25 = vadd.f32 %v4077_v53, %v1921_v20  ;;  %v2078_v20 = vld [vmem:[%s894_s23 + $0x10] sm:$0xff] }
 0x1c6   : > { %v1990_v62 = vadd.f32 %v1977_v21, %v1922_v25  ;;  %v2079_v21 = vld [vmem:[%s894_s23 + $0x18] sm:$0xff]  ;;  %v2080_v25 = vld [vmem:[%s894_s23 + $0x20] sm:$0xff] }
 0x1c8   : > { %vm2016_vm11 = vcmp.gt.f32.partialorder %v1990_v62, 0.2  ;;  %2003 = vst [vmem:[%s4092_s29 + $0x18] sm:$0xff] %v1990_v62  ;;  %v2081_v62 = vld [vmem:[%s894_s23 + $0x28] sm:$0xff] }
 0x1c9   : > { %vm3393_vm12 = vmpackc.low %vm2016_vm11, %vm2015_vm10 }
 0x1ca   : > { %3394 = vmatmul.msk.bf16.gmra.mxu2 %vm3393_vm12, %v3653_v13  ;;  %vm1959_vm12 = vcmp.gt.f32.partialorder %v4096_v0, 0.2 }
 0x1cb   : > { %v1924_v31 = vpop.f32.mrf.mxu1  ;;  %v1985_v2 = vsel %vm1959_vm12, 0.0, %v1972_v29 }
 0x1cc   : > { %v1925_v6 = vadd.f32 %v4077_v53, %v1924_v31  ;;  %v4176_v31 = vld [vmem:[%s894_s23 + $0x38] sm:$0xff] }
 0x1cd   : > { %v2203_v23 = vmul.f32 0.2, %v4176_v31 }
 0x1ce   : > { %v1991_v32 = vadd.f32 %v1978_v14, %v1925_v6  ;;  %v4178_v14 = vld [vmem:[%s894_s23 + $0x40] sm:$0xff]  ;;  %v4180_v6 = vld [vmem:[%s894_s23 + $0x48] sm:$0xff] }
 0x1d0   : > { %2004 = vst [vmem:[%s4092_s29 + $0x20] sm:$0xff] %v1991_v32  ;;  %vm2017_vm15 = vcmp.gt.f32.partialorder %v1991_v32, 0.2  ;;  %v4188_v32 = vld [vmem:[%s894_s23 + $0x50] sm:$0xff] }
 0x1d3   : > { %v1926_v36 = vpop.f32.mrf.mxu1 }
 0x1d4   : > { %v1927_v27 = vadd.f32 %v4077_v53, %v1926_v36  ;;  %v4192_v36 = vld [vmem:[%s894_s23 + $0x60] sm:$0xff] }
 0x1d6   : > { %v1992_v33 = vadd.f32 %v1979_v37, %v1927_v27  ;;  %v2197_v27 = vmul.f32 0.2, %v2077_v19 }
 0x1d8   : > { %vm2018_vm0 = vcmp.gt.f32.partialorder %v1992_v33, 0.2  ;;  %2005 = vst [vmem:[%s4092_s29 + $0x28] sm:$0xff] %v1992_v33 }
 0x1d9   : > { %vm3395_vm1 = vmpackc.low %vm2018_vm0, %vm2017_vm15 }
 0x1da   : > { %3396 = vmatmul.msk.bf16.gmra.mxu2 %vm3395_vm1, %v3653_v13 }
 0x1db   : > { %v1929_v42 = vpop.f32.mrf.mxu1 }
 0x1dc   : > { %v1930_v43 = vadd.f32 %v4077_v53, %v1929_v42 }
 0x1de   : > { %v1993_v44 = vadd.f32 %v1980_v39, %v1930_v43  ;;  %v2198_v39 = vmul.f32 0.2, %v2078_v20 }
 0x1e0   : > { %2006 = vst [vmem:[%s4092_s29 + $0x30] sm:$0xff] %v1993_v44  ;;  %vm2019_vm4 = vcmp.gt.f32.partialorder %v1993_v44, 0.2 }
 0x1e3   : > { %v1931_v45 = vpop.f32.mrf.mxu1 }
 0x1e4   : > { %v1932_v46 = vadd.f32 %v4077_v53, %v1931_v45 }
 0x1e6   : > { %v1994_v49 = vadd.f32 %v1981_v12, %v1932_v46  ;;  %v2199_v12 = vmul.f32 0.2, %v2079_v21 }
 0x1e8   : > { %vm2020_vm5 = vcmp.gt.f32.partialorder %v1994_v49, 0.2  ;;  %2007 = vst [vmem:[%s4092_s29 + $0x38] sm:$0xff] %v1994_v49 }
 0x1e9   : > { %vm3397_vm6 = vmpackc.low %vm2020_vm5, %vm2019_vm4  ;;  %vm2184_vm4 = vcmp.gt.f32.partialorder %v2077_v19, 0.2  ;;  %vm2185_vm5 = vcmp.gt.f32.partialorder %v2078_v20, 0.2 }
 0x1ea   : > { %3398 = vmatmul.msk.bf16.gmra.mxu2 %vm3397_vm6, %v3653_v13  ;;  %v2210_v38 = vsel %vm2184_vm4, 0.0, %v2197_v27  ;;  %v2211_v44 = vsel %vm2185_vm5, 0.0, %v2198_v39  ;;  %vm2191_vm4 = vcmp.gt.f32.partialorder %v4178_v14, 0.2  ;;  %v2314_v39 = vld [vmem:[%s912_s20 + $0x18] sm:$0xff] }
 0x1eb   : > { %v1934_v48 = vpop.f32.mrf.mxu1 }
 0x1ec   : > { %v1935_v50 = vadd.f32 %v4077_v53, %v1934_v48  ;;  %v2200_v48 = vmul.f32 0.2, %v2080_v25 }
 0x1ee   : > { %v1995_v8 = vadd.f32 %v1982_v58, %v1935_v50 }
 0x1f0   : > { %2008 = vst [vmem:[%s4092_s29 + $0x40] sm:$0xff] %v1995_v8  ;;  %vm2021_vm9 = vcmp.gt.f32.partialorder %v1995_v8, 0.2 }
 0x1f3   : > { %v1936_v3 = vpop.f32.mrf.mxu1 }
 0x1f4   : > { %v1937_v54 = vadd.f32 %v4077_v53, %v1936_v3  ;;  %v2201_v3 = vmul.f32 0.2, %v2081_v62 }
 0x1f6   : > { %v1996_v55 = vadd.f32 %v1983_v61, %v1937_v54 }
 0x1f8   : > { %vm2022_vm10 = vcmp.gt.f32.partialorder %v1996_v55, 0.2  ;;  %2009 = vst [vmem:[%s4092_s29 + $0x48] sm:$0xff] %v1996_v55 }
 0x1f9   : > { %vm3399_vm11 = vmpackc.low %vm2022_vm10, %vm2021_vm9  ;;  %vm2186_vm9 = vcmp.gt.f32.partialorder %v2079_v21, 0.2  ;;  %vm2187_vm10 = vcmp.gt.f32.partialorder %v2080_v25, 0.2  ;;  %v2207_v21 = vmul.f32 0.2, %v4190_v7 }
 0x1fa   : > { %3400 = vmatmul.msk.bf16.gmra.mxu2 %vm3399_vm11, %v3653_v13  ;;  %v2212_v49 = vsel %vm2186_vm9, 0.0, %v2199_v12  ;;  %v2213_v50 = vsel %vm2187_vm10, 0.0, %v2200_v48  ;;  %vm2193_vm9 = vcmp.gt.f32.partialorder %v4188_v32, 0.2  ;;  %v4254_v12 = vld [vmem:[%s912_s20 + $0x40] sm:$0xff] }
 0x1fb   : > { %v1939_v59 = vpop.f32.mrf.mxu1 }
 0x1fc   : > { %v1940_v24 = vadd.f32 %v4077_v53, %v1939_v59 }
 0x1fe   : > { %v1997_v28 = vadd.f32 %v1984_v60, %v1940_v24 }
 0x200   : > { %2010 = vst [vmem:[%s4092_s29 + $0x50] sm:$0xff] %v1997_v28  ;;  %vm2023_vm14 = vcmp.gt.f32.partialorder %v1997_v28, 0.2 }
 0x203   : > { %v1941_v63 = vpop.f32.mrf.mxu1 }
 0x204   : > { %v1942_v4 = vadd.f32 %v4077_v53, %v1941_v63 }
 0x206   : > { %v1998_v5 = vadd.f32 %v1985_v2, %v1942_v4  ;;  %v2204_v4 = vmul.f32 0.2, %v4178_v14 }
 0x208   : > { %vm2024_vm15 = vcmp.gt.f32.partialorder %v1998_v5, 0.2  ;;  %2011 = vst [vmem:[%s4092_s29 + $0x58] sm:$0xff] %v1998_v5  ;;  %v2217_v9 = vsel %vm2191_vm4, 0.0, %v2204_v4 }
 0x209   : > { %vm3401_vm0 = vmpackc.low %vm2024_vm15, %vm2023_vm14  ;;  %vm2188_vm14 = vcmp.gt.f32.partialorder %v2081_v62, 0.2  ;;  %vm2189_vm15 = vcmp.gt.f32.partialorder %v2082_v26, 0.2 }
 0x20a   : > { %3402 = vmatmul.msk.bf16.gmra.mxu2 %vm3401_vm0, %v3653_v13  ;;  %v2214_v22 = vsel %vm2188_vm14, 0.0, %v2201_v3  ;;  %v2215_v59 = vsel %vm2189_vm15, 0.0, %v2202_v56  ;;  %vm2195_vm14 = vcmp.gt.f32.partialorder %v4192_v36, 0.2 }
 0x20b   : > { %v1944_v0 = vpop.f32.mrf.mxu1 }
 0x20c   : > { %v1945_v41 = vadd.f32 %v4077_v53, %v1944_v0  ;;  %v2196_v53 = vmul.f32 0.2, %v2076_v16 }
 0x20e   : > { %v1999_v11 = vadd.f32 %v1986_v10, %v1945_v41  ;;  %v2209_v18 = vsel %vm2183_vm3, 0.0, %v2196_v53  ;;  %vm2190_vm3 = vcmp.gt.f32.partialorder %v4176_v31, 0.2  ;;  %v2205_v41 = vmul.f32 0.2, %v4180_v6 }
 0x20f   : > { %v2216_v29 = vsel %vm2190_vm3, 0.0, %v2203_v23  ;;  %v2206_v53 = vmul.f32 0.2, %v4188_v32  ;;  %v2208_v31 = vmul.f32 0.2, %v4192_v36  ;;  %v2311_v36 = vld [vmem:[%s912_s20] sm:$0xff] }
 0x210   : > { %2012 = vst [vmem:[%s4092_s29 + $0x60] sm:$0xff] %v1999_v11  ;;  %vm2025_vm1 = vcmp.gt.f32.partialorder %v1999_v11, 0.2  ;;  %v2431_v27 = vmul.f32 0.2, %v2311_v36  ;;  %s4262_s29 = scalar_lea.vmem %s4360_s16, %s3963_s28 }
 0x211   : > { %vm3403_vm2 = vmpackc.low %vm2025_vm1, %vm2025_vm1  ;;  %vm2418_vm4 = vcmp.gt.f32.partialorder %v2311_v36, 0.2  ;;  %v2434_v23 = vmul.f32 0.2, %v2314_v39  ;;  %v2439_v36 = vmul.f32 0.2, %v4254_v12 }
 0x213   : > { %v1946_v15 = vpop.f32.mrf.mxu1 }
 0x21a   : > { %3404 = vmatmul.msk.bf16.gmra.mxu2 %vm3403_vm2, %v3653_v13 }
 0x23d   : > { %v2149_v52 = vpop.f32.mrf.mxu2 }
 0x23e   : > { %v2150_v30 = vadd.f32 %v4173_v17, %v2149_v52 }
 0x240   : > { %v2222_v37 = vadd.f32 %v2209_v18, %v2150_v30  ;;  %v2219_v18 = vsel %vm2193_vm9, 0.0, %v2206_v53  ;;  %vm2421_vm9 = vcmp.gt.f32.partialorder %v2314_v39, 0.2 }
 0x242   : > { %2235 = vst [vmem:[%s4186_s1] sm:$0xff] %v2222_v37  ;;  %vm2248_vm6 = vcmp.gt.f32.partialorder %v2222_v37, 0.2 }
 0x245   : > { %v2151_v33 = vpop.f32.mrf.mxu2 }
 0x246   : > { %v2152_v40 = vadd.f32 %v4173_v17, %v2151_v33  ;;  %v4247_v33 = vld [vmem:[%s903_s22] ss:$0 sm:$0xff] }
 0x248   : > { %v2223_v42 = vadd.f32 %v2210_v38, %v2152_v40  ;;  %v2444_v38 = vsel %vm2418_vm4, 0.0, %v2431_v27  ;;  %v2312_v40 = vld [vmem:[%s912_s20 + $0x8] sm:$0xff]  ;;  %vm2426_vm4 = vcmp.gt.f32.partialorder %v4254_v12, 0.2 }
 0x24a   : > { %vm2249_vm7 = vcmp.gt.f32.partialorder %v2223_v42, 0.2  ;;  %2236 = vst [vmem:[%s4186_s1 + $0x8] sm:$0xff] %v2223_v42  ;;  %v2313_v42 = vld [vmem:[%s912_s20 + $0x10] sm:$0xff] }
 0x24b   : > { %vm3450_vm8 = vmpackc.low %vm2249_vm7, %vm2248_vm6 }
 0x24c   : > { %3451 = vmatmul.msk.bf16.vlgmr.msrb.gmra.mxu3 %vm3450_vm8, %v3653_v13  ;;  %vm2192_vm8 = vcmp.gt.f32.partialorder %v4180_v6, 0.2  ;;  %v2221_v6 = vsel %vm2195_vm14, 0.0, %v2208_v31 }
 0x24d   : > { %v2154_v43 = vpop.f32.mrf.mxu2  ;;  %v2218_v15 = vsel %vm2192_vm8, 0.0, %v2205_v41  ;;  %vm2420_vm8 = vcmp.gt.f32.partialorder %v2313_v42, 0.2 }
 0x24e   : > { %v2155_v34 = vadd.f32 %v4173_v17, %v2154_v43  ;;  %v2316_v43 = vld [vmem:[%s912_s20 + $0x28] sm:$0xff] }
 0x250   : > { %v2224_v45 = vadd.f32 %v2211_v44, %v2155_v34  ;;  %v4249_v44 = vld [vmem:[%s912_s20 + $0x30] sm:$0xff] }
 0x252   : > { %2237 = vst [vmem:[%s4186_s1 + $0x10] sm:$0xff] %v2224_v45  ;;  %vm2250_vm11 = vcmp.gt.f32.partialorder %v2224_v45, 0.2  ;;  %v4252_v45 = vld [vmem:[%s912_s20 + $0x38] sm:$0xff] }
 0x255   : > { %v2156_v46 = vpop.f32.mrf.mxu2 }
 0x256   : > { %v2157_v35 = vadd.f32 %v4173_v17, %v2156_v46  ;;  %v4256_v46 = vld [vmem:[%s912_s20 + $0x48] sm:$0xff] }
 0x258   : > { %v2225_v47 = vadd.f32 %v2212_v49, %v2157_v35  ;;  %v4264_v49 = vld [vmem:[%s912_s20 + $0x50] sm:$0xff]  ;;  %v4266_v35 = vld [vmem:[%s912_s20 + $0x58] sm:$0xff] }
 0x25a   : > { %vm2251_vm12 = vcmp.gt.f32.partialorder %v2225_v47, 0.2  ;;  %2238 = vst [vmem:[%s4186_s1 + $0x18] sm:$0xff] %v2225_v47  ;;  %v4268_v47 = vld [vmem:[%s912_s20 + $0x60] sm:$0xff] }
 0x25b   : > { %vm3452_vm13 = vmpackc.low %vm2251_vm12, %vm2250_vm11 }
 0x25c   : > { %3453 = vmatmul.msk.bf16.gmra.mxu3 %vm3452_vm13, %v3653_v13  ;;  %vm2194_vm13 = vcmp.gt.f32.partialorder %v4190_v7, 0.2 }
 0x25d   : > { %v2159_v58 = vpop.f32.mrf.mxu2  ;;  %v2220_v62 = vsel %vm2194_vm13, 0.0, %v2207_v21  ;;  %vm2423_vm13 = vcmp.gt.f32.partialorder %v2316_v43, 0.2 }
 0x25e   : > { %v2160_v8 = vadd.f32 %v4173_v17, %v2159_v58  ;;  %v2432_v58 = vmul.f32 0.2, %v2312_v40 }
 0x260   : > { %v2226_v51 = vadd.f32 %v2213_v50, %v2160_v8 }
 0x262   : > { %2239 = vst [vmem:[%s4186_s1 + $0x20] sm:$0xff] %v2226_v51  ;;  %vm2252_vm0 = vcmp.gt.f32.partialorder %v2226_v51, 0.2 }
 0x265   : > { %v2161_v61 = vpop.f32.mrf.mxu2 }
 0x266   : > { %v2162_v54 = vadd.f32 %v4173_v17, %v2161_v61  ;;  %v2433_v61 = vmul.f32 0.2, %v2313_v42  ;;  %v2452_v42 = vsel %vm2426_vm4, 0.0, %v2439_v36 }
 0x268   : > { %v2227_v55 = vadd.f32 %v2214_v22, %v2162_v54  ;;  %v3654_v22 = vmov 0.0  }
 0x26a   : > { %vm2253_vm1 = vcmp.gt.f32.partialorder %v2227_v55, 0.2  ;;  %2240 = vst [vmem:[%s4186_s1 + $0x28] sm:$0xff] %v2227_v55 }
 0x26b   : > { %vm3454_vm2 = vmpackc.low %vm2253_vm1, %vm2252_vm0 }
 0x26c   : > { %3455 = vmatmul.msk.bf16.gmra.mxu3 %vm3454_vm2, %v3653_v13 }
 0x26d   : > { %v2164_v57 = vpop.f32.mrf.mxu2 }
 0x26e   : > { %v2165_v60 = vadd.f32 %v4173_v17, %v2164_v57 }
 0x270   : > { %v2228_v24 = vadd.f32 %v2215_v59, %v2165_v60  ;;  %v2446_v59 = vsel %vm2420_vm8, 0.0, %v2433_v61  ;;  %vm2428_vm8 = vcmp.gt.f32.partialorder %v4264_v49, 0.2 }
 0x272   : > { %2241 = vst [vmem:[%s4186_s1 + $0x30] sm:$0xff] %v2228_v24  ;;  %vm2254_vm5 = vcmp.gt.f32.partialorder %v2228_v24, 0.2 }
 0x275   : > { %v2166_v28 = vpop.f32.mrf.mxu2 }
 0x276   : > { %v2167_v63 = vadd.f32 %v4173_v17, %v2166_v28 }
 0x278   : > { %v2229_v2 = vadd.f32 %v2216_v29, %v2167_v63  ;;  %v2447_v29 = vsel %vm2421_vm9, 0.0, %v2434_v23  ;;  %vm2429_vm9 = vcmp.gt.f32.partialorder %v4266_v35, 0.2 }
 0x27a   : > { %vm2255_vm6 = vcmp.gt.f32.partialorder %v2229_v2, 0.2  ;;  %2242 = vst [vmem:[%s4186_s1 + $0x38] sm:$0xff] %v2229_v2 }
 0x27b   : > { %vm3456_vm7 = vmpackc.low %vm2255_vm6, %vm2254_vm5  ;;  %vm2419_vm5 = vcmp.gt.f32.partialorder %v2312_v40, 0.2 }
 0x27c   : > { %3457 = vmatmul.msk.bf16.gmra.mxu3 %vm3456_vm7, %v3653_v13  ;;  %v2445_v8 = vsel %vm2419_vm5, 0.0, %v2432_v58  ;;  %vm2427_vm5 = vcmp.gt.f32.partialorder %v4256_v46, 0.2 }
 0x27d   : > { %v2169_v5 = vpop.f32.mrf.mxu2 }
 0x27e   : > { %v2170_v0 = vadd.f32 %v4173_v17, %v2169_v5 }
 0x280   : > { %v2230_v10 = vadd.f32 %v2217_v9, %v2170_v0 }
 0x282   : > { %2243 = vst [vmem:[%s4186_s1 + $0x40] sm:$0xff] %v2230_v10  ;;  %vm2256_vm10 = vcmp.gt.f32.partialorder %v2230_v10, 0.2 }
 0x285   : > { %v2171_v11 = vpop.f32.mrf.mxu2 }
 0x286   : > { %v2172_v1 = vadd.f32 %v4173_v17, %v2171_v11 }
 0x288   : > { %v2231_v16 = vadd.f32 %v2218_v15, %v2172_v1  ;;  %v2436_v1 = vmul.f32 0.2, %v2316_v43  ;;  %v2440_v43 = vmul.f32 0.2, %v4256_v46 }
 0x28a   : > { %vm2257_vm11 = vcmp.gt.f32.partialorder %v2231_v16, 0.2  ;;  %2244 = vst [vmem:[%s4186_s1 + $0x48] sm:$0xff] %v2231_v16  ;;  %v2449_v53 = vsel %vm2423_vm13, 0.0, %v2436_v1 }
 0x28b   : > { %vm3458_vm12 = vmpackc.low %vm2257_vm11, %vm2256_vm10 }
 0x28c   : > { %3459 = vmatmul.msk.bf16.gmra.mxu3 %vm3458_vm12, %v3653_v13 }
 0x28d   : > { %v2174_v52 = vpop.f32.mrf.mxu2 }
 0x28e   : > { %v2175_v19 = vadd.f32 %v4173_v17, %v2174_v52 }
 0x290   : > { %v2232_v20 = vadd.f32 %v2219_v18, %v2175_v19  ;;  %v2437_v19 = vmul.f32 0.2, %v4249_v44 }
 0x292   : > { %2245 = vst [vmem:[%s4186_s1 + $0x50] sm:$0xff] %v2232_v20  ;;  %vm2258_vm15 = vcmp.gt.f32.partialorder %v2232_v20, 0.2 }
 0x295   : > { %v2176_v25 = vpop.f32.mrf.mxu2 }
 0x296   : > { %v2177_v26 = vadd.f32 %v4173_v17, %v2176_v25 }
 0x298   : > { %v2233_v30 = vadd.f32 %v2220_v62, %v2177_v26 }
 0x29a   : > { %vm2259_vm0 = vcmp.gt.f32.partialorder %v2233_v30, 0.2  ;;  %2246 = vst [vmem:[%s4186_s1 + $0x58] sm:$0xff] %v2233_v30 }
 0x29b   : > { %vm3460_vm1 = vmpackc.low %vm2259_vm0, %vm2258_vm15  ;;  %vm2424_vm0 = vcmp.gt.f32.partialorder %v4249_v44, 0.2 }
 0x29c   : > { %3461 = vmatmul.msk.bf16.gmra.mxu3 %vm3460_vm1, %v3653_v13  ;;  %v2450_v26 = vsel %vm2424_vm0, 0.0, %v2437_v19  ;;  %vm2425_vm1 = vcmp.gt.f32.partialorder %v4252_v45, 0.2 }
 0x29d   : > { %v2179_v14 = vpop.f32.mrf.mxu2 }
 0x29e   : > { %v2180_v32 = vadd.f32 %v4173_v17, %v2179_v14  ;;  %v2438_v14 = vmul.f32 0.2, %v4252_v45 }
 0x2a0   : > { %v2234_v7 = vadd.f32 %v2221_v6, %v2180_v32  ;;  %v2451_v32 = vsel %vm2425_vm1, 0.0, %v2438_v14 }
 0x2a2   : > { %2247 = vst [vmem:[%s4186_s1 + $0x60] sm:$0xff] %v2234_v7  ;;  %vm2260_vm2 = vcmp.gt.f32.partialorder %v2234_v7, 0.2  ;;  %s4278_s1 = scalar_lea.vmem %s4361_s17, %s3598_s18 }
 0x2a3   : > { %vm3462_vm3 = vmpackc.low %vm2260_vm2, %vm2260_vm2 }
 0x2a5   : > { %v2181_v37 = vpop.f32.mrf.mxu2 }
 0x2ac   : > { %3463 = vmatmul.msk.bf16.gmra.mxu3 %vm3462_vm3, %v3653_v13  ;;  %v2315_v13 = vld [vmem:[%s912_s20 + $0x20] sm:$0xff] }
 0x2ad   : > { %v2435_v4 = vmul.f32 0.2, %v2315_v13  ;;  %vm2422_vm12 = vcmp.gt.f32.partialorder %v2315_v13, 0.2 }
 0x2af   : > { %v2448_v41 = vsel %vm2422_vm12, 0.0, %v2435_v4  ;;  %vm2430_vm12 = vcmp.gt.f32.partialorder %v4268_v47, 0.2 }
 0x2cf   : > { %v2384_v17 = vpop.f32.mrf.mxu3 }
 0x2d0   : > { %v2385_v34 = vadd.f32 %v4247_v33, %v2384_v17 }
 0x2d2   : > { %v2457_v48 = vadd.f32 %v2444_v38, %v2385_v34  ;;  %v2453_v34 = vsel %vm2427_vm5, 0.0, %v2440_v43 }
 0x2d4   : > { %2470 = vst [vmem:[%s4262_s29] sm:$0xff] %v2457_v48  ;;  %vm2483_vm6 = vcmp.gt.f32.partialorder %v2457_v48, 0.2  ;;  %v2441_v48 = vmul.f32 0.2, %v4264_v49 }
 0x2d5   : > { %v3464_v54 = vsel %vm2483_vm6, 1.0, %v3654_v22 }
 0x2d7   : > { %v2386_v50 = vpop.f32.mrf.mxu3 }
 0x2d8   : > { %v2387_v51 = vadd.f32 %v4247_v33, %v2386_v50 }
 0x2da   : > { %v2458_v3 = vadd.f32 %v2445_v8, %v2387_v51  ;;  %v2454_v51 = vsel %vm2428_vm8, 0.0, %v2441_v48 }
 0x2dc   : > { %vm2484_vm7 = vcmp.gt.f32.partialorder %v2458_v3, 0.2  ;;  %2471 = vst [vmem:[%s4262_s29 + $0x8] sm:$0xff] %v2458_v3 }
 0x2dd   : > { %v3465_v55 = vsel %vm2484_vm7, 1.0, %v3654_v22 }
 0x2de   : > { %v3573_v56 = vpack.c.bf16 %v3465_v55, %v3464_v54  ;;  %v2442_v54 = vmul.f32 0.2, %v4266_v35 }
 0x2df   : > { %v2389_v57 = vpop.f32.mrf.mxu3 }
 0x2e0   : > { %3574 = vst [vmem:[%s4278_s1] sm:$0xff] %v3573_v56   ;;  %v2390_v60 = vadd.f32 %v4247_v33, %v2389_v57  ;;  %v2455_v55 = vsel %vm2429_vm9, 0.0, %v2442_v54 }
 0x2e2   : > { %v2459_v24 = vadd.f32 %v2446_v59, %v2390_v60  ;;  %v2443_v59 = vmul.f32 0.2, %v4268_v47 }
 0x2e4   : > { %2472 = vst [vmem:[%s4262_s29 + $0x10] sm:$0xff] %v2459_v24  ;;  %vm2485_vm10 = vcmp.gt.f32.partialorder %v2459_v24, 0.2 }
 0x2e5   : > { %v3466_v5 = vsel %vm2485_vm10, 1.0, %v3654_v22 }
 0x2e7   : > { %v2391_v28 = vpop.f32.mrf.mxu3 }
 0x2e8   : > { %v2392_v63 = vadd.f32 %v4247_v33, %v2391_v28  ;;  %v2456_v28 = vsel %vm2430_vm12, 0.0, %v2443_v59 }
 0x2ea   : > { %v2460_v2 = vadd.f32 %v2447_v29, %v2392_v63 }
 0x2ec   : > { %vm2486_vm11 = vcmp.gt.f32.partialorder %v2460_v2, 0.2  ;;  %2473 = vst [vmem:[%s4262_s29 + $0x18] sm:$0xff] %v2460_v2 }
 0x2ed   : > { %v3467_v9 = vsel %vm2486_vm11, 1.0, %v3654_v22 }
 0x2ee   : > { %v3576_v0 = vpack.c.bf16 %v3467_v9, %v3466_v5 }
 0x2ef   : > { %v2394_v10 = vpop.f32.mrf.mxu3 }
 0x2f0   : > { %3590 = vst [vmem:[%s4278_s1 + $0x8] sm:$0xff] %v3576_v0   ;;  %v2395_v11 = vadd.f32 %v4247_v33, %v2394_v10 }
 0x2f2   : > { %v2461_v15 = vadd.f32 %v2448_v41, %v2395_v11 }
 0x2f4   : > { %2474 = vst [vmem:[%s4262_s29 + $0x20] sm:$0xff] %v2461_v15  ;;  %vm2487_vm14 = vcmp.gt.f32.partialorder %v2461_v15, 0.2 }
 0x2f5   : > { %v3468_v20 = vsel %vm2487_vm14, 1.0, %v3654_v22 }
 0x2f7   : > { %v2396_v16 = vpop.f32.mrf.mxu3 }
 0x2f8   : > { %v2397_v52 = vadd.f32 %v4247_v33, %v2396_v16 }
 0x2fa   : > { %v2462_v18 = vadd.f32 %v2449_v53, %v2397_v52 }
 0x2fc   : > { %vm2488_vm15 = vcmp.gt.f32.partialorder %v2462_v18, 0.2  ;;  %2475 = vst [vmem:[%s4262_s29 + $0x28] sm:$0xff] %v2462_v18 }
 0x2fd   : > { %v3469_v21 = vsel %vm2488_vm15, 1.0, %v3654_v22 }
 0x2fe   : > { %v3579_v25 = vpack.c.bf16 %v3469_v21, %v3468_v20 }
 0x2ff   : > { %v2399_v62 = vpop.f32.mrf.mxu3 }
 0x300   : > { %3591 = vst [vmem:[%s4278_s1 + $0x10] sm:$0xff] %v3579_v25   ;;  %v2400_v30 = vadd.f32 %v4247_v33, %v2399_v62 }
 0x302   : > { %v2463_v31 = vadd.f32 %v2450_v26, %v2400_v30 }
 0x304   : > { %2476 = vst [vmem:[%s4262_s29 + $0x30] sm:$0xff] %v2463_v31  ;;  %vm2489_vm2 = vcmp.gt.f32.partialorder %v2463_v31, 0.2 }
 0x305   : > { %v3470_v27 = vsel %vm2489_vm2, 1.0, %v3654_v22 }
 0x307   : > { %v2401_v6 = vpop.f32.mrf.mxu3 }
 0x308   : > { %v2402_v7 = vadd.f32 %v4247_v33, %v2401_v6 }
 0x30a   : > { %v2464_v37 = vadd.f32 %v2451_v32, %v2402_v7 }
 0x30c   : > { %vm2490_vm3 = vcmp.gt.f32.partialorder %v2464_v37, 0.2  ;;  %2477 = vst [vmem:[%s4262_s29 + $0x38] sm:$0xff] %v2464_v37 }
 0x30d   : > { %v3471_v17 = vsel %vm2490_vm3, 1.0, %v3654_v22 }
 0x30e   : > { %v3582_v38 = vpack.c.bf16 %v3471_v17, %v3470_v27 }
 0x30f   : > { %v2404_v40 = vpop.f32.mrf.mxu3 }
 0x310   : > { %3592 = vst [vmem:[%s4278_s1 + $0x18] sm:$0xff] %v3582_v38   ;;  %v2405_v39 = vadd.f32 %v4247_v33, %v2404_v40 }
 0x312   : > { %v2465_v13 = vadd.f32 %v2452_v42, %v2405_v39 }
 0x314   : > { %2478 = vst [vmem:[%s4262_s29 + $0x40] sm:$0xff] %v2465_v13  ;;  %vm2491_vm6 = vcmp.gt.f32.partialorder %v2465_v13, 0.2 }
 0x315   : > { %v3472_v58 = vsel %vm2491_vm6, 1.0, %v3654_v22 }
 0x317   : > { %v2406_v44 = vpop.f32.mrf.mxu3 }
 0x318   : > { %v2407_v45 = vadd.f32 %v4247_v33, %v2406_v44 }
 0x31a   : > { %v2466_v12 = vadd.f32 %v2453_v34, %v2407_v45 }
 0x31c   : > { %vm2492_vm7 = vcmp.gt.f32.partialorder %v2466_v12, 0.2  ;;  %2479 = vst [vmem:[%s4262_s29 + $0x48] sm:$0xff] %v2466_v12 }
 0x31d   : > { %v3473_v50 = vsel %vm2492_vm7, 1.0, %v3654_v22 }
 0x31e   : > { %v3585_v46 = vpack.c.bf16 %v3473_v50, %v3472_v58 }
 0x31f   : > { %v2409_v8 = vpop.f32.mrf.mxu3 }
 0x320   : > { %3593 = vst [vmem:[%s4278_s1 + $0x20] sm:$0xff] %v3585_v46   ;;  %v2410_v3 = vadd.f32 %v4247_v33, %v2409_v8 }
 0x322   : > { %v2467_v61 = vadd.f32 %v2454_v51, %v2410_v3 }
 0x324   : > { %2480 = vst [vmem:[%s4262_s29 + $0x50] sm:$0xff] %v2467_v61  ;;  %vm2493_vm10 = vcmp.gt.f32.partialorder %v2467_v61, 0.2 }
 0x325   : > { %v3474_v60 = vsel %vm2493_vm10, 1.0, %v3654_v22 }
 0x327   : > { %v2411_v49 = vpop.f32.mrf.mxu3 }
 0x328   : > { %v2412_v56 = vadd.f32 %v4247_v33, %v2411_v49 }
 0x32a   : > { %v2468_v57 = vadd.f32 %v2455_v55, %v2412_v56 }
 0x32c   : > { %vm2494_vm11 = vcmp.gt.f32.partialorder %v2468_v57, 0.2  ;;  %2481 = vst [vmem:[%s4262_s29 + $0x58] sm:$0xff] %v2468_v57 }
 0x32d   : > { %v3475_v35 = vsel %vm2494_vm11, 1.0, %v3654_v22 }
 0x32e   : > { %v3588_v24 = vpack.c.bf16 %v3475_v35, %v3474_v60 }
 0x32f   : > { %v2414_v23 = vpop.f32.mrf.mxu3 }
 0x330   : > { %3594 = vst [vmem:[%s4278_s1 + $0x28] sm:$0xff] %v3588_v24   ;;  %v2415_v29 = vadd.f32 %v4247_v33, %v2414_v23 }
 0x332   : > { %v2469_v63 = vadd.f32 %v2456_v28, %v2415_v29 }
 0x334   : > { %2482 = vst [vmem:[%s4262_s29 + $0x60] sm:$0xff] %v2469_v63  ;;  %vm2495_vm13 = vcmp.gt.f32.partialorder %v2469_v63, 0.2 }
 0x335   : > { %v3476_v2 = vsel %vm2495_vm13, 1.0, %v3654_v22 }
 0x336   : > { %v2534_v4 = vpack.c.bf16 %v3476_v2, %v3476_v2 }
 0x337   : > { %v2416_v5 = vpop.f32.mrf.mxu3 }
 0x338   : > { %2547 = vst [vmem:[%s4278_s1 + $0x30] sm:$0xf] %v2534_v4 }
 0x339 PF: > { %s28_s26 = sadd.s32 1, %s3651_s26   ;;  %s4369_s24 = smov %s3647_s25 }
 0x33a   : > { %p25_p5 = scmp.ge.s32.totalorder %s28_s26, 6   ;;  %s4370_s25 = smov %s4372_s27 }
 0x33c   :  { %27 = sbr.rel (!%p25_p5) target bundleno = 4 (0x4), region = 186 }

// kernel: closed_call.133
= control target key start
LH: loop header
LB: loop body
LE: loop exit
PB: predicated region body
PF: predicated region fallthrough
CT: control target
= control target key end

     0   :  { %s1229_s18 = smov 0   ;;  %s1231_s19 = smov 0   ;;  %s1337_s0 = inlined_call_operand.vmem [shape: bf16[4,24,512], index: 0, kind: input, shape index: {}]   ;;  %s1338_s1 = inlined_call_operand.vmem [shape: bf16[4,512,128], index: 1, kind: input, shape index: {}]   ;;  %s1339_s2 = inlined_call_operand.vmem [shape: f32[4,1,128], index: 2, kind: input, shape index: {}]   ;;  %s1340_s3 = inlined_call_operand.vmem [shape: f32[4,24,128], index: 3, kind: input, shape index: {}, may-alias: {3,4}]   ;;  %s1341_s4 = inlined_call_operand.vmem [shape: f32[4,24,128], index: 4, kind: output, shape index: {0}, may-alias: {3,4}]   ;;  %s1342_s5 = inlined_call_operand.vmem [shape: bf16[4,24,128], index: 5, kind: output, shape index: {1}]  }
   0x1   :  { %s1233_s20 = smov 0  }
   0x2 LB: > { %s28_s21 = sadd.s32 1, %s1192_s19  ;;  %p949_p0 = scmp.ge.s32.totalorder %s1196_s20, 1  ;;  %s1196_s20 = sphi %s1233_s20, %s16_s20   ;;  %s1192_s19 = sphi %s1231_s19, %s1344_s19   ;;  %s1188_s18 = sphi %s1229_s18, %s1343_s18  }
   0x3   : > { %p30_p1 = scmp.ge.s32.totalorder %s28_s21, 4  ;;  %p249_p2 = scmp.lt.s32.totalorder %s1196_s20, 5 }
   0x5   : > { %s1346_s21 = smov (%p30_p1, %s28_s21), 0  ;;  %p250_p3 = pnand %p949_p0, %p249_p2 }
   0x6   : > { %p313_p4 = scmp.lt.s32.totalorder (!%p250_p3), %s1188_s18, 3 }
   0x7   : > { %253 = sbr.rel (%p250_p3) target bundleno = 208 (0xd0), region = 36 }
   0xc   : > { %s1348_s18 = smov (!%p313_p4, %s1188_s18), 3 }
   0xd   : > { %s1105_s22 = sshll.u32 %s1348_s18, 8  ;;  %s330_s28 = scalar_lea.vmem %s1339_s2, %s1348_s18 }
   0xe   : > { %s1253_s25 = scalar_lea.vmem %s1338_s1, %s1105_s22  ;;  %s1145_s29 = smul.u32 48, %s1348_s18  ;;  %v1173_v54 = vld [vmem:[%s330_s28] ss:$0 sm:$0xff] }
   0xf   : > { %v1117_v0 = vld [vmem:[%s1253_s25 + $0x38] sm:$0xff]  ;;  %v1116_v4 = vld [vmem:[%s1253_s25 + $0x30] sm:$0xff]  ;;  %v1115_v8 = vld [vmem:[%s1253_s25 + $0x28] sm:$0xff]  ;;  %s1146_s8 = smul.u32 24, %s1348_s18 }
  0x10   : > { %v1125_v1 = vld [vmem:[%s1253_s25 + $0x78] sm:$0xff]  ;;  %664 = vmatpush.bf16.msra.mxu0 %v1117_v0  ;;  %v1124_v5 = vld [vmem:[%s1253_s25 + $0x70] sm:$0xff]  ;;  %v1123_v9 = vld [vmem:[%s1253_s25 + $0x68] sm:$0xff]  ;;  %s1289_s7 = scalar_lea.vmem %s1337_s0, %s1145_s29  ;;  %s1147_s17 = smul.u32 12, %s1348_s18 }
  0x11   : > { %v1133_v2 = vld [vmem:[%s1253_s25 + $0xb8] sm:$0xff]  ;;  %682 = vmatpush.bf16.msra.mxu1 %v1125_v1  ;;  %v1132_v6 = vld [vmem:[%s1253_s25 + $0xb0] sm:$0xff]  ;;  %v1131_v10 = vld [vmem:[%s1253_s25 + $0xa8] sm:$0xff]  ;;  %s339_s13 = scalar_lea.vmem %s1340_s3, %s1146_s8  ;;  %s1319_s16 = scalar_lea.vmem %s1341_s4, %s1146_s8 }
  0x12   : > { %v1141_v3 = vld [vmem:[%s1253_s25 + $0xf8] sm:$0xff]  ;;  %700 = vmatpush.bf16.msra.mxu2 %v1133_v2  ;;  %v1140_v7 = vld [vmem:[%s1253_s25 + $0xf0] sm:$0xff]  ;;  %v1139_v11 = vld [vmem:[%s1253_s25 + $0xe8] sm:$0xff]  ;;  %s359_s24 = scalar_lea.vmem %s1342_s5, %s1147_s17 }
  0x13   : > { %718 = vmatpush.bf16.msra.mxu3 %v1141_v3  ;;  %v1114_v12 = vld [vmem:[%s1253_s25 + $0x20] sm:$0xff]  ;;  %v1113_v16 = vld [vmem:[%s1253_s25 + $0x18] sm:$0xff]  ;;  %v1112_v20 = vld [vmem:[%s1253_s25 + $0x10] sm:$0xff] }
  0x14   : > { %665 = vmatpush.bf16.msra.mxu0 %v1116_v4  ;;  %v1122_v13 = vld [vmem:[%s1253_s25 + $0x60] sm:$0xff]  ;;  %v1121_v17 = vld [vmem:[%s1253_s25 + $0x58] sm:$0xff]  ;;  %v1120_v21 = vld [vmem:[%s1253_s25 + $0x50] sm:$0xff] }
  0x15   : > { %683 = vmatpush.bf16.msra.mxu1 %v1124_v5  ;;  %v1130_v14 = vld [vmem:[%s1253_s25 + $0xa0] sm:$0xff]  ;;  %v1129_v18 = vld [vmem:[%s1253_s25 + $0x98] sm:$0xff]  ;;  %v1128_v22 = vld [vmem:[%s1253_s25 + $0x90] sm:$0xff] }
  0x16   : > { %701 = vmatpush.bf16.msra.mxu2 %v1132_v6  ;;  %v1138_v15 = vld [vmem:[%s1253_s25 + $0xe0] sm:$0xff]  ;;  %v1137_v19 = vld [vmem:[%s1253_s25 + $0xd8] sm:$0xff]  ;;  %v1136_v23 = vld [vmem:[%s1253_s25 + $0xd0] sm:$0xff] }
  0x17   : > { %719 = vmatpush.bf16.msra.mxu3 %v1140_v7  ;;  %v1111_v24 = vld [vmem:[%s1253_s25 + $0x8] sm:$0xff]  ;;  %v1110_v28 = vld [vmem:[%s1253_s25] sm:$0xff]  ;;  %v1108_v33 = vld [vmem:[%s1289_s7 + $0xc] sm:$0xf0] }
  0x18   : > { %666 = vmatpush.bf16.msra.mxu0 %v1115_v8  ;;  %v1119_v25 = vld [vmem:[%s1253_s25 + $0x48] sm:$0xff]  ;;  %v1118_v29 = vld [vmem:[%s1253_s25 + $0x40] sm:$0xff]  ;;  %v960_v35 = vld [vmem:[%s1289_s7 + $0x10] sm:$0xf0] }
  0x19   : > { %684 = vmatpush.bf16.msra.mxu1 %v1123_v9  ;;  %v1127_v26 = vld [vmem:[%s1253_s25 + $0x88] sm:$0xff]  ;;  %v1126_v30 = vld [vmem:[%s1253_s25 + $0x80] sm:$0xff]  ;;  %v1109_v37 = vld [vmem:[%s1289_s7 + $0x14] sm:$0xf0] }
  0x1a   : > { %702 = vmatpush.bf16.msra.mxu2 %v1131_v10  ;;  %v1135_v27 = vld [vmem:[%s1253_s25 + $0xc8] sm:$0xff]  ;;  %v1134_v31 = vld [vmem:[%s1253_s25 + $0xc0] sm:$0xff]  ;;  %v968_v39 = vld [vmem:[%s1289_s7 + $0x18] sm:$0xf0] }
  0x1b   : > { %720 = vmatpush.bf16.msra.mxu3 %v1139_v11  ;;  %v958_v32 = vld [vmem:[%s1289_s7] sm:$0xf]  ;;  %v1106_v34 = vld [vmem:[%s1289_s7 + $0x4] sm:$0xf]  ;;  %v966_v36 = vld [vmem:[%s1289_s7 + $0x8] sm:$0xf] }
  0x1c   : > { %667 = vmatpush.bf16.msra.mxu0 %v1114_v12  ;;  %v1107_v38 = vld [vmem:[%s1289_s7 + $0xc] sm:$0xf]  ;;  %v959_v40 = vor.u32 %v1108_v33, %v958_v32  ;;  %v963_v41 = vor.u32 %v1106_v34, %v960_v35  ;;  %v967_v42 = vor.u32 %v1109_v37, %v966_v36  ;;  %v365_v44 = vld [vmem:[%s1289_s7 + $0x20] sm:$0xff]  ;;  %v434_v6 = vld [vmem:[%s339_s13 + $0x10] sm:$0xff] }
  0x1d   : > { %685 = vmatpush.bf16.msra.mxu1 %v1122_v13  ;;  %v971_v43 = vor.u32 %v1107_v38, %v968_v39  ;;  %v366_v45 = vld [vmem:[%s1289_s7 + $0x28] sm:$0xff]  ;;  %v452_v46 = vunpack.c.l.b16 %v365_v44  ;;  %v453_v47 = vunpack.c.h.b16 %v365_v44  ;;  %v432_v58 = vld [vmem:[%s339_s13] sm:$0xff]  ;;  %vm738_vm4 = vcmp.gt.f32.partialorder %v434_v6, 0.2 }
  0x1e   : > { %703 = vmatpush.bf16.msra.mxu2 %v1130_v14  ;;  %v454_v48 = vunpack.c.l.b16 %v366_v45  ;;  %v455_v49 = vunpack.c.h.b16 %v366_v45  ;;  %v739_v60 = vmul.f32 0.2, %v432_v58  ;;  %vm736_vm0 = vcmp.gt.f32.partialorder %v432_v58, 0.2  ;;  %v433_v5 = vld [vmem:[%s339_s13 + $0x8] sm:$0xff] }
  0x1f   : > { %721 = vmatpush.bf16.msra.mxu3 %v1138_v15  ;;  %v460_v50 = vpack.c.b16 %v452_v46, %v452_v46  ;;  %v461_v51 = vpack.c.b16 %v453_v47, %v453_v47  ;;  %v740_v8 = vmul.f32 0.2, %v433_v5  ;;  %vm737_vm1 = vcmp.gt.f32.partialorder %v433_v5, 0.2 }
  0x20   : > { %668 = vmatpush.bf16.msra.mxu0 %v1113_v16  ;;  %v462_v52 = vpack.c.b16 %v454_v48, %v454_v48  ;;  %v463_v53 = vpack.c.b16 %v455_v49, %v455_v49  ;;  %v742_v2 = vsel %vm736_vm0, 0.0, %v739_v60 }
  0x21   : > { %686 = vmatpush.bf16.msra.mxu1 %v1121_v17  ;;  %v743_v15 = vsel %vm737_vm1, 0.0, %v740_v8 }
  0x22   : > { %704 = vmatpush.bf16.msra.mxu2 %v1129_v18 }
  0x23   : > { %722 = vmatpush.bf16.msra.mxu3 %v1137_v19 }
  0x24   : > { %669 = vmatpush.bf16.msra.mxu0 %v1112_v20  ;;  %v741_v20 = vmul.f32 0.2, %v434_v6 }
  0x25   : > { %687 = vmatpush.bf16.msra.mxu1 %v1120_v21  ;;  %v1198_v21 = vmov 0.0  }
  0x26   : > { %705 = vmatpush.bf16.msra.mxu2 %v1128_v22 }
  0x27   : > { %723 = vmatpush.bf16.msra.mxu3 %v1136_v23 }
  0x28   : > { %670 = vmatpush.bf16.msra.mxu0 %v1111_v24 }
  0x29   : > { %688 = vmatpush.bf16.msra.mxu1 %v1119_v25 }
  0x2a   : > { %706 = vmatpush.bf16.msra.mxu2 %v1127_v26 }
  0x2b   : > { %724 = vmatpush.bf16.msra.mxu3 %v1135_v27 }
  0x2c   : > { %671 = vmatpush.bf16.msra.mxu0 %v1110_v28 }
  0x2d   : > { %689 = vmatpush.bf16.msra.mxu1 %v1118_v29 }
  0x2e   : > { %707 = vmatpush.bf16.msra.mxu2 %v1126_v30  ;;  %v744_v30 = vsel %vm738_vm4, 0.0, %v741_v20 }
  0x2f   : > { %725 = vmatpush.bf16.msra.mxu3 %v1134_v31  ;;  %672 = vmatmul.bf16.vlgmr.msra.gmra.mxu0 %v959_v40 }
  0x30   : > { %690 = vmatmul.bf16.vlgmr.msra.gmra.mxu1 %v963_v41 }
  0x31   : > { %708 = vmatmul.bf16.vlgmr.msra.gmra.mxu2 %v967_v42 }
  0x32   : > { %726 = vmatmul.bf16.vlgmr.msra.gmra.mxu3 %v971_v43 }
  0x3f   : > { %677 = vmatmul.bf16.gmra.mxu0 %v460_v50 }
  0x40   : > { %695 = vmatmul.bf16.gmra.mxu1 %v461_v51 }
  0x41   : > { %713 = vmatmul.bf16.gmra.mxu2 %v462_v52 }
  0x42   : > { %731 = vmatmul.bf16.gmra.mxu3 %v463_v53 }
  0xac   : > { %v673_v55 = vpop.f32.mrf.mxu0 }
  0xad   : > { %v691_v56 = vpop.f32.mrf.mxu1  ;;  %v674_v57 = vadd.f32 %v1173_v54, %v673_v55 }
  0xaf   : > { %v692_v59 = vadd.f32 %v691_v56, %v674_v57 }
  0xb4   : > { %v709_v61 = vpop.f32.mrf.mxu2  ;;  %v675_v0 = vpop.f32.mrf.mxu0 }
  0xb5   : > { %v727_v62 = vpop.f32.mrf.mxu3  ;;  %v710_v63 = vadd.f32 %v709_v61, %v692_v59  ;;  %v693_v1 = vpop.f32.mrf.mxu1  ;;  %v676_v4 = vadd.f32 %v1173_v54, %v675_v0 }
  0xb7   : > { %v728_v3 = vadd.f32 %v727_v62, %v710_v63  ;;  %v694_v9 = vadd.f32 %v693_v1, %v676_v4 }
  0xb9   : > { %v745_v7 = vadd.f32 %v742_v2, %v728_v3 }
  0xbb   : > { %748 = vst [vmem:[%s1319_s16] sm:$0xff] %v745_v7  ;;  %vm751_vm2 = vcmp.gt.f32.partialorder %v745_v7, 0.2 }
  0xbc   : > { %v711_v10 = vpop.f32.mrf.mxu2  ;;  %v678_v13 = vpop.f32.mrf.mxu0  ;;  %v1100_v22 = vsel %vm751_vm2, 1.0, %v1198_v21 }
  0xbd   : > { %v729_v11 = vpop.f32.mrf.mxu3  ;;  %v712_v12 = vadd.f32 %v711_v10, %v694_v9  ;;  %v696_v14 = vpop.f32.mrf.mxu1  ;;  %v679_v16 = vadd.f32 %v1173_v54, %v678_v13 }
  0xbf   : > { %v730_v17 = vadd.f32 %v729_v11, %v712_v12  ;;  %v697_v19 = vadd.f32 %v696_v14, %v679_v16 }
  0xc1   : > { %v746_v18 = vadd.f32 %v743_v15, %v730_v17 }
  0xc3   : > { %vm752_vm3 = vcmp.gt.f32.partialorder %v746_v18, 0.2  ;;  %749 = vst [vmem:[%s1319_s16 + $0x8] sm:$0xff] %v746_v18 }
  0xc4   : > { %v1101_v23 = vsel %vm752_vm3, 1.0, %v1198_v21  ;;  %v714_v24 = vpop.f32.mrf.mxu2  ;;  %v680_v28 = vpop.f32.mrf.mxu0 }
  0xc5   : > { %v732_v25 = vpop.f32.mrf.mxu3  ;;  %v1143_v26 = vpack.c.bf16 %v1101_v23, %v1100_v22  ;;  %v715_v27 = vadd.f32 %v714_v24, %v697_v19  ;;  %v698_v29 = vpop.f32.mrf.mxu1 }
  0xc7   : > { %1144 = vst [vmem:[%s359_s24] sm:$0xff] %v1143_v26   ;;  %v733_v31 = vadd.f32 %v732_v25, %v715_v27 }
  0xc9   : > { %v747_v32 = vadd.f32 %v744_v30, %v733_v31 }
  0xcb   : > { %750 = vst [vmem:[%s1319_s16 + $0x10] sm:$0xff] %v747_v32  ;;  %vm753_vm5 = vcmp.gt.f32.partialorder %v747_v32, 0.2 }
  0xcc   : > { %v1102_v33 = vsel %vm753_vm5, 1.0, %v1198_v21  ;;  %v716_v34 = vpop.f32.mrf.mxu2 }
  0xcd   : > { %v734_v35 = vpop.f32.mrf.mxu3  ;;  %v762_v36 = vpack.c.bf16 %v1102_v33, %v1102_v33 }
  0xcf   : > { %765 = vst [vmem:[%s359_s24 + $0x8] sm:$0xf] %v762_v36 }
  0xd0 PF: > { %s16_s20 = sadd.s32 1, %s1196_s20   ;;  %s1343_s18 = smov %s1192_s19 }
  0xd1   : > { %p13_p5 = scmp.ge.s32.totalorder %s16_s20, 6   ;;  %s1344_s19 = smov %s1346_s21 }
  0xd3   :  { %15 = sbr.rel (!%p13_p5) target bundleno = 2 (0x2), region = 87 }

// kernel: closed_call.134
= control target key start
LH: loop header
LB: loop body
LE: loop exit
PB: predicated region body
PF: predicated region fallthrough
CT: control target
= control target key end

     0   :  { %s2286_s25 = smov 0   ;;  %s2288_s26 = smov 0   ;;  %s2455_s0 = inlined_call_operand.vmem [shape: bf16[8,24,576], index: 0, kind: input, shape index: {}]   ;;  %s2456_s1 = inlined_call_operand.vmem [shape: bf16[8,576,128], index: 1, kind: input, shape index: {}]   ;;  %s2457_s2 = inlined_call_operand.vmem [shape: f32[8,1,128], index: 2, kind: input, shape index: {}]   ;;  %s2458_s3 = inlined_call_operand.vmem [shape: f32[8,24,128], index: 3, kind: input, shape index: {}, may-alias: {3,10}]   ;;  %s2459_s4 = inlined_call_operand.vmem [shape: bf16[8,128,128], index: 4, kind: input, shape index: {}]   ;;  %s2460_s5 = inlined_call_operand.vmem [shape: f32[8,1,128], index: 5, kind: input, shape index: {}]   ;;  %s2461_s6 = inlined_call_operand.vmem [shape: f32[8,24,128], index: 6, kind: input, shape index: {}, may-alias: {6,11}]   ;;  %s2462_s7 = inlined_call_operand.vmem [shape: bf16[8,128,128], index: 7, kind: input, shape index: {}]   ;;  %s2463_s8 = inlined_call_operand.vmem [shape: f32[8,1,128], index: 8, kind: input, shape index: {}]   ;;  %s2464_s9 = inlined_call_operand.vmem [shape: f32[8,24,128], index: 9, kind: input, shape index: {}, may-alias: {9,12}]   ;;  %s2465_s10 = inlined_call_operand.vmem [shape: f32[8,24,128], index: 10, kind: output, shape index: {0}, may-alias: {3,10}]   ;;  %s2466_s11 = inlined_call_operand.vmem [shape: f32[8,24,128], index: 11, kind: output, shape index: {1}, may-alias: {6,11}]   ;;  %s2467_s12 = inlined_call_operand.vmem [shape: f32[8,24,128], index: 12, kind: output, shape index: {2}, may-alias: {9,12}]   ;;  %s2468_s13 = inlined_call_operand.vmem [shape: bf16[8,24,128], index: 13, kind: output, shape index: {3}]  }
   0x1   :  { %s2290_s27 = smov 0  }
   0x2 LB: > { %s36_s28 = sadd.s32 1, %s2208_s26  ;;  %p1828_p0 = scmp.ge.s32.totalorder %s2212_s27, 1  ;;  %s2212_s27 = sphi %s2290_s27, %s24_s27   ;;  %s2208_s26 = sphi %s2288_s26, %s2470_s26   ;;  %s2204_s25 = sphi %s2286_s25, %s2469_s25  }
   0x3   : > { %p38_p1 = scmp.ge.s32.totalorder %s36_s28, 8  ;;  %p527_p2 = scmp.lt.s32.totalorder %s2212_s27, 9 }
   0x5   : > { %s2472_s28 = smov (%p38_p1, %s36_s28), 0  ;;  %p528_p3 = pnand %p1828_p0, %p527_p2 }
   0x6   : > { %p659_p4 = scmp.lt.s32.totalorder (!%p528_p3), %s2204_s25, 7 }
   0x7   : > { %531 = sbr.rel (%p528_p3) target bundleno = 517 (0x205), region = 60 }
   0xc   : > { %s2474_s25 = smov (!%p659_p4, %s2204_s25), 7  ;;  %vm1110_vm0 = vcmask 523264  }
   0xd   : > { %s2158_s29 = smul.u32 288, %s2474_s25  ;;  %s676_s15 = scalar_lea.vmem %s2457_s2, %s2474_s25 }
   0xe   : > { %s2157_s19 = smul.u32 60, %s2474_s25  ;;  %s2091_s30 = sshll.u32 %s2474_s25, 6 }
   0xf   : > { %s2314_s18 = scalar_lea.vmem %s2456_s1, %s2158_s29  ;;  %s694_s29 = scalar_lea.vmem %s2460_s5, %s2474_s25 }
  0x10   : > { %v2105_v0 = vld [vmem:[%s2314_s18 + $0x38] sm:$0xff]  ;;  %v2104_v4 = vld [vmem:[%s2314_s18 + $0x30] sm:$0xff]  ;;  %v2103_v8 = vld [vmem:[%s2314_s18 + $0x28] sm:$0xff]  ;;  %s2346_s22 = scalar_lea.vmem %s2455_s0, %s2157_s19  ;;  %s691_s17 = scalar_lea.vmem %s2459_s4, %s2091_s30 }
  0x11   : > { %v2121_v1 = vld [vmem:[%s2314_s18 + $0xb8] sm:$0xff]  ;;  %1117 = vmatpush.bf16.msra.mxu0 %v2105_v0  ;;  %v2120_v5 = vld [vmem:[%s2314_s18 + $0xb0] sm:$0xff]  ;;  %v2119_v9 = vld [vmem:[%s2314_s18 + $0xa8] sm:$0xff]  ;;  %s2387_s20 = smul.u32 24, %s2474_s25  ;;  %s2398_s14 = scalar_lea.vmem %s2462_s7, %s2091_s30 }
  0x12   : > { %v2129_v2 = vld [vmem:[%s2314_s18 + $0xf8] sm:$0xff]  ;;  %1153 = vmatpush.bf16.msra.mxu2 %v2121_v1  ;;  %v2128_v6 = vld [vmem:[%s2314_s18 + $0xf0] sm:$0xff]  ;;  %v2127_v10 = vld [vmem:[%s2314_s18 + $0xe8] sm:$0xff]  ;;  %s712_s21 = scalar_lea.vmem %s2463_s8, %s2474_s25  ;;  %s2160_s16 = smul.u32 12, %s2474_s25 }
  0x13   : > { %v2113_v3 = vld [vmem:[%s2314_s18 + $0x78] sm:$0xff]  ;;  %1171 = vmatpush.bf16.msra.mxu3 %v2129_v2  ;;  %v2112_v7 = vld [vmem:[%s2314_s18 + $0x70] sm:$0xff]  ;;  %v2111_v11 = vld [vmem:[%s2314_s18 + $0x68] sm:$0xff]  ;;  %s685_s23 = scalar_lea.vmem %s2458_s3, %s2387_s20  ;;  %s721_s19 = scalar_lea.vmem %s2464_s9, %s2387_s20 }
  0x14   : > { %1135 = vmatpush.bf16.msra.mxu1 %v2113_v3  ;;  %v2102_v12 = vld [vmem:[%s2314_s18 + $0x20] sm:$0xff]  ;;  %v2101_v16 = vld [vmem:[%s2314_s18 + $0x18] sm:$0xff]  ;;  %v2100_v20 = vld [vmem:[%s2314_s18 + $0x10] sm:$0xff]  ;;  %s751_s30 = scalar_lea.vmem %s2467_s12, %s2387_s20 }
  0x15   : > { %1118 = vmatpush.bf16.msra.mxu0 %v2104_v4  ;;  %v2118_v13 = vld [vmem:[%s2314_s18 + $0xa0] sm:$0xff]  ;;  %v2117_v17 = vld [vmem:[%s2314_s18 + $0x98] sm:$0xff]  ;;  %v2116_v21 = vld [vmem:[%s2314_s18 + $0x90] sm:$0xff] }
  0x16   : > { %1154 = vmatpush.bf16.msra.mxu2 %v2120_v5  ;;  %v2126_v14 = vld [vmem:[%s2314_s18 + $0xe0] sm:$0xff]  ;;  %v2125_v18 = vld [vmem:[%s2314_s18 + $0xd8] sm:$0xff]  ;;  %v2124_v22 = vld [vmem:[%s2314_s18 + $0xd0] sm:$0xff] }
  0x17   : > { %1172 = vmatpush.bf16.msra.mxu3 %v2128_v6  ;;  %v2110_v15 = vld [vmem:[%s2314_s18 + $0x60] sm:$0xff]  ;;  %v2109_v19 = vld [vmem:[%s2314_s18 + $0x58] sm:$0xff]  ;;  %v2108_v23 = vld [vmem:[%s2314_s18 + $0x50] sm:$0xff] }
  0x18   : > { %1136 = vmatpush.bf16.msra.mxu1 %v2112_v7  ;;  %v2099_v24 = vld [vmem:[%s2314_s18 + $0x8] sm:$0xff]  ;;  %v2098_v28 = vld [vmem:[%s2314_s18] sm:$0xff]  ;;  %v2095_v33 = vld [vmem:[%s2346_s22 + $0x10] sm:$0xf0] }
  0x19   : > { %1119 = vmatpush.bf16.msra.mxu0 %v2103_v8  ;;  %v2115_v25 = vld [vmem:[%s2314_s18 + $0x88] sm:$0xff]  ;;  %v2114_v29 = vld [vmem:[%s2314_s18 + $0x80] sm:$0xff]  ;;  %v2096_v35 = vld [vmem:[%s2346_s22 + $0x18] sm:$0xf0] }
  0x1a   : > { %1155 = vmatpush.bf16.msra.mxu2 %v2119_v9  ;;  %v2123_v26 = vld [vmem:[%s2314_s18 + $0xc8] sm:$0xff]  ;;  %v2122_v30 = vld [vmem:[%s2314_s18 + $0xc0] sm:$0xff]  ;;  %v1846_v39 = vld [vmem:[%s2346_s22 + $0x14] sm:$0xf0] }
  0x1b   : > { %1173 = vmatpush.bf16.msra.mxu3 %v2127_v10  ;;  %v2107_v27 = vld [vmem:[%s2314_s18 + $0x48] sm:$0xff]  ;;  %v2106_v31 = vld [vmem:[%s2314_s18 + $0x40] sm:$0xff]  ;;  %v2133_v40 = vld [vmem:[%s2314_s18 + $0x118] sm:$0xff] }
  0x1c   : > { %1137 = vmatpush.bf16.msra.mxu1 %v2111_v11  ;;  %v1844_v32 = vld [vmem:[%s2346_s22] sm:$0xf]  ;;  %v1852_v34 = vld [vmem:[%s2346_s22 + $0x8] sm:$0xf]  ;;  %v2094_v36 = vld [vmem:[%s2346_s22 + $0xc] sm:$0xf] }
  0x1d   : > { %1120 = vmatpush.bf16.msra.mxu0 %v2102_v12  ;;  %v1854_v37 = vld [vmem:[%s2346_s22 + $0x1c] sm:$0xf0]  ;;  %v2093_v38 = vld [vmem:[%s2346_s22 + $0x4] sm:$0xf]  ;;  %v1845_v41 = vor.u32 %v2095_v33, %v1844_v32  ;;  %v1853_v42 = vor.u32 %v2096_v35, %v1852_v34  ;;  %v2132_v45 = vld [vmem:[%s2314_s18 + $0x110] sm:$0xff] }
  0x1e   : > { %1156 = vmatpush.bf16.msra.mxu2 %v2118_v13  ;;  %v1857_v43 = vor.u32 %v2094_v36, %v1854_v37  ;;  %v1849_v44 = vor.u32 %v2093_v38, %v1846_v39  ;;  %v2131_v46 = vld [vmem:[%s2314_s18 + $0x108] sm:$0xff]  ;;  %v771_v48 = vld [vmem:[%s2346_s22 + $0x30] sm:$0xff]  ;;  %v2130_v49 = vld [vmem:[%s2314_s18 + $0x100] sm:$0xff] }
  0x1f   : > { %1174 = vmatpush.bf16.msra.mxu3 %v2126_v14  ;;  %v770_v47 = vld [vmem:[%s2346_s22 + $0x28] sm:$0xff]  ;;  %v873_v51 = vunpack.c.l.b16 %v771_v48  ;;  %v874_v52 = vunpack.c.h.b16 %v771_v48  ;;  %v772_v58 = vld [vmem:[%s2346_s22 + $0x38] sm:$0xf]  ;;  %v1860_v59 = vld [vmem:[%s2346_s22 + $0x10] sm:$0xf] }
  0x20   : > { %1138 = vmatpush.bf16.msra.mxu1 %v2110_v15  ;;  %v871_v50 = vunpack.c.l.b16 %v770_v47  ;;  %v872_v53 = vunpack.c.h.b16 %v770_v47  ;;  %v2097_v60 = vld [vmem:[%s2346_s22 + $0x20] sm:$0xf0]  ;;  %v875_v61 = vunpack.c.l.b16 %v772_v58  ;;  %v2141_v0 = vld [vmem:[%s691_s17 + $0x38] sm:$0xff]  ;;  %v2140_v1 = vld [vmem:[%s691_s17 + $0x30] sm:$0xff] }
  0x21   : > { %1121 = vmatpush.bf16.msra.mxu0 %v2101_v16  ;;  %v883_v55 = vpack.c.b16 %v873_v51, %v873_v51  ;;  %v884_v56 = vpack.c.b16 %v874_v52, %v874_v52  ;;  %v1861_v62 = vor.u32 %v2097_v60, %v1860_v59  ;;  %v2139_v2 = vld [vmem:[%s691_s17 + $0x28] sm:$0xff]  ;;  %v2138_v3 = vld [vmem:[%s691_s17 + $0x20] sm:$0xff]  ;;  %v2137_v4 = vld [vmem:[%s691_s17 + $0x18] sm:$0xff]  ;;  %v2214_v60 = vmov 1.0|1.0  }
  0x22   : > { %1157 = vmatpush.bf16.msra.mxu2 %v2117_v17  ;;  %v881_v54 = vpack.c.b16 %v871_v50, %v871_v50  ;;  %v882_v57 = vpack.c.b16 %v872_v53, %v872_v53  ;;  %v885_v63 = vpack.c.b16 %v875_v61, %v875_v61  ;;  %v2136_v7 = vld [vmem:[%s691_s17 + $0x10] sm:$0xff]  ;;  %v2135_v10 = vld [vmem:[%s691_s17 + $0x8] sm:$0xff]  ;;  %v2134_v13 = vld [vmem:[%s691_s17] sm:$0xff]  ;;  %s731_s17 = scalar_lea.vmem %s2465_s10, %s2387_s20 }
  0x23   : > { %1175 = vmatpush.bf16.msra.mxu3 %v2125_v18  ;;  %v2187_v17 = vld [vmem:[%s676_s15] ss:$0 sm:$0xff]  ;;  %v2149_v33 = vld [vmem:[%s2398_s14 + $0x38] sm:$0xff]  ;;  %v848_v37 = vld [vmem:[%s685_s23 + $0x10] sm:$0xff]  ;;  %s703_s15 = scalar_lea.vmem %s2461_s6, %s2387_s20 }
  0x24   : > { %1139 = vmatpush.bf16.msra.mxu1 %v2109_v19  ;;  %vm1209_vm2 = vcmp.gt.f32.partialorder %v848_v37, 0.2  ;;  %v2147_v47 = vld [vmem:[%s2398_s14 + $0x28] sm:$0xff]  ;;  %v2145_v59 = vld [vmem:[%s2398_s14 + $0x18] sm:$0xff] }
  0x25   : > { %1122 = vmatpush.bf16.msra.mxu0 %v2100_v20 }
  0x26   : > { %1158 = vmatpush.bf16.msra.mxu2 %v2116_v21 }
  0x27   : > { %1176 = vmatpush.bf16.msra.mxu3 %v2124_v22 }
  0x28   : > { %1140 = vmatpush.bf16.msra.mxu1 %v2108_v23 }
  0x29   : > { %1123 = vmatpush.bf16.msra.mxu0 %v2099_v24  ;;  %v846_v24 = vld [vmem:[%s685_s23] sm:$0xff] }
  0x2a   : > { %1159 = vmatpush.bf16.msra.mxu2 %v2115_v25  ;;  %vm1207_vm1 = vcmp.gt.f32.partialorder %v846_v24, 0.2 }
  0x2b   : > { %1177 = vmatpush.bf16.msra.mxu3 %v2123_v26 }
  0x2c   : > { %1141 = vmatpush.bf16.msra.mxu1 %v2107_v27 }
  0x2d   : > { %1124 = vmatpush.bf16.msra.mxu0 %v2098_v28  ;;  %v1210_v28 = vmul.f32 0.2, %v846_v24 }
  0x2e   : > { %1160 = vmatpush.bf16.msra.mxu2 %v2114_v29 }
  0x2f   : > { %1178 = vmatpush.bf16.msra.mxu3 %v2122_v30  ;;  %v1213_v36 = vsel %vm1207_vm1, 0.0, %v1210_v28  ;;  %v1367_v28 = vld [vmem:[%s721_s19 + $0x10] sm:$0xff] }
  0x30   : > { %1142 = vmatpush.bf16.msra.mxu1 %v2106_v31  ;;  %1125 = vmatmul.bf16.vlgmr.msra.gmra.mxu0 %v1845_v41 }
  0x31   : > { %1193 = vmatpush.bf16.msrb.mxu0 %v2133_v40  ;;  %1161 = vmatmul.bf16.vlgmr.msra.gmra.mxu2 %v1853_v42  ;;  %v847_v42 = vld [vmem:[%s685_s23 + $0x8] sm:$0xff] }
  0x32   : > { %1179 = vmatmul.bf16.vlgmr.msra.gmra.mxu3 %v1857_v43  ;;  %1419 = vmatpush.bf16.msrb.mxu2 %v2149_v33  ;;  %vm1208_vm3 = vcmp.gt.f32.partialorder %v847_v42, 0.2 }
  0x33   : > { %2153 = vmatpush.bf16.msrb.mxu3 %v2133_v40  ;;  %1143 = vmatmul.bf16.vlgmr.msra.gmra.mxu1 %v1849_v44  ;;  %v2148_v40 = vld [vmem:[%s2398_s14 + $0x30] sm:$0xff] }
  0x34   : > { %1304 = vmatpush.bf16.msrb.mxu1 %v2141_v0  ;;  %v2142_v0 = vld [vmem:[%s2398_s14] sm:$0xff] }
  0x35   : > { %1194 = vmatpush.bf16.msrb.mxu0 %v2132_v45 }
  0x36   : > { %1420 = vmatpush.bf16.msrb.mxu2 %v2148_v40 }
  0x37   : > { %2154 = vmatpush.bf16.msrb.mxu3 %v2132_v45  ;;  %v1212_v45 = vmul.f32 0.2, %v848_v37 }
  0x38   : > { %1305 = vmatpush.bf16.msrb.mxu1 %v2140_v1  ;;  %v1250_v1 = vld [vmem:[%s703_s15] sm:$0xff] }
  0x39   : > { %1195 = vmatpush.bf16.msrb.mxu0 %v2131_v46  ;;  %v1215_v51 = vsel %vm1209_vm2, 0.0, %v1212_v45  ;;  %vm1322_vm9 = vcmp.gt.f32.partialorder %v1250_v1, 0.2 }
  0x3a   : > { %1421 = vmatpush.bf16.msrb.mxu2 %v2147_v47 }
  0x3b   : > { %2155 = vmatpush.bf16.msrb.mxu3 %v2131_v46  ;;  %v1211_v46 = vmul.f32 0.2, %v847_v42 }
  0x3c   : > { %1306 = vmatpush.bf16.msrb.mxu1 %v2139_v2  ;;  %v1325_v2 = vmul.f32 0.2, %v1250_v1 }
  0x3d   : > { %1196 = vmatpush.bf16.msrb.mxu0 %v2130_v49 }
  0x3f   : > { %2156 = vmatpush.bf16.msrb.mxu3 %v2130_v49 }
  0x40   : > { %1130 = vmatmul.bf16.gmra.mxu0 %v881_v54  ;;  %1307 = vmatpush.bf16.msrb.mxu1 %v2138_v3  ;;  %v1214_v54 = vsel %vm1208_vm3, 0.0, %v1211_v46  ;;  %v2188_v3 = vld [vmem:[%s694_s29] ss:$0 sm:$0xff] }
  0x41   : > { %1166 = vmatmul.bf16.gmra.mxu2 %v883_v55 }
  0x42   : > { %1184 = vmatmul.bf16.gmra.mxu3 %v884_v56  ;;  %v2146_v56 = vld [vmem:[%s2398_s14 + $0x20] sm:$0xff] }
  0x43   : > { %1148 = vmatmul.bf16.gmra.mxu1 %v882_v57  ;;  %1422 = vmatpush.bf16.msrb.mxu2 %v2146_v56 }
  0x44   : > { %1308 = vmatpush.bf16.msrb.mxu1 %v2137_v4 }
  0x47   : > { %1423 = vmatpush.bf16.msrb.mxu2 %v2145_v59 }
  0x48   : > { %1309 = vmatpush.bf16.msrb.mxu1 %v2136_v7  ;;  %v1251_v7 = vld [vmem:[%s703_s15 + $0x8] sm:$0xff] }
  0x49   : > { %vm1323_vm10 = vcmp.gt.f32.partialorder %v1251_v7, 0.2 }
  0x4c   : > { %1310 = vmatpush.bf16.msrb.mxu1 %v2135_v10  ;;  %v1326_v10 = vmul.f32 0.2, %v1251_v7 }
  0x50   : > { %2006 = vmatmul.msk.bf16.vlgmr.msrb.gmra.mxu0 %vm1110_vm0, %v1861_v62  ;;  %1311 = vmatpush.bf16.msrb.mxu1 %v2134_v13  ;;  %v2144_v62 = vld [vmem:[%s2398_s14 + $0x10] sm:$0xff] }
  0x51   : > { %1424 = vmatpush.bf16.msrb.mxu2 %v2144_v62 }
  0x52   : > { %2007 = vmatmul.msk.bf16.vlgmr.msrb.gmra.mxu3 %vm1110_vm0, %v885_v63  ;;  %v2143_v63 = vld [vmem:[%s2398_s14 + $0x8] sm:$0xff]  ;;  %s741_s14 = scalar_lea.vmem %s2466_s11, %s2387_s20  ;;  %s761_s20 = scalar_lea.vmem %s2468_s13, %s2160_s16 }
  0x55   : > { %1425 = vmatpush.bf16.msrb.mxu2 %v2143_v63 }
  0x59   : > { %1426 = vmatpush.bf16.msrb.mxu2 %v2142_v0 }
  0xad   : > { %v1126_v5 = vpop.f32.mrf.mxu0 }
  0xae   : > { %v1127_v19 = vadd.f32 %v2187_v17, %v1126_v5  ;;  %v1328_v5 = vsel %vm1322_vm9, 0.0, %v1325_v2 }
  0xb0   : > { %v1144_v6 = vpop.f32.mrf.mxu1 }
  0xb1   : > { %v1145_v23 = vadd.f32 %v1144_v6, %v1127_v19 }
  0xb4   : > { %v1162_v8 = vpop.f32.mrf.mxu2 }
  0xb5   : > { %v1180_v9 = vpop.f32.mrf.mxu3  ;;  %v1128_v11 = vpop.f32.mrf.mxu0  ;;  %v1163_v26 = vadd.f32 %v1162_v8, %v1145_v23  ;;  %v1252_v8 = vld [vmem:[%s703_s15 + $0x10] sm:$0xff]  ;;  %v2189_v23 = vld [vmem:[%s712_s21] ss:$0 sm:$0xff] }
  0xb6   : > { %v1129_v29 = vadd.f32 %v2187_v17, %v1128_v11  ;;  %vm1324_vm11 = vcmp.gt.f32.partialorder %v1252_v8, 0.2 }
  0xb7   : > { %v1181_v31 = vadd.f32 %v1180_v9, %v1163_v26 }
  0xb8   : > { %v1146_v12 = vpop.f32.mrf.mxu1 }
  0xb9   : > { %v1147_v38 = vadd.f32 %v1146_v12, %v1129_v29  ;;  %v1329_v12 = vsel %vm1323_vm10, 0.0, %v1326_v10 }
  0xbc   : > { %v1164_v14 = vpop.f32.mrf.mxu2 }
  0xbd   : > { %v1182_v15 = vpop.f32.mrf.mxu3  ;;  %v1131_v16 = vpop.f32.mrf.mxu0  ;;  %v1165_v43 = vadd.f32 %v1164_v14, %v1147_v38 }
  0xbe   : > { %v1132_v27 = vadd.f32 %v2187_v17, %v1131_v16 }
  0xbf   : > { %v1183_v49 = vadd.f32 %v1182_v15, %v1165_v43  ;;  %v1327_v15 = vmul.f32 0.2, %v1252_v8 }
  0xc0   : > { %v1149_v18 = vpop.f32.mrf.mxu1 }
  0xc1   : > { %v1150_v34 = vadd.f32 %v1149_v18, %v1132_v27  ;;  %v1330_v17 = vsel %vm1324_vm11, 0.0, %v1327_v15  ;;  %v1366_v27 = vld [vmem:[%s721_s19 + $0x8] sm:$0xff] }
  0xc2   : > { %vm1438_vm2 = vcmp.gt.f32.partialorder %v1366_v27, 0.2 }
  0xc4   : > { %v1167_v20 = vpop.f32.mrf.mxu2 }
  0xc5   : > { %v1185_v21 = vpop.f32.mrf.mxu3  ;;  %v1133_v22 = vpop.f32.mrf.mxu0  ;;  %v1168_v41 = vadd.f32 %v1167_v20, %v1150_v34 }
  0xc7   : > { %v1186_v48 = vadd.f32 %v1185_v21, %v1168_v41  ;;  %v1365_v21 = vld [vmem:[%s721_s19] sm:$0xff] }
  0xc8   : > { %v1151_v25 = vpop.f32.mrf.mxu1  ;;  %v1440_v22 = vmul.f32 0.2, %v1365_v21  ;;  %vm1437_vm1 = vcmp.gt.f32.partialorder %v1365_v21, 0.2 }
  0xca   : > { %v1443_v25 = vsel %vm1437_vm1, 0.0, %v1440_v22 }
  0xcc   : > { %v1169_v30 = vpop.f32.mrf.mxu2 }
  0xcd   : > { %v1187_v32 = vpop.f32.mrf.mxu3  ;;  %v1198_v35 = vpop.f32.mrf.mxu0  ;;  %v1441_v30 = vmul.f32 0.2, %v1366_v27 }
  0xce   : > { %v1199_v39 = vadd.f32 %v1198_v35, %v1181_v31  ;;  %v1442_v35 = vmul.f32 0.2, %v1367_v28 }
  0xcf   : > { %v1444_v32 = vsel %vm1438_vm2, 0.0, %v1441_v30 }
  0xd0   : > { %v1216_v44 = vadd.f32 %v1213_v36, %v1199_v39  ;;  %v2215_v36 = vmov 0.0  }
  0xd2   : > { %1219 = vst [vmem:[%s731_s17] sm:$0xff] %v1216_v44  ;;  %vm1222_vm4 = vcmp.gt.f32.partialorder %v1216_v44, 0.2 }
  0xd5   : > { %v1203_v50 = vpop.f32.mrf.mxu3  ;;  %v1200_v53 = vpop.f32.mrf.mxu0 }
  0xd6   : > { %v1204_v52 = vadd.f32 %v1203_v50, %v1186_v48  ;;  %v1201_v55 = vadd.f32 %v1200_v53, %v1183_v49 }
  0xd8   : > { %v1218_v57 = vadd.f32 %v1215_v51, %v1204_v52  ;;  %v1217_v58 = vadd.f32 %v1214_v54, %v1201_v55 }
  0xda   : > { %1221 = vst [vmem:[%s731_s17 + $0x10] sm:$0xff] %v1218_v57  ;;  %vm1223_vm5 = vcmp.gt.f32.partialorder %v1217_v58, 0.2  ;;  %vm1224_vm7 = vcmp.gt.f32.partialorder %v1218_v57, 0.2 }
  0xdb   : > { %1220 = vst [vmem:[%s731_s17 + $0x8] sm:$0xff] %v1217_v58  ;;  %vm2043_vm6 = vmpackc.low %vm1223_vm5, %vm1222_vm4  ;;  %vm1439_vm5 = vcmp.gt.f32.partialorder %v1367_v28, 0.2 }
  0xdc   : > { %2044 = vmatmul.msk.bf16.vlgmr.msrb.gmra.mxu1 %vm2043_vm6, %v2214_v60  ;;  %vm2045_vm8 = vmpackc.low %vm1224_vm7, %vm1224_vm7  ;;  %v1445_v41 = vsel %vm1439_vm5, 0.0, %v1442_v35 }
  0xdd   : > { %v1205_v61 = vpop.f32.mrf.mxu3 }
  0xec   : > { %2046 = vmatmul.msk.bf16.gmra.mxu1 %vm2045_vm8, %v2214_v60 }
 0x159   : > { %v1313_v4 = vpop.f32.mrf.mxu1 }
 0x15a   : > { %v1314_v6 = vadd.f32 %v2188_v3, %v1313_v4 }
 0x15c   : > { %v1331_v9 = vadd.f32 %v1328_v5, %v1314_v6 }
 0x15e   : > { %1334 = vst [vmem:[%s741_s14] sm:$0xff] %v1331_v9  ;;  %vm1337_vm12 = vcmp.gt.f32.partialorder %v1331_v9, 0.2 }
 0x161   : > { %v1315_v11 = vpop.f32.mrf.mxu1 }
 0x162   : > { %v1316_v13 = vadd.f32 %v2188_v3, %v1315_v11 }
 0x164   : > { %v1332_v14 = vadd.f32 %v1329_v12, %v1316_v13 }
 0x166   : > { %vm1338_vm13 = vcmp.gt.f32.partialorder %v1332_v14, 0.2  ;;  %1335 = vst [vmem:[%s741_s14 + $0x8] sm:$0xff] %v1332_v14 }
 0x167   : > { %vm2082_vm14 = vmpackc.low %vm1338_vm13, %vm1337_vm12 }
 0x168   : > { %2083 = vmatmul.msk.bf16.vlgmr.msrb.gmra.mxu2 %vm2082_vm14, %v2214_v60 }
 0x169   : > { %v1318_v16 = vpop.f32.mrf.mxu1 }
 0x16a   : > { %v1319_v18 = vadd.f32 %v2188_v3, %v1318_v16 }
 0x16c   : > { %v1333_v19 = vadd.f32 %v1330_v17, %v1319_v18 }
 0x16e   : > { %1336 = vst [vmem:[%s741_s14 + $0x10] sm:$0xff] %v1333_v19  ;;  %vm1339_vm15 = vcmp.gt.f32.partialorder %v1333_v19, 0.2 }
 0x16f   : > { %vm2084_vm0 = vmpackc.low %vm1339_vm15, %vm1339_vm15 }
 0x171   : > { %v1320_v20 = vpop.f32.mrf.mxu1 }
 0x178   : > { %2085 = vmatmul.msk.bf16.gmra.mxu2 %vm2084_vm0, %v2214_v60 }
 0x1eb   : > { %v1428_v24 = vpop.f32.mrf.mxu2 }
 0x1ec   : > { %v1429_v26 = vadd.f32 %v2189_v23, %v1428_v24 }
 0x1ee   : > { %v1446_v29 = vadd.f32 %v1443_v25, %v1429_v26 }
 0x1f0   : > { %1449 = vst [vmem:[%s751_s30] sm:$0xff] %v1446_v29  ;;  %vm1452_vm3 = vcmp.gt.f32.partialorder %v1446_v29, 0.2 }
 0x1f1   : > { %v2086_v37 = vsel %vm1452_vm3, 1.0, %v2215_v36 }
 0x1f3   : > { %v1430_v31 = vpop.f32.mrf.mxu2 }
 0x1f4   : > { %v1431_v33 = vadd.f32 %v2189_v23, %v1430_v31 }
 0x1f6   : > { %v1447_v34 = vadd.f32 %v1444_v32, %v1431_v33 }
 0x1f8   : > { %vm1453_vm4 = vcmp.gt.f32.partialorder %v1447_v34, 0.2  ;;  %1450 = vst [vmem:[%s751_s30 + $0x8] sm:$0xff] %v1447_v34 }
 0x1f9   : > { %v2087_v38 = vsel %vm1453_vm4, 1.0, %v2215_v36 }
 0x1fa   : > { %v2151_v39 = vpack.c.bf16 %v2087_v38, %v2086_v37 }
 0x1fb   : > { %v1433_v40 = vpop.f32.mrf.mxu2 }
 0x1fc   : > { %2152 = vst [vmem:[%s761_s20] sm:$0xff] %v2151_v39   ;;  %v1434_v42 = vadd.f32 %v2189_v23, %v1433_v40 }
 0x1fe   : > { %v1448_v43 = vadd.f32 %v1445_v41, %v1434_v42 }
 0x200   : > { %1451 = vst [vmem:[%s751_s30 + $0x10] sm:$0xff] %v1448_v43  ;;  %vm1454_vm6 = vcmp.gt.f32.partialorder %v1448_v43, 0.2 }
 0x201   : > { %v2088_v44 = vsel %vm1454_vm6, 1.0, %v2215_v36 }
 0x202   : > { %v1463_v45 = vpack.c.bf16 %v2088_v44, %v2088_v44 }
 0x203   : > { %v1435_v46 = vpop.f32.mrf.mxu2 }
 0x204   : > { %1466 = vst [vmem:[%s761_s20 + $0x8] sm:$0xf] %v1463_v45 }
 0x205 PF: > { %s24_s27 = sadd.s32 1, %s2212_s27   ;;  %s2469_s25 = smov %s2208_s26 }
 0x206   : > { %p21_p5 = scmp.ge.s32.totalorder %s24_s27, 10   ;;  %s2470_s26 = smov %s2472_s28 }
 0x208   :  { %23 = sbr.rel (!%p21_p5) target bundleno = 2 (0x2), region = 153 }

// kernel: closed_call.135
= control target key start
LH: loop header
LB: loop body
LE: loop exit
PB: predicated region body
PF: predicated region fallthrough
CT: control target
= control target key end

     0   :  { %s3196_s27 = smov 0   ;;  %s3527_s0 = inlined_call_operand.vmem [shape: bf16[8,2,512], index: 0, kind: input, shape index: {}]   ;;  %s3528_s1 = inlined_call_operand.vmem [shape: bf16[8,512,128], index: 1, kind: input, shape index: {}]   ;;  %s3529_s2 = inlined_call_operand.vmem [shape: f32[8,1,128], index: 2, kind: input, shape index: {}]   ;;  %s3530_s3 = inlined_call_operand.vmem [shape: f32[8,2,128], index: 3, kind: input, shape index: {}, may-alias: {3,20}]   ;;  %s3531_s4 = inlined_call_operand.vmem [shape: bf16[8,128,128], index: 4, kind: input, shape index: {}]   ;;  %s3532_s5 = inlined_call_operand.vmem [shape: f32[8,1,128], index: 5, kind: input, shape index: {}]   ;;  %s3533_s6 = inlined_call_operand.vmem [shape: f32[8,2,128], index: 6, kind: input, shape index: {}, may-alias: {6,21}]   ;;  %s3534_s7 = inlined_call_operand.vmem [shape: bf16[8,128,128], index: 7, kind: input, shape index: {}]   ;;  %s3535_s8 = inlined_call_operand.vmem [shape: f32[8,1,128], index: 8, kind: input, shape index: {}]   ;;  %s3536_s9 = inlined_call_operand.vmem [shape: f32[8,2,128], index: 9, kind: input, shape index: {}, may-alias: {9,22}]   ;;  %s3537_s10 = inlined_call_operand.vmem [shape: bf16[8,128,384], index: 10, kind: input, shape index: {}]   ;;  %s3538_s11 = inlined_call_operand.vmem [shape: f32[8,1,384], index: 11, kind: input, shape index: {}]   ;;  %s3539_s12 = inlined_call_operand.vmem [shape: f32[8,2,384], index: 12, kind: input, shape index: {}, may-alias: {12,23}]   ;;  %s3540_s13 = inlined_call_operand.vmem [shape: bf16[8,384,128], index: 13, kind: input, shape index: {}]   ;;  %s3541_s14 = inlined_call_operand.vmem [shape: f32[1,128], index: 14, kind: input, shape index: {}]   ;;  %s3542_s15 = inlined_call_operand.vmem [shape: f32[2,128], index: 15, kind: input, shape index: {}, may-alias: {15,24}]   ;;  %s3543_s16 = inlined_call_operand.vmem [shape: bf16[128,128], index: 16, kind: input, shape index: {}]   ;;  %s3544_s17 = inlined_call_operand.vmem [shape: f32[1,128], index: 17, kind: input, shape index: {}]   ;;  %s3545_s18 = inlined_call_operand.vmem [shape: f32[2,128], index: 18, kind: input, shape index: {}, may-alias: {18,25}]   ;;  %s3546_s19 = inlined_call_operand.vmem [shape: f32[2,128], index: 19, kind: input, shape index: {}, may-alias: {19,26}]   ;;  %s3547_s20 = inlined_call_operand.vmem [shape: f32[8,2,128], index: 20, kind: output, shape index: {0}, may-alias: {3,20}]   ;;  %s3548_s21 = inlined_call_operand.vmem [shape: f32[8,2,128], index: 21, kind: output, shape index: {1}, may-alias: {6,21}]   ;;  %s3549_s22 = inlined_call_operand.vmem [shape: f32[8,2,128], index: 22, kind: output, shape index: {2}, may-alias: {9,22}]   ;;  %s3550_s23 = inlined_call_operand.vmem [shape: f32[8,2,384], index: 23, kind: output, shape index: {3}, may-alias: {12,23}]   ;;  %s3551_s24 = inlined_call_operand.vmem [shape: f32[2,128], index: 24, kind: output, shape index: {4}, may-alias: {15,24}]   ;;  %s3552_s25 = inlined_call_operand.vmem [shape: f32[2,128], index: 25, kind: output, shape index: {5}, may-alias: {18,25}]   ;;  %s3553_s26 = inlined_call_operand.vmem [shape: f32[2,128], index: 26, kind: output, shape index: {6}, may-alias: {19,26}]  }
   0x1   :  { %3559 = sst [smem:[#allocation8_spill]] %s3527_s0 }
   0x2   :  { %3560 = sst [smem:[#allocation9_spill]] %s3528_s1 }
   0x3   :  { %3561 = sst [smem:[#allocation10_spill]] %s3529_s2 }
   0x4   :  { %3562 = sst [smem:[#allocation11_spill]] %s3530_s3 }
   0x5   :  { %3563 = sst [smem:[#allocation12_spill]] %s3531_s4 }
   0x6   :  { %3564 = sst [smem:[#allocation13_spill]] %s3532_s5 }
   0x7   :  { %3565 = sst [smem:[#allocation14_spill]] %s3533_s6 }
   0x8   :  { %3566 = sst [smem:[#allocation15_spill]] %s3534_s7 }
   0x9   :  { %3567 = sst [smem:[#allocation16_spill]] %s3535_s8 }
   0xa   :  { %3568 = sst [smem:[#allocation17_spill]] %s3536_s9 }
   0xb   :  { %3569 = sst [smem:[#allocation18_spill]] %s3537_s10 }
   0xc   :  { %3570 = sst [smem:[#allocation19_spill]] %s3541_s14 }
   0xd   :  { %3571 = sst [smem:[#allocation20_spill]] %s3542_s15 }
   0xe   :  { %3572 = sst [smem:[#allocation21_spill]] %s3543_s16 }
   0xf   :  { %3573 = sst [smem:[#allocation22_spill]] %s3544_s17 }
  0x10   :  { %3574 = sst [smem:[#allocation23_spill]] %s3545_s18 }
  0x11   :  { %3575 = sst [smem:[#allocation24_spill]] %s3546_s19 }
  0x12   :  { %3576 = sst [smem:[#allocation25_spill]] %s3551_s24 }
  0x13   :  { %3577 = sst [smem:[#allocation26_spill]] %s3552_s25 }
  0x14   :  { %3578 = sst [smem:[#allocation27_spill]] %s3553_s26 }
  0x15 LB: > { %3579 = sst [smem:[#allocation3_spill]] %s3054_s27  ;;  %s3202_s3 = sadd.s32 4294967295, %s3054_s27   ;;  %s3054_s27 = sphi %s3196_s27, %s37_s27  }
  0x16   : > { %3580 = sst [smem:[#allocation4_spill]] %s3202_s3  ;;  %p2464_p0 = scmp.ge.s32.totalorder %s3054_s27, 1 }
  0x17   : > { %p829_p1 = scmp.lt.s32.totalorder %s3054_s27, 9 }
  0x19   : > { %p830_p2 = pnand %p2464_p0, %p829_p1 }
  0x1b   : > { %833 = sbr.rel (%p830_p2) target bundleno = 967 (0x3c7), region = 100 }
  0x20   : > { %p965_p3 = scmp.lt.s32.totalorder %s3202_s3, 7  ;;  %s3581_s0 = sld [smem:[#allocation8_spill]] }
  0x21   : > { %s3583_s5 = sld [smem:[#allocation9_spill]] }
  0x22   : > { %s3208_s7 = scalar_select %p965_p3, %s3202_s3, 7 }
  0x23   : > { %s3590_s24 = sld [smem:[#allocation14_spill]] }
  0x24   : > { %s2465_s28 = sshll.u32 %s3208_s7, 2  ;;  %s2920_s8 = sshll.u32 %s3208_s7, 8 }
  0x25   : > { %s3227_s25 = sshll.u32 %s3208_s7, 1  ;;  %s2921_s4 = sshll.u32 %s3208_s7, 6 }
  0x26   : > { %s3215_s9 = scalar_lea.vmem %s3581_s0, %s2465_s28  ;;  %s3587_s0 = sld [smem:[#allocation12_spill]] }
  0x27   : > { %3582 = sst [smem:[#allocation5_spill]] %s3215_s9  ;;  %s3220_s10 = scalar_lea.vmem %s3583_s5, %s2920_s8 }
  0x28   : > { %3584 = sst [smem:[#allocation6_spill]] %s3220_s10  ;;  %s3027_s3 = smul.u32 192, %s3208_s7 }
  0x29   : > { %s992_s17 = scalar_lea.vmem %s3590_s24, %s3227_s25  ;;  %s3591_s15 = sld [smem:[#allocation15_spill]] }
  0x2a   : > { %s1027_s5 = scalar_lea.vmem %s3547_s20, %s3227_s25  ;;  %s3028_s26 = smul.u32 3, %s3208_s7 }
  0x2b   : > { %s1031_s14 = scalar_lea.vmem %s3548_s21, %s3227_s25  ;;  %s3594_s19 = sld [smem:[#allocation18_spill]] }
  0x2c   : > { %s3237_s30 = scalar_lea.vmem %s3587_s0, %s2921_s4  ;;  %s3029_s9 = smul.u32 6, %s3208_s7 }
  0x2d   : > { %3588 = sst [smem:[#allocation7_spill]] %s3237_s30  ;;  %s3279_s30 = scalar_lea.vmem %s3538_s11, %s3028_s26 }
  0x2e   : > { %s3284_s2 = scalar_lea.vmem %s3540_s13, %s3027_s3  ;;  %s3289_s24 = scalar_lea.vmem %s3539_s12, %s3029_s9 }
  0x2f   : > { %s3250_s16 = scalar_lea.vmem %s3591_s15, %s2921_s4  ;;  %s1035_s4 = scalar_lea.vmem %s3549_s22, %s3227_s25 }
  0x30   : > { %s3298_s28 = scalar_lea.vmem %s3550_s23, %s3029_s9  ;;  %s3595_s26 = sld [smem:[#allocation4_spill]] }
  0x31   : > { %s3273_s6 = scalar_lea.vmem %s3594_s19, %s3027_s3 }
  0x36   : > { %p2482_p4 = scmp.ne.s32.totalorder %s3595_s26, 0 }
  0x38   : > { %1044 = sbr.rel (%p2482_p4) target bundleno = 63 (0x3f), region = 104 }
  0x3d   : > { %v3056_v0 = vmov 0.0  }
  0x3e   : > { %1045 = vst [vmem:[#allocation2] sm:$0x3] %v3056_v0 }
  0x3f PF: > { %s3596_s3 = sld [smem:[#allocation6_spill]]  ;;  %v2970_v46 = vld [vmem:[%s3250_s16 + $0x38] sm:$0xff]  ;;  %v2969_v47 = vld [vmem:[%s3250_s16 + $0x30] sm:$0xff]  ;;  %v2968_v48 = vld [vmem:[%s3250_s16 + $0x28] sm:$0xff]  ;;  %vm1777_vm10 = vcmask 1041408   ;;  %vm1779_vm11 = vcmask 1043456  }
  0x40   : > { %s3597_s10 = sld [smem:[#allocation5_spill]]  ;;  %v2967_v49 = vld [vmem:[%s3250_s16 + $0x20] sm:$0xff]  ;;  %v2966_v51 = vld [vmem:[%s3250_s16 + $0x18] sm:$0xff]  ;;  %v2965_v56 = vld [vmem:[%s3250_s16 + $0x10] sm:$0xff] }
  0x41   : > { %s3598_s29 = sld [smem:[#allocation7_spill]] }
  0x42   : > { %s3599_s8 = sld [smem:[#allocation10_spill]] }
  0x43   : > { %s3601_s15 = sld [smem:[#allocation11_spill]] }
  0x44   : > { %s3604_s9 = sld [smem:[#allocation13_spill]] }
  0x45   : > { %v2930_v1 = vld [vmem:[%s3596_s3 + $0x38] sm:$0xff]  ;;  %v2929_v5 = vld [vmem:[%s3596_s3 + $0x30] sm:$0xff]  ;;  %v2928_v9 = vld [vmem:[%s3596_s3 + $0x28] sm:$0xff]  ;;  %s3606_s1 = sld [smem:[#allocation17_spill]] }
  0x46   : > { %v2938_v2 = vld [vmem:[%s3596_s3 + $0x78] sm:$0xff]  ;;  %1318 = vmatpush.bf16.msra.mxu0 %v2930_v1  ;;  %v2937_v6 = vld [vmem:[%s3596_s3 + $0x70] sm:$0xff]  ;;  %v2936_v10 = vld [vmem:[%s3596_s3 + $0x68] sm:$0xff]  ;;  %s3608_s26 = sld [smem:[#allocation16_spill]] }
  0x47   : > { %v2946_v3 = vld [vmem:[%s3596_s3 + $0xb8] sm:$0xff]  ;;  %1331 = vmatpush.bf16.msra.mxu1 %v2938_v2  ;;  %v2945_v7 = vld [vmem:[%s3596_s3 + $0xb0] sm:$0xff]  ;;  %v2944_v11 = vld [vmem:[%s3596_s3 + $0xa8] sm:$0xff] }
  0x48   : > { %v2954_v4 = vld [vmem:[%s3596_s3 + $0xf8] sm:$0xff]  ;;  %1344 = vmatpush.bf16.msra.mxu2 %v2946_v3  ;;  %v2953_v8 = vld [vmem:[%s3596_s3 + $0xf0] sm:$0xff]  ;;  %v2952_v12 = vld [vmem:[%s3596_s3 + $0xe8] sm:$0xff]  ;;  %s3600_s0 = scalar_lea.vmem %s3599_s8, %s3208_s7 }
  0x49   : > { %1357 = vmatpush.bf16.msra.mxu3 %v2954_v4  ;;  %v2927_v13 = vld [vmem:[%s3596_s3 + $0x20] sm:$0xff]  ;;  %v2926_v18 = vld [vmem:[%s3596_s3 + $0x18] sm:$0xff]  ;;  %v2925_v22 = vld [vmem:[%s3596_s3 + $0x10] sm:$0xff]  ;;  %s3602_s19 = scalar_lea.vmem %s3601_s15, %s3227_s25 }
  0x4a   : > { %1319 = vmatpush.bf16.msra.mxu0 %v2929_v5  ;;  %v2935_v14 = vld [vmem:[%s3596_s3 + $0x60] sm:$0xff]  ;;  %v2934_v19 = vld [vmem:[%s3596_s3 + $0x58] sm:$0xff]  ;;  %v2933_v23 = vld [vmem:[%s3596_s3 + $0x50] sm:$0xff]  ;;  %v3057_v5 = vmov 1.0|1.0   ;;  %s3605_s18 = scalar_lea.vmem %s3604_s9, %s3208_s7 }
  0x4b   : > { %1332 = vmatpush.bf16.msra.mxu1 %v2937_v6  ;;  %v1047_v15 = vld [vmem:[%s3597_s10] sm:$0xf]  ;;  %v2942_v20 = vld [vmem:[%s3596_s3 + $0x98] sm:$0xff]  ;;  %v2941_v24 = vld [vmem:[%s3596_s3 + $0x90] sm:$0xff]  ;;  %s3607_s15 = scalar_lea.vmem %s3606_s1, %s3227_s25  ;;  %s3610_s25 = sld [smem:[#allocation4_spill]] }
  0x4c   : > { %1345 = vmatpush.bf16.msra.mxu2 %v2945_v7  ;;  %v2943_v16 = vld [vmem:[%s3596_s3 + $0xa0] sm:$0xff]  ;;  %1117 = vst [vmem:[#allocation1] ss:$9 sm:$0xff] %v1047_v15  ;;  %v2950_v21 = vld [vmem:[%s3596_s3 + $0xd8] sm:$0xff]  ;;  %v2949_v25 = vld [vmem:[%s3596_s3 + $0xd0] sm:$0xff] }
  0x4d   : > { %1358 = vmatpush.bf16.msra.mxu3 %v2953_v8  ;;  %v2951_v17 = vld [vmem:[%s3596_s3 + $0xe0] sm:$0xff]  ;;  %v2924_v26 = vld [vmem:[%s3596_s3 + $0x8] sm:$0xff]  ;;  %v2962_v34 = vld [vmem:[%s3598_s29 + $0x38] sm:$0xff] }
  0x4e   : > { %1320 = vmatpush.bf16.msra.mxu0 %v2928_v9  ;;  %v2932_v27 = vld [vmem:[%s3596_s3 + $0x48] sm:$0xff]  ;;  %v2923_v30 = vld [vmem:[%s3596_s3] sm:$0xff]  ;;  %v2961_v39 = vld [vmem:[%s3598_s29 + $0x30] sm:$0xff] }
  0x4f   : > { %1333 = vmatpush.bf16.msra.mxu1 %v2936_v10  ;;  %v2940_v28 = vld [vmem:[%s3596_s3 + $0x88] sm:$0xff]  ;;  %v2931_v31 = vld [vmem:[%s3596_s3 + $0x40] sm:$0xff]  ;;  %v2958_v42 = vld [vmem:[%s3598_s29 + $0x18] sm:$0xff] }
  0x50   : > { %1346 = vmatpush.bf16.msra.mxu2 %v2944_v11  ;;  %v2948_v29 = vld [vmem:[%s3596_s3 + $0xc8] sm:$0xff]  ;;  %v2939_v32 = vld [vmem:[%s3596_s3 + $0x80] sm:$0xff]  ;;  %v2957_v43 = vld [vmem:[%s3598_s29 + $0x10] sm:$0xff] }
  0x51   : > { %1359 = vmatpush.bf16.msra.mxu3 %v2952_v12  ;;  %v2947_v33 = vld [vmem:[%s3596_s3 + $0xc0] sm:$0xff]  ;;  %v2960_v40 = vld [vmem:[%s3598_s29 + $0x28] sm:$0xff]  ;;  %v2993_v9 = vld [vmem:[%s3273_s6 + $0xb0] sm:$0xf0]  ;;  %s3609_s3 = scalar_lea.vmem %s3608_s26, %s3208_s7  ;;  %p2881_p5 = scmp.ne.s32.totalorder %s3610_s25, 7 }
  0x52   : > { %1321 = vmatpush.bf16.msra.mxu0 %v2927_v13  ;;  %v2959_v41 = vld [vmem:[%s3598_s29 + $0x20] sm:$0xff]  ;;  %v2956_v44 = vld [vmem:[%s3598_s29 + $0x8] sm:$0xff]  ;;  %v2770_v12 = vld [vmem:[%s3273_s6 + $0xb4] sm:$0xf0]  ;;  %s3614_s1 = sld [smem:[#allocation25_spill]] (!%p2881_p5) }
  0x53   : > { %1334 = vmatpush.bf16.msra.mxu1 %v2935_v14  ;;  %v1118_v35 = vld [vmem:[#allocation1] sm:$0xff]  ;;  %v1119_v36 = vld [vmem:[#allocation1 + $0x9] sm:$0xff]  ;;  %v1120_v37 = vld [vmem:[#allocation1 + $0x12] sm:$0xff]  ;;  %s3617_s8 = sld [smem:[#allocation24_spill]] (!%p2881_p5) }
  0x54   : > { %1347 = vmatpush.bf16.msra.mxu2 %v2943_v16  ;;  %v1121_v38 = vld [vmem:[#allocation1 + $0x1b] sm:$0xff]  ;;  %v2964_v6 = vld [vmem:[%s3250_s16 + $0x8] sm:$0xff]  ;;  %v2776_v13 = vld [vmem:[%s3273_s6 + $0xb0] sm:$0xf]  ;;  %s3618_s27 = sld [smem:[#allocation26_spill]] (!%p2881_p5) }
  0x55   : > { %1360 = vmatpush.bf16.msra.mxu3 %v2951_v17  ;;  %v2955_v45 = vld [vmem:[%s3598_s29] sm:$0xff]  ;;  %v2768_v8 = vld [vmem:[%s3273_s6 + $0xa8] sm:$0xf]  ;;  %v2992_v10 = vld [vmem:[%s3273_s6 + $0xac] sm:$0xf]  ;;  %s3616_s29 = sld [smem:[#allocation22_spill]] (!%p2881_p5) }
  0x56   : > { %1322 = vmatpush.bf16.msra.mxu0 %v2926_v18  ;;  %v3043_v50 = vld [vmem:[%s3600_s0] ss:$0 sm:$0xff]  ;;  %v2769_v11 = vor.u32 %v2993_v9, %v2768_v8  ;;  %v2994_v14 = vld [vmem:[%s3273_s6 + $0xb8] sm:$0xf0]  ;;  %v2773_v15 = vor.u32 %v2992_v10, %v2770_v12  ;;  %v2756_v17 = vld [vmem:[%s3273_s6 + $0x90] sm:$0xf] }
  0x57   : > { %1335 = vmatpush.bf16.msra.mxu1 %v2934_v19  ;;  %v1046_v55 = vld [vmem:[%s3602_s19] sm:$0x3]  ;;  %v2777_v16 = vor.u32 %v2994_v14, %v2776_v13  ;;  %v2990_v18 = vld [vmem:[%s3273_s6 + $0x98] sm:$0xf0]  ;;  %v2989_v19 = vld [vmem:[%s3273_s6 + $0x94] sm:$0xf] }
  0x58   : > { %1348 = vmatpush.bf16.msra.mxu2 %v2942_v20  ;;  %v1371_v58 = vmul.f32 0.2, %v1046_v55  ;;  %vm1370_vm0 = vcmp.gt.f32.partialorder %v1046_v55, 0.2  ;;  %v2963_v7 = vld [vmem:[%s3250_s16] sm:$0xff]  ;;  %v2757_v20 = vor.u32 %v2990_v18, %v2756_v17 }
  0x59   : > { %1361 = vmatpush.bf16.msra.mxu3 %v2950_v21  ;;  %v2758_v21 = vld [vmem:[%s3273_s6 + $0x9c] sm:$0xf0]  ;;  %v2978_v55 = vld [vmem:[%s3273_s6 + $0x38] sm:$0xf0]  ;;  %v2975_v8 = vld [vmem:[%s3273_s6 + $0x20] sm:$0xf0] }
  0x5a   : > { %1323 = vmatpush.bf16.msra.mxu0 %v2925_v22  ;;  %v1372_v0 = vsel %vm1370_vm0, 0.0, %v1371_v58  ;;  %v2764_v22 = vld [vmem:[%s3273_s6 + $0x98] sm:$0xf]  ;;  %v2974_v9 = vld [vmem:[%s3273_s6 + $0x1c] sm:$0xf] }
  0x5b   : > { %1336 = vmatpush.bf16.msra.mxu1 %v2933_v23  ;;  %v2991_v23 = vld [vmem:[%s3273_s6 + $0xa0] sm:$0xf0]  ;;  %v2716_v58 = vld [vmem:[%s3273_s6 + $0x38] sm:$0xf]  ;;  %v2704_v12 = vld [vmem:[%s3273_s6 + $0x20] sm:$0xf] }
  0x5c   : > { %1349 = vmatpush.bf16.msra.mxu2 %v2941_v24  ;;  %v2761_v24 = vor.u32 %v2989_v19, %v2758_v21  ;;  %v2976_v13 = vld [vmem:[%s3273_s6 + $0x28] sm:$0xf0]  ;;  %v2971_v19 = vld [vmem:[%s3273_s6 + $0x4] sm:$0xf] }
  0x5d   : > { %1362 = vmatpush.bf16.msra.mxu3 %v2949_v25  ;;  %v2765_v25 = vor.u32 %v2991_v23, %v2764_v22  ;;  %v2972_v17 = vld [vmem:[%s3273_s6 + $0x8] sm:$0xf0]  ;;  %v2692_v22 = vld [vmem:[%s3273_s6 + $0x8] sm:$0xf]  ;;  %v2973_v23 = vld [vmem:[%s3273_s6 + $0x10] sm:$0xf0] }
  0x5e   : > { %1324 = vmatpush.bf16.msra.mxu0 %v2924_v26  ;;  %v2744_v26 = vld [vmem:[%s3273_s6 + $0x78] sm:$0xf] }
  0x5f   : > { %1337 = vmatpush.bf16.msra.mxu1 %v2932_v27  ;;  %v2987_v27 = vld [vmem:[%s3273_s6 + $0x80] sm:$0xf0] }
  0x60   : > { %1350 = vmatpush.bf16.msra.mxu2 %v2940_v28  ;;  %v2986_v28 = vld [vmem:[%s3273_s6 + $0x7c] sm:$0xf] }
  0x61   : > { %1363 = vmatpush.bf16.msra.mxu3 %v2948_v29  ;;  %v2746_v29 = vld [vmem:[%s3273_s6 + $0x84] sm:$0xf0] }
  0x62   : > { %1325 = vmatpush.bf16.msra.mxu0 %v2923_v30  ;;  %v2752_v30 = vld [vmem:[%s3273_s6 + $0x80] sm:$0xf] }
  0x63   : > { %1338 = vmatpush.bf16.msra.mxu1 %v2931_v31  ;;  %v2988_v31 = vld [vmem:[%s3273_s6 + $0x88] sm:$0xf0] }
  0x64   : > { %1351 = vmatpush.bf16.msra.mxu2 %v2939_v32  ;;  %v2745_v32 = vor.u32 %v2987_v27, %v2744_v26  ;;  %v3010_v26 = vld [vmem:[%s3284_s2 + $0x78] sm:$0xff] }
  0x65   : > { %1364 = vmatpush.bf16.msra.mxu3 %v2947_v33  ;;  %1326 = vmatmul.bf16.vlgmr.msra.gmra.mxu0 %v1118_v35  ;;  %v2749_v33 = vor.u32 %v2986_v28, %v2746_v29  ;;  %v2732_v35 = vld [vmem:[%s3273_s6 + $0x60] sm:$0xf]  ;;  %v3018_v27 = vld [vmem:[%s3284_s2 + $0xb8] sm:$0xff] }
  0x66   : > { %1448 = vmatpush.bf16.msrb.mxu0 %v2962_v34  ;;  %1339 = vmatmul.bf16.vlgmr.msra.gmra.mxu1 %v1119_v36  ;;  %v2753_v34 = vor.u32 %v2988_v31, %v2752_v30  ;;  %v2984_v36 = vld [vmem:[%s3273_s6 + $0x68] sm:$0xf0]  ;;  %v1470_v28 = vld [vmem:[%s3607_s15] sm:$0x3] }
  0x67   : > { %1352 = vmatmul.bf16.vlgmr.msra.gmra.mxu2 %v1120_v37  ;;  %1539 = vmatpush.bf16.msrb.mxu1 %v2970_v46  ;;  %v2983_v37 = vld [vmem:[%s3273_s6 + $0x64] sm:$0xf]  ;;  %v2980_v46 = vld [vmem:[%s3273_s6 + $0x4c] sm:$0xf]  ;;  %v1553_v29 = vmul.f32 0.2, %v1470_v28 }
  0x68   : > { %1365 = vmatmul.bf16.vlgmr.msra.gmra.mxu3 %v1121_v38  ;;  %1730 = vmatpush.bf16.msrb.mxu2 %v2769_v11  ;;  %v2734_v38 = vld [vmem:[%s3273_s6 + $0x6c] sm:$0xf0]  ;;  %v2698_v11 = vld [vmem:[%s3273_s6 + $0x24] sm:$0xf0]  ;;  %v3045_v30 = vld [vmem:[%s3609_s3] ss:$0 sm:$0xff] }
  0x69   : > { %1743 = vmatpush.bf16.msrb.mxu3 %v2773_v15  ;;  %v2701_v14 = vor.u32 %v2974_v9, %v2698_v11  ;;  %v2705_v15 = vor.u32 %v2976_v13, %v2704_v12  ;;  %vm1552_vm6 = vcmp.gt.f32.partialorder %v1470_v28, 0.2 }
  0x6a   : > { %1449 = vmatpush.bf16.msrb.mxu0 %v2961_v39  ;;  %v2740_v39 = vld [vmem:[%s3273_s6 + $0x68] sm:$0xf] }
  0x6b   : > { %1540 = vmatpush.bf16.msrb.mxu1 %v2969_v47  ;;  %v2722_v47 = vld [vmem:[%s3273_s6 + $0x54] sm:$0xf0] }
  0x6c   : > { %1731 = vmatpush.bf16.msrb.mxu2 %v2757_v20  ;;  %v2686_v20 = vld [vmem:[%s3273_s6 + $0xc] sm:$0xf0] }
  0x6d   : > { %1744 = vmatpush.bf16.msrb.mxu3 %v2761_v24  ;;  %v2689_v21 = vor.u32 %v2971_v19, %v2686_v20  ;;  %v2693_v24 = vor.u32 %v2973_v23, %v2692_v22 }
  0x6e   : > { %1450 = vmatpush.bf16.msrb.mxu0 %v2960_v40  ;;  %v2985_v40 = vld [vmem:[%s3273_s6 + $0x70] sm:$0xf0] }
  0x6f   : > { %1541 = vmatpush.bf16.msrb.mxu1 %v2968_v48  ;;  %v2728_v48 = vld [vmem:[%s3273_s6 + $0x50] sm:$0xf] }
  0x70   : > { %1732 = vmatpush.bf16.msrb.mxu2 %v2745_v32  ;;  %v1554_v32 = vsel %vm1552_vm6, 0.0, %v1553_v29 }
  0x71   : > { %1745 = vmatpush.bf16.msrb.mxu3 %v2749_v33 }
  0x72   : > { %1451 = vmatpush.bf16.msrb.mxu0 %v2959_v41  ;;  %v2733_v41 = vor.u32 %v2984_v36, %v2732_v35  ;;  %v3001_v36 = vld [vmem:[%s3284_s2 + $0x30] sm:$0xff] }
  0x73   : > { %1542 = vmatpush.bf16.msrb.mxu1 %v2967_v49  ;;  %v2982_v49 = vld [vmem:[%s3273_s6 + $0x58] sm:$0xf0] }
  0x74   : > { %1733 = vmatpush.bf16.msrb.mxu2 %v2733_v41  ;;  %v3016_v41 = vld [vmem:[%s3284_s2 + $0xa8] sm:$0xff] }
  0x76   : > { %1452 = vmatpush.bf16.msrb.mxu0 %v2958_v42  ;;  %v2737_v42 = vor.u32 %v2983_v37, %v2734_v38  ;;  %v3009_v37 = vld [vmem:[%s3284_s2 + $0x70] sm:$0xff] }
  0x77   : > { %1543 = vmatpush.bf16.msrb.mxu1 %v2966_v51  ;;  %v3017_v38 = vld [vmem:[%s3284_s2 + $0xb0] sm:$0xff] }
  0x78   : > { %1746 = vmatpush.bf16.msrb.mxu3 %v2737_v42  ;;  %v3007_v42 = vld [vmem:[%s3284_s2 + $0x60] sm:$0xff] }
  0x7a   : > { %1453 = vmatpush.bf16.msrb.mxu0 %v2957_v43  ;;  %v2741_v43 = vor.u32 %v2985_v40, %v2740_v39  ;;  %v3000_v39 = vld [vmem:[%s3284_s2 + $0x28] sm:$0xff] }
  0x7b   : > { %1544 = vmatpush.bf16.msrb.mxu1 %v2965_v56  ;;  %v2977_v56 = vld [vmem:[%s3273_s6 + $0x34] sm:$0xf]  ;;  %v3008_v40 = vld [vmem:[%s3284_s2 + $0x68] sm:$0xff] }
  0x7e   : > { %1454 = vmatpush.bf16.msrb.mxu0 %v2956_v44  ;;  %v2720_v44 = vld [vmem:[%s3273_s6 + $0x48] sm:$0xf] }
  0x7f   : > { %1545 = vmatpush.bf16.msrb.mxu1 %v2964_v6 }
  0x82   : > { %1455 = vmatpush.bf16.msrb.mxu0 %v2955_v45  ;;  %v2981_v45 = vld [vmem:[%s3273_s6 + $0x50] sm:$0xf0] }
  0x83   : > { %1546 = vmatpush.bf16.msrb.mxu1 %v2963_v7  ;;  %v2721_v51 = vor.u32 %v2981_v45, %v2720_v44  ;;  %v2696_v7 = vld [vmem:[%s3273_s6 + $0x18] sm:$0xf] }
  0x84   : > { %v2697_v10 = vor.u32 %v2975_v8, %v2696_v7  ;;  %v2998_v44 = vld [vmem:[%s3284_s2 + $0x18] sm:$0xff] }
  0x85   : > { %1734 = vmatpush.bf16.msrb.mxu2 %v2721_v51  ;;  %v3006_v45 = vld [vmem:[%s3284_s2 + $0x58] sm:$0xff]  ;;  %v3004_v51 = vld [vmem:[%s3284_s2 + $0x48] sm:$0xff] }
  0x86   : > { %1756 = vmatpush.bf16.msra.mxu0 %v2777_v16  ;;  %v2684_v16 = vld [vmem:[%s3273_s6] sm:$0xf] }
  0x87   : > { %v2685_v18 = vor.u32 %v2972_v17, %v2684_v16 }
  0x8a   : > { %1757 = vmatpush.bf16.msra.mxu0 %v2765_v25  ;;  %v3002_v25 = vld [vmem:[%s3284_s2 + $0x38] sm:$0xff] }
  0x8b   : > { %1991 = vmatpush.bf16.msra.mxu1 %v3002_v25 }
  0x8e   : > { %1758 = vmatpush.bf16.msra.mxu0 %v2753_v34 }
  0x8f   : > { %1992 = vmatpush.bf16.msra.mxu1 %v3001_v36 }
  0x92   : > { %1759 = vmatpush.bf16.msra.mxu0 %v2741_v43  ;;  %v3015_v43 = vld [vmem:[%s3284_s2 + $0xa0] sm:$0xff] }
  0x93   : > { %1993 = vmatpush.bf16.msra.mxu1 %v3000_v39 }
  0xe2   : > { %v1327_v52 = vpop.f32.mrf.mxu0 }
  0xe3   : > { %v1340_v53 = vpop.f32.mrf.mxu1  ;;  %v1328_v54 = vadd.f32 %v3043_v50, %v1327_v52  ;;  %v1379_v50 = vld [vmem:[%s992_s17] sm:$0x3]  ;;  %v2725_v52 = vor.u32 %v2980_v46, %v2722_v47  ;;  %v3014_v46 = vld [vmem:[%s3284_s2 + $0x98] sm:$0xff]  ;;  %v2997_v47 = vld [vmem:[%s3284_s2 + $0x10] sm:$0xff]  ;;  %s3612_s17 = sld [smem:[#allocation20_spill]] (!%p2881_p5) }
  0xe4   : > { %vm1461_vm3 = vcmp.gt.f32.partialorder %v1379_v50, 0.2 }
  0xe5   : > { %v1341_v57 = vadd.f32 %v1340_v53, %v1328_v54  ;;  %v2729_v53 = vor.u32 %v2982_v49, %v2728_v48  ;;  %v2708_v54 = vld [vmem:[%s3273_s6 + $0x30] sm:$0xf]  ;;  %1747 = vmatpush.bf16.msrb.mxu3 %v2725_v52  ;;  %v3012_v52 = vld [vmem:[%s3284_s2 + $0x88] sm:$0xff] }
  0xe6   : > { %v3005_v48 = vld [vmem:[%s3284_s2 + $0x50] sm:$0xff] }
  0xe7   : > { %1760 = vmatpush.bf16.msra.mxu0 %v2729_v53  ;;  %v3013_v49 = vld [vmem:[%s3284_s2 + $0x90] sm:$0xff]  ;;  %v2995_v53 = vld [vmem:[%s3284_s2] sm:$0xff] }
  0xea   : > { %v1353_v59 = vpop.f32.mrf.mxu2  ;;  %v1329_v62 = vpop.f32.mrf.mxu0 }
  0xeb   : > { %v1366_v60 = vpop.f32.mrf.mxu3  ;;  %v1354_v61 = vadd.f32 %v1353_v59, %v1341_v57  ;;  %v1342_v63 = vpop.f32.mrf.mxu1  ;;  %v2710_v57 = vld [vmem:[%s3273_s6 + $0x3c] sm:$0xf0]  ;;  %v2979_v59 = vld [vmem:[%s3273_s6 + $0x40] sm:$0xf0]  ;;  %s3619_s6 = sld [smem:[#allocation27_spill]] (!%p2881_p5) }
  0xec   : > { %v2713_v62 = vor.u32 %v2977_v56, %v2710_v57  ;;  %v2717_v63 = vor.u32 %v2979_v59, %v2716_v58  ;;  %v1594_v56 = vld [vmem:[%s3279_s30] sm:$0x7] }
  0xed   : > { %v1367_v1 = vadd.f32 %v1366_v60, %v1354_v61  ;;  %v2709_v60 = vor.u32 %v2978_v55, %v2708_v54  ;;  %v1462_v61 = vmul.f32 0.2, %v1379_v50  ;;  %v2996_v50 = vld [vmem:[%s3284_s2 + $0x8] sm:$0xff]  ;;  %v3003_v54 = vld [vmem:[%s3284_s2 + $0x40] sm:$0xff]  ;;  %v1598_v58 = vperm.slane %v1594_v56, 2 }
  0xee   : > { %1748 = vmatpush.bf16.msrb.mxu3 %v2713_v62  ;;  %1761 = vmatpush.bf16.msra.mxu0 %v2717_v63  ;;  %v3011_v55 = vld [vmem:[%s3284_s2 + $0x80] sm:$0xff] }
  0xef   : > { %v1373_v2 = vadd.f32 %v1372_v0, %v1367_v1  ;;  %v3044_v0 = vld [vmem:[%s3605_s18] ss:$0 sm:$0xff]  ;;  %1735 = vmatpush.bf16.msrb.mxu2 %v2709_v60  ;;  %v1597_v60 = vperm.slane %v1594_v56, 1  ;;  %s3613_s18 = sld [smem:[#allocation19_spill]] (!%p2881_p5) }
  0xf0   : > { %v1561_v59 = vld [vmem:[%s3289_s24] sm:$0x3f] }
  0xf1   : > { %1378 = vst [vmem:[%s1027_s5] sm:$0x3] %v1373_v2  ;;  %vm1374_vm1 = vcmp.gt.f32.partialorder %v1373_v2, 0.2  ;;  %v1463_v2 = vsel %vm1461_vm3, 0.0, %v1462_v61  ;;  %v1596_v61 = vperm.slane %v1594_v56, 0 }
  0xf2   : > { %v1355_v3 = vpop.f32.mrf.mxu2  ;;  %vm2644_vm2 = vmpackc.low %vm1374_vm1, %vm1374_vm1  ;;  %1749 = vmatpush.bf16.msrb.mxu3 %v2701_v14  ;;  %1762 = vmatpush.bf16.msra.mxu0 %v2705_v15  ;;  %vm1769_vm9 = vcmp.gt.f32.partialorder %v1561_v59, 0.2  ;;  %v3058_v14 = vmov 0.0  }
  0xf3   : > { %v1368_v4 = vpop.f32.mrf.mxu3  ;;  %2645 = vmatmul.msk.bf16.vlgmr.msrb.gmra.mxu0 %vm2644_vm2, %v3057_v5  ;;  %1736 = vmatpush.bf16.msrb.mxu2 %v2697_v10 }
  0xf6   : > { %1750 = vmatpush.bf16.msrb.mxu3 %v2689_v21  ;;  %1763 = vmatpush.bf16.msra.mxu0 %v2693_v24 }
  0xf7   : > { %1737 = vmatpush.bf16.msrb.mxu2 %v2685_v18 }
  0xfa   : > { %2017 = vmatpush.bf16.msra.mxu3 %v3018_v27 }
  0xfb   : > { %2004 = vmatpush.bf16.msra.mxu2 %v3010_v26  ;;  %v1798_v26 = vld [vmem:[#allocation2] sm:$0x3] }
  0xfe   : > { %2018 = vmatpush.bf16.msra.mxu3 %v3017_v38 }
  0xff   : > { %2005 = vmatpush.bf16.msra.mxu2 %v3009_v37 }
 0x102   : > { %2019 = vmatpush.bf16.msra.mxu3 %v3016_v41 }
 0x103   : > { %2006 = vmatpush.bf16.msra.mxu2 %v3008_v40 }
 0x106   : > { %2020 = vmatpush.bf16.msra.mxu3 %v3015_v43 }
 0x107   : > { %2007 = vmatpush.bf16.msra.mxu2 %v3007_v42 }
 0x10a   : > { %2021 = vmatpush.bf16.msra.mxu3 %v3014_v46 }
 0x10b   : > { %2008 = vmatpush.bf16.msra.mxu2 %v3006_v45 }
 0x10e   : > { %2022 = vmatpush.bf16.msra.mxu3 %v3013_v49 }
 0x10f   : > { %2009 = vmatpush.bf16.msra.mxu2 %v3005_v48 }
 0x112   : > { %2023 = vmatpush.bf16.msra.mxu3 %v3012_v52 }
 0x113   : > { %2010 = vmatpush.bf16.msra.mxu2 %v3004_v51 }
 0x116   : > { %2024 = vmatpush.bf16.msra.mxu3 %v3011_v55 }
 0x117   : > { %2011 = vmatpush.bf16.msra.mxu2 %v3003_v54 }
 0x170   : > { %v1457_v1 = vpop.f32.mrf.mxu0 }
 0x171   : > { %v1458_v3 = vadd.f32 %v3044_v0, %v1457_v1  ;;  %v1770_v1 = vmul.f32 0.2, %v1561_v59 }
 0x173   : > { %v1464_v4 = vadd.f32 %v1463_v2, %v1458_v3  ;;  %v1771_v8 = vsel %vm1769_vm9, 0.0, %v1770_v1 }
 0x175   : > { %1469 = vst [vmem:[%s1031_s14] sm:$0x3] %v1464_v4  ;;  %vm1465_vm4 = vcmp.gt.f32.partialorder %v1464_v4, 0.2 }
 0x176   : > { %vm2679_vm5 = vmpackc.low %vm1465_vm4, %vm1465_vm4 }
 0x177   : > { %2680 = vmatmul.msk.bf16.vlgmr.msrb.gmra.mxu1 %vm2679_vm5, %v3057_v5 }
 0x178   : > { %v1459_v6 = vpop.f32.mrf.mxu0 }
 0x1f4   : > { %v1548_v31 = vpop.f32.mrf.mxu1 }
 0x1f5   : > { %v1549_v33 = vadd.f32 %v3045_v30, %v1548_v31 }
 0x1f7   : > { %v1555_v34 = vadd.f32 %v1554_v32, %v1549_v33 }
 0x1f9   : > { %1560 = vst [vmem:[%s1035_s4] sm:$0x3] %v1555_v34  ;;  %vm1556_vm7 = vcmp.gt.f32.partialorder %v1555_v34, 0.2 }
 0x1fa   : > { %vm2778_vm8 = vmpackc.low %vm1556_vm7, %vm1556_vm7 }
 0x1fb   : > { %2779 = vmatmul.msk.bf16.vlgmr.msrb.gmra.mxu2 %vm2778_vm8, %v3057_v5  ;;  %2781 = vmatmul.msk.bf16.vlgmr.msrb.gmra.mxu3 %vm2778_vm8, %v3057_v5 }
 0x1fc   : > { %2783 = vmatmul.msk.bf16.vlgmr.msra.gmra.mxu0 %vm2778_vm8, %v3057_v5  ;;  %v1550_v35 = vpop.f32.mrf.mxu1  ;;  %v2999_v5 = vld [vmem:[%s3284_s2 + $0x20] sm:$0xff]  ;;  %s3611_s2 = sld [smem:[#allocation21_spill]] (!%p2881_p5) }
 0x1fd   : > { %1994 = vmatpush.bf16.msra.mxu1 %v2999_v5 }
 0x201   : > { %1995 = vmatpush.bf16.msra.mxu1 %v2998_v44 }
 0x205   : > { %1996 = vmatpush.bf16.msra.mxu1 %v2997_v47 }
 0x209   : > { %1997 = vmatpush.bf16.msra.mxu1 %v2996_v50 }
 0x20d   : > { %1998 = vmatpush.bf16.msra.mxu1 %v2995_v53 }
 0x279   : > { %v1765_v57 = vpop.f32.mrf.mxu0 }
 0x27a   : > { %v1766_v62 = vadd.f32 %v1765_v57, %v1598_v58 }
 0x27c   : > { %v1776_v7 = vrot.slane %v1766_v62, 4 }
 0x27e   : > { %v1739_v63 = vpop.f32.mrf.mxu2  ;;  %v1752_v0 = vpop.f32.mrf.mxu3 }
 0x27f   : > { %v1753_v2 = vadd.f32 %v1752_v0, %v1597_v60  ;;  %v1740_v3 = vadd.f32 %v1739_v63, %v1596_v61 }
 0x281   : > { %v1775_v4 = vrot.slane %v1753_v2, 6  ;;  %v1767_v6 = vpop.f32.mrf.mxu0 }
 0x283   : > { %v1778_v9 = vsel %vm1777_vm10, %v1740_v3, %v1775_v4 }
 0x284   : > { %v1780_v10 = vsel %vm1779_vm11, %v1778_v9, %v1776_v7 }
 0x285   : > { %v1782_v11 = vadd.f32 %v1780_v10, %v1771_v8 }
 0x286   : > { %v1741_v12 = vpop.f32.mrf.mxu2  ;;  %v1754_v13 = vpop.f32.mrf.mxu3 }
 0x287   : > { %vm1783_vm12 = vcmp.gt.f32.partialorder %v1782_v11, 0.2  ;;  %1797 = vst [vmem:[%s3298_s28] sm:$0x3f] %v1782_v11  ;;  %s3615_s28 = sld [smem:[#allocation23_spill]] (!%p2881_p5) }
 0x288   : > { %v2784_v15 = vsel %vm1783_vm12, 1.0, %v3058_v14 }
 0x289   : > { %1787 = vst [vmem:[#allocation1] ss:$4 sm:$0xff] %v2784_v15 }
 0x290   : > { %v1788_v16 = vld.sshfl [vmem:[#allocation1] sm:$0xff pattern:$0x73625140]  ;;  %v1789_v17 = vld.sshfl [vmem:[#allocation1 + $0x8] sm:$0xff pattern:$0x73625140] }
 0x291   : > { %v1794_v18 = vpack.c.bf16 %v1788_v16, %v1788_v16  ;;  %v1795_v19 = vpack.c.bf16 %v1789_v17, %v1789_v17  ;;  %v1790_v20 = vld.sshfl [vmem:[#allocation1 + $0x10] sm:$0xff pattern:$0x73625140] }
 0x292   : > { %v1796_v21 = vpack.c.bf16 %v1790_v20, %v1790_v20 }
 0x293   : > { %1999 = vmatmul.bf16.vlgmr.msra.gmra.mxu1 %v1794_v18  ;;  %2012 = vmatmul.bf16.vlgmr.msra.gmra.mxu2 %v1795_v19 }
 0x294   : > { %2025 = vmatmul.bf16.vlgmr.msra.gmra.mxu3 %v1796_v21 }
 0x310   : > { %v2000_v22 = vpop.f32.mrf.mxu1 }
 0x316   : > { %v2013_v23 = vpop.f32.mrf.mxu2 }
 0x317   : > { %v2014_v24 = vadd.f32 %v2013_v23, %v2000_v22  ;;  %v2026_v25 = vpop.f32.mrf.mxu3 }
 0x318   : > { %v2002_v27 = vpop.f32.mrf.mxu1 }
 0x319   : > { %v2027_v28 = vadd.f32 %v2026_v25, %v2014_v24 }
 0x31b   : > { %v2030_v29 = vadd.f32 %v2027_v28, %v1798_v26  ;;  %2035 = sbr.rel (%p2881_p5) target bundleno = 967 (0x3c7), region = 108 }
 0x31d   : > { %2031 = vst [vmem:[#allocation2] sm:$0x3] %v2030_v29 }
 0x31e   : > { %v2015_v30 = vpop.f32.mrf.mxu2 }
 0x31f   : > { %v2028_v31 = vpop.f32.mrf.mxu3 }
 0x320   : > { %v3026_v32 = vld [vmem:[%s3611_s2 + $0x38] sm:$0xff]  ;;  %v3025_v33 = vld [vmem:[%s3611_s2 + $0x30] sm:$0xff]  ;;  %v2036_v34 = vld [vmem:[%s3612_s17] sm:$0x3]  ;;  %v3059_v46 = vmov 1.0|1.0  }
 0x321   : > { %2120 = vmatpush.bf16.msra.mxu0 %v3026_v32  ;;  %v3046_v36 = vld [vmem:[%s3613_s18] ss:$0 sm:$0xff]  ;;  %vm2043_vm13 = vcmp.gt.f32.partialorder %v2036_v34, 0.2  ;;  %v2044_v37 = vmul.f32 0.2, %v2036_v34 }
 0x322   : > { %v3024_v39 = vld [vmem:[%s3611_s2 + $0x28] sm:$0xff]  ;;  %v3023_v5 = vld [vmem:[%s3611_s2 + $0x20] sm:$0xff]  ;;  %v3022_v42 = vld [vmem:[%s3611_s2 + $0x18] sm:$0xff]  ;;  %v3060_v55 = vmov 0.0  }
 0x323   : > { %v2045_v40 = vsel %vm2043_vm13, 0.0, %v2044_v37  ;;  %v3021_v43 = vld [vmem:[%s3611_s2 + $0x10] sm:$0xff]  ;;  %v3020_v44 = vld [vmem:[%s3611_s2 + $0x8] sm:$0xff]  ;;  %v3019_v45 = vld [vmem:[%s3611_s2] sm:$0xff] }
 0x324   : > { %v2037_v35 = vld [vmem:[#allocation2] sm:$0x3]  ;;  %v2133_v47 = vld [vmem:[%s3615_s28] sm:$0x3] }
 0x325   : > { %v2042_v38 = vadd.f32 %v3046_v36, %v2037_v35  ;;  %2121 = vmatpush.bf16.msra.mxu0 %v3025_v33  ;;  %v2135_v48 = vmul.f32 0.2, %v2133_v47  ;;  %v3047_v49 = vld [vmem:[%s3616_s29] ss:$0 sm:$0xff]  ;;  %vm2134_vm0 = vcmp.gt.f32.partialorder %v2133_v47, 0.2 }
 0x326   : > { %v2143_v54 = vld [vmem:[%s3617_s8] sm:$0x3] }
 0x327   : > { %v2046_v41 = vadd.f32 %v2045_v40, %v2042_v38  ;;  %v2136_v51 = vsel %vm2134_vm0, 0.0, %v2135_v48 }
 0x329   : > { %2051 = vst [vmem:[%s3614_s1] sm:$0x3] %v2046_v41  ;;  %2122 = vmatpush.bf16.msra.mxu0 %v3024_v39  ;;  %vm2047_vm14 = vcmp.gt.f32.partialorder %v2046_v41, 0.2 }
 0x32a   : > { %vm2915_vm15 = vmpackc.low %vm2047_vm14, %vm2047_vm14 }
 0x32d   : > { %2123 = vmatpush.bf16.msra.mxu0 %v3023_v5 }
 0x331   : > { %2124 = vmatpush.bf16.msra.mxu0 %v3022_v42 }
 0x335   : > { %2125 = vmatpush.bf16.msra.mxu0 %v3021_v43 }
 0x339   : > { %2126 = vmatpush.bf16.msra.mxu0 %v3020_v44 }
 0x33d   : > { %2127 = vmatpush.bf16.msra.mxu0 %v3019_v45 }
 0x340   : > { %2916 = vmatmul.msk.bf16.vlgmr.msra.gmra.mxu0 %vm2915_vm15, %v3059_v46 }
 0x3bd   : > { %v2129_v50 = vpop.f32.mrf.mxu0 }
 0x3be   : > { %v2130_v52 = vadd.f32 %v3047_v49, %v2129_v50 }
 0x3c0   : > { %v2137_v53 = vadd.f32 %v2136_v51, %v2130_v52 }
 0x3c2   : > { %vm2138_vm1 = vcmp.gt.f32.partialorder %v2137_v53, 0.2  ;;  %2142 = vst [vmem:[%s3618_s27] sm:$0x3] %v2137_v53 }
 0x3c3   : > { %v2917_v56 = vsel %vm2138_vm1, 1.0, %v3060_v55 }
 0x3c4   : > { %v2145_v57 = vadd.f32 %v2917_v56, %v2143_v54 }
 0x3c5   : > { %v2131_v58 = vpop.f32.mrf.mxu0 }
 0x3c6   : > { %2146 = vst [vmem:[%s3619_s6] sm:$0x3] %v2145_v57 }
 0x3c7 PF: > { %s3620_s19 = sld [smem:[#allocation3_spill]] }
 0x3cd   : > { %s37_s27 = sadd.s32 1, %s3620_s19  }
 0x3ce   : > { %p34_p6 = scmp.ge.s32.totalorder %s37_s27, 10  }
 0x3d0   :  { %36 = sbr.rel (!%p34_p6) target bundleno = 21 (0x15), region = 237 }

</bundles_post_ra>
